<compile_context>
chip_gen: v7x
topology: tpu7x:2x2x1
jax: 0.10.0
libtpu: 0.0.40
codegen_flags: <defaults>
</compile_context>

<pallas_src>
import functools

import numpy as np
import jax
import jax.numpy as jnp
from jax import lax
from jax.experimental import pallas as pl
from jax.experimental.pallas import tpu as pltpu

# ----------------------------- config (small synthetic) -----------------------------
MEAN = -30.0          # self.mean
STD = 20.0            # self.std
N_FFT = 64            # small n_fft (constructor arg)
HOP = 16              # hop_length
IN_CH = 2             # in_channels (stereo)
FOC = 8               # first_out_channels (small)
LSTM_CH = FOC << 4    # 128
HIDDEN = LSTM_CH >> 1 # 64
LN10 = float(np.log(10.0))

KPAD = 16             # contraction-dim padding quantum (bf16 sublane tile)
LANES = 128           # lane width: N / last-dim padding quantum
M_SINGLE = 256        # GEMMs with M <= this run as a single block (no M padding)


def _round_up(x, m):
    return -(-x // m) * m


def _default_tile_m():
    # 128-wide tiles on 128x128-MXU generations, 256 on v6e / v7x.
    try:
        kind = jax.devices()[0].device_kind.lower()
        if any(t in kind for t in ("v2", "v3", "v4", "v5")):
            return 128
        return 256
    except Exception:
        return 128


_TM_BIG = _default_tile_m()


# ----------------------------- Pallas matmul kernels (bias/act fused) -----------------------------
def _mm_bias_kernel(a_ref, b_ref, bias_ref, o_ref, *, act):
    acc = jnp.dot(a_ref[...], b_ref[...], preferred_element_type=jnp.float32)
    acc = acc + bias_ref[...]
    if act == "tanh":
        acc = jnp.tanh(acc)
    o_ref[...] = acc.astype(o_ref.dtype)


def _mm_kernel(a_ref, b_ref, o_ref, *, act):
    acc = jnp.dot(a_ref[...], b_ref[...], preferred_element_type=jnp.float32)
    if act == "tanh":
        acc = jnp.tanh(acc)
    o_ref[...] = acc.astype(o_ref.dtype)


def pmatmul(a, b, bias2=None, act=None, out_dtype=jnp.bfloat16):
    """A(M,K) @ B(Kp,N) [+ bias] [+ tanh], single full-K block, f32 accumulation.

    `b` (Kp, N) and `bias2` (1, N) are pre-prepared: Kp multiple of 16, N multiple of 128
    (lane-dense stores).  Activations are matched to the weight dtype (bf16 for the net,
    f32 for the DFT path).  Only M is tiled; when it is tiled we always get >= 2 blocks so
    the parallel M grid lets v7x shard across both TensorCores.
    """
    M, K = a.shape
    Kp, N = b.shape
    a = a.astype(jnp.bfloat16 if b.dtype == jnp.bfloat16 else jnp.float32)
    if K < Kp:
        a = jnp.pad(a, ((0, 0), (0, Kp - K)))
    if M <= M_SINGLE:
        tm, Mp = M, M
    else:
        tm_cap = _TM_BIG if N <= 128 else 128          # keep f32 epilogue tile small at wide N
        tm = min(tm_cap, _round_up(pl.cdiv(M, 2), 16)) # guarantees >= 2 M blocks
        Mp = _round_up(M, tm)
        if Mp != M:
            a = jnp.pad(a, ((0, Mp - M), (0, 0)))
    grid_m = Mp // tm

    o_item = jnp.dtype(out_dtype).itemsize
    est = (2 * tm * Kp * a.dtype.itemsize + 2 * Kp * N * b.dtype.itemsize
           + 2 * N * 4 + 2 * tm * N * o_item + tm * N * 4)
    cparams = pltpu.CompilerParams(
        dimension_semantics=("parallel",),
        vmem_limit_bytes=int(min(max(4 * est, 32 << 20), 96 << 20)),
    )

    if bias2 is not None:
        kern = functools.partial(_mm_bias_kernel, act=act)
        in_specs = [pl.BlockSpec((tm, Kp), lambda i: (i, 0)),
                    pl.BlockSpec((Kp, N), lambda i: (0, 0)),
                    pl.BlockSpec((1, N), lambda i: (0, 0))]
        operands = (a, b, bias2)
    else:
        kern = functools.partial(_mm_kernel, act=act)
        in_specs = [pl.BlockSpec((tm, Kp), lambda i: (i, 0)),
                    pl.BlockSpec((Kp, N), lambda i: (0, 0))]
        operands = (a, b)

    out = pl.pallas_call(
        kern,
        out_shape=jax.ShapeDtypeStruct((Mp, N), out_dtype),
        grid=(grid_m,),
        in_specs=in_specs,
        out_specs=pl.BlockSpec((tm, N), lambda i: (i, 0)),
        compiler_params=cparams,
    )(*operands)
    return out[:M] if Mp != M else out


# ----------------------------- Pallas elementwise kernels -----------------------------
def _front_kernel(re_ref, im_ref, x_ref, cos_ref, sin_ref):
    # magnitude -> AmplitudeToDB('amplitude') -> (x - mean)/std, plus torch-style phase.
    re = re_ref[...]
    im = im_ref[...]
    mag = jnp.sqrt(re * re + im * im)
    safe = jnp.maximum(mag, 1e-10)
    db = (20.0 / LN10) * jnp.log(safe)
    x_ref[...] = ((db - MEAN) / STD).astype(x_ref.dtype)
    # torch: phase = atan(im / (re + 1e-7)); phase[re < 0] += pi; later polar -> cos/sin.
    u = re + 1e-7
    r = jnp.maximum(jnp.sqrt(u * u + im * im), 1e-20)
    inv = 1.0 / r
    q = jnp.where(jnp.logical_and(re < 0.0, u >= 0.0), -1.0, 1.0)
    cos_ref[...] = q * u * inv
    sin_ref[...] = q * im * inv


def _back_kernel(x_ref, cos_ref, sin_ref, re_ref, im_ref):
    # x*std + mean -> DB_to_amplitude(x, 1, 0.5) -> polar(amp, phase)
    db = x_ref[...].astype(jnp.float32) * STD + MEAN
    amp = jnp.exp(db * (0.05 * LN10))      # 10 ** (0.05 * db)
    re_ref[...] = amp * cos_ref[...]
    im_ref[...] = amp * sin_ref[...]


def ew_flat_call(kernel, inputs, out_dtypes):
    """Lane-dense elementwise pallas_call: flatten, view as (rows, 128), row-tile if big.

    Padded tail lanes are computed on garbage-free zeros and sliced off afterwards.
    """
    total = int(inputs[0].size)
    rows = pl.cdiv(total, LANES)
    padt = rows * LANES - total
    mats = []
    for t in inputs:
        f = t.reshape(-1)
        if padt:
            f = jnp.pad(f, (0, padt))
        mats.append(f.reshape(rows, LANES))
    if rows <= 1024:
        tr, rp, grid_r = rows, rows, 1
    else:
        tr = 512
        rp = _round_up(rows, tr)
        grid_r = rp // tr
        if rp != rows:
            mats = [jnp.pad(m, ((0, rp - rows), (0, 0))) for m in mats]
    spec = pl.BlockSpec((tr, LANES), lambda i: (i, 0))
    n_out = len(out_dtypes)
    out_shape = tuple(jax.ShapeDtypeStruct((rp, LANES), d) for d in out_dtypes)
    res = pl.pallas_call(
        kernel,
        grid=(grid_r,),
        out_shape=out_shape if n_out > 1 else out_shape[0],
        in_specs=[spec] * len(mats),
        out_specs=tuple([spec] * n_out) if n_out > 1 else spec,
        compiler_params=pltpu.CompilerParams(dimension_semantics=("parallel",)),
    )(*mats)
    outs = res if isinstance(res, (tuple, list)) else (res,)
    flat = tuple(o.reshape(-1)[:total] for o in outs)
    return flat if n_out > 1 else flat[0]


def _layernorm_kernel(x_ref, o_ref):
    # nn.LayerNorm(lstm_channels): default weight=1, bias=0, eps=1e-5 (f32 math inside).
    x = x_ref[...].astype(jnp.float32)
    mu = jnp.mean(x, axis=-1, keepdims=True)
    var = jnp.mean((x - mu) ** 2, axis=-1, keepdims=True)
    o_ref[...] = ((x - mu) * lax.rsqrt(var + 1e-5)).astype(o_ref.dtype)


def layernorm_call(x2d):
    M0, N0 = x2d.shape
    assert N0 % LANES == 0, "row-wise LayerNorm requires a lane-multiple feature dim"
    return pl.pallas_call(
        _layernorm_kernel,
        out_shape=jax.ShapeDtypeStruct((M0, N0), jnp.bfloat16),
        grid=(1,),
        in_specs=[pl.BlockSpec((M0, N0), lambda i: (0, 0))],
        out_specs=pl.BlockSpec((M0, N0), lambda i: (0, 0)),
    )(x2d)


# ----------------------------- conv / pool / resize glue -----------------------------
CONV_DEFS = {
    'enc1_0': (IN_CH, FOC, 3, 3),        'enc1_1': (FOC, FOC, 3, 3),
    'enc2_0': (FOC, FOC * 2, 3, 3),      'enc2_1': (FOC * 2, FOC * 2, 3, 3),
    'enc3_0': (FOC * 2, FOC * 4, 3, 3),  'enc3_1': (FOC * 4, FOC * 4, 3, 3),
    'enc4_0': (FOC * 4, FOC * 8, 3, 3),  'enc4_1': (FOC * 8, FOC * 8, 3, 3),
    'enc5_0': (FOC * 8, FOC * 16, 3, 3), 'enc5_1': (FOC * 16, FOC * 16, 3, 3),
    'dec1_0': (LSTM_CH, LSTM_CH >> 1, 2, 2),
    'dec4_0': (FOC * 16, FOC * 8, 3, 3), 'dec4_1': (FOC * 8, FOC * 8, 3, 3),
    'dec4_2': (FOC * 8, FOC * 4, 2, 2),
    'dec5_0': (FOC * 8, FOC * 4, 3, 3),  'dec5_1': (FOC * 4, FOC * 4, 3, 3),
    'dec5_2': (FOC * 4, FOC * 2, 2, 2),
    'dec6_0': (FOC * 4, FOC * 2, 3, 3),  'dec6_1': (FOC * 2, FOC * 2, 3, 3),
    'dec6_2': (FOC * 2, FOC, 2, 2),
    'dec7_0': (FOC * 2, FOC, 3, 3),      'dec7_1': (FOC, FOC, 3, 3),
    'dec7_2': (FOC, IN_CH, 3, 3),        'dec7_3': (IN_CH, IN_CH, 1, 1),
}
# TODO(synk): enc6/enc7/dec2/dec3 exist in __init__ but are unused in forward(); not built.


def conv2d(x, name, params, act=None):
    """NHWC conv, stride 1, symmetric zero pad 1, via bf16 im2col + fused Pallas matmul."""
    # TODO(synk): replace the materialized im2col with a kh*kw reduction grid axis using
    # element-offset index_maps into the padded NHWC input (P3 accumulation); the same
    # index_map trick would also absorb the nearest-upsample / skip-concat remaps.
    wm, b2 = params[name]
    _, cout, kh, kw = CONV_DEFS[name]
    B, H, W, Cin = x.shape
    pad = 1
    xp = jnp.pad(x, ((0, 0), (pad, pad), (pad, pad), (0, 0)))
    Ho = H + 2 * pad - kh + 1
    Wo = W + 2 * pad - kw + 1
    cols = []
    for dy in range(kh):
        for dx in range(kw):
            cols.append(xp[:, dy:dy + Ho, dx:dx + Wo, :])
    K = kh * kw * Cin
    Kp = wm.shape[0]
    if Kp > K:                                  # fold the K pad into the im2col concat
        cols.append(jnp.zeros((B, Ho, Wo, Kp - K), x.dtype))
    pat = jnp.concatenate(cols, axis=-1).reshape(B * Ho * Wo, Kp)
    out = pmatmul(pat, wm, b2, act=act, out_dtype=jnp.bfloat16)
    out = out.reshape(B, Ho, Wo, wm.shape[1])
    return out[..., :cout] if wm.shape[1] != cout else out


def maxpool2(x):
    B, H, W, C = x.shape
    H2, W2 = H // 2, W // 2
    xc = x[:, :H2 * 2, :W2 * 2, :].reshape(B, H2, 2, W2, 2, C)
    return xc.max(axis=(2, 4))


def upsample2(x):
    return jnp.repeat(jnp.repeat(x, 2, axis=1), 2, axis=2)


def resize_nearest(x, out_h, out_w):
    # matches nn.Upsample(mode='nearest', size=...)
    B, H, W, C = x.shape
    hi = np.floor(np.arange(out_h) * (H / out_h)).astype(np.int32)
    wi = np.floor(np.arange(out_w) * (W / out_w)).astype(np.int32)
    return x[:, hi][:, :, wi]


# ----------------------------- fused bidirectional LSTM kernel -----------------------------
def _lstm_bidir_kernel(xg_ref, whh_ref, out_ref,
                       hf_sc, cf_sc, hb_sc, cb_sc, hf_all, hb_all, *, S, H):
    # xg_ref: (S, BP, 8H) bf16 pre-projected gates [fwd 4H | bwd 4H] with both biases folded.
    # whh_ref: (2, H, 4H) bf16 recurrent weights (fwd, bwd).
    hf_sc[...] = jnp.zeros_like(hf_sc)
    cf_sc[...] = jnp.zeros_like(cf_sc)
    hb_sc[...] = jnp.zeros_like(hb_sc)
    cb_sc[...] = jnp.zeros_like(cb_sc)
    whh_f = whh_ref[0]
    whh_b = whh_ref[1]
    G = 4 * H

    def cell(g, c_prev):
        i = jax.nn.sigmoid(g[:, 0:H])
        f = jax.nn.sigmoid(g[:, H:2 * H])
        gg = jnp.tanh(g[:, 2 * H:3 * H])
        o = jax.nn.sigmoid(g[:, 3 * H:4 * H])
        c_new = f * c_prev + i * gg
        h_new = o * jnp.tanh(c_new)
        return h_new, c_new

    def step(s, carry):
        sb = S - 1 - s
        gf = (xg_ref[s].astype(jnp.float32)[:, :G] +
              jnp.dot(hf_sc[...].astype(jnp.bfloat16), whh_f,
                      preferred_element_type=jnp.float32))
        gb = (xg_ref[sb].astype(jnp.float32)[:, G:] +
              jnp.dot(hb_sc[...].astype(jnp.bfloat16), whh_b,
                      preferred_element_type=jnp.float32))
        hf_n, cf_n = cell(gf, cf_sc[...])
        hb_n, cb_n = cell(gb, cb_sc[...])
        hf_sc[...] = hf_n
        cf_sc[...] = cf_n
        hb_sc[...] = hb_n
        cb_sc[...] = cb_n
        hf_all[s] = hf_n
        hb_all[sb] = hb_n
        return carry

    lax.fori_loop(0, S, step, 0, unroll=True if S <= 16 else 4)
    # single lane-dense (2H = 128) store of the whole layer output
    out_ref[...] = jnp.concatenate([hf_all[...], hb_all[...]],
                                   axis=-1).astype(out_ref.dtype)


def _lstm_bidir_call(xg, whh_stk):
    S, BP, G8 = xg.shape
    H = G8 // 8
    kern = functools.partial(_lstm_bidir_kernel, S=S, H=H)
    return pl.pallas_call(
        kern,
        out_shape=jax.ShapeDtypeStruct((S, BP, 2 * H), jnp.bfloat16),
        grid=(1,),
        in_specs=[pl.BlockSpec((S, BP, G8), lambda i: (0, 0, 0)),
                  pl.BlockSpec((2, H, 4 * H), lambda i: (0, 0, 0))],
        out_specs=pl.BlockSpec((S, BP, 2 * H), lambda i: (0, 0, 0)),
        scratch_shapes=[pltpu.VMEM((BP, H), jnp.float32),
                        pltpu.VMEM((BP, H), jnp.float32),
                        pltpu.VMEM((BP, H), jnp.float32),
                        pltpu.VMEM((BP, H), jnp.float32),
                        pltpu.VMEM((S, BP, H), jnp.float32),
                        pltpu.VMEM((S, BP, H), jnp.float32)],
    )(xg, whh_stk)


def lstm_bidir_layer(h_seq, p):
    """h_seq: (S, BP, Din) -> (S, BP, 2*HIDDEN). One fused GEMM + one fused bidir kernel."""
    S, BP, Din = h_seq.shape
    flat = h_seq.reshape(S * BP, Din)
    # fused fwd|bwd input projection (N = 8H = 512 fills the 256-wide MXU columns)
    xg = pmatmul(flat, p['wihT'], p['bias'], out_dtype=jnp.bfloat16)
    xg = xg.reshape(S, BP, 8 * HIDDEN)
    return _lstm_bidir_call(xg, p['whh'])


# ----------------------------- parameters -----------------------------
def conv_init(key, cin, cout, kh, kw):
    k1, k2 = jax.random.split(key)
    s = 1.0 / np.sqrt(cin * kh * kw)
    w = jax.random.uniform(k1, (cout, cin, kh, kw), jnp.float32, -s, s)
    b = jax.random.uniform(k2, (cout,), jnp.float32, -s, s)
    return w, b


def lstm_init(key, din, h):
    ks = jax.random.split(key, 4)
    s = 1.0 / np.sqrt(h)
    return dict(
        wih=jax.random.uniform(ks[0], (4 * h, din), jnp.float32, -s, s),
        whh=jax.random.uniform(ks[1], (4 * h, h), jnp.float32, -s, s),
        bih=jax.random.uniform(ks[2], (4 * h,), jnp.float32, -s, s),
        bhh=jax.random.uniform(ks[3], (4 * h,), jnp.float32, -s, s),
    )


def build_params(key):
    names = list(CONV_DEFS.keys())
    keys = jax.random.split(key, len(names) + 6)
    params = {}
    for i, name in enumerate(names):
        ci, co, kh, kw = CONV_DEFS[name]
        params[name] = conv_init(keys[i], ci, co, kh, kw)
    lstm = []
    for l in range(3):
        din = LSTM_CH if l == 0 else 2 * HIDDEN
        fwd = lstm_init(keys[len(names) + 2 * l], din, HIDDEN)
        bwd = lstm_init(keys[len(names) + 2 * l + 1], din, HIDDEN)
        lstm.append((fwd, bwd))
    params['lstm'] = lstm
    return params


def prep_params(raw):
    """One-time conversion of raw PyTorch-layout weights to padded bf16 GEMM form."""
    prepped = {}
    for name in CONV_DEFS:
        w, b = raw[name]
        Cout, Cin, kh, kw = w.shape
        K = kh * kw * Cin
        Kp = _round_up(K, KPAD)
        Np = _round_up(Cout, LANES)               # lane-dense N padding
        wm = jnp.transpose(w, (2, 3, 1, 0)).reshape(K, Cout)
        wm = jnp.pad(wm, ((0, Kp - K), (0, Np - Cout))).astype(jnp.bfloat16)
        b2 = jnp.pad(b, (0, Np - Cout)).reshape(1, Np).astype(jnp.float32)
        prepped[name] = (wm, b2)

    def prep_layer(fwd, bwd):
        din = fwd['wih'].shape[1]
        kp = _round_up(din, KPAD)

        def pad_t(w):                              # (4H, din) -> (kp, 4H)
            return jnp.pad(w.T, ((0, kp - din), (0, 0)))

        wihT = jnp.concatenate([pad_t(fwd['wih']), pad_t(bwd['wih'])],
                               axis=1).astype(jnp.bfloat16)        # (kp, 8H)
        bias = jnp.concatenate([fwd['bih'] + fwd['bhh'],
                                bwd['bih'] + bwd['bhh']]).reshape(1, -1).astype(jnp.float32)
        whh = jnp.stack([fwd['whh'].T, bwd['whh'].T], axis=0).astype(jnp.bfloat16)  # (2,H,4H)
        return dict(wihT=wihT, bias=bias, whh=whh)

    prepped['lstm'] = [prep_layer(f, b) for f, b in raw['lstm']]
    return prepped


def make_dft_mats(n_fft):
    """Windowed forward DFT (n_fft, 2F->128) and inverse DFT (2F->pad, 128) matrices (f32)."""
    F_ = n_fft // 2 + 1
    n = np.arange(n_fft)[:, None]
    k = np.arange(F_)[None, :]
    ang = 2.0 * np.pi * n * k / n_fft                                    # (n_fft, F)
    win = 0.5 * (1.0 - np.cos(2.0 * np.pi * np.arange(n_fft) / n_fft))   # periodic hann
    fwd = np.concatenate([win[:, None] * np.cos(ang),
                          -win[:, None] * np.sin(ang)], axis=1)           # (n_fft, 2F)
    wgt = np.ones(F_)
    wgt[1:-1] = 2.0
    inv = np.concatenate([(wgt[:, None] / n_fft) * np.cos(ang.T),
                          -(wgt[:, None] / n_fft) * np.sin(ang.T)], axis=0)  # (2F, n_fft)
    kp_f = _round_up(n_fft, 8)
    kp_i = _round_up(2 * F_, 8)
    nf = _round_up(2 * F_, LANES)
    ni = _round_up(n_fft, LANES)
    fwd_p = np.zeros((kp_f, nf), np.float32)
    fwd_p[:n_fft, :2 * F_] = fwd
    inv_p = np.zeros((kp_i, ni), np.float32)
    inv_p[:2 * F_, :n_fft] = inv
    return (jnp.asarray(fwd_p), jnp.asarray(inv_p), jnp.asarray(win, jnp.float32))


# ----------------------------- forward -----------------------------
def forward(params, audio, dft_fwd, dft_inv, window):
    B, C, L = audio.shape
    pad = N_FFT // 2
    F_ = N_FFT // 2 + 1
    n_frames = 1 + L // HOP

    # ---- Spectrogram(n_fft, hop, power=None): center=True, reflect pad, hann (f32 DFT) ----
    sig = audio.reshape(B * C, L)
    sig_p = jnp.pad(sig, ((0, 0), (pad, pad)), mode='reflect')
    idx = np.arange(n_frames)[:, None] * HOP + np.arange(N_FFT)[None, :]
    frames = sig_p[:, idx]                                             # (B*C, T, n_fft)
    spec = pmatmul(frames.reshape(-1, N_FFT), dft_fwd, None, out_dtype=jnp.float32)
    re = spec[:, :F_].reshape(B * C, n_frames, F_).transpose(0, 2, 1)  # (B*C, F, T)
    im = spec[:, F_:2 * F_].reshape(B * C, n_frames, F_).transpose(0, 2, 1)

    # ---- magnitude -> dB -> normalize + torch-semantics phase cos/sin, one fused pass ----
    xdb, cos_p, sin_p = ew_flat_call(
        _front_kernel, [re, im], (jnp.bfloat16, jnp.float32, jnp.float32))
    x = jnp.transpose(xdb.reshape(B, C, F_, n_frames), (0, 2, 3, 1))   # NHWC bf16

    def cv(t, name, act=None):
        return conv2d(t, name, params, act=act)

    # ---- encoder ----
    e1 = cv(cv(x, 'enc1_0'), 'enc1_1')
    e2 = cv(cv(maxpool2(e1), 'enc2_0'), 'enc2_1')
    e3 = cv(cv(maxpool2(e2), 'enc3_0'), 'enc3_1')
    e4 = cv(cv(maxpool2(e3), 'enc4_0'), 'enc4_1')
    x5 = cv(cv(maxpool2(e4), 'enc5_0'), 'enc5_1', act='tanh')    # tanh fused in epilogue

    Bq, F5, T5, C5 = x5.shape

    # ---- LSTM block (exact torch .reshape semantics on NCHW memory layout) ----
    x_nchw = jnp.transpose(x5, (0, 3, 1, 2))                     # (B, C5, F5, T5)
    S = F5 * T5
    seq = x_nchw.reshape(B, S, C5)                               # raw reshape, as in torch
    seq = layernorm_call(seq.reshape(B * S, C5)).reshape(B, S, C5)

    h = jnp.transpose(seq, (1, 0, 2))                            # (S, B, C5)
    BP = _round_up(B, 8)
    if BP != B:
        h = jnp.pad(h, ((0, 0), (0, BP - B), (0, 0)))            # batch pad for sublane layout
    for l in range(3):
        h = lstm_bidir_layer(h, params['lstm'][l])               # dropout inactive (inference)
    out = jnp.transpose(h[:, :B, :], (1, 0, 2))                  # (B, S, 2H)
    x = out.reshape(B, 2 * HIDDEN, F5, T5)                       # raw reshape, as in torch
    x = jnp.transpose(x, (0, 2, 3, 1))                           # NHWC

    # ---- decoder ----
    # TODO(synk): fold upsample2/resize_nearest + skip-concat into the following conv's
    # index_map (pure index remaps) once the im2col-free conv path lands.
    x = cv(upsample2(x), 'dec1_0')                                        # dec1
    x = resize_nearest(x, e4.shape[1], e4.shape[2])
    x = jnp.concatenate([x, e4], axis=-1)
    x = cv(upsample2(cv(cv(x, 'dec4_0'), 'dec4_1')), 'dec4_2')            # dec4
    x = resize_nearest(x, e3.shape[1], e3.shape[2])
    x = jnp.concatenate([x, e3], axis=-1)
    x = cv(upsample2(cv(cv(x, 'dec5_0'), 'dec5_1')), 'dec5_2')            # dec5
    x = resize_nearest(x, e2.shape[1], e2.shape[2])
    x = jnp.concatenate([x, e2], axis=-1)
    x = cv(upsample2(cv(cv(x, 'dec6_0'), 'dec6_1')), 'dec6_2')            # dec6
    x = resize_nearest(x, e1.shape[1], e1.shape[2])
    x = jnp.concatenate([x, e1], axis=-1)
    x = cv(cv(cv(cv(x, 'dec7_0'), 'dec7_1'), 'dec7_2'), 'dec7_3')         # dec7

    # ---- mag_upsample to phase spatial size ----
    x = resize_nearest(x, F_, n_frames)
    x_nchw = jnp.transpose(x, (0, 3, 1, 2))                      # (B, C, F, T) bf16

    # ---- de-normalize, dB->amplitude, polar (Pallas, reuses unit-phase vectors) ----
    re2, im2 = ew_flat_call(_back_kernel, [x_nchw, cos_p, sin_p],
                            (jnp.float32, jnp.float32))
    re2 = re2.reshape(B * C, F_, n_frames)
    im2 = im2.reshape(B * C, F_, n_frames)

    # ---- InverseSpectrogram: iDFT (f32 Pallas matmul) + window + overlap-add ----
    reT = jnp.transpose(re2, (0, 2, 1)).reshape(B * C * n_frames, F_)
    imT = jnp.transpose(im2, (0, 2, 1)).reshape(B * C * n_frames, F_)
    spec_ri = jnp.concatenate([reT, imT], axis=-1)               # (M, 2F)
    fr_time = pmatmul(spec_ri, dft_inv, None, out_dtype=jnp.float32)[:, :N_FFT]
    fr_time = fr_time.reshape(B * C, n_frames, N_FFT) * window[None, None, :]

    # overlap-add via R = N_FFT/HOP shifted adds (no per-frame scatter loop)
    R = N_FFT // HOP
    fr4 = fr_time.reshape(B * C, n_frames, R, HOP)
    ola = sum(jnp.pad(fr4[:, :, r, :], ((0, 0), (r, R - 1 - r), (0, 0)))
              for r in range(R))
    ola = ola.reshape(B * C, (n_frames + R - 1) * HOP)

    # window-square normalization is input-independent -> numpy trace-time constant
    win_np = 0.5 * (1.0 - np.cos(2.0 * np.pi * np.arange(N_FFT) / N_FFT))
    wsq = np.zeros(((n_frames - 1) * HOP + N_FFT,), np.float64)
    for t in range(n_frames):
        wsq[t * HOP:t * HOP + N_FFT] += win_np * win_np
    y_len = (n_frames - 1) * HOP
    inv_wsq = jnp.asarray(1.0 / np.maximum(wsq[pad:pad + y_len], 1e-11), jnp.float32)

    y = ola[:, pad:pad + y_len] * inv_wsq[None, :]
    y = y.reshape(B, C, y_len)

    # ---- final nn.Upsample(size=L, mode='nearest') on the time axis ----
    ti = np.floor(np.arange(L) * (y_len / L)).astype(np.int32)
    return y[:, :, ti]


# ----------------------------- main -----------------------------
if __name__ == "__main__":
    key = jax.random.PRNGKey(0)
    pkey, xkey = jax.random.split(key)
    raw_params = build_params(pkey)
    params = prep_params(raw_params)          # one-time GEMM-form weight prep (hoisted)
    dft_fwd, dft_inv, window = make_dft_mats(N_FFT)

    B, L = 2, 512
    audio = jax.random.normal(xkey, (B, IN_CH, L), jnp.float32) * 0.1

    fwd = jax.jit(forward)
    y = fwd(params, audio, dft_fwd, dft_inv, window)
    y = jax.block_until_ready(y)

    assert y.shape == (B, IN_CH, L), y.shape
    assert bool(jnp.all(jnp.isfinite(y)))
    print("KERNEL_OK")
</pallas_src>

<mosaic_0001>
module attributes {stable_mosaic.version = 11 : i64} {
  func.func @_mm_kernel(%arg0: i32, %arg1: memref<132x64xf32, #tpu.memory_space<vmem>>, %arg2: memref<64x128xf32, #tpu.memory_space<vmem>>, %arg3: memref<132x128xf32, #tpu.memory_space<vmem>>) attributes {dimension_semantics = [#tpu.dimension_semantics<parallel>], iteration_bounds = array<i64: 1>, scalar_prefetch = 0 : i64, scratch_operands = 0 : i64, tpu.core_type = #tpu.core_type<tc>, window_params = [{transform_indices = @transform_0, window_bounds = array<i64: 132, 64>}, {pipeline_mode = #tpu.pipeline_mode<synchronous>, transform_indices = @transform_1, window_bounds = array<i64: 64, 128>}, {transform_indices = @transform_2, window_bounds = array<i64: 132, 128>}]} {
    %c0 = arith.constant 0 : index
    %c0_0 = arith.constant 0 : index
    %0 = vector.load %arg1[%c0, %c0_0] : memref<132x64xf32, #tpu.memory_space<vmem>>, vector<132x64xf32>
    %c0_1 = arith.constant 0 : index
    %c0_2 = arith.constant 0 : index
    %1 = vector.load %arg2[%c0_1, %c0_2] : memref<64x128xf32, #tpu.memory_space<vmem>>, vector<64x128xf32>
    %cst = arith.constant dense<0.000000e+00> : vector<132x128xf32>
    %2 = tpu.matmul %0, %1, %cst {dimension_numbers = #tpu.dot_dimension_numbers<[1], [0], [0], [1], [0, 0, 1, 1], [], []>} : vector<132x64xf32>, vector<64x128xf32>, vector<132x128xf32> -> vector<132x128xf32>
    %c0_3 = arith.constant 0 : index
    %c0_4 = arith.constant 0 : index
    %3 = vector.load %arg3[%c0_3, %c0_4] : memref<132x128xf32, #tpu.memory_space<vmem>>, vector<132x128xf32>
    tpu.vector_store %arg3[%c0_3, %c0_4], %2 {strides = array<i32>} : memref<132x128xf32, #tpu.memory_space<vmem>>, vector<132x128xf32>,
    return
  }
  func.func @transform_0(%arg0: i32) -> (i32, i32) {
    %c0_i32 = arith.constant 0 : i32
    %c0_i32_0 = arith.constant 0 : i32
    return %arg0, %c0_i32 : i32, i32
  }
  func.func @transform_1(%arg0: i32) -> (i32, i32) {
    %c0_i32 = arith.constant 0 : i32
    %c0_i32_0 = arith.constant 0 : i32
    %c0_i32_1 = arith.constant 0 : i32
    return %c0_i32, %c0_i32_0 : i32, i32
  }
  func.func @transform_2(%arg0: i32) -> (i32, i32) {
    %c0_i32 = arith.constant 0 : i32
    %c0_i32_0 = arith.constant 0 : i32
    return %arg0, %c0_i32 : i32, i32
  }
}

module attributes {stable_mosaic.version = 11 : i64} {
  func.func @_front_kernel(%arg0: i32, %arg1: memref<35x128xf32, #tpu.memory_space<vmem>>, %arg2: memref<35x128xf32, #tpu.memory_space<vmem>>, %arg3: memref<35x128xbf16, #tpu.memory_space<vmem>>, %arg4: memref<35x128xf32, #tpu.memory_space<vmem>>, %arg5: memref<35x128xf32, #tpu.memory_space<vmem>>) attributes {dimension_semantics = [#tpu.dimension_semantics<parallel>], iteration_bounds = array<i64: 1>, scalar_prefetch = 0 : i64, scratch_operands = 0 : i64, tpu.core_type = #tpu.core_type<tc>, window_params = [{transform_indices = @transform_0, window_bounds = array<i64: 35, 128>}, {transform_indices = @transform_1, window_bounds = array<i64: 35, 128>}, {transform_indices = @transform_2, window_bounds = array<i64: 35, 128>}, {transform_indices = @transform_3, window_bounds = array<i64: 35, 128>}, {transform_indices = @transform_4, window_bounds = array<i64: 35, 128>}]} {
    %c0 = arith.constant 0 : index
    %c0_0 = arith.constant 0 : index
    %0 = vector.load %arg1[%c0, %c0_0] : memref<35x128xf32, #tpu.memory_space<vmem>>, vector<35x128xf32>
    %c0_1 = arith.constant 0 : index
    %c0_2 = arith.constant 0 : index
    %1 = vector.load %arg2[%c0_1, %c0_2] : memref<35x128xf32, #tpu.memory_space<vmem>>, vector<35x128xf32>
    %2 = arith.mulf %0, %0 : vector<35x128xf32>
    %3 = arith.mulf %1, %1 : vector<35x128xf32>
    %4 = arith.addf %2, %3 : vector<35x128xf32>
    %5 = math.sqrt %4 : vector<35x128xf32>
    %cst = arith.constant 1.000000e-10 : f32
    %6 = vector.broadcast %cst : f32 to vector<35x128xf32>
    %7 = arith.maximumf %5, %6 : vector<35x128xf32>
    %8 = math.log %7 : vector<35x128xf32>
    %cst_3 = arith.constant 8.68588924 : f32
    %9 = vector.broadcast %cst_3 : f32 to vector<35x128xf32>
    %10 = arith.mulf %9, %8 : vector<35x128xf32>
    %cst_4 = arith.constant -3.000000e+01 : f32
    %11 = vector.broadcast %cst_4 : f32 to vector<35x128xf32>
    %12 = arith.subf %10, %11 : vector<35x128xf32>
    %cst_5 = arith.constant 2.000000e+01 : f32
    %13 = vector.broadcast %cst_5 : f32 to vector<35x128xf32>
    %14 = arith.divf %12, %13 : vector<35x128xf32>
    %15 = arith.truncf %14 : vector<35x128xf32> to vector<35x128xbf16>
    %c0_6 = arith.constant 0 : index
    %c0_7 = arith.constant 0 : index
    %16 = vector.load %arg3[%c0_6, %c0_7] : memref<35x128xbf16, #tpu.memory_space<vmem>>, vector<35x128xbf16>
    tpu.vector_store %arg3[%c0_6, %c0_7], %15 {strides = array<i32>} : memref<35x128xbf16, #tpu.memory_space<vmem>>, vector<35x128xbf16>,
    %cst_8 = arith.constant 1.000000e-07 : f32
    %17 = vector.broadcast %cst_8 : f32 to vector<35x128xf32>
    %18 = arith.addf %0, %17 : vector<35x128xf32>
    %19 = arith.mulf %18, %18 : vector<35x128xf32>
    %20 = arith.mulf %1, %1 : vector<35x128xf32>
    %21 = arith.addf %19, %20 : vector<35x128xf32>
    %22 = math.sqrt %21 : vector<35x128xf32>
    %cst_9 = arith.constant 9.99999968E-21 : f32
    %23 = vector.broadcast %cst_9 : f32 to vector<35x128xf32>
    %24 = arith.maximumf %22, %23 : vector<35x128xf32>
    %cst_10 = arith.constant 1.000000e+00 : f32
    %25 = vector.broadcast %cst_10 : f32 to vector<35x128xf32>
    %26 = arith.divf %25, %24 : vector<35x128xf32>
    %cst_11 = arith.constant 0.000000e+00 : f32
    %27 = vector.broadcast %cst_11 : f32 to vector<35x128xf32>
    %28 = arith.cmpf olt, %0, %27 : vector<35x128xf32>
    %cst_12 = arith.constant 0.000000e+00 : f32
    %29 = vector.broadcast %cst_12 : f32 to vector<35x128xf32>
    %30 = arith.cmpf oge, %18, %29 : vector<35x128xf32>
    %31 = arith.andi %28, %30 : vector<35x128xi1>
    %cst_13 = arith.constant -1.000000e+00 : f32
    %cst_14 = arith.constant 1.000000e+00 : f32
    %32 = vector.broadcast %cst_13 : f32 to vector<35x128xf32>
    %33 = vector.broadcast %cst_14 : f32 to vector<35x128xf32>
    %34 = arith.select %31, %32, %33 : vector<35x128xi1>, vector<35x128xf32>
    %35 = arith.mulf %34, %18 : vector<35x128xf32>
    %36 = arith.mulf %35, %26 : vector<35x128xf32>
    %c0_15 = arith.constant 0 : index
    %c0_16 = arith.constant 0 : index
    %37 = vector.load %arg4[%c0_15, %c0_16] : memref<35x128xf32, #tpu.memory_space<vmem>>, vector<35x128xf32>
    tpu.vector_store %arg4[%c0_15, %c0_16], %36 {strides = array<i32>} : memref<35x128xf32, #tpu.memory_space<vmem>>, vector<35x128xf32>,
    %38 = arith.mulf %34, %1 : vector<35x128xf32>
    %39 = arith.mulf %38, %26 : vector<35x128xf32>
    %c0_17 = arith.constant 0 : index
    %c0_18 = arith.constant 0 : index
    %40 = vector.load %arg5[%c0_17, %c0_18] : memref<35x128xf32, #tpu.memory_space<vmem>>, vector<35x128xf32>
    tpu.vector_store %arg5[%c0_17, %c0_18], %39 {strides = array<i32>} : memref<35x128xf32, #tpu.memory_space<vmem>>, vector<35x128xf32>,
    return
  }
  func.func @transform_0(%arg0: i32) -> (i32, i32) {
    %c0_i32 = arith.constant 0 : i32
    %c0_i32_0 = arith.constant 0 : i32
    return %arg0, %c0_i32 : i32, i32
  }
  func.func @transform_1(%arg0: i32) -> (i32, i32) {
    %c0_i32 = arith.constant 0 : i32
    %c0_i32_0 = arith.constant 0 : i32
    return %arg0, %c0_i32 : i32, i32
  }
  func.func @transform_2(%arg0: i32) -> (i32, i32) {
    %c0_i32 = arith.constant 0 : i32
    %c0_i32_0 = arith.constant 0 : i32
    return %arg0, %c0_i32 : i32, i32
  }
  func.func @transform_3(%arg0: i32) -> (i32, i32) {
    %c0_i32 = arith.constant 0 : i32
    %c0_i32_0 = arith.constant 0 : i32
    return %arg0, %c0_i32 : i32, i32
  }
  func.func @transform_4(%arg0: i32) -> (i32, i32) {
    %c0_i32 = arith.constant 0 : i32
    %c0_i32_0 = arith.constant 0 : i32
    return %arg0, %c0_i32 : i32, i32
  }
}

module attributes {stable_mosaic.version = 11 : i64} {
  func.func @_mm_bias_kernel(%arg0: i32, %arg1: memref<256x32xbf16, #tpu.memory_space<vmem>>, %arg2: memref<32x128xbf16, #tpu.memory_space<vmem>>, %arg3: memref<1x128xf32, #tpu.memory_space<vmem>>, %arg4: memref<256x128xbf16, #tpu.memory_space<vmem>>) attributes {dimension_semantics = [#tpu.dimension_semantics<parallel>], iteration_bounds = array<i64: 9>, scalar_prefetch = 0 : i64, scratch_operands = 0 : i64, tpu.core_type = #tpu.core_type<tc>, window_params = [{transform_indices = @transform_0, window_bounds = array<i64: 256, 32>}, {pipeline_mode = #tpu.pipeline_mode<synchronous>, transform_indices = @transform_1, window_bounds = array<i64: 32, 128>}, {pipeline_mode = #tpu.pipeline_mode<synchronous>, transform_indices = @transform_2, window_bounds = array<i64: 1, 128>}, {transform_indices = @transform_3, window_bounds = array<i64: 256, 128>}]} {
    %c0 = arith.constant 0 : index
    %c0_0 = arith.constant 0 : index
    %0 = vector.load %arg1[%c0, %c0_0] : memref<256x32xbf16, #tpu.memory_space<vmem>>, vector<256x32xbf16>
    %c0_1 = arith.constant 0 : index
    %c0_2 = arith.constant 0 : index
    %1 = vector.load %arg2[%c0_1, %c0_2] : memref<32x128xbf16, #tpu.memory_space<vmem>>, vector<32x128xbf16>
    %cst = arith.constant dense<0.000000e+00> : vector<256x128xf32>
    %2 = tpu.matmul %0, %1, %cst {dimension_numbers = #tpu.dot_dimension_numbers<[1], [0], [0], [1], [0, 0, 1, 1], [], []>} : vector<256x32xbf16>, vector<32x128xbf16>, vector<256x128xf32> -> vector<256x128xf32>
    %c0_3 = arith.constant 0 : index
    %c0_4 = arith.constant 0 : index
    %3 = vector.load %arg3[%c0_3, %c0_4] : memref<1x128xf32, #tpu.memory_space<vmem>>, vector<1x128xf32>
    %4 = vector.broadcast %3 : vector<1x128xf32> to vector<256x128xf32>
    %5 = arith.addf %2, %4 : vector<256x128xf32>
    %6 = arith.truncf %5 : vector<256x128xf32> to vector<256x128xbf16>
    %c0_5 = arith.constant 0 : index
    %c0_6 = arith.constant 0 : index
    %7 = vector.load %arg4[%c0_5, %c0_6] : memref<256x128xbf16, #tpu.memory_space<vmem>>, vector<256x128xbf16>
    tpu.vector_store %arg4[%c0_5, %c0_6], %6 {strides = array<i32>} : memref<256x128xbf16, #tpu.memory_space<vmem>>, vector<256x128xbf16>,
    return
  }
  func.func @transform_0(%arg0: i32) -> (i32, i32) {
    %c0_i32 = arith.constant 0 : i32
    %c0_i32_0 = arith.constant 0 : i32
    return %arg0, %c0_i32 : i32, i32
  }
  func.func @transform_1(%arg0: i32) -> (i32, i32) {
    %c0_i32 = arith.constant 0 : i32
    %c0_i32_0 = arith.constant 0 : i32
    %c0_i32_1 = arith.constant 0 : i32
    return %c0_i32, %c0_i32_0 : i32, i32
  }
  func.func @transform_2(%arg0: i32) -> (i32, i32) {
    %c0_i32 = arith.constant 0 : i32
    %c0_i32_0 = arith.constant 0 : i32
    %c0_i32_1 = arith.constant 0 : i32
    return %c0_i32, %c0_i32_0 : i32, i32
  }
  func.func @transform_3(%arg0: i32) -> (i32, i32) {
    %c0_i32 = arith.constant 0 : i32
    %c0_i32_0 = arith.constant 0 : i32
    return %arg0, %c0_i32 : i32, i32
  }
}

module attributes {stable_mosaic.version = 11 : i64} {
  func.func @_mm_bias_kernel(%arg0: i32, %arg1: memref<256x80xbf16, #tpu.memory_space<vmem>>, %arg2: memref<80x128xbf16, #tpu.memory_space<vmem>>, %arg3: memref<1x128xf32, #tpu.memory_space<vmem>>, %arg4: memref<256x128xbf16, #tpu.memory_space<vmem>>) attributes {dimension_semantics = [#tpu.dimension_semantics<parallel>], iteration_bounds = array<i64: 9>, scalar_prefetch = 0 : i64, scratch_operands = 0 : i64, tpu.core_type = #tpu.core_type<tc>, window_params = [{transform_indices = @transform_0, window_bounds = array<i64: 256, 80>}, {pipeline_mode = #tpu.pipeline_mode<synchronous>, transform_indices = @transform_1, window_bounds = array<i64: 80, 128>}, {pipeline_mode = #tpu.pipeline_mode<synchronous>, transform_indices = @transform_2, window_bounds = array<i64: 1, 128>}, {transform_indices = @transform_3, window_bounds = array<i64: 256, 128>}]} {
    %c0 = arith.constant 0 : index
    %c0_0 = arith.constant 0 : index
    %0 = vector.load %arg1[%c0, %c0_0] : memref<256x80xbf16, #tpu.memory_space<vmem>>, vector<256x80xbf16>
    %c0_1 = arith.constant 0 : index
    %c0_2 = arith.constant 0 : index
    %1 = vector.load %arg2[%c0_1, %c0_2] : memref<80x128xbf16, #tpu.memory_space<vmem>>, vector<80x128xbf16>
    %cst = arith.constant dense<0.000000e+00> : vector<256x128xf32>
    %2 = tpu.matmul %0, %1, %cst {dimension_numbers = #tpu.dot_dimension_numbers<[1], [0], [0], [1], [0, 0, 1, 1], [], []>} : vector<256x80xbf16>, vector<80x128xbf16>, vector<256x128xf32> -> vector<256x128xf32>
    %c0_3 = arith.constant 0 : index
    %c0_4 = arith.constant 0 : index
    %3 = vector.load %arg3[%c0_3, %c0_4] : memref<1x128xf32, #tpu.memory_space<vmem>>, vector<1x128xf32>
    %4 = vector.broadcast %3 : vector<1x128xf32> to vector<256x128xf32>
    %5 = arith.addf %2, %4 : vector<256x128xf32>
    %6 = arith.truncf %5 : vector<256x128xf32> to vector<256x128xbf16>
    %c0_5 = arith.constant 0 : index
    %c0_6 = arith.constant 0 : index
    %7 = vector.load %arg4[%c0_5, %c0_6] : memref<256x128xbf16, #tpu.memory_space<vmem>>, vector<256x128xbf16>
    tpu.vector_store %arg4[%c0_5, %c0_6], %6 {strides = array<i32>} : memref<256x128xbf16, #tpu.memory_space<vmem>>, vector<256x128xbf16>,
    return
  }
  func.func @transform_0(%arg0: i32) -> (i32, i32) {
    %c0_i32 = arith.constant 0 : i32
    %c0_i32_0 = arith.constant 0 : i32
    return %arg0, %c0_i32 : i32, i32
  }
  func.func @transform_1(%arg0: i32) -> (i32, i32) {
    %c0_i32 = arith.constant 0 : i32
    %c0_i32_0 = arith.constant 0 : i32
    %c0_i32_1 = arith.constant 0 : i32
    return %c0_i32, %c0_i32_0 : i32, i32
  }
  func.func @transform_2(%arg0: i32) -> (i32, i32) {
    %c0_i32 = arith.constant 0 : i32
    %c0_i32_0 = arith.constant 0 : i32
    %c0_i32_1 = arith.constant 0 : i32
    return %c0_i32, %c0_i32_0 : i32, i32
  }
  func.func @transform_3(%arg0: i32) -> (i32, i32) {
    %c0_i32 = arith.constant 0 : i32
    %c0_i32_0 = arith.constant 0 : i32
    return %arg0, %c0_i32 : i32, i32
  }
}

module attributes {stable_mosaic.version = 11 : i64} {
  func.func @_mm_bias_kernel(%arg0: i32, %arg1: memref<256x80xbf16, #tpu.memory_space<vmem>>, %arg2: memref<80x128xbf16, #tpu.memory_space<vmem>>, %arg3: memref<1x128xf32, #tpu.memory_space<vmem>>, %arg4: memref<256x128xbf16, #tpu.memory_space<vmem>>) attributes {dimension_semantics = [#tpu.dimension_semantics<parallel>], iteration_bounds = array<i64: 2>, scalar_prefetch = 0 : i64, scratch_operands = 0 : i64, tpu.core_type = #tpu.core_type<tc>, window_params = [{transform_indices = @transform_0, window_bounds = array<i64: 256, 80>}, {pipeline_mode = #tpu.pipeline_mode<synchronous>, transform_indices = @transform_1, window_bounds = array<i64: 80, 128>}, {pipeline_mode = #tpu.pipeline_mode<synchronous>, transform_indices = @transform_2, window_bounds = array<i64: 1, 128>}, {transform_indices = @transform_3, window_bounds = array<i64: 256, 128>}]} {
    %c0 = arith.constant 0 : index
    %c0_0 = arith.constant 0 : index
    %0 = vector.load %arg1[%c0, %c0_0] : memref<256x80xbf16, #tpu.memory_space<vmem>>, vector<256x80xbf16>
    %c0_1 = arith.constant 0 : index
    %c0_2 = arith.constant 0 : index
    %1 = vector.load %arg2[%c0_1, %c0_2] : memref<80x128xbf16, #tpu.memory_space<vmem>>, vector<80x128xbf16>
    %cst = arith.constant dense<0.000000e+00> : vector<256x128xf32>
    %2 = tpu.matmul %0, %1, %cst {dimension_numbers = #tpu.dot_dimension_numbers<[1], [0], [0], [1], [0, 0, 1, 1], [], []>} : vector<256x80xbf16>, vector<80x128xbf16>, vector<256x128xf32> -> vector<256x128xf32>
    %c0_3 = arith.constant 0 : index
    %c0_4 = arith.constant 0 : index
    %3 = vector.load %arg3[%c0_3, %c0_4] : memref<1x128xf32, #tpu.memory_space<vmem>>, vector<1x128xf32>
    %4 = vector.broadcast %3 : vector<1x128xf32> to vector<256x128xf32>
    %5 = arith.addf %2, %4 : vector<256x128xf32>
    %6 = arith.truncf %5 : vector<256x128xf32> to vector<256x128xbf16>
    %c0_5 = arith.constant 0 : index
    %c0_6 = arith.constant 0 : index
    %7 = vector.load %arg4[%c0_5, %c0_6] : memref<256x128xbf16, #tpu.memory_space<vmem>>, vector<256x128xbf16>
    tpu.vector_store %arg4[%c0_5, %c0_6], %6 {strides = array<i32>} : memref<256x128xbf16, #tpu.memory_space<vmem>>, vector<256x128xbf16>,
    return
  }
  func.func @transform_0(%arg0: i32) -> (i32, i32) {
    %c0_i32 = arith.constant 0 : i32
    %c0_i32_0 = arith.constant 0 : i32
    return %arg0, %c0_i32 : i32, i32
  }
  func.func @transform_1(%arg0: i32) -> (i32, i32) {
    %c0_i32 = arith.constant 0 : i32
    %c0_i32_0 = arith.constant 0 : i32
    %c0_i32_1 = arith.constant 0 : i32
    return %c0_i32, %c0_i32_0 : i32, i32
  }
  func.func @transform_2(%arg0: i32) -> (i32, i32) {
    %c0_i32 = arith.constant 0 : i32
    %c0_i32_0 = arith.constant 0 : i32
    %c0_i32_1 = arith.constant 0 : i32
    return %c0_i32, %c0_i32_0 : i32, i32
  }
  func.func @transform_3(%arg0: i32) -> (i32, i32) {
    %c0_i32 = arith.constant 0 : i32
    %c0_i32_0 = arith.constant 0 : i32
    return %arg0, %c0_i32 : i32, i32
  }
}

module attributes {stable_mosaic.version = 11 : i64} {
  func.func @_mm_bias_kernel(%arg0: i32, %arg1: memref<256x144xbf16, #tpu.memory_space<vmem>>, %arg2: memref<144x128xbf16, #tpu.memory_space<vmem>>, %arg3: memref<1x128xf32, #tpu.memory_space<vmem>>, %arg4: memref<256x128xbf16, #tpu.memory_space<vmem>>) attributes {dimension_semantics = [#tpu.dimension_semantics<parallel>], iteration_bounds = array<i64: 2>, scalar_prefetch = 0 : i64, scratch_operands = 0 : i64, tpu.core_type = #tpu.core_type<tc>, window_params = [{transform_indices = @transform_0, window_bounds = array<i64: 256, 144>}, {pipeline_mode = #tpu.pipeline_mode<synchronous>, transform_indices = @transform_1, window_bounds = array<i64: 144, 128>}, {pipeline_mode = #tpu.pipeline_mode<synchronous>, transform_indices = @transform_2, window_bounds = array<i64: 1, 128>}, {transform_indices = @transform_3, window_bounds = array<i64: 256, 128>}]} {
    %c0 = arith.constant 0 : index
    %c0_0 = arith.constant 0 : index
    %0 = vector.load %arg1[%c0, %c0_0] : memref<256x144xbf16, #tpu.memory_space<vmem>>, vector<256x144xbf16>
    %c0_1 = arith.constant 0 : index
    %c0_2 = arith.constant 0 : index
    %1 = vector.load %arg2[%c0_1, %c0_2] : memref<144x128xbf16, #tpu.memory_space<vmem>>, vector<144x128xbf16>
    %cst = arith.constant dense<0.000000e+00> : vector<256x128xf32>
    %2 = tpu.matmul %0, %1, %cst {dimension_numbers = #tpu.dot_dimension_numbers<[1], [0], [0], [1], [0, 0, 1, 1], [], []>} : vector<256x144xbf16>, vector<144x128xbf16>, vector<256x128xf32> -> vector<256x128xf32>
    %c0_3 = arith.constant 0 : index
    %c0_4 = arith.constant 0 : index
    %3 = vector.load %arg3[%c0_3, %c0_4] : memref<1x128xf32, #tpu.memory_space<vmem>>, vector<1x128xf32>
    %4 = vector.broadcast %3 : vector<1x128xf32> to vector<256x128xf32>
    %5 = arith.addf %2, %4 : vector<256x128xf32>
    %6 = arith.truncf %5 : vector<256x128xf32> to vector<256x128xbf16>
    %c0_5 = arith.constant 0 : index
    %c0_6 = arith.constant 0 : index
    %7 = vector.load %arg4[%c0_5, %c0_6] : memref<256x128xbf16, #tpu.memory_space<vmem>>, vector<256x128xbf16>
    tpu.vector_store %arg4[%c0_5, %c0_6], %6 {strides = array<i32>} : memref<256x128xbf16, #tpu.memory_space<vmem>>, vector<256x128xbf16>,
    return
  }
  func.func @transform_0(%arg0: i32) -> (i32, i32) {
    %c0_i32 = arith.constant 0 : i32
    %c0_i32_0 = arith.constant 0 : i32
    return %arg0, %c0_i32 : i32, i32
  }
  func.func @transform_1(%arg0: i32) -> (i32, i32) {
    %c0_i32 = arith.constant 0 : i32
    %c0_i32_0 = arith.constant 0 : i32
    %c0_i32_1 = arith.constant 0 : i32
    return %c0_i32, %c0_i32_0 : i32, i32
  }
  func.func @transform_2(%arg0: i32) -> (i32, i32) {
    %c0_i32 = arith.constant 0 : i32
    %c0_i32_0 = arith.constant 0 : i32
    %c0_i32_1 = arith.constant 0 : i32
    return %c0_i32, %c0_i32_0 : i32, i32
  }
  func.func @transform_3(%arg0: i32) -> (i32, i32) {
    %c0_i32 = arith.constant 0 : i32
    %c0_i32_0 = arith.constant 0 : i32
    return %arg0, %c0_i32 : i32, i32
  }
}

module attributes {stable_mosaic.version = 11 : i64} {
  func.func @_mm_bias_kernel(%arg0: i32, %arg1: memref<128x144xbf16, #tpu.memory_space<vmem>>, %arg2: memref<144x128xbf16, #tpu.memory_space<vmem>>, %arg3: memref<1x128xf32, #tpu.memory_space<vmem>>, %arg4: memref<128x128xbf16, #tpu.memory_space<vmem>>) attributes {dimension_semantics = [#tpu.dimension_semantics<parallel>], iteration_bounds = array<i64: 1>, scalar_prefetch = 0 : i64, scratch_operands = 0 : i64, tpu.core_type = #tpu.core_type<tc>, window_params = [{transform_indices = @transform_0, window_bounds = array<i64: 128, 144>}, {pipeline_mode = #tpu.pipeline_mode<synchronous>, transform_indices = @transform_1, window_bounds = array<i64: 144, 128>}, {pipeline_mode = #tpu.pipeline_mode<synchronous>, transform_indices = @transform_2, window_bounds = array<i64: 1, 128>}, {transform_indices = @transform_3, window_bounds = array<i64: 128, 128>}]} {
    %c0 = arith.constant 0 : index
    %c0_0 = arith.constant 0 : index
    %0 = vector.load %arg1[%c0, %c0_0] : memref<128x144xbf16, #tpu.memory_space<vmem>>, vector<128x144xbf16>
    %c0_1 = arith.constant 0 : index
    %c0_2 = arith.constant 0 : index
    %1 = vector.load %arg2[%c0_1, %c0_2] : memref<144x128xbf16, #tpu.memory_space<vmem>>, vector<144x128xbf16>
    %cst = arith.constant dense<0.000000e+00> : vector<128x128xf32>
    %2 = tpu.matmul %0, %1, %cst {dimension_numbers = #tpu.dot_dimension_numbers<[1], [0], [0], [1], [0, 0, 1, 1], [], []>} : vector<128x144xbf16>, vector<144x128xbf16>, vector<128x128xf32> -> vector<128x128xf32>
    %c0_3 = arith.constant 0 : index
    %c0_4 = arith.constant 0 : index
    %3 = vector.load %arg3[%c0_3, %c0_4] : memref<1x128xf32, #tpu.memory_space<vmem>>, vector<1x128xf32>
    %4 = vector.broadcast %3 : vector<1x128xf32> to vector<128x128xf32>
    %5 = arith.addf %2, %4 : vector<128x128xf32>
    %6 = arith.truncf %5 : vector<128x128xf32> to vector<128x128xbf16>
    %c0_5 = arith.constant 0 : index
    %c0_6 = arith.constant 0 : index
    %7 = vector.load %arg4[%c0_5, %c0_6] : memref<128x128xbf16, #tpu.memory_space<vmem>>, vector<128x128xbf16>
    tpu.vector_store %arg4[%c0_5, %c0_6], %6 {strides = array<i32>} : memref<128x128xbf16, #tpu.memory_space<vmem>>, vector<128x128xbf16>,
    return
  }
  func.func @transform_0(%arg0: i32) -> (i32, i32) {
    %c0_i32 = arith.constant 0 : i32
    %c0_i32_0 = arith.constant 0 : i32
    return %arg0, %c0_i32 : i32, i32
  }
  func.func @transform_1(%arg0: i32) -> (i32, i32) {
    %c0_i32 = arith.constant 0 : i32
    %c0_i32_0 = arith.constant 0 : i32
    %c0_i32_1 = arith.constant 0 : i32
    return %c0_i32, %c0_i32_0 : i32, i32
  }
  func.func @transform_2(%arg0: i32) -> (i32, i32) {
    %c0_i32 = arith.constant 0 : i32
    %c0_i32_0 = arith.constant 0 : i32
    %c0_i32_1 = arith.constant 0 : i32
    return %c0_i32, %c0_i32_0 : i32, i32
  }
  func.func @transform_3(%arg0: i32) -> (i32, i32) {
    %c0_i32 = arith.constant 0 : i32
    %c0_i32_0 = arith.constant 0 : i32
    return %arg0, %c0_i32 : i32, i32
  }
}

module attributes {stable_mosaic.version = 11 : i64} {
  func.func @_mm_bias_kernel(%arg0: i32, %arg1: memref<128x288xbf16, #tpu.memory_space<vmem>>, %arg2: memref<288x128xbf16, #tpu.memory_space<vmem>>, %arg3: memref<1x128xf32, #tpu.memory_space<vmem>>, %arg4: memref<128x128xbf16, #tpu.memory_space<vmem>>) attributes {dimension_semantics = [#tpu.dimension_semantics<parallel>], iteration_bounds = array<i64: 1>, scalar_prefetch = 0 : i64, scratch_operands = 0 : i64, tpu.core_type = #tpu.core_type<tc>, window_params = [{transform_indices = @transform_0, window_bounds = array<i64: 128, 288>}, {pipeline_mode = #tpu.pipeline_mode<synchronous>, transform_indices = @transform_1, window_bounds = array<i64: 288, 128>}, {pipeline_mode = #tpu.pipeline_mode<synchronous>, transform_indices = @transform_2, window_bounds = array<i64: 1, 128>}, {transform_indices = @transform_3, window_bounds = array<i64: 128, 128>}]} {
    %c0 = arith.constant 0 : index
    %c0_0 = arith.constant 0 : index
    %0 = vector.load %arg1[%c0, %c0_0] : memref<128x288xbf16, #tpu.memory_space<vmem>>, vector<128x288xbf16>
    %c0_1 = arith.constant 0 : index
    %c0_2 = arith.constant 0 : index
    %1 = vector.load %arg2[%c0_1, %c0_2] : memref<288x128xbf16, #tpu.memory_space<vmem>>, vector<288x128xbf16>
    %cst = arith.constant dense<0.000000e+00> : vector<128x128xf32>
    %2 = tpu.matmul %0, %1, %cst {dimension_numbers = #tpu.dot_dimension_numbers<[1], [0], [0], [1], [0, 0, 1, 1], [], []>} : vector<128x288xbf16>, vector<288x128xbf16>, vector<128x128xf32> -> vector<128x128xf32>
    %c0_3 = arith.constant 0 : index
    %c0_4 = arith.constant 0 : index
    %3 = vector.load %arg3[%c0_3, %c0_4] : memref<1x128xf32, #tpu.memory_space<vmem>>, vector<1x128xf32>
    %4 = vector.broadcast %3 : vector<1x128xf32> to vector<128x128xf32>
    %5 = arith.addf %2, %4 : vector<128x128xf32>
    %6 = arith.truncf %5 : vector<128x128xf32> to vector<128x128xbf16>
    %c0_5 = arith.constant 0 : index
    %c0_6 = arith.constant 0 : index
    %7 = vector.load %arg4[%c0_5, %c0_6] : memref<128x128xbf16, #tpu.memory_space<vmem>>, vector<128x128xbf16>
    tpu.vector_store %arg4[%c0_5, %c0_6], %6 {strides = array<i32>} : memref<128x128xbf16, #tpu.memory_space<vmem>>, vector<128x128xbf16>,
    return
  }
  func.func @transform_0(%arg0: i32) -> (i32, i32) {
    %c0_i32 = arith.constant 0 : i32
    %c0_i32_0 = arith.constant 0 : i32
    return %arg0, %c0_i32 : i32, i32
  }
  func.func @transform_1(%arg0: i32) -> (i32, i32) {
    %c0_i32 = arith.constant 0 : i32
    %c0_i32_0 = arith.constant 0 : i32
    %c0_i32_1 = arith.constant 0 : i32
    return %c0_i32, %c0_i32_0 : i32, i32
  }
  func.func @transform_2(%arg0: i32) -> (i32, i32) {
    %c0_i32 = arith.constant 0 : i32
    %c0_i32_0 = arith.constant 0 : i32
    %c0_i32_1 = arith.constant 0 : i32
    return %c0_i32, %c0_i32_0 : i32, i32
  }
  func.func @transform_3(%arg0: i32) -> (i32, i32) {
    %c0_i32 = arith.constant 0 : i32
    %c0_i32_0 = arith.constant 0 : i32
    return %arg0, %c0_i32 : i32, i32
  }
}

module attributes {stable_mosaic.version = 11 : i64} {
  func.func @_mm_bias_kernel(%arg0: i32, %arg1: memref<32x288xbf16, #tpu.memory_space<vmem>>, %arg2: memref<288x128xbf16, #tpu.memory_space<vmem>>, %arg3: memref<1x128xf32, #tpu.memory_space<vmem>>, %arg4: memref<32x128xbf16, #tpu.memory_space<vmem>>) attributes {dimension_semantics = [#tpu.dimension_semantics<parallel>], iteration_bounds = array<i64: 1>, scalar_prefetch = 0 : i64, scratch_operands = 0 : i64, tpu.core_type = #tpu.core_type<tc>, window_params = [{transform_indices = @transform_0, window_bounds = array<i64: 32, 288>}, {pipeline_mode = #tpu.pipeline_mode<synchronous>, transform_indices = @transform_1, window_bounds = array<i64: 288, 128>}, {pipeline_mode = #tpu.pipeline_mode<synchronous>, transform_indices = @transform_2, window_bounds = array<i64: 1, 128>}, {transform_indices = @transform_3, window_bounds = array<i64: 32, 128>}]} {
    %c0 = arith.constant 0 : index
    %c0_0 = arith.constant 0 : index
    %0 = vector.load %arg1[%c0, %c0_0] : memref<32x288xbf16, #tpu.memory_space<vmem>>, vector<32x288xbf16>
    %c0_1 = arith.constant 0 : index
    %c0_2 = arith.constant 0 : index
    %1 = vector.load %arg2[%c0_1, %c0_2] : memref<288x128xbf16, #tpu.memory_space<vmem>>, vector<288x128xbf16>
    %cst = arith.constant dense<0.000000e+00> : vector<32x128xf32>
    %2 = tpu.matmul %0, %1, %cst {dimension_numbers = #tpu.dot_dimension_numbers<[1], [0], [0], [1], [0, 0, 1, 1], [], []>} : vector<32x288xbf16>, vector<288x128xbf16>, vector<32x128xf32> -> vector<32x128xf32>
    %c0_3 = arith.constant 0 : index
    %c0_4 = arith.constant 0 : index
    %3 = vector.load %arg3[%c0_3, %c0_4] : memref<1x128xf32, #tpu.memory_space<vmem>>, vector<1x128xf32>
    %4 = vector.broadcast %3 : vector<1x128xf32> to vector<32x128xf32>
    %5 = arith.addf %2, %4 : vector<32x128xf32>
    %6 = arith.truncf %5 : vector<32x128xf32> to vector<32x128xbf16>
    %c0_5 = arith.constant 0 : index
    %c0_6 = arith.constant 0 : index
    %7 = vector.load %arg4[%c0_5, %c0_6] : memref<32x128xbf16, #tpu.memory_space<vmem>>, vector<32x128xbf16>
    tpu.vector_store %arg4[%c0_5, %c0_6], %6 {strides = array<i32>} : memref<32x128xbf16, #tpu.memory_space<vmem>>, vector<32x128xbf16>,
    return
  }
  func.func @transform_0(%arg0: i32) -> (i32, i32) {
    %c0_i32 = arith.constant 0 : i32
    %c0_i32_0 = arith.constant 0 : i32
    return %arg0, %c0_i32 : i32, i32
  }
  func.func @transform_1(%arg0: i32) -> (i32, i32) {
    %c0_i32 = arith.constant 0 : i32
    %c0_i32_0 = arith.constant 0 : i32
    %c0_i32_1 = arith.constant 0 : i32
    return %c0_i32, %c0_i32_0 : i32, i32
  }
  func.func @transform_2(%arg0: i32) -> (i32, i32) {
    %c0_i32 = arith.constant 0 : i32
    %c0_i32_0 = arith.constant 0 : i32
    %c0_i32_1 = arith.constant 0 : i32
    return %c0_i32, %c0_i32_0 : i32, i32
  }
  func.func @transform_3(%arg0: i32) -> (i32, i32) {
    %c0_i32 = arith.constant 0 : i32
    %c0_i32_0 = arith.constant 0 : i32
    return %arg0, %c0_i32 : i32, i32
  }
}

module attributes {stable_mosaic.version = 11 : i64} {
  func.func @_mm_bias_kernel(%arg0: i32, %arg1: memref<32x576xbf16, #tpu.memory_space<vmem>>, %arg2: memref<576x128xbf16, #tpu.memory_space<vmem>>, %arg3: memref<1x128xf32, #tpu.memory_space<vmem>>, %arg4: memref<32x128xbf16, #tpu.memory_space<vmem>>) attributes {dimension_semantics = [#tpu.dimension_semantics<parallel>], iteration_bounds = array<i64: 1>, scalar_prefetch = 0 : i64, scratch_operands = 0 : i64, tpu.core_type = #tpu.core_type<tc>, window_params = [{transform_indices = @transform_0, window_bounds = array<i64: 32, 576>}, {pipeline_mode = #tpu.pipeline_mode<synchronous>, transform_indices = @transform_1, window_bounds = array<i64: 576, 128>}, {pipeline_mode = #tpu.pipeline_mode<synchronous>, transform_indices = @transform_2, window_bounds = array<i64: 1, 128>}, {transform_indices = @transform_3, window_bounds = array<i64: 32, 128>}]} {
    %c0 = arith.constant 0 : index
    %c0_0 = arith.constant 0 : index
    %0 = vector.load %arg1[%c0, %c0_0] : memref<32x576xbf16, #tpu.memory_space<vmem>>, vector<32x576xbf16>
    %c0_1 = arith.constant 0 : index
    %c0_2 = arith.constant 0 : index
    %1 = vector.load %arg2[%c0_1, %c0_2] : memref<576x128xbf16, #tpu.memory_space<vmem>>, vector<576x128xbf16>
    %cst = arith.constant dense<0.000000e+00> : vector<32x128xf32>
    %2 = tpu.matmul %0, %1, %cst {dimension_numbers = #tpu.dot_dimension_numbers<[1], [0], [0], [1], [0, 0, 1, 1], [], []>} : vector<32x576xbf16>, vector<576x128xbf16>, vector<32x128xf32> -> vector<32x128xf32>
    %c0_3 = arith.constant 0 : index
    %c0_4 = arith.constant 0 : index
    %3 = vector.load %arg3[%c0_3, %c0_4] : memref<1x128xf32, #tpu.memory_space<vmem>>, vector<1x128xf32>
    %4 = vector.broadcast %3 : vector<1x128xf32> to vector<32x128xf32>
    %5 = arith.addf %2, %4 : vector<32x128xf32>
    %6 = arith.truncf %5 : vector<32x128xf32> to vector<32x128xbf16>
    %c0_5 = arith.constant 0 : index
    %c0_6 = arith.constant 0 : index
    %7 = vector.load %arg4[%c0_5, %c0_6] : memref<32x128xbf16, #tpu.memory_space<vmem>>, vector<32x128xbf16>
    tpu.vector_store %arg4[%c0_5, %c0_6], %6 {strides = array<i32>} : memref<32x128xbf16, #tpu.memory_space<vmem>>, vector<32x128xbf16>,
    return
  }
  func.func @transform_0(%arg0: i32) -> (i32, i32) {
    %c0_i32 = arith.constant 0 : i32
    %c0_i32_0 = arith.constant 0 : i32
    return %arg0, %c0_i32 : i32, i32
  }
  func.func @transform_1(%arg0: i32) -> (i32, i32) {
    %c0_i32 = arith.constant 0 : i32
    %c0_i32_0 = arith.constant 0 : i32
    %c0_i32_1 = arith.constant 0 : i32
    return %c0_i32, %c0_i32_0 : i32, i32
  }
  func.func @transform_2(%arg0: i32) -> (i32, i32) {
    %c0_i32 = arith.constant 0 : i32
    %c0_i32_0 = arith.constant 0 : i32
    %c0_i32_1 = arith.constant 0 : i32
    return %c0_i32, %c0_i32_0 : i32, i32
  }
  func.func @transform_3(%arg0: i32) -> (i32, i32) {
    %c0_i32 = arith.constant 0 : i32
    %c0_i32_0 = arith.constant 0 : i32
    return %arg0, %c0_i32 : i32, i32
  }
}

module attributes {stable_mosaic.version = 11 : i64} {
  func.func @_mm_bias_kernel(%arg0: i32, %arg1: memref<8x576xbf16, #tpu.memory_space<vmem>>, %arg2: memref<576x128xbf16, #tpu.memory_space<vmem>>, %arg3: memref<1x128xf32, #tpu.memory_space<vmem>>, %arg4: memref<8x128xbf16, #tpu.memory_space<vmem>>) attributes {dimension_semantics = [#tpu.dimension_semantics<parallel>], iteration_bounds = array<i64: 1>, scalar_prefetch = 0 : i64, scratch_operands = 0 : i64, tpu.core_type = #tpu.core_type<tc>, window_params = [{transform_indices = @transform_0, window_bounds = array<i64: 8, 576>}, {pipeline_mode = #tpu.pipeline_mode<synchronous>, transform_indices = @transform_1, window_bounds = array<i64: 576, 128>}, {pipeline_mode = #tpu.pipeline_mode<synchronous>, transform_indices = @transform_2, window_bounds = array<i64: 1, 128>}, {transform_indices = @transform_3, window_bounds = array<i64: 8, 128>}]} {
    %c0 = arith.constant 0 : index
    %c0_0 = arith.constant 0 : index
    %0 = vector.load %arg1[%c0, %c0_0] : memref<8x576xbf16, #tpu.memory_space<vmem>>, vector<8x576xbf16>
    %c0_1 = arith.constant 0 : index
    %c0_2 = arith.constant 0 : index
    %1 = vector.load %arg2[%c0_1, %c0_2] : memref<576x128xbf16, #tpu.memory_space<vmem>>, vector<576x128xbf16>
    %cst = arith.constant dense<0.000000e+00> : vector<8x128xf32>
    %2 = tpu.matmul %0, %1, %cst {dimension_numbers = #tpu.dot_dimension_numbers<[1], [0], [0], [1], [0, 0, 1, 1], [], []>} : vector<8x576xbf16>, vector<576x128xbf16>, vector<8x128xf32> -> vector<8x128xf32>
    %c0_3 = arith.constant 0 : index
    %c0_4 = arith.constant 0 : index
    %3 = vector.load %arg3[%c0_3, %c0_4] : memref<1x128xf32, #tpu.memory_space<vmem>>, vector<1x128xf32>
    %4 = vector.broadcast %3 : vector<1x128xf32> to vector<8x128xf32>
    %5 = arith.addf %2, %4 : vector<8x128xf32>
    %6 = arith.truncf %5 : vector<8x128xf32> to vector<8x128xbf16>
    %c0_5 = arith.constant 0 : index
    %c0_6 = arith.constant 0 : index
    %7 = vector.load %arg4[%c0_5, %c0_6] : memref<8x128xbf16, #tpu.memory_space<vmem>>, vector<8x128xbf16>
    tpu.vector_store %arg4[%c0_5, %c0_6], %6 {strides = array<i32>} : memref<8x128xbf16, #tpu.memory_space<vmem>>, vector<8x128xbf16>,
    return
  }
  func.func @transform_0(%arg0: i32) -> (i32, i32) {
    %c0_i32 = arith.constant 0 : i32
    %c0_i32_0 = arith.constant 0 : i32
    return %arg0, %c0_i32 : i32, i32
  }
  func.func @transform_1(%arg0: i32) -> (i32, i32) {
    %c0_i32 = arith.constant 0 : i32
    %c0_i32_0 = arith.constant 0 : i32
    %c0_i32_1 = arith.constant 0 : i32
    return %c0_i32, %c0_i32_0 : i32, i32
  }
  func.func @transform_2(%arg0: i32) -> (i32, i32) {
    %c0_i32 = arith.constant 0 : i32
    %c0_i32_0 = arith.constant 0 : i32
    %c0_i32_1 = arith.constant 0 : i32
    return %c0_i32, %c0_i32_0 : i32, i32
  }
  func.func @transform_3(%arg0: i32) -> (i32, i32) {
    %c0_i32 = arith.constant 0 : i32
    %c0_i32_0 = arith.constant 0 : i32
    return %arg0, %c0_i32 : i32, i32
  }
}

module attributes {stable_mosaic.version = 11 : i64} {
  func.func @_mm_bias_kernel(%arg0: i32, %arg1: memref<8x1152xbf16, #tpu.memory_space<vmem>>, %arg2: memref<1152x128xbf16, #tpu.memory_space<vmem>>, %arg3: memref<1x128xf32, #tpu.memory_space<vmem>>, %arg4: memref<8x128xbf16, #tpu.memory_space<vmem>>) attributes {dimension_semantics = [#tpu.dimension_semantics<parallel>], iteration_bounds = array<i64: 1>, scalar_prefetch = 0 : i64, scratch_operands = 0 : i64, tpu.core_type = #tpu.core_type<tc>, window_params = [{transform_indices = @transform_0, window_bounds = array<i64: 8, 1152>}, {pipeline_mode = #tpu.pipeline_mode<synchronous>, transform_indices = @transform_1, window_bounds = array<i64: 1152, 128>}, {pipeline_mode = #tpu.pipeline_mode<synchronous>, transform_indices = @transform_2, window_bounds = array<i64: 1, 128>}, {transform_indices = @transform_3, window_bounds = array<i64: 8, 128>}]} {
    %c0 = arith.constant 0 : index
    %c0_0 = arith.constant 0 : index
    %0 = vector.load %arg1[%c0, %c0_0] : memref<8x1152xbf16, #tpu.memory_space<vmem>>, vector<8x1152xbf16>
    %c0_1 = arith.constant 0 : index
    %c0_2 = arith.constant 0 : index
    %1 = vector.load %arg2[%c0_1, %c0_2] : memref<1152x128xbf16, #tpu.memory_space<vmem>>, vector<1152x128xbf16>
    %cst = arith.constant dense<0.000000e+00> : vector<8x128xf32>
    %2 = tpu.matmul %0, %1, %cst {dimension_numbers = #tpu.dot_dimension_numbers<[1], [0], [0], [1], [0, 0, 1, 1], [], []>} : vector<8x1152xbf16>, vector<1152x128xbf16>, vector<8x128xf32> -> vector<8x128xf32>
    %c0_3 = arith.constant 0 : index
    %c0_4 = arith.constant 0 : index
    %3 = vector.load %arg3[%c0_3, %c0_4] : memref<1x128xf32, #tpu.memory_space<vmem>>, vector<1x128xf32>
    %4 = vector.broadcast %3 : vector<1x128xf32> to vector<8x128xf32>
    %5 = arith.addf %2, %4 : vector<8x128xf32>
    %6 = math.tanh %5 : vector<8x128xf32>
    %7 = arith.truncf %6 : vector<8x128xf32> to vector<8x128xbf16>
    %c0_5 = arith.constant 0 : index
    %c0_6 = arith.constant 0 : index
    %8 = vector.load %arg4[%c0_5, %c0_6] : memref<8x128xbf16, #tpu.memory_space<vmem>>, vector<8x128xbf16>
    tpu.vector_store %arg4[%c0_5, %c0_6], %7 {strides = array<i32>} : memref<8x128xbf16, #tpu.memory_space<vmem>>, vector<8x128xbf16>,
    return
  }
  func.func @transform_0(%arg0: i32) -> (i32, i32) {
    %c0_i32 = arith.constant 0 : i32
    %c0_i32_0 = arith.constant 0 : i32
    return %arg0, %c0_i32 : i32, i32
  }
  func.func @transform_1(%arg0: i32) -> (i32, i32) {
    %c0_i32 = arith.constant 0 : i32
    %c0_i32_0 = arith.constant 0 : i32
    %c0_i32_1 = arith.constant 0 : i32
    return %c0_i32, %c0_i32_0 : i32, i32
  }
  func.func @transform_2(%arg0: i32) -> (i32, i32) {
    %c0_i32 = arith.constant 0 : i32
    %c0_i32_0 = arith.constant 0 : i32
    %c0_i32_1 = arith.constant 0 : i32
    return %c0_i32, %c0_i32_0 : i32, i32
  }
  func.func @transform_3(%arg0: i32) -> (i32, i32) {
    %c0_i32 = arith.constant 0 : i32
    %c0_i32_0 = arith.constant 0 : i32
    return %arg0, %c0_i32 : i32, i32
  }
}

module attributes {stable_mosaic.version = 11 : i64} {
  func.func @_layernorm_kernel(%arg0: i32, %arg1: memref<8x128xbf16, #tpu.memory_space<vmem>>, %arg2: memref<8x128xbf16, #tpu.memory_space<vmem>>) attributes {dimension_semantics = [#tpu.dimension_semantics<arbitrary>], iteration_bounds = array<i64: 1>, scalar_prefetch = 0 : i64, scratch_operands = 0 : i64, tpu.core_type = #tpu.core_type<tc>, window_params = [{pipeline_mode = #tpu.pipeline_mode<synchronous>, transform_indices = @transform_0, window_bounds = array<i64: 8, 128>}, {pipeline_mode = #tpu.pipeline_mode<synchronous>, transform_indices = @transform_1, window_bounds = array<i64: 8, 128>}]} {
    %c0 = arith.constant 0 : index
    %c0_0 = arith.constant 0 : index
    %0 = vector.load %arg1[%c0, %c0_0] : memref<8x128xbf16, #tpu.memory_space<vmem>>, vector<8x128xbf16>
    %1 = arith.extf %0 : vector<8x128xbf16> to vector<8x128xf32>
    %cst = arith.constant dense<0.000000e+00> : vector<8xf32>
    %2 = vector.multi_reduction <add>, %1, %cst [1] : vector<8x128xf32> to vector<8xf32>
    %3 = vector.shape_cast %2 : vector<8xf32> to vector<8x1xf32>
    %cst_1 = arith.constant 1.280000e+02 : f32
    %4 = vector.broadcast %cst_1 : f32 to vector<8x1xf32>
    %5 = arith.divf %3, %4 : vector<8x1xf32>
    %6 = vector.broadcast %5 : vector<8x1xf32> to vector<8x128xf32>
    %7 = arith.subf %1, %6 : vector<8x128xf32>
    %8 = arith.mulf %7, %7 : vector<8x128xf32>
    %cst_2 = arith.constant dense<0.000000e+00> : vector<8xf32>
    %9 = vector.multi_reduction <add>, %8, %cst_2 [1] : vector<8x128xf32> to vector<8xf32>
    %10 = vector.shape_cast %9 : vector<8xf32> to vector<8x1xf32>
    %cst_3 = arith.constant 1.280000e+02 : f32
    %11 = vector.broadcast %cst_3 : f32 to vector<8x1xf32>
    %12 = arith.divf %10, %11 : vector<8x1xf32>
    %13 = vector.broadcast %5 : vector<8x1xf32> to vector<8x128xf32>
    %14 = arith.subf %1, %13 : vector<8x128xf32>
    %cst_4 = arith.constant 9.99999974E-6 : f32
    %15 = vector.broadcast %cst_4 : f32 to vector<8x1xf32>
    %16 = arith.addf %12, %15 : vector<8x1xf32>
    %17 = math.rsqrt %16 : vector<8x1xf32>
    %18 = vector.broadcast %17 : vector<8x1xf32> to vector<8x128xf32>
    %19 = arith.mulf %14, %18 : vector<8x128xf32>
    %20 = arith.truncf %19 : vector<8x128xf32> to vector<8x128xbf16>
    %c0_5 = arith.constant 0 : index
    %c0_6 = arith.constant 0 : index
    %21 = vector.load %arg2[%c0_5, %c0_6] : memref<8x128xbf16, #tpu.memory_space<vmem>>, vector<8x128xbf16>
    tpu.vector_store %arg2[%c0_5, %c0_6], %20 {strides = array<i32>} : memref<8x128xbf16, #tpu.memory_space<vmem>>, vector<8x128xbf16>,
    return
  }
  func.func @transform_0(%arg0: i32) -> (i32, i32) {
    %c0_i32 = arith.constant 0 : i32
    %c0_i32_0 = arith.constant 0 : i32
    %c0_i32_1 = arith.constant 0 : i32
    return %c0_i32, %c0_i32_0 : i32, i32
  }
  func.func @transform_1(%arg0: i32) -> (i32, i32) {
    %c0_i32 = arith.constant 0 : i32
    %c0_i32_0 = arith.constant 0 : i32
    %c0_i32_1 = arith.constant 0 : i32
    return %c0_i32, %c0_i32_0 : i32, i32
  }
}

module attributes {stable_mosaic.version = 11 : i64} {
  func.func @_mm_bias_kernel(%arg0: i32, %arg1: memref<32x128xbf16, #tpu.memory_space<vmem>>, %arg2: memref<128x512xbf16, #tpu.memory_space<vmem>>, %arg3: memref<1x512xf32, #tpu.memory_space<vmem>>, %arg4: memref<32x512xbf16, #tpu.memory_space<vmem>>) attributes {dimension_semantics = [#tpu.dimension_semantics<parallel>], iteration_bounds = array<i64: 1>, scalar_prefetch = 0 : i64, scratch_operands = 0 : i64, tpu.core_type = #tpu.core_type<tc>, window_params = [{transform_indices = @transform_0, window_bounds = array<i64: 32, 128>}, {pipeline_mode = #tpu.pipeline_mode<synchronous>, transform_indices = @transform_1, window_bounds = array<i64: 128, 512>}, {pipeline_mode = #tpu.pipeline_mode<synchronous>, transform_indices = @transform_2, window_bounds = array<i64: 1, 512>}, {transform_indices = @transform_3, window_bounds = array<i64: 32, 512>}]} {
    %c0 = arith.constant 0 : index
    %c0_0 = arith.constant 0 : index
    %0 = vector.load %arg1[%c0, %c0_0] : memref<32x128xbf16, #tpu.memory_space<vmem>>, vector<32x128xbf16>
    %c0_1 = arith.constant 0 : index
    %c0_2 = arith.constant 0 : index
    %1 = vector.load %arg2[%c0_1, %c0_2] : memref<128x512xbf16, #tpu.memory_space<vmem>>, vector<128x512xbf16>
    %cst = arith.constant dense<0.000000e+00> : vector<32x512xf32>
    %2 = tpu.matmul %0, %1, %cst {dimension_numbers = #tpu.dot_dimension_numbers<[1], [0], [0], [1], [0, 0, 1, 1], [], []>} : vector<32x128xbf16>, vector<128x512xbf16>, vector<32x512xf32> -> vector<32x512xf32>
    %c0_3 = arith.constant 0 : index
    %c0_4 = arith.constant 0 : index
    %3 = vector.load %arg3[%c0_3, %c0_4] : memref<1x512xf32, #tpu.memory_space<vmem>>, vector<1x512xf32>
    %4 = vector.broadcast %3 : vector<1x512xf32> to vector<32x512xf32>
    %5 = arith.addf %2, %4 : vector<32x512xf32>
    %6 = arith.truncf %5 : vector<32x512xf32> to vector<32x512xbf16>
    %c0_5 = arith.constant 0 : index
    %c0_6 = arith.constant 0 : index
    %7 = vector.load %arg4[%c0_5, %c0_6] : memref<32x512xbf16, #tpu.memory_space<vmem>>, vector<32x512xbf16>
    tpu.vector_store %arg4[%c0_5, %c0_6], %6 {strides = array<i32>} : memref<32x512xbf16, #tpu.memory_space<vmem>>, vector<32x512xbf16>,
    return
  }
  func.func @transform_0(%arg0: i32) -> (i32, i32) {
    %c0_i32 = arith.constant 0 : i32
    %c0_i32_0 = arith.constant 0 : i32
    return %arg0, %c0_i32 : i32, i32
  }
  func.func @transform_1(%arg0: i32) -> (i32, i32) {
    %c0_i32 = arith.constant 0 : i32
    %c0_i32_0 = arith.constant 0 : i32
    %c0_i32_1 = arith.constant 0 : i32
    return %c0_i32, %c0_i32_0 : i32, i32
  }
  func.func @transform_2(%arg0: i32) -> (i32, i32) {
    %c0_i32 = arith.constant 0 : i32
    %c0_i32_0 = arith.constant 0 : i32
    %c0_i32_1 = arith.constant 0 : i32
    return %c0_i32, %c0_i32_0 : i32, i32
  }
  func.func @transform_3(%arg0: i32) -> (i32, i32) {
    %c0_i32 = arith.constant 0 : i32
    %c0_i32_0 = arith.constant 0 : i32
    return %arg0, %c0_i32 : i32, i32
  }
}

module attributes {stable_mosaic.version = 11 : i64} {
  func.func @_lstm_bidir_kernel(%arg0: i32, %arg1: memref<4x8x512xbf16, #tpu.memory_space<vmem>>, %arg2: memref<2x64x256xbf16, #tpu.memory_space<vmem>>, %arg3: memref<4x8x128xbf16, #tpu.memory_space<vmem>>, %arg4: memref<8x64xf32, #tpu.memory_space<vmem>>, %arg5: memref<8x64xf32, #tpu.memory_space<vmem>>, %arg6: memref<8x64xf32, #tpu.memory_space<vmem>>, %arg7: memref<8x64xf32, #tpu.memory_space<vmem>>, %arg8: memref<4x8x64xf32, #tpu.memory_space<vmem>>, %arg9: memref<4x8x64xf32, #tpu.memory_space<vmem>>) attributes {dimension_semantics = [#tpu.dimension_semantics<arbitrary>], iteration_bounds = array<i64: 1>, scalar_prefetch = 0 : i64, scratch_operands = 6 : i64, tpu.core_type = #tpu.core_type<tc>, window_params = [{pipeline_mode = #tpu.pipeline_mode<synchronous>, transform_indices = @transform_0, window_bounds = array<i64: 4, 8, 512>}, {pipeline_mode = #tpu.pipeline_mode<synchronous>, transform_indices = @transform_1, window_bounds = array<i64: 2, 64, 256>}, {pipeline_mode = #tpu.pipeline_mode<synchronous>, transform_indices = @transform_2, window_bounds = array<i64: 4, 8, 128>}]} {
    %cst = arith.constant 0.000000e+00 : f32
    %0 = vector.broadcast %cst : f32 to vector<8x64xf32>
    %c0 = arith.constant 0 : index
    %c0_0 = arith.constant 0 : index
    %1 = vector.load %arg4[%c0, %c0_0] : memref<8x64xf32, #tpu.memory_space<vmem>>, vector<8x64xf32>
    tpu.vector_store %arg4[%c0, %c0_0], %0 {strides = array<i32>} : memref<8x64xf32, #tpu.memory_space<vmem>>, vector<8x64xf32>,
    %cst_1 = arith.constant 0.000000e+00 : f32
    %2 = vector.broadcast %cst_1 : f32 to vector<8x64xf32>
    %c0_2 = arith.constant 0 : index
    %c0_3 = arith.constant 0 : index
    %3 = vector.load %arg5[%c0_2, %c0_3] : memref<8x64xf32, #tpu.memory_space<vmem>>, vector<8x64xf32>
    tpu.vector_store %arg5[%c0_2, %c0_3], %2 {strides = array<i32>} : memref<8x64xf32, #tpu.memory_space<vmem>>, vector<8x64xf32>,
    %cst_4 = arith.constant 0.000000e+00 : f32
    %4 = vector.broadcast %cst_4 : f32 to vector<8x64xf32>
    %c0_5 = arith.constant 0 : index
    %c0_6 = arith.constant 0 : index
    %5 = vector.load %arg6[%c0_5, %c0_6] : memref<8x64xf32, #tpu.memory_space<vmem>>, vector<8x64xf32>
    tpu.vector_store %arg6[%c0_5, %c0_6], %4 {strides = array<i32>} : memref<8x64xf32, #tpu.memory_space<vmem>>, vector<8x64xf32>,
    %cst_7 = arith.constant 0.000000e+00 : f32
    %6 = vector.broadcast %cst_7 : f32 to vector<8x64xf32>
    %c0_8 = arith.constant 0 : index
    %c0_9 = arith.constant 0 : index
    %7 = vector.load %arg7[%c0_8, %c0_9] : memref<8x64xf32, #tpu.memory_space<vmem>>, vector<8x64xf32>
    tpu.vector_store %arg7[%c0_8, %c0_9], %6 {strides = array<i32>} : memref<8x64xf32, #tpu.memory_space<vmem>>, vector<8x64xf32>,
    %c0_10 = arith.constant 0 : index
    %c0_11 = arith.constant 0 : index
    %c0_12 = arith.constant 0 : index
    %8 = vector.load %arg2[%c0_10, %c0_11, %c0_12] : memref<2x64x256xbf16, #tpu.memory_space<vmem>>, vector<1x64x256xbf16>
    %9 = vector.shape_cast %8 : vector<1x64x256xbf16> to vector<64x256xbf16>
    %c1 = arith.constant 1 : index
    %c0_13 = arith.constant 0 : index
    %c0_14 = arith.constant 0 : index
    %10 = vector.load %arg2[%c1, %c0_13, %c0_14] : memref<2x64x256xbf16, #tpu.memory_space<vmem>>, vector<1x64x256xbf16>
    %11 = vector.shape_cast %10 : vector<1x64x256xbf16> to vector<64x256xbf16>
    %c0_i32 = arith.constant 0 : i32
    %c3_i32 = arith.constant 3 : i32
    %12 = arith.subi %c3_i32, %c0_i32 : i32
    %13 = arith.index_cast %c0_i32 : i32 to index
    %c0_15 = arith.constant 0 : index
    %c0_16 = arith.constant 0 : index
    %14 = vector.load %arg1[%13, %c0_15, %c0_16] : memref<4x8x512xbf16, #tpu.memory_space<vmem>>, vector<1x8x512xbf16>
    %15 = vector.shape_cast %14 : vector<1x8x512xbf16> to vector<8x512xbf16>
    %16 = arith.extf %15 : vector<8x512xbf16> to vector<8x512xf32>
    %17 = vector.extract_strided_slice %16 {offsets = [0, 0], sizes = [8, 256], strides = [1, 1]} : vector<8x512xf32> to vector<8x256xf32>
    %c0_17 = arith.constant 0 : index
    %c0_18 = arith.constant 0 : index
    %18 = vector.load %arg4[%c0_17, %c0_18] : memref<8x64xf32, #tpu.memory_space<vmem>>, vector<8x64xf32>
    %19 = arith.truncf %18 : vector<8x64xf32> to vector<8x64xbf16>
    %cst_19 = arith.constant dense<0.000000e+00> : vector<8x256xf32>
    %20 = tpu.matmul %19, %9, %cst_19 {dimension_numbers = #tpu.dot_dimension_numbers<[1], [0], [0], [1], [0, 0, 1, 1], [], []>} : vector<8x64xbf16>, vector<64x256xbf16>, vector<8x256xf32> -> vector<8x256xf32>
    %21 = arith.addf %17, %20 : vector<8x256xf32>
    %22 = arith.index_cast %12 : i32 to index
    %c0_20 = arith.constant 0 : index
    %c0_21 = arith.constant 0 : index
    %23 = vector.load %arg1[%22, %c0_20, %c0_21] : memref<4x8x512xbf16, #tpu.memory_space<vmem>>, vector<1x8x512xbf16>
    %24 = vector.shape_cast %23 : vector<1x8x512xbf16> to vector<8x512xbf16>
    %25 = arith.extf %24 : vector<8x512xbf16> to vector<8x512xf32>
    %26 = vector.extract_strided_slice %25 {offsets = [0, 256], sizes = [8, 256], strides = [1, 1]} : vector<8x512xf32> to vector<8x256xf32>
    %c0_22 = arith.constant 0 : index
    %c0_23 = arith.constant 0 : index
    %27 = vector.load %arg6[%c0_22, %c0_23] : memref<8x64xf32, #tpu.memory_space<vmem>>, vector<8x64xf32>
    %28 = arith.truncf %27 : vector<8x64xf32> to vector<8x64xbf16>
    %cst_24 = arith.constant dense<0.000000e+00> : vector<8x256xf32>
    %29 = tpu.matmul %28, %11, %cst_24 {dimension_numbers = #tpu.dot_dimension_numbers<[1], [0], [0], [1], [0, 0, 1, 1], [], []>} : vector<8x64xbf16>, vector<64x256xbf16>, vector<8x256xf32> -> vector<8x256xf32>
    %30 = arith.addf %26, %29 : vector<8x256xf32>
    %c0_25 = arith.constant 0 : index
    %c0_26 = arith.constant 0 : index
    %31 = vector.load %arg5[%c0_25, %c0_26] : memref<8x64xf32, #tpu.memory_space<vmem>>, vector<8x64xf32>
    %32 = vector.extract_strided_slice %21 {offsets = [0, 0], sizes = [8, 64], strides = [1, 1]} : vector<8x256xf32> to vector<8x64xf32>
    %33 = arith.negf %32 : vector<8x64xf32>
    %34 = math.exp %33 : vector<8x64xf32>
    %cst_27 = arith.constant 1.000000e+00 : f32
    %35 = vector.broadcast %cst_27 : f32 to vector<8x64xf32>
    %36 = arith.addf %35, %34 : vector<8x64xf32>
    %37 = arith.divf %35, %36 : vector<8x64xf32>
    %38 = vector.extract_strided_slice %21 {offsets = [0, 64], sizes = [8, 64], strides = [1, 1]} : vector<8x256xf32> to vector<8x64xf32>
    %39 = arith.negf %38 : vector<8x64xf32>
    %40 = math.exp %39 : vector<8x64xf32>
    %cst_28 = arith.constant 1.000000e+00 : f32
    %41 = vector.broadcast %cst_28 : f32 to vector<8x64xf32>
    %42 = arith.addf %41, %40 : vector<8x64xf32>
    %43 = arith.divf %41, %42 : vector<8x64xf32>
    %44 = vector.extract_strided_slice %21 {offsets = [0, 128], sizes = [8, 64], strides = [1, 1]} : vector<8x256xf32> to vector<8x64xf32>
    %45 = math.tanh %44 : vector<8x64xf32>
    %46 = vector.extract_strided_slice %21 {offsets = [0, 192], sizes = [8, 64], strides = [1, 1]} : vector<8x256xf32> to vector<8x64xf32>
    %47 = arith.negf %46 : vector<8x64xf32>
    %48 = math.exp %47 : vector<8x64xf32>
    %cst_29 = arith.constant 1.000000e+00 : f32
    %49 = vector.broadcast %cst_29 : f32 to vector<8x64xf32>
    %50 = arith.addf %49, %48 : vector<8x64xf32>
    %51 = arith.divf %49, %50 : vector<8x64xf32>
    %52 = arith.mulf %43, %31 : vector<8x64xf32>
    %53 = arith.mulf %37, %45 : vector<8x64xf32>
    %54 = arith.addf %52, %53 : vector<8x64xf32>
    %55 = math.tanh %54 : vector<8x64xf32>
    %56 = arith.mulf %51, %55 : vector<8x64xf32>
    %c0_30 = arith.constant 0 : index
    %c0_31 = arith.constant 0 : index
    %57 = vector.load %arg7[%c0_30, %c0_31] : memref<8x64xf32, #tpu.memory_space<vmem>>, vector<8x64xf32>
    %58 = vector.extract_strided_slice %30 {offsets = [0, 0], sizes = [8, 64], strides = [1, 1]} : vector<8x256xf32> to vector<8x64xf32>
    %59 = arith.negf %58 : vector<8x64xf32>
    %60 = math.exp %59 : vector<8x64xf32>
    %cst_32 = arith.constant 1.000000e+00 : f32
    %61 = vector.broadcast %cst_32 : f32 to vector<8x64xf32>
    %62 = arith.addf %61, %60 : vector<8x64xf32>
    %63 = arith.divf %61, %62 : vector<8x64xf32>
    %64 = vector.extract_strided_slice %30 {offsets = [0, 64], sizes = [8, 64], strides = [1, 1]} : vector<8x256xf32> to vector<8x64xf32>
    %65 = arith.negf %64 : vector<8x64xf32>
    %66 = math.exp %65 : vector<8x64xf32>
    %cst_33 = arith.constant 1.000000e+00 : f32
    %67 = vector.broadcast %cst_33 : f32 to vector<8x64xf32>
    %68 = arith.addf %67, %66 : vector<8x64xf32>
    %69 = arith.divf %67, %68 : vector<8x64xf32>
    %70 = vector.extract_strided_slice %30 {offsets = [0, 128], sizes = [8, 64], strides = [1, 1]} : vector<8x256xf32> to vector<8x64xf32>
    %71 = math.tanh %70 : vector<8x64xf32>
    %72 = vector.extract_strided_slice %30 {offsets = [0, 192], sizes = [8, 64], strides = [1, 1]} : vector<8x256xf32> to vector<8x64xf32>
    %73 = arith.negf %72 : vector<8x64xf32>
    %74 = math.exp %73 : vector<8x64xf32>
    %cst_34 = arith.constant 1.000000e+00 : f32
    %75 = vector.broadcast %cst_34 : f32 to vector<8x64xf32>
    %76 = arith.addf %75, %74 : vector<8x64xf32>
    %77 = arith.divf %75, %76 : vector<8x64xf32>
    %78 = arith.mulf %69, %57 : vector<8x64xf32>
    %79 = arith.mulf %63, %71 : vector<8x64xf32>
    %80 = arith.addf %78, %79 : vector<8x64xf32>
    %81 = math.tanh %80 : vector<8x64xf32>
    %82 = arith.mulf %77, %81 : vector<8x64xf32>
    %c0_35 = arith.constant 0 : index
    %c0_36 = arith.constant 0 : index
    %83 = vector.load %arg4[%c0_35, %c0_36] : memref<8x64xf32, #tpu.memory_space<vmem>>, vector<8x64xf32>
    tpu.vector_store %arg4[%c0_35, %c0_36], %56 {strides = array<i32>} : memref<8x64xf32, #tpu.memory_space<vmem>>, vector<8x64xf32>,
    %c0_37 = arith.constant 0 : index
    %c0_38 = arith.constant 0 : index
    %84 = vector.load %arg5[%c0_37, %c0_38] : memref<8x64xf32, #tpu.memory_space<vmem>>, vector<8x64xf32>
    tpu.vector_store %arg5[%c0_37, %c0_38], %54 {strides = array<i32>} : memref<8x64xf32, #tpu.memory_space<vmem>>, vector<8x64xf32>,
    %c0_39 = arith.constant 0 : index
    %c0_40 = arith.constant 0 : index
    %85 = vector.load %arg6[%c0_39, %c0_40] : memref<8x64xf32, #tpu.memory_space<vmem>>, vector<8x64xf32>
    tpu.vector_store %arg6[%c0_39, %c0_40], %82 {strides = array<i32>} : memref<8x64xf32, #tpu.memory_space<vmem>>, vector<8x64xf32>,
    %c0_41 = arith.constant 0 : index
    %c0_42 = arith.constant 0 : index
    %86 = vector.load %arg7[%c0_41, %c0_42] : memref<8x64xf32, #tpu.memory_space<vmem>>, vector<8x64xf32>
    tpu.vector_store %arg7[%c0_41, %c0_42], %80 {strides = array<i32>} : memref<8x64xf32, #tpu.memory_space<vmem>>, vector<8x64xf32>,
    %87 = arith.index_cast %c0_i32 : i32 to index
    %c0_43 = arith.constant 0 : index
    %c0_44 = arith.constant 0 : index
    %88 = vector.load %arg8[%87, %c0_43, %c0_44] : memref<4x8x64xf32, #tpu.memory_space<vmem>>, vector<1x8x64xf32>
    %89 = vector.shape_cast %88 : vector<1x8x64xf32> to vector<8x64xf32>
    %90 = vector.shape_cast %56 : vector<8x64xf32> to vector<1x8x64xf32>
    tpu.vector_store %arg8[%87, %c0_43, %c0_44], %90 {strides = array<i32>} : memref<4x8x64xf32, #tpu.memory_space<vmem>>, vector<1x8x64xf32>,
    %91 = arith.index_cast %12 : i32 to index
    %c0_45 = arith.constant 0 : index
    %c0_46 = arith.constant 0 : index
    %92 = vector.load %arg9[%91, %c0_45, %c0_46] : memref<4x8x64xf32, #tpu.memory_space<vmem>>, vector<1x8x64xf32>
    %93 = vector.shape_cast %92 : vector<1x8x64xf32> to vector<8x64xf32>
    %94 = vector.shape_cast %82 : vector<8x64xf32> to vector<1x8x64xf32>
    tpu.vector_store %arg9[%91, %c0_45, %c0_46], %94 {strides = array<i32>} : memref<4x8x64xf32, #tpu.memory_space<vmem>>, vector<1x8x64xf32>,
    %c1_i32 = arith.constant 1 : i32
    %c3_i32_47 = arith.constant 3 : i32
    %95 = arith.subi %c3_i32_47, %c1_i32 : i32
    %96 = arith.index_cast %c1_i32 : i32 to index
    %c0_48 = arith.constant 0 : index
    %c0_49 = arith.constant 0 : index
    %97 = vector.load %arg1[%96, %c0_48, %c0_49] : memref<4x8x512xbf16, #tpu.memory_space<vmem>>, vector<1x8x512xbf16>
    %98 = vector.shape_cast %97 : vector<1x8x512xbf16> to vector<8x512xbf16>
    %99 = arith.extf %98 : vector<8x512xbf16> to vector<8x512xf32>
    %100 = vector.extract_strided_slice %99 {offsets = [0, 0], sizes = [8, 256], strides = [1, 1]} : vector<8x512xf32> to vector<8x256xf32>
    %c0_50 = arith.constant 0 : index
    %c0_51 = arith.constant 0 : index
    %101 = vector.load %arg4[%c0_50, %c0_51] : memref<8x64xf32, #tpu.memory_space<vmem>>, vector<8x64xf32>
    %102 = arith.truncf %101 : vector<8x64xf32> to vector<8x64xbf16>
    %cst_52 = arith.constant dense<0.000000e+00> : vector<8x256xf32>
    %103 = tpu.matmul %102, %9, %cst_52 {dimension_numbers = #tpu.dot_dimension_numbers<[1], [0], [0], [1], [0, 0, 1, 1], [], []>} : vector<8x64xbf16>, vector<64x256xbf16>, vector<8x256xf32> -> vector<8x256xf32>
    %104 = arith.addf %100, %103 : vector<8x256xf32>
    %105 = arith.index_cast %95 : i32 to index
    %c0_53 = arith.constant 0 : index
    %c0_54 = arith.constant 0 : index
    %106 = vector.load %arg1[%105, %c0_53, %c0_54] : memref<4x8x512xbf16, #tpu.memory_space<vmem>>, vector<1x8x512xbf16>
    %107 = vector.shape_cast %106 : vector<1x8x512xbf16> to vector<8x512xbf16>
    %108 = arith.extf %107 : vector<8x512xbf16> to vector<8x512xf32>
    %109 = vector.extract_strided_slice %108 {offsets = [0, 256], sizes = [8, 256], strides = [1, 1]} : vector<8x512xf32> to vector<8x256xf32>
    %c0_55 = arith.constant 0 : index
    %c0_56 = arith.constant 0 : index
    %110 = vector.load %arg6[%c0_55, %c0_56] : memref<8x64xf32, #tpu.memory_space<vmem>>, vector<8x64xf32>
    %111 = arith.truncf %110 : vector<8x64xf32> to vector<8x64xbf16>
    %cst_57 = arith.constant dense<0.000000e+00> : vector<8x256xf32>
    %112 = tpu.matmul %111, %11, %cst_57 {dimension_numbers = #tpu.dot_dimension_numbers<[1], [0], [0], [1], [0, 0, 1, 1], [], []>} : vector<8x64xbf16>, vector<64x256xbf16>, vector<8x256xf32> -> vector<8x256xf32>
    %113 = arith.addf %109, %112 : vector<8x256xf32>
    %c0_58 = arith.constant 0 : index
    %c0_59 = arith.constant 0 : index
    %114 = vector.load %arg5[%c0_58, %c0_59] : memref<8x64xf32, #tpu.memory_space<vmem>>, vector<8x64xf32>
    %115 = vector.extract_strided_slice %104 {offsets = [0, 0], sizes = [8, 64], strides = [1, 1]} : vector<8x256xf32> to vector<8x64xf32>
    %116 = arith.negf %115 : vector<8x64xf32>
    %117 = math.exp %116 : vector<8x64xf32>
    %cst_60 = arith.constant 1.000000e+00 : f32
    %118 = vector.broadcast %cst_60 : f32 to vector<8x64xf32>
    %119 = arith.addf %118, %117 : vector<8x64xf32>
    %120 = arith.divf %118, %119 : vector<8x64xf32>
    %121 = vector.extract_strided_slice %104 {offsets = [0, 64], sizes = [8, 64], strides = [1, 1]} : vector<8x256xf32> to vector<8x64xf32>
    %122 = arith.negf %121 : vector<8x64xf32>
    %123 = math.exp %122 : vector<8x64xf32>
    %cst_61 = arith.constant 1.000000e+00 : f32
    %124 = vector.broadcast %cst_61 : f32 to vector<8x64xf32>
    %125 = arith.addf %124, %123 : vector<8x64xf32>
    %126 = arith.divf %124, %125 : vector<8x64xf32>
    %127 = vector.extract_strided_slice %104 {offsets = [0, 128], sizes = [8, 64], strides = [1, 1]} : vector<8x256xf32> to vector<8x64xf32>
    %128 = math.tanh %127 : vector<8x64xf32>
    %129 = vector.extract_strided_slice %104 {offsets = [0, 192], sizes = [8, 64], strides = [1, 1]} : vector<8x256xf32> to vector<8x64xf32>
    %130 = arith.negf %129 : vector<8x64xf32>
    %131 = math.exp %130 : vector<8x64xf32>
    %cst_62 = arith.constant 1.000000e+00 : f32
    %132 = vector.broadcast %cst_62 : f32 to vector<8x64xf32>
    %133 = arith.addf %132, %131 : vector<8x64xf32>
    %134 = arith.divf %132, %133 : vector<8x64xf32>
    %135 = arith.mulf %126, %114 : vector<8x64xf32>
    %136 = arith.mulf %120, %128 : vector<8x64xf32>
    %137 = arith.addf %135, %136 : vector<8x64xf32>
    %138 = math.tanh %137 : vector<8x64xf32>
    %139 = arith.mulf %134, %138 : vector<8x64xf32>
    %c0_63 = arith.constant 0 : index
    %c0_64 = arith.constant 0 : index
    %140 = vector.load %arg7[%c0_63, %c0_64] : memref<8x64xf32, #tpu.memory_space<vmem>>, vector<8x64xf32>
    %141 = vector.extract_strided_slice %113 {offsets = [0, 0], sizes = [8, 64], strides = [1, 1]} : vector<8x256xf32> to vector<8x64xf32>
    %142 = arith.negf %141 : vector<8x64xf32>
    %143 = math.exp %142 : vector<8x64xf32>
    %cst_65 = arith.constant 1.000000e+00 : f32
    %144 = vector.broadcast %cst_65 : f32 to vector<8x64xf32>
    %145 = arith.addf %144, %143 : vector<8x64xf32>
    %146 = arith.divf %144, %145 : vector<8x64xf32>
    %147 = vector.extract_strided_slice %113 {offsets = [0, 64], sizes = [8, 64], strides = [1, 1]} : vector<8x256xf32> to vector<8x64xf32>
    %148 = arith.negf %147 : vector<8x64xf32>
    %149 = math.exp %148 : vector<8x64xf32>
    %cst_66 = arith.constant 1.000000e+00 : f32
    %150 = vector.broadcast %cst_66 : f32 to vector<8x64xf32>
    %151 = arith.addf %150, %149 : vector<8x64xf32>
    %152 = arith.divf %150, %151 : vector<8x64xf32>
    %153 = vector.extract_strided_slice %113 {offsets = [0, 128], sizes = [8, 64], strides = [1, 1]} : vector<8x256xf32> to vector<8x64xf32>
    %154 = math.tanh %153 : vector<8x64xf32>
    %155 = vector.extract_strided_slice %113 {offsets = [0, 192], sizes = [8, 64], strides = [1, 1]} : vector<8x256xf32> to vector<8x64xf32>
    %156 = arith.negf %155 : vector<8x64xf32>
    %157 = math.exp %156 : vector<8x64xf32>
    %cst_67 = arith.constant 1.000000e+00 : f32
    %158 = vector.broadcast %cst_67 : f32 to vector<8x64xf32>
    %159 = arith.addf %158, %157 : vector<8x64xf32>
    %160 = arith.divf %158, %159 : vector<8x64xf32>
    %161 = arith.mulf %152, %140 : vector<8x64xf32>
    %162 = arith.mulf %146, %154 : vector<8x64xf32>
    %163 = arith.addf %161, %162 : vector<8x64xf32>
    %164 = math.tanh %163 : vector<8x64xf32>
    %165 = arith.mulf %160, %164 : vector<8x64xf32>
    %c0_68 = arith.constant 0 : index
    %c0_69 = arith.constant 0 : index
    %166 = vector.load %arg4[%c0_68, %c0_69] : memref<8x64xf32, #tpu.memory_space<vmem>>, vector<8x64xf32>
    tpu.vector_store %arg4[%c0_68, %c0_69], %139 {strides = array<i32>} : memref<8x64xf32, #tpu.memory_space<vmem>>, vector<8x64xf32>,
    %c0_70 = arith.constant 0 : index
    %c0_71 = arith.constant 0 : index
    %167 = vector.load %arg5[%c0_70, %c0_71] : memref<8x64xf32, #tpu.memory_space<vmem>>, vector<8x64xf32>
    tpu.vector_store %arg5[%c0_70, %c0_71], %137 {strides = array<i32>} : memref<8x64xf32, #tpu.memory_space<vmem>>, vector<8x64xf32>,
    %c0_72 = arith.constant 0 : index
    %c0_73 = arith.constant 0 : index
    %168 = vector.load %arg6[%c0_72, %c0_73] : memref<8x64xf32, #tpu.memory_space<vmem>>, vector<8x64xf32>
    tpu.vector_store %arg6[%c0_72, %c0_73], %165 {strides = array<i32>} : memref<8x64xf32, #tpu.memory_space<vmem>>, vector<8x64xf32>,
    %c0_74 = arith.constant 0 : index
    %c0_75 = arith.constant 0 : index
    %169 = vector.load %arg7[%c0_74, %c0_75] : memref<8x64xf32, #tpu.memory_space<vmem>>, vector<8x64xf32>
    tpu.vector_store %arg7[%c0_74, %c0_75], %163 {strides = array<i32>} : memref<8x64xf32, #tpu.memory_space<vmem>>, vector<8x64xf32>,
    %170 = arith.index_cast %c1_i32 : i32 to index
    %c0_76 = arith.constant 0 : index
    %c0_77 = arith.constant 0 : index
    %171 = vector.load %arg8[%170, %c0_76, %c0_77] : memref<4x8x64xf32, #tpu.memory_space<vmem>>, vector<1x8x64xf32>
    %172 = vector.shape_cast %171 : vector<1x8x64xf32> to vector<8x64xf32>
    %173 = vector.shape_cast %139 : vector<8x64xf32> to vector<1x8x64xf32>
    tpu.vector_store %arg8[%170, %c0_76, %c0_77], %173 {strides = array<i32>} : memref<4x8x64xf32, #tpu.memory_space<vmem>>, vector<1x8x64xf32>,
    %174 = arith.index_cast %95 : i32 to index
    %c0_78 = arith.constant 0 : index
    %c0_79 = arith.constant 0 : index
    %175 = vector.load %arg9[%174, %c0_78, %c0_79] : memref<4x8x64xf32, #tpu.memory_space<vmem>>, vector<1x8x64xf32>
    %176 = vector.shape_cast %175 : vector<1x8x64xf32> to vector<8x64xf32>
    %177 = vector.shape_cast %165 : vector<8x64xf32> to vector<1x8x64xf32>
    tpu.vector_store %arg9[%174, %c0_78, %c0_79], %177 {strides = array<i32>} : memref<4x8x64xf32, #tpu.memory_space<vmem>>, vector<1x8x64xf32>,
    %c2_i32 = arith.constant 2 : i32
    %c3_i32_80 = arith.constant 3 : i32
    %178 = arith.subi %c3_i32_80, %c2_i32 : i32
    %179 = arith.index_cast %c2_i32 : i32 to index
    %c0_81 = arith.constant 0 : index
    %c0_82 = arith.constant 0 : index
    %180 = vector.load %arg1[%179, %c0_81, %c0_82] : memref<4x8x512xbf16, #tpu.memory_space<vmem>>, vector<1x8x512xbf16>
    %181 = vector.shape_cast %180 : vector<1x8x512xbf16> to vector<8x512xbf16>
    %182 = arith.extf %181 : vector<8x512xbf16> to vector<8x512xf32>
    %183 = vector.extract_strided_slice %182 {offsets = [0, 0], sizes = [8, 256], strides = [1, 1]} : vector<8x512xf32> to vector<8x256xf32>
    %c0_83 = arith.constant 0 : index
    %c0_84 = arith.constant 0 : index
    %184 = vector.load %arg4[%c0_83, %c0_84] : memref<8x64xf32, #tpu.memory_space<vmem>>, vector<8x64xf32>
    %185 = arith.truncf %184 : vector<8x64xf32> to vector<8x64xbf16>
    %cst_85 = arith.constant dense<0.000000e+00> : vector<8x256xf32>
    %186 = tpu.matmul %185, %9, %cst_85 {dimension_numbers = #tpu.dot_dimension_numbers<[1], [0], [0], [1], [0, 0, 1, 1], [], []>} : vector<8x64xbf16>, vector<64x256xbf16>, vector<8x256xf32> -> vector<8x256xf32>
    %187 = arith.addf %183, %186 : vector<8x256xf32>
    %188 = arith.index_cast %178 : i32 to index
    %c0_86 = arith.constant 0 : index
    %c0_87 = arith.constant 0 : index
    %189 = vector.load %arg1[%188, %c0_86, %c0_87] : memref<4x8x512xbf16, #tpu.memory_space<vmem>>, vector<1x8x512xbf16>
    %190 = vector.shape_cast %189 : vector<1x8x512xbf16> to vector<8x512xbf16>
    %191 = arith.extf %190 : vector<8x512xbf16> to vector<8x512xf32>
    %192 = vector.extract_strided_slice %191 {offsets = [0, 256], sizes = [8, 256], strides = [1, 1]} : vector<8x512xf32> to vector<8x256xf32>
    %c0_88 = arith.constant 0 : index
    %c0_89 = arith.constant 0 : index
    %193 = vector.load %arg6[%c0_88, %c0_89] : memref<8x64xf32, #tpu.memory_space<vmem>>, vector<8x64xf32>
    %194 = arith.truncf %193 : vector<8x64xf32> to vector<8x64xbf16>
    %cst_90 = arith.constant dense<0.000000e+00> : vector<8x256xf32>
    %195 = tpu.matmul %194, %11, %cst_90 {dimension_numbers = #tpu.dot_dimension_numbers<[1], [0], [0], [1], [0, 0, 1, 1], [], []>} : vector<8x64xbf16>, vector<64x256xbf16>, vector<8x256xf32> -> vector<8x256xf32>
    %196 = arith.addf %192, %195 : vector<8x256xf32>
    %c0_91 = arith.constant 0 : index
    %c0_92 = arith.constant 0 : index
    %197 = vector.load %arg5[%c0_91, %c0_92] : memref<8x64xf32, #tpu.memory_space<vmem>>, vector<8x64xf32>
    %198 = vector.extract_strided_slice %187 {offsets = [0, 0], sizes = [8, 64], strides = [1, 1]} : vector<8x256xf32> to vector<8x64xf32>
    %199 = arith.negf %198 : vector<8x64xf32>
    %200 = math.exp %199 : vector<8x64xf32>
    %cst_93 = arith.constant 1.000000e+00 : f32
    %201 = vector.broadcast %cst_93 : f32 to vector<8x64xf32>
    %202 = arith.addf %201, %200 : vector<8x64xf32>
    %203 = arith.divf %201, %202 : vector<8x64xf32>
    %204 = vector.extract_strided_slice %187 {offsets = [0, 64], sizes = [8, 64], strides = [1, 1]} : vector<8x256xf32> to vector<8x64xf32>
    %205 = arith.negf %204 : vector<8x64xf32>
    %206 = math.exp %205 : vector<8x64xf32>
    %cst_94 = arith.constant 1.000000e+00 : f32
    %207 = vector.broadcast %cst_94 : f32 to vector<8x64xf32>
    %208 = arith.addf %207, %206 : vector<8x64xf32>
    %209 = arith.divf %207, %208 : vector<8x64xf32>
    %210 = vector.extract_strided_slice %187 {offsets = [0, 128], sizes = [8, 64], strides = [1, 1]} : vector<8x256xf32> to vector<8x64xf32>
    %211 = math.tanh %210 : vector<8x64xf32>
    %212 = vector.extract_strided_slice %187 {offsets = [0, 192], sizes = [8, 64], strides = [1, 1]} : vector<8x256xf32> to vector<8x64xf32>
    %213 = arith.negf %212 : vector<8x64xf32>
    %214 = math.exp %213 : vector<8x64xf32>
    %cst_95 = arith.constant 1.000000e+00 : f32
    %215 = vector.broadcast %cst_95 : f32 to vector<8x64xf32>
    %216 = arith.addf %215, %214 : vector<8x64xf32>
    %217 = arith.divf %215, %216 : vector<8x64xf32>
    %218 = arith.mulf %209, %197 : vector<8x64xf32>
    %219 = arith.mulf %203, %211 : vector<8x64xf32>
    %220 = arith.addf %218, %219 : vector<8x64xf32>
    %221 = math.tanh %220 : vector<8x64xf32>
    %222 = arith.mulf %217, %221 : vector<8x64xf32>
    %c0_96 = arith.constant 0 : index
    %c0_97 = arith.constant 0 : index
    %223 = vector.load %arg7[%c0_96, %c0_97] : memref<8x64xf32, #tpu.memory_space<vmem>>, vector<8x64xf32>
    %224 = vector.extract_strided_slice %196 {offsets = [0, 0], sizes = [8, 64], strides = [1, 1]} : vector<8x256xf32> to vector<8x64xf32>
    %225 = arith.negf %224 : vector<8x64xf32>
    %226 = math.exp %225 : vector<8x64xf32>
    %cst_98 = arith.constant 1.000000e+00 : f32
    %227 = vector.broadcast %cst_98 : f32 to vector<8x64xf32>
    %228 = arith.addf %227, %226 : vector<8x64xf32>
    %229 = arith.divf %227, %228 : vector<8x64xf32>
    %230 = vector.extract_strided_slice %196 {offsets = [0, 64], sizes = [8, 64], strides = [1, 1]} : vector<8x256xf32> to vector<8x64xf32>
    %231 = arith.negf %230 : vector<8x64xf32>
    %232 = math.exp %231 : vector<8x64xf32>
    %cst_99 = arith.constant 1.000000e+00 : f32
    %233 = vector.broadcast %cst_99 : f32 to vector<8x64xf32>
    %234 = arith.addf %233, %232 : vector<8x64xf32>
    %235 = arith.divf %233, %234 : vector<8x64xf32>
    %236 = vector.extract_strided_slice %196 {offsets = [0, 128], sizes = [8, 64], strides = [1, 1]} : vector<8x256xf32> to vector<8x64xf32>
    %237 = math.tanh %236 : vector<8x64xf32>
    %238 = vector.extract_strided_slice %196 {offsets = [0, 192], sizes = [8, 64], strides = [1, 1]} : vector<8x256xf32> to vector<8x64xf32>
    %239 = arith.negf %238 : vector<8x64xf32>
    %240 = math.exp %239 : vector<8x64xf32>
    %cst_100 = arith.constant 1.000000e+00 : f32
    %241 = vector.broadcast %cst_100 : f32 to vector<8x64xf32>
    %242 = arith.addf %241, %240 : vector<8x64xf32>
    %243 = arith.divf %241, %242 : vector<8x64xf32>
    %244 = arith.mulf %235, %223 : vector<8x64xf32>
    %245 = arith.mulf %229, %237 : vector<8x64xf32>
    %246 = arith.addf %244, %245 : vector<8x64xf32>
    %247 = math.tanh %246 : vector<8x64xf32>
    %248 = arith.mulf %243, %247 : vector<8x64xf32>
    %c0_101 = arith.constant 0 : index
    %c0_102 = arith.constant 0 : index
    %249 = vector.load %arg4[%c0_101, %c0_102] : memref<8x64xf32, #tpu.memory_space<vmem>>, vector<8x64xf32>
    tpu.vector_store %arg4[%c0_101, %c0_102], %222 {strides = array<i32>} : memref<8x64xf32, #tpu.memory_space<vmem>>, vector<8x64xf32>,
    %c0_103 = arith.constant 0 : index
    %c0_104 = arith.constant 0 : index
    %250 = vector.load %arg5[%c0_103, %c0_104] : memref<8x64xf32, #tpu.memory_space<vmem>>, vector<8x64xf32>
    tpu.vector_store %arg5[%c0_103, %c0_104], %220 {strides = array<i32>} : memref<8x64xf32, #tpu.memory_space<vmem>>, vector<8x64xf32>,
    %c0_105 = arith.constant 0 : index
    %c0_106 = arith.constant 0 : index
    %251 = vector.load %arg6[%c0_105, %c0_106] : memref<8x64xf32, #tpu.memory_space<vmem>>, vector<8x64xf32>
    tpu.vector_store %arg6[%c0_105, %c0_106], %248 {strides = array<i32>} : memref<8x64xf32, #tpu.memory_space<vmem>>, vector<8x64xf32>,
    %c0_107 = arith.constant 0 : index
    %c0_108 = arith.constant 0 : index
    %252 = vector.load %arg7[%c0_107, %c0_108] : memref<8x64xf32, #tpu.memory_space<vmem>>, vector<8x64xf32>
    tpu.vector_store %arg7[%c0_107, %c0_108], %246 {strides = array<i32>} : memref<8x64xf32, #tpu.memory_space<vmem>>, vector<8x64xf32>,
    %253 = arith.index_cast %c2_i32 : i32 to index
    %c0_109 = arith.constant 0 : index
    %c0_110 = arith.constant 0 : index
    %254 = vector.load %arg8[%253, %c0_109, %c0_110] : memref<4x8x64xf32, #tpu.memory_space<vmem>>, vector<1x8x64xf32>
    %255 = vector.shape_cast %254 : vector<1x8x64xf32> to vector<8x64xf32>
    %256 = vector.shape_cast %222 : vector<8x64xf32> to vector<1x8x64xf32>
    tpu.vector_store %arg8[%253, %c0_109, %c0_110], %256 {strides = array<i32>} : memref<4x8x64xf32, #tpu.memory_space<vmem>>, vector<1x8x64xf32>,
    %257 = arith.index_cast %178 : i32 to index
    %c0_111 = arith.constant 0 : index
    %c0_112 = arith.constant 0 : index
    %258 = vector.load %arg9[%257, %c0_111, %c0_112] : memref<4x8x64xf32, #tpu.memory_space<vmem>>, vector<1x8x64xf32>
    %259 = vector.shape_cast %258 : vector<1x8x64xf32> to vector<8x64xf32>
    %260 = vector.shape_cast %248 : vector<8x64xf32> to vector<1x8x64xf32>
    tpu.vector_store %arg9[%257, %c0_111, %c0_112], %260 {strides = array<i32>} : memref<4x8x64xf32, #tpu.memory_space<vmem>>, vector<1x8x64xf32>,
    %c3_i32_113 = arith.constant 3 : i32
    %c3_i32_114 = arith.constant 3 : i32
    %261 = arith.subi %c3_i32_114, %c3_i32_113 : i32
    %262 = arith.index_cast %c3_i32_113 : i32 to index
    %c0_115 = arith.constant 0 : index
    %c0_116 = arith.constant 0 : index
    %263 = vector.load %arg1[%262, %c0_115, %c0_116] : memref<4x8x512xbf16, #tpu.memory_space<vmem>>, vector<1x8x512xbf16>
    %264 = vector.shape_cast %263 : vector<1x8x512xbf16> to vector<8x512xbf16>
    %265 = arith.extf %264 : vector<8x512xbf16> to vector<8x512xf32>
    %266 = vector.extract_strided_slice %265 {offsets = [0, 0], sizes = [8, 256], strides = [1, 1]} : vector<8x512xf32> to vector<8x256xf32>
    %c0_117 = arith.constant 0 : index
    %c0_118 = arith.constant 0 : index
    %267 = vector.load %arg4[%c0_117, %c0_118] : memref<8x64xf32, #tpu.memory_space<vmem>>, vector<8x64xf32>
    %268 = arith.truncf %267 : vector<8x64xf32> to vector<8x64xbf16>
    %cst_119 = arith.constant dense<0.000000e+00> : vector<8x256xf32>
    %269 = tpu.matmul %268, %9, %cst_119 {dimension_numbers = #tpu.dot_dimension_numbers<[1], [0], [0], [1], [0, 0, 1, 1], [], []>} : vector<8x64xbf16>, vector<64x256xbf16>, vector<8x256xf32> -> vector<8x256xf32>
    %270 = arith.addf %266, %269 : vector<8x256xf32>
    %271 = arith.index_cast %261 : i32 to index
    %c0_120 = arith.constant 0 : index
    %c0_121 = arith.constant 0 : index
    %272 = vector.load %arg1[%271, %c0_120, %c0_121] : memref<4x8x512xbf16, #tpu.memory_space<vmem>>, vector<1x8x512xbf16>
    %273 = vector.shape_cast %272 : vector<1x8x512xbf16> to vector<8x512xbf16>
    %274 = arith.extf %273 : vector<8x512xbf16> to vector<8x512xf32>
    %275 = vector.extract_strided_slice %274 {offsets = [0, 256], sizes = [8, 256], strides = [1, 1]} : vector<8x512xf32> to vector<8x256xf32>
    %c0_122 = arith.constant 0 : index
    %c0_123 = arith.constant 0 : index
    %276 = vector.load %arg6[%c0_122, %c0_123] : memref<8x64xf32, #tpu.memory_space<vmem>>, vector<8x64xf32>
    %277 = arith.truncf %276 : vector<8x64xf32> to vector<8x64xbf16>
    %cst_124 = arith.constant dense<0.000000e+00> : vector<8x256xf32>
    %278 = tpu.matmul %277, %11, %cst_124 {dimension_numbers = #tpu.dot_dimension_numbers<[1], [0], [0], [1], [0, 0, 1, 1], [], []>} : vector<8x64xbf16>, vector<64x256xbf16>, vector<8x256xf32> -> vector<8x256xf32>
    %279 = arith.addf %275, %278 : vector<8x256xf32>
    %c0_125 = arith.constant 0 : index
    %c0_126 = arith.constant 0 : index
    %280 = vector.load %arg5[%c0_125, %c0_126] : memref<8x64xf32, #tpu.memory_space<vmem>>, vector<8x64xf32>
    %281 = vector.extract_strided_slice %270 {offsets = [0, 0], sizes = [8, 64], strides = [1, 1]} : vector<8x256xf32> to vector<8x64xf32>
    %282 = arith.negf %281 : vector<8x64xf32>
    %283 = math.exp %282 : vector<8x64xf32>
    %cst_127 = arith.constant 1.000000e+00 : f32
    %284 = vector.broadcast %cst_127 : f32 to vector<8x64xf32>
    %285 = arith.addf %284, %283 : vector<8x64xf32>
    %286 = arith.divf %284, %285 : vector<8x64xf32>
    %287 = vector.extract_strided_slice %270 {offsets = [0, 64], sizes = [8, 64], strides = [1, 1]} : vector<8x256xf32> to vector<8x64xf32>
    %288 = arith.negf %287 : vector<8x64xf32>
    %289 = math.exp %288 : vector<8x64xf32>
    %cst_128 = arith.constant 1.000000e+00 : f32
    %290 = vector.broadcast %cst_128 : f32 to vector<8x64xf32>
    %291 = arith.addf %290, %289 : vector<8x64xf32>
    %292 = arith.divf %290, %291 : vector<8x64xf32>
    %293 = vector.extract_strided_slice %270 {offsets = [0, 128], sizes = [8, 64], strides = [1, 1]} : vector<8x256xf32> to vector<8x64xf32>
    %294 = math.tanh %293 : vector<8x64xf32>
    %295 = vector.extract_strided_slice %270 {offsets = [0, 192], sizes = [8, 64], strides = [1, 1]} : vector<8x256xf32> to vector<8x64xf32>
    %296 = arith.negf %295 : vector<8x64xf32>
    %297 = math.exp %296 : vector<8x64xf32>
    %cst_129 = arith.constant 1.000000e+00 : f32
    %298 = vector.broadcast %cst_129 : f32 to vector<8x64xf32>
    %299 = arith.addf %298, %297 : vector<8x64xf32>
    %300 = arith.divf %298, %299 : vector<8x64xf32>
    %301 = arith.mulf %292, %280 : vector<8x64xf32>
    %302 = arith.mulf %286, %294 : vector<8x64xf32>
    %303 = arith.addf %301, %302 : vector<8x64xf32>
    %304 = math.tanh %303 : vector<8x64xf32>
    %305 = arith.mulf %300, %304 : vector<8x64xf32>
    %c0_130 = arith.constant 0 : index
    %c0_131 = arith.constant 0 : index
    %306 = vector.load %arg7[%c0_130, %c0_131] : memref<8x64xf32, #tpu.memory_space<vmem>>, vector<8x64xf32>
    %307 = vector.extract_strided_slice %279 {offsets = [0, 0], sizes = [8, 64], strides = [1, 1]} : vector<8x256xf32> to vector<8x64xf32>
    %308 = arith.negf %307 : vector<8x64xf32>
    %309 = math.exp %308 : vector<8x64xf32>
    %cst_132 = arith.constant 1.000000e+00 : f32
    %310 = vector.broadcast %cst_132 : f32 to vector<8x64xf32>
    %311 = arith.addf %310, %309 : vector<8x64xf32>
    %312 = arith.divf %310, %311 : vector<8x64xf32>
    %313 = vector.extract_strided_slice %279 {offsets = [0, 64], sizes = [8, 64], strides = [1, 1]} : vector<8x256xf32> to vector<8x64xf32>
    %314 = arith.negf %313 : vector<8x64xf32>
    %315 = math.exp %314 : vector<8x64xf32>
    %cst_133 = arith.constant 1.000000e+00 : f32
    %316 = vector.broadcast %cst_133 : f32 to vector<8x64xf32>
    %317 = arith.addf %316, %315 : vector<8x64xf32>
    %318 = arith.divf %316, %317 : vector<8x64xf32>
    %319 = vector.extract_strided_slice %279 {offsets = [0, 128], sizes = [8, 64], strides = [1, 1]} : vector<8x256xf32> to vector<8x64xf32>
    %320 = math.tanh %319 : vector<8x64xf32>
    %321 = vector.extract_strided_slice %279 {offsets = [0, 192], sizes = [8, 64], strides = [1, 1]} : vector<8x256xf32> to vector<8x64xf32>
    %322 = arith.negf %321 : vector<8x64xf32>
    %323 = math.exp %322 : vector<8x64xf32>
    %cst_134 = arith.constant 1.000000e+00 : f32
    %324 = vector.broadcast %cst_134 : f32 to vector<8x64xf32>
    %325 = arith.addf %324, %323 : vector<8x64xf32>
    %326 = arith.divf %324, %325 : vector<8x64xf32>
    %327 = arith.mulf %318, %306 : vector<8x64xf32>
    %328 = arith.mulf %312, %320 : vector<8x64xf32>
    %329 = arith.addf %327, %328 : vector<8x64xf32>
    %330 = math.tanh %329 : vector<8x64xf32>
    %331 = arith.mulf %326, %330 : vector<8x64xf32>
    %c0_135 = arith.constant 0 : index
    %c0_136 = arith.constant 0 : index
    %332 = vector.load %arg4[%c0_135, %c0_136] : memref<8x64xf32, #tpu.memory_space<vmem>>, vector<8x64xf32>
    tpu.vector_store %arg4[%c0_135, %c0_136], %305 {strides = array<i32>} : memref<8x64xf32, #tpu.memory_space<vmem>>, vector<8x64xf32>,
    %c0_137 = arith.constant 0 : index
    %c0_138 = arith.constant 0 : index
    %333 = vector.load %arg5[%c0_137, %c0_138] : memref<8x64xf32, #tpu.memory_space<vmem>>, vector<8x64xf32>
    tpu.vector_store %arg5[%c0_137, %c0_138], %303 {strides = array<i32>} : memref<8x64xf32, #tpu.memory_space<vmem>>, vector<8x64xf32>,
    %c0_139 = arith.constant 0 : index
    %c0_140 = arith.constant 0 : index
    %334 = vector.load %arg6[%c0_139, %c0_140] : memref<8x64xf32, #tpu.memory_space<vmem>>, vector<8x64xf32>
    tpu.vector_store %arg6[%c0_139, %c0_140], %331 {strides = array<i32>} : memref<8x64xf32, #tpu.memory_space<vmem>>, vector<8x64xf32>,
    %c0_141 = arith.constant 0 : index
    %c0_142 = arith.constant 0 : index
    %335 = vector.load %arg7[%c0_141, %c0_142] : memref<8x64xf32, #tpu.memory_space<vmem>>, vector<8x64xf32>
    tpu.vector_store %arg7[%c0_141, %c0_142], %329 {strides = array<i32>} : memref<8x64xf32, #tpu.memory_space<vmem>>, vector<8x64xf32>,
    %336 = arith.index_cast %c3_i32_113 : i32 to index
    %c0_143 = arith.constant 0 : index
    %c0_144 = arith.constant 0 : index
    %337 = vector.load %arg8[%336, %c0_143, %c0_144] : memref<4x8x64xf32, #tpu.memory_space<vmem>>, vector<1x8x64xf32>
    %338 = vector.shape_cast %337 : vector<1x8x64xf32> to vector<8x64xf32>
    %339 = vector.shape_cast %305 : vector<8x64xf32> to vector<1x8x64xf32>
    tpu.vector_store %arg8[%336, %c0_143, %c0_144], %339 {strides = array<i32>} : memref<4x8x64xf32, #tpu.memory_space<vmem>>, vector<1x8x64xf32>,
    %340 = arith.index_cast %261 : i32 to index
    %c0_145 = arith.constant 0 : index
    %c0_146 = arith.constant 0 : index
    %341 = vector.load %arg9[%340, %c0_145, %c0_146] : memref<4x8x64xf32, #tpu.memory_space<vmem>>, vector<1x8x64xf32>
    %342 = vector.shape_cast %341 : vector<1x8x64xf32> to vector<8x64xf32>
    %343 = vector.shape_cast %331 : vector<8x64xf32> to vector<1x8x64xf32>
    tpu.vector_store %arg9[%340, %c0_145, %c0_146], %343 {strides = array<i32>} : memref<4x8x64xf32, #tpu.memory_space<vmem>>, vector<1x8x64xf32>,
    %c4_i32 = arith.constant 4 : i32
    %c0_147 = arith.constant 0 : index
    %c0_148 = arith.constant 0 : index
    %c0_149 = arith.constant 0 : index
    %344 = vector.load %arg8[%c0_147, %c0_148, %c0_149] : memref<4x8x64xf32, #tpu.memory_space<vmem>>, vector<4x8x64xf32>
    %c0_150 = arith.constant 0 : index
    %c0_151 = arith.constant 0 : index
    %c0_152 = arith.constant 0 : index
    %345 = vector.load %arg9[%c0_150, %c0_151, %c0_152] : memref<4x8x64xf32, #tpu.memory_space<vmem>>, vector<4x8x64xf32>
    %346 = tpu.concatenate %344, %345 in 2 : vector<4x8x64xf32>, vector<4x8x64xf32> -> vector<4x8x128xf32>
    %347 = arith.truncf %346 : vector<4x8x128xf32> to vector<4x8x128xbf16>
    %c0_153 = arith.constant 0 : index
    %c0_154 = arith.constant 0 : index
    %c0_155 = arith.constant 0 : index
    %348 = vector.load %arg3[%c0_153, %c0_154, %c0_155] : memref<4x8x128xbf16, #tpu.memory_space<vmem>>, vector<4x8x128xbf16>
    tpu.vector_store %arg3[%c0_153, %c0_154, %c0_155], %347 {strides = array<i32>} : memref<4x8x128xbf16, #tpu.memory_space<vmem>>, vector<4x8x128xbf16>,
    return
  }
  func.func @transform_0(%arg0: i32) -> (i32, i32, i32) {
    %c0_i32 = arith.constant 0 : i32
    %c0_i32_0 = arith.constant 0 : i32
    %c0_i32_1 = arith.constant 0 : i32
    %c0_i32_2 = arith.constant 0 : i32
    return %c0_i32, %c0_i32_0, %c0_i32_1 : i32, i32, i32
  }
  func.func @transform_1(%arg0: i32) -> (i32, i32, i32) {
    %c0_i32 = arith.constant 0 : i32
    %c0_i32_0 = arith.constant 0 : i32
    %c0_i32_1 = arith.constant 0 : i32
    %c0_i32_2 = arith.constant 0 : i32
    return %c0_i32, %c0_i32_0, %c0_i32_1 : i32, i32, i32
  }
  func.func @transform_2(%arg0: i32) -> (i32, i32, i32) {
    %c0_i32 = arith.constant 0 : i32
    %c0_i32_0 = arith.constant 0 : i32
    %c0_i32_1 = arith.constant 0 : i32
    %c0_i32_2 = arith.constant 0 : i32
    return %c0_i32, %c0_i32_0, %c0_i32_1 : i32, i32, i32
  }
}

module attributes {stable_mosaic.version = 11 : i64} {
  func.func @_mm_bias_kernel(%arg0: i32, %arg1: memref<50x512xbf16, #tpu.memory_space<vmem>>, %arg2: memref<512x128xbf16, #tpu.memory_space<vmem>>, %arg3: memref<1x128xf32, #tpu.memory_space<vmem>>, %arg4: memref<50x128xbf16, #tpu.memory_space<vmem>>) attributes {dimension_semantics = [#tpu.dimension_semantics<parallel>], iteration_bounds = array<i64: 1>, scalar_prefetch = 0 : i64, scratch_operands = 0 : i64, tpu.core_type = #tpu.core_type<tc>, window_params = [{transform_indices = @transform_0, window_bounds = array<i64: 50, 512>}, {pipeline_mode = #tpu.pipeline_mode<synchronous>, transform_indices = @transform_1, window_bounds = array<i64: 512, 128>}, {pipeline_mode = #tpu.pipeline_mode<synchronous>, transform_indices = @transform_2, window_bounds = array<i64: 1, 128>}, {transform_indices = @transform_3, window_bounds = array<i64: 50, 128>}]} {
    %c0 = arith.constant 0 : index
    %c0_0 = arith.constant 0 : index
    %0 = vector.load %arg1[%c0, %c0_0] : memref<50x512xbf16, #tpu.memory_space<vmem>>, vector<50x512xbf16>
    %c0_1 = arith.constant 0 : index
    %c0_2 = arith.constant 0 : index
    %1 = vector.load %arg2[%c0_1, %c0_2] : memref<512x128xbf16, #tpu.memory_space<vmem>>, vector<512x128xbf16>
    %cst = arith.constant dense<0.000000e+00> : vector<50x128xf32>
    %2 = tpu.matmul %0, %1, %cst {dimension_numbers = #tpu.dot_dimension_numbers<[1], [0], [0], [1], [0, 0, 1, 1], [], []>} : vector<50x512xbf16>, vector<512x128xbf16>, vector<50x128xf32> -> vector<50x128xf32>
    %c0_3 = arith.constant 0 : index
    %c0_4 = arith.constant 0 : index
    %3 = vector.load %arg3[%c0_3, %c0_4] : memref<1x128xf32, #tpu.memory_space<vmem>>, vector<1x128xf32>
    %4 = vector.broadcast %3 : vector<1x128xf32> to vector<50x128xf32>
    %5 = arith.addf %2, %4 : vector<50x128xf32>
    %6 = arith.truncf %5 : vector<50x128xf32> to vector<50x128xbf16>
    %c0_5 = arith.constant 0 : index
    %c0_6 = arith.constant 0 : index
    %7 = vector.load %arg4[%c0_5, %c0_6] : memref<50x128xbf16, #tpu.memory_space<vmem>>, vector<50x128xbf16>
    tpu.vector_store %arg4[%c0_5, %c0_6], %6 {strides = array<i32>} : memref<50x128xbf16, #tpu.memory_space<vmem>>, vector<50x128xbf16>,
    return
  }
  func.func @transform_0(%arg0: i32) -> (i32, i32) {
    %c0_i32 = arith.constant 0 : i32
    %c0_i32_0 = arith.constant 0 : i32
    return %arg0, %c0_i32 : i32, i32
  }
  func.func @transform_1(%arg0: i32) -> (i32, i32) {
    %c0_i32 = arith.constant 0 : i32
    %c0_i32_0 = arith.constant 0 : i32
    %c0_i32_1 = arith.constant 0 : i32
    return %c0_i32, %c0_i32_0 : i32, i32
  }
  func.func @transform_2(%arg0: i32) -> (i32, i32) {
    %c0_i32 = arith.constant 0 : i32
    %c0_i32_0 = arith.constant 0 : i32
    %c0_i32_1 = arith.constant 0 : i32
    return %c0_i32, %c0_i32_0 : i32, i32
  }
  func.func @transform_3(%arg0: i32) -> (i32, i32) {
    %c0_i32 = arith.constant 0 : i32
    %c0_i32_0 = arith.constant 0 : i32
    return %arg0, %c0_i32 : i32, i32
  }
}

module attributes {stable_mosaic.version = 11 : i64} {
  func.func @_mm_bias_kernel(%arg0: i32, %arg1: memref<32x1152xbf16, #tpu.memory_space<vmem>>, %arg2: memref<1152x128xbf16, #tpu.memory_space<vmem>>, %arg3: memref<1x128xf32, #tpu.memory_space<vmem>>, %arg4: memref<32x128xbf16, #tpu.memory_space<vmem>>) attributes {dimension_semantics = [#tpu.dimension_semantics<parallel>], iteration_bounds = array<i64: 1>, scalar_prefetch = 0 : i64, scratch_operands = 0 : i64, tpu.core_type = #tpu.core_type<tc>, window_params = [{transform_indices = @transform_0, window_bounds = array<i64: 32, 1152>}, {pipeline_mode = #tpu.pipeline_mode<synchronous>, transform_indices = @transform_1, window_bounds = array<i64: 1152, 128>}, {pipeline_mode = #tpu.pipeline_mode<synchronous>, transform_indices = @transform_2, window_bounds = array<i64: 1, 128>}, {transform_indices = @transform_3, window_bounds = array<i64: 32, 128>}]} {
    %c0 = arith.constant 0 : index
    %c0_0 = arith.constant 0 : index
    %0 = vector.load %arg1[%c0, %c0_0] : memref<32x1152xbf16, #tpu.memory_space<vmem>>, vector<32x1152xbf16>
    %c0_1 = arith.constant 0 : index
    %c0_2 = arith.constant 0 : index
    %1 = vector.load %arg2[%c0_1, %c0_2] : memref<1152x128xbf16, #tpu.memory_space<vmem>>, vector<1152x128xbf16>
    %cst = arith.constant dense<0.000000e+00> : vector<32x128xf32>
    %2 = tpu.matmul %0, %1, %cst {dimension_numbers = #tpu.dot_dimension_numbers<[1], [0], [0], [1], [0, 0, 1, 1], [], []>} : vector<32x1152xbf16>, vector<1152x128xbf16>, vector<32x128xf32> -> vector<32x128xf32>
    %c0_3 = arith.constant 0 : index
    %c0_4 = arith.constant 0 : index
    %3 = vector.load %arg3[%c0_3, %c0_4] : memref<1x128xf32, #tpu.memory_space<vmem>>, vector<1x128xf32>
    %4 = vector.broadcast %3 : vector<1x128xf32> to vector<32x128xf32>
    %5 = arith.addf %2, %4 : vector<32x128xf32>
    %6 = arith.truncf %5 : vector<32x128xf32> to vector<32x128xbf16>
    %c0_5 = arith.constant 0 : index
    %c0_6 = arith.constant 0 : index
    %7 = vector.load %arg4[%c0_5, %c0_6] : memref<32x128xbf16, #tpu.memory_space<vmem>>, vector<32x128xbf16>
    tpu.vector_store %arg4[%c0_5, %c0_6], %6 {strides = array<i32>} : memref<32x128xbf16, #tpu.memory_space<vmem>>, vector<32x128xbf16>,
    return
  }
  func.func @transform_0(%arg0: i32) -> (i32, i32) {
    %c0_i32 = arith.constant 0 : i32
    %c0_i32_0 = arith.constant 0 : i32
    return %arg0, %c0_i32 : i32, i32
  }
  func.func @transform_1(%arg0: i32) -> (i32, i32) {
    %c0_i32 = arith.constant 0 : i32
    %c0_i32_0 = arith.constant 0 : i32
    %c0_i32_1 = arith.constant 0 : i32
    return %c0_i32, %c0_i32_0 : i32, i32
  }
  func.func @transform_2(%arg0: i32) -> (i32, i32) {
    %c0_i32 = arith.constant 0 : i32
    %c0_i32_0 = arith.constant 0 : i32
    %c0_i32_1 = arith.constant 0 : i32
    return %c0_i32, %c0_i32_0 : i32, i32
  }
  func.func @transform_3(%arg0: i32) -> (i32, i32) {
    %c0_i32 = arith.constant 0 : i32
    %c0_i32_0 = arith.constant 0 : i32
    return %arg0, %c0_i32 : i32, i32
  }
}

module attributes {stable_mosaic.version = 11 : i64} {
  func.func @_mm_bias_kernel(%arg0: i32, %arg1: memref<162x256xbf16, #tpu.memory_space<vmem>>, %arg2: memref<256x128xbf16, #tpu.memory_space<vmem>>, %arg3: memref<1x128xf32, #tpu.memory_space<vmem>>, %arg4: memref<162x128xbf16, #tpu.memory_space<vmem>>) attributes {dimension_semantics = [#tpu.dimension_semantics<parallel>], iteration_bounds = array<i64: 1>, scalar_prefetch = 0 : i64, scratch_operands = 0 : i64, tpu.core_type = #tpu.core_type<tc>, window_params = [{transform_indices = @transform_0, window_bounds = array<i64: 162, 256>}, {pipeline_mode = #tpu.pipeline_mode<synchronous>, transform_indices = @transform_1, window_bounds = array<i64: 256, 128>}, {pipeline_mode = #tpu.pipeline_mode<synchronous>, transform_indices = @transform_2, window_bounds = array<i64: 1, 128>}, {transform_indices = @transform_3, window_bounds = array<i64: 162, 128>}]} {
    %c0 = arith.constant 0 : index
    %c0_0 = arith.constant 0 : index
    %0 = vector.load %arg1[%c0, %c0_0] : memref<162x256xbf16, #tpu.memory_space<vmem>>, vector<162x256xbf16>
    %c0_1 = arith.constant 0 : index
    %c0_2 = arith.constant 0 : index
    %1 = vector.load %arg2[%c0_1, %c0_2] : memref<256x128xbf16, #tpu.memory_space<vmem>>, vector<256x128xbf16>
    %cst = arith.constant dense<0.000000e+00> : vector<162x128xf32>
    %2 = tpu.matmul %0, %1, %cst {dimension_numbers = #tpu.dot_dimension_numbers<[1], [0], [0], [1], [0, 0, 1, 1], [], []>} : vector<162x256xbf16>, vector<256x128xbf16>, vector<162x128xf32> -> vector<162x128xf32>
    %c0_3 = arith.constant 0 : index
    %c0_4 = arith.constant 0 : index
    %3 = vector.load %arg3[%c0_3, %c0_4] : memref<1x128xf32, #tpu.memory_space<vmem>>, vector<1x128xf32>
    %4 = vector.broadcast %3 : vector<1x128xf32> to vector<162x128xf32>
    %5 = arith.addf %2, %4 : vector<162x128xf32>
    %6 = arith.truncf %5 : vector<162x128xf32> to vector<162x128xbf16>
    %c0_5 = arith.constant 0 : index
    %c0_6 = arith.constant 0 : index
    %7 = vector.load %arg4[%c0_5, %c0_6] : memref<162x128xbf16, #tpu.memory_space<vmem>>, vector<162x128xbf16>
    tpu.vector_store %arg4[%c0_5, %c0_6], %6 {strides = array<i32>} : memref<162x128xbf16, #tpu.memory_space<vmem>>, vector<162x128xbf16>,
    return
  }
  func.func @transform_0(%arg0: i32) -> (i32, i32) {
    %c0_i32 = arith.constant 0 : i32
    %c0_i32_0 = arith.constant 0 : i32
    return %arg0, %c0_i32 : i32, i32
  }
  func.func @transform_1(%arg0: i32) -> (i32, i32) {
    %c0_i32 = arith.constant 0 : i32
    %c0_i32_0 = arith.constant 0 : i32
    %c0_i32_1 = arith.constant 0 : i32
    return %c0_i32, %c0_i32_0 : i32, i32
  }
  func.func @transform_2(%arg0: i32) -> (i32, i32) {
    %c0_i32 = arith.constant 0 : i32
    %c0_i32_0 = arith.constant 0 : i32
    %c0_i32_1 = arith.constant 0 : i32
    return %c0_i32, %c0_i32_0 : i32, i32
  }
  func.func @transform_3(%arg0: i32) -> (i32, i32) {
    %c0_i32 = arith.constant 0 : i32
    %c0_i32_0 = arith.constant 0 : i32
    return %arg0, %c0_i32 : i32, i32
  }
}

module attributes {stable_mosaic.version = 11 : i64} {
  func.func @_mm_bias_kernel(%arg0: i32, %arg1: memref<128x576xbf16, #tpu.memory_space<vmem>>, %arg2: memref<576x128xbf16, #tpu.memory_space<vmem>>, %arg3: memref<1x128xf32, #tpu.memory_space<vmem>>, %arg4: memref<128x128xbf16, #tpu.memory_space<vmem>>) attributes {dimension_semantics = [#tpu.dimension_semantics<parallel>], iteration_bounds = array<i64: 1>, scalar_prefetch = 0 : i64, scratch_operands = 0 : i64, tpu.core_type = #tpu.core_type<tc>, window_params = [{transform_indices = @transform_0, window_bounds = array<i64: 128, 576>}, {pipeline_mode = #tpu.pipeline_mode<synchronous>, transform_indices = @transform_1, window_bounds = array<i64: 576, 128>}, {pipeline_mode = #tpu.pipeline_mode<synchronous>, transform_indices = @transform_2, window_bounds = array<i64: 1, 128>}, {transform_indices = @transform_3, window_bounds = array<i64: 128, 128>}]} {
    %c0 = arith.constant 0 : index
    %c0_0 = arith.constant 0 : index
    %0 = vector.load %arg1[%c0, %c0_0] : memref<128x576xbf16, #tpu.memory_space<vmem>>, vector<128x576xbf16>
    %c0_1 = arith.constant 0 : index
    %c0_2 = arith.constant 0 : index
    %1 = vector.load %arg2[%c0_1, %c0_2] : memref<576x128xbf16, #tpu.memory_space<vmem>>, vector<576x128xbf16>
    %cst = arith.constant dense<0.000000e+00> : vector<128x128xf32>
    %2 = tpu.matmul %0, %1, %cst {dimension_numbers = #tpu.dot_dimension_numbers<[1], [0], [0], [1], [0, 0, 1, 1], [], []>} : vector<128x576xbf16>, vector<576x128xbf16>, vector<128x128xf32> -> vector<128x128xf32>
    %c0_3 = arith.constant 0 : index
    %c0_4 = arith.constant 0 : index
    %3 = vector.load %arg3[%c0_3, %c0_4] : memref<1x128xf32, #tpu.memory_space<vmem>>, vector<1x128xf32>
    %4 = vector.broadcast %3 : vector<1x128xf32> to vector<128x128xf32>
    %5 = arith.addf %2, %4 : vector<128x128xf32>
    %6 = arith.truncf %5 : vector<128x128xf32> to vector<128x128xbf16>
    %c0_5 = arith.constant 0 : index
    %c0_6 = arith.constant 0 : index
    %7 = vector.load %arg4[%c0_5, %c0_6] : memref<128x128xbf16, #tpu.memory_space<vmem>>, vector<128x128xbf16>
    tpu.vector_store %arg4[%c0_5, %c0_6], %6 {strides = array<i32>} : memref<128x128xbf16, #tpu.memory_space<vmem>>, vector<128x128xbf16>,
    return
  }
  func.func @transform_0(%arg0: i32) -> (i32, i32) {
    %c0_i32 = arith.constant 0 : i32
    %c0_i32_0 = arith.constant 0 : i32
    return %arg0, %c0_i32 : i32, i32
  }
  func.func @transform_1(%arg0: i32) -> (i32, i32) {
    %c0_i32 = arith.constant 0 : i32
    %c0_i32_0 = arith.constant 0 : i32
    %c0_i32_1 = arith.constant 0 : i32
    return %c0_i32, %c0_i32_0 : i32, i32
  }
  func.func @transform_2(%arg0: i32) -> (i32, i32) {
    %c0_i32 = arith.constant 0 : i32
    %c0_i32_0 = arith.constant 0 : i32
    %c0_i32_1 = arith.constant 0 : i32
    return %c0_i32, %c0_i32_0 : i32, i32
  }
  func.func @transform_3(%arg0: i32) -> (i32, i32) {
    %c0_i32 = arith.constant 0 : i32
    %c0_i32_0 = arith.constant 0 : i32
    return %arg0, %c0_i32 : i32, i32
  }
}

module attributes {stable_mosaic.version = 11 : i64} {
  func.func @_mm_bias_kernel(%arg0: i32, %arg1: memref<256x128xbf16, #tpu.memory_space<vmem>>, %arg2: memref<128x128xbf16, #tpu.memory_space<vmem>>, %arg3: memref<1x128xf32, #tpu.memory_space<vmem>>, %arg4: memref<256x128xbf16, #tpu.memory_space<vmem>>) attributes {dimension_semantics = [#tpu.dimension_semantics<parallel>], iteration_bounds = array<i64: 3>, scalar_prefetch = 0 : i64, scratch_operands = 0 : i64, tpu.core_type = #tpu.core_type<tc>, window_params = [{transform_indices = @transform_0, window_bounds = array<i64: 256, 128>}, {pipeline_mode = #tpu.pipeline_mode<synchronous>, transform_indices = @transform_1, window_bounds = array<i64: 128, 128>}, {pipeline_mode = #tpu.pipeline_mode<synchronous>, transform_indices = @transform_2, window_bounds = array<i64: 1, 128>}, {transform_indices = @transform_3, window_bounds = array<i64: 256, 128>}]} {
    %c0 = arith.constant 0 : index
    %c0_0 = arith.constant 0 : index
    %0 = vector.load %arg1[%c0, %c0_0] : memref<256x128xbf16, #tpu.memory_space<vmem>>, vector<256x128xbf16>
    %c0_1 = arith.constant 0 : index
    %c0_2 = arith.constant 0 : index
    %1 = vector.load %arg2[%c0_1, %c0_2] : memref<128x128xbf16, #tpu.memory_space<vmem>>, vector<128x128xbf16>
    %cst = arith.constant dense<0.000000e+00> : vector<256x128xf32>
    %2 = tpu.matmul %0, %1, %cst {dimension_numbers = #tpu.dot_dimension_numbers<[1], [0], [0], [1], [0, 0, 1, 1], [], []>} : vector<256x128xbf16>, vector<128x128xbf16>, vector<256x128xf32> -> vector<256x128xf32>
    %c0_3 = arith.constant 0 : index
    %c0_4 = arith.constant 0 : index
    %3 = vector.load %arg3[%c0_3, %c0_4] : memref<1x128xf32, #tpu.memory_space<vmem>>, vector<1x128xf32>
    %4 = vector.broadcast %3 : vector<1x128xf32> to vector<256x128xf32>
    %5 = arith.addf %2, %4 : vector<256x128xf32>
    %6 = arith.truncf %5 : vector<256x128xf32> to vector<256x128xbf16>
    %c0_5 = arith.constant 0 : index
    %c0_6 = arith.constant 0 : index
    %7 = vector.load %arg4[%c0_5, %c0_6] : memref<256x128xbf16, #tpu.memory_space<vmem>>, vector<256x128xbf16>
    tpu.vector_store %arg4[%c0_5, %c0_6], %6 {strides = array<i32>} : memref<256x128xbf16, #tpu.memory_space<vmem>>, vector<256x128xbf16>,
    return
  }
  func.func @transform_0(%arg0: i32) -> (i32, i32) {
    %c0_i32 = arith.constant 0 : i32
    %c0_i32_0 = arith.constant 0 : i32
    return %arg0, %c0_i32 : i32, i32
  }
  func.func @transform_1(%arg0: i32) -> (i32, i32) {
    %c0_i32 = arith.constant 0 : i32
    %c0_i32_0 = arith.constant 0 : i32
    %c0_i32_1 = arith.constant 0 : i32
    return %c0_i32, %c0_i32_0 : i32, i32
  }
  func.func @transform_2(%arg0: i32) -> (i32, i32) {
    %c0_i32 = arith.constant 0 : i32
    %c0_i32_0 = arith.constant 0 : i32
    %c0_i32_1 = arith.constant 0 : i32
    return %c0_i32, %c0_i32_0 : i32, i32
  }
  func.func @transform_3(%arg0: i32) -> (i32, i32) {
    %c0_i32 = arith.constant 0 : i32
    %c0_i32_0 = arith.constant 0 : i32
    return %arg0, %c0_i32 : i32, i32
  }
}

module attributes {stable_mosaic.version = 11 : i64} {
  func.func @_mm_bias_kernel(%arg0: i32, %arg1: memref<256x288xbf16, #tpu.memory_space<vmem>>, %arg2: memref<288x128xbf16, #tpu.memory_space<vmem>>, %arg3: memref<1x128xf32, #tpu.memory_space<vmem>>, %arg4: memref<256x128xbf16, #tpu.memory_space<vmem>>) attributes {dimension_semantics = [#tpu.dimension_semantics<parallel>], iteration_bounds = array<i64: 2>, scalar_prefetch = 0 : i64, scratch_operands = 0 : i64, tpu.core_type = #tpu.core_type<tc>, window_params = [{transform_indices = @transform_0, window_bounds = array<i64: 256, 288>}, {pipeline_mode = #tpu.pipeline_mode<synchronous>, transform_indices = @transform_1, window_bounds = array<i64: 288, 128>}, {pipeline_mode = #tpu.pipeline_mode<synchronous>, transform_indices = @transform_2, window_bounds = array<i64: 1, 128>}, {transform_indices = @transform_3, window_bounds = array<i64: 256, 128>}]} {
    %c0 = arith.constant 0 : index
    %c0_0 = arith.constant 0 : index
    %0 = vector.load %arg1[%c0, %c0_0] : memref<256x288xbf16, #tpu.memory_space<vmem>>, vector<256x288xbf16>
    %c0_1 = arith.constant 0 : index
    %c0_2 = arith.constant 0 : index
    %1 = vector.load %arg2[%c0_1, %c0_2] : memref<288x128xbf16, #tpu.memory_space<vmem>>, vector<288x128xbf16>
    %cst = arith.constant dense<0.000000e+00> : vector<256x128xf32>
    %2 = tpu.matmul %0, %1, %cst {dimension_numbers = #tpu.dot_dimension_numbers<[1], [0], [0], [1], [0, 0, 1, 1], [], []>} : vector<256x288xbf16>, vector<288x128xbf16>, vector<256x128xf32> -> vector<256x128xf32>
    %c0_3 = arith.constant 0 : index
    %c0_4 = arith.constant 0 : index
    %3 = vector.load %arg3[%c0_3, %c0_4] : memref<1x128xf32, #tpu.memory_space<vmem>>, vector<1x128xf32>
    %4 = vector.broadcast %3 : vector<1x128xf32> to vector<256x128xf32>
    %5 = arith.addf %2, %4 : vector<256x128xf32>
    %6 = arith.truncf %5 : vector<256x128xf32> to vector<256x128xbf16>
    %c0_5 = arith.constant 0 : index
    %c0_6 = arith.constant 0 : index
    %7 = vector.load %arg4[%c0_5, %c0_6] : memref<256x128xbf16, #tpu.memory_space<vmem>>, vector<256x128xbf16>
    tpu.vector_store %arg4[%c0_5, %c0_6], %6 {strides = array<i32>} : memref<256x128xbf16, #tpu.memory_space<vmem>>, vector<256x128xbf16>,
    return
  }
  func.func @transform_0(%arg0: i32) -> (i32, i32) {
    %c0_i32 = arith.constant 0 : i32
    %c0_i32_0 = arith.constant 0 : i32
    return %arg0, %c0_i32 : i32, i32
  }
  func.func @transform_1(%arg0: i32) -> (i32, i32) {
    %c0_i32 = arith.constant 0 : i32
    %c0_i32_0 = arith.constant 0 : i32
    %c0_i32_1 = arith.constant 0 : i32
    return %c0_i32, %c0_i32_0 : i32, i32
  }
  func.func @transform_2(%arg0: i32) -> (i32, i32) {
    %c0_i32 = arith.constant 0 : i32
    %c0_i32_0 = arith.constant 0 : i32
    %c0_i32_1 = arith.constant 0 : i32
    return %c0_i32, %c0_i32_0 : i32, i32
  }
  func.func @transform_3(%arg0: i32) -> (i32, i32) {
    %c0_i32 = arith.constant 0 : i32
    %c0_i32_0 = arith.constant 0 : i32
    return %arg0, %c0_i32 : i32, i32
  }
}

module attributes {stable_mosaic.version = 11 : i64} {
  func.func @_mm_bias_kernel(%arg0: i32, %arg1: memref<256x64xbf16, #tpu.memory_space<vmem>>, %arg2: memref<64x128xbf16, #tpu.memory_space<vmem>>, %arg3: memref<1x128xf32, #tpu.memory_space<vmem>>, %arg4: memref<256x128xbf16, #tpu.memory_space<vmem>>) attributes {dimension_semantics = [#tpu.dimension_semantics<parallel>], iteration_bounds = array<i64: 9>, scalar_prefetch = 0 : i64, scratch_operands = 0 : i64, tpu.core_type = #tpu.core_type<tc>, window_params = [{transform_indices = @transform_0, window_bounds = array<i64: 256, 64>}, {pipeline_mode = #tpu.pipeline_mode<synchronous>, transform_indices = @transform_1, window_bounds = array<i64: 64, 128>}, {pipeline_mode = #tpu.pipeline_mode<synchronous>, transform_indices = @transform_2, window_bounds = array<i64: 1, 128>}, {transform_indices = @transform_3, window_bounds = array<i64: 256, 128>}]} {
    %c0 = arith.constant 0 : index
    %c0_0 = arith.constant 0 : index
    %0 = vector.load %arg1[%c0, %c0_0] : memref<256x64xbf16, #tpu.memory_space<vmem>>, vector<256x64xbf16>
    %c0_1 = arith.constant 0 : index
    %c0_2 = arith.constant 0 : index
    %1 = vector.load %arg2[%c0_1, %c0_2] : memref<64x128xbf16, #tpu.memory_space<vmem>>, vector<64x128xbf16>
    %cst = arith.constant dense<0.000000e+00> : vector<256x128xf32>
    %2 = tpu.matmul %0, %1, %cst {dimension_numbers = #tpu.dot_dimension_numbers<[1], [0], [0], [1], [0, 0, 1, 1], [], []>} : vector<256x64xbf16>, vector<64x128xbf16>, vector<256x128xf32> -> vector<256x128xf32>
    %c0_3 = arith.constant 0 : index
    %c0_4 = arith.constant 0 : index
    %3 = vector.load %arg3[%c0_3, %c0_4] : memref<1x128xf32, #tpu.memory_space<vmem>>, vector<1x128xf32>
    %4 = vector.broadcast %3 : vector<1x128xf32> to vector<256x128xf32>
    %5 = arith.addf %2, %4 : vector<256x128xf32>
    %6 = arith.truncf %5 : vector<256x128xf32> to vector<256x128xbf16>
    %c0_5 = arith.constant 0 : index
    %c0_6 = arith.constant 0 : index
    %7 = vector.load %arg4[%c0_5, %c0_6] : memref<256x128xbf16, #tpu.memory_space<vmem>>, vector<256x128xbf16>
    tpu.vector_store %arg4[%c0_5, %c0_6], %6 {strides = array<i32>} : memref<256x128xbf16, #tpu.memory_space<vmem>>, vector<256x128xbf16>,
    return
  }
  func.func @transform_0(%arg0: i32) -> (i32, i32) {
    %c0_i32 = arith.constant 0 : i32
    %c0_i32_0 = arith.constant 0 : i32
    return %arg0, %c0_i32 : i32, i32
  }
  func.func @transform_1(%arg0: i32) -> (i32, i32) {
    %c0_i32 = arith.constant 0 : i32
    %c0_i32_0 = arith.constant 0 : i32
    %c0_i32_1 = arith.constant 0 : i32
    return %c0_i32, %c0_i32_0 : i32, i32
  }
  func.func @transform_2(%arg0: i32) -> (i32, i32) {
    %c0_i32 = arith.constant 0 : i32
    %c0_i32_0 = arith.constant 0 : i32
    %c0_i32_1 = arith.constant 0 : i32
    return %c0_i32, %c0_i32_0 : i32, i32
  }
  func.func @transform_3(%arg0: i32) -> (i32, i32) {
    %c0_i32 = arith.constant 0 : i32
    %c0_i32_0 = arith.constant 0 : i32
    return %arg0, %c0_i32 : i32, i32
  }
}

module attributes {stable_mosaic.version = 11 : i64} {
  func.func @_mm_bias_kernel(%arg0: i32, %arg1: memref<256x144xbf16, #tpu.memory_space<vmem>>, %arg2: memref<144x128xbf16, #tpu.memory_space<vmem>>, %arg3: memref<1x128xf32, #tpu.memory_space<vmem>>, %arg4: memref<256x128xbf16, #tpu.memory_space<vmem>>) attributes {dimension_semantics = [#tpu.dimension_semantics<parallel>], iteration_bounds = array<i64: 9>, scalar_prefetch = 0 : i64, scratch_operands = 0 : i64, tpu.core_type = #tpu.core_type<tc>, window_params = [{transform_indices = @transform_0, window_bounds = array<i64: 256, 144>}, {pipeline_mode = #tpu.pipeline_mode<synchronous>, transform_indices = @transform_1, window_bounds = array<i64: 144, 128>}, {pipeline_mode = #tpu.pipeline_mode<synchronous>, transform_indices = @transform_2, window_bounds = array<i64: 1, 128>}, {transform_indices = @transform_3, window_bounds = array<i64: 256, 128>}]} {
    %c0 = arith.constant 0 : index
    %c0_0 = arith.constant 0 : index
    %0 = vector.load %arg1[%c0, %c0_0] : memref<256x144xbf16, #tpu.memory_space<vmem>>, vector<256x144xbf16>
    %c0_1 = arith.constant 0 : index
    %c0_2 = arith.constant 0 : index
    %1 = vector.load %arg2[%c0_1, %c0_2] : memref<144x128xbf16, #tpu.memory_space<vmem>>, vector<144x128xbf16>
    %cst = arith.constant dense<0.000000e+00> : vector<256x128xf32>
    %2 = tpu.matmul %0, %1, %cst {dimension_numbers = #tpu.dot_dimension_numbers<[1], [0], [0], [1], [0, 0, 1, 1], [], []>} : vector<256x144xbf16>, vector<144x128xbf16>, vector<256x128xf32> -> vector<256x128xf32>
    %c0_3 = arith.constant 0 : index
    %c0_4 = arith.constant 0 : index
    %3 = vector.load %arg3[%c0_3, %c0_4] : memref<1x128xf32, #tpu.memory_space<vmem>>, vector<1x128xf32>
    %4 = vector.broadcast %3 : vector<1x128xf32> to vector<256x128xf32>
    %5 = arith.addf %2, %4 : vector<256x128xf32>
    %6 = arith.truncf %5 : vector<256x128xf32> to vector<256x128xbf16>
    %c0_5 = arith.constant 0 : index
    %c0_6 = arith.constant 0 : index
    %7 = vector.load %arg4[%c0_5, %c0_6] : memref<256x128xbf16, #tpu.memory_space<vmem>>, vector<256x128xbf16>
    tpu.vector_store %arg4[%c0_5, %c0_6], %6 {strides = array<i32>} : memref<256x128xbf16, #tpu.memory_space<vmem>>, vector<256x128xbf16>,
    return
  }
  func.func @transform_0(%arg0: i32) -> (i32, i32) {
    %c0_i32 = arith.constant 0 : i32
    %c0_i32_0 = arith.constant 0 : i32
    return %arg0, %c0_i32 : i32, i32
  }
  func.func @transform_1(%arg0: i32) -> (i32, i32) {
    %c0_i32 = arith.constant 0 : i32
    %c0_i32_0 = arith.constant 0 : i32
    %c0_i32_1 = arith.constant 0 : i32
    return %c0_i32, %c0_i32_0 : i32, i32
  }
  func.func @transform_2(%arg0: i32) -> (i32, i32) {
    %c0_i32 = arith.constant 0 : i32
    %c0_i32_0 = arith.constant 0 : i32
    %c0_i32_1 = arith.constant 0 : i32
    return %c0_i32, %c0_i32_0 : i32, i32
  }
  func.func @transform_3(%arg0: i32) -> (i32, i32) {
    %c0_i32 = arith.constant 0 : i32
    %c0_i32_0 = arith.constant 0 : i32
    return %arg0, %c0_i32 : i32, i32
  }
}

module attributes {stable_mosaic.version = 11 : i64} {
  func.func @_mm_bias_kernel(%arg0: i32, %arg1: memref<256x16xbf16, #tpu.memory_space<vmem>>, %arg2: memref<16x128xbf16, #tpu.memory_space<vmem>>, %arg3: memref<1x128xf32, #tpu.memory_space<vmem>>, %arg4: memref<256x128xbf16, #tpu.memory_space<vmem>>) attributes {dimension_semantics = [#tpu.dimension_semantics<parallel>], iteration_bounds = array<i64: 10>, scalar_prefetch = 0 : i64, scratch_operands = 0 : i64, tpu.core_type = #tpu.core_type<tc>, window_params = [{transform_indices = @transform_0, window_bounds = array<i64: 256, 16>}, {pipeline_mode = #tpu.pipeline_mode<synchronous>, transform_indices = @transform_1, window_bounds = array<i64: 16, 128>}, {pipeline_mode = #tpu.pipeline_mode<synchronous>, transform_indices = @transform_2, window_bounds = array<i64: 1, 128>}, {transform_indices = @transform_3, window_bounds = array<i64: 256, 128>}]} {
    %c0 = arith.constant 0 : index
    %c0_0 = arith.constant 0 : index
    %0 = vector.load %arg1[%c0, %c0_0] : memref<256x16xbf16, #tpu.memory_space<vmem>>, vector<256x16xbf16>
    %c0_1 = arith.constant 0 : index
    %c0_2 = arith.constant 0 : index
    %1 = vector.load %arg2[%c0_1, %c0_2] : memref<16x128xbf16, #tpu.memory_space<vmem>>, vector<16x128xbf16>
    %cst = arith.constant dense<0.000000e+00> : vector<256x128xf32>
    %2 = tpu.matmul %0, %1, %cst {dimension_numbers = #tpu.dot_dimension_numbers<[1], [0], [0], [1], [0, 0, 1, 1], [], []>} : vector<256x16xbf16>, vector<16x128xbf16>, vector<256x128xf32> -> vector<256x128xf32>
    %c0_3 = arith.constant 0 : index
    %c0_4 = arith.constant 0 : index
    %3 = vector.load %arg3[%c0_3, %c0_4] : memref<1x128xf32, #tpu.memory_space<vmem>>, vector<1x128xf32>
    %4 = vector.broadcast %3 : vector<1x128xf32> to vector<256x128xf32>
    %5 = arith.addf %2, %4 : vector<256x128xf32>
    %6 = arith.truncf %5 : vector<256x128xf32> to vector<256x128xbf16>
    %c0_5 = arith.constant 0 : index
    %c0_6 = arith.constant 0 : index
    %7 = vector.load %arg4[%c0_5, %c0_6] : memref<256x128xbf16, #tpu.memory_space<vmem>>, vector<256x128xbf16>
    tpu.vector_store %arg4[%c0_5, %c0_6], %6 {strides = array<i32>} : memref<256x128xbf16, #tpu.memory_space<vmem>>, vector<256x128xbf16>,
    return
  }
  func.func @transform_0(%arg0: i32) -> (i32, i32) {
    %c0_i32 = arith.constant 0 : i32
    %c0_i32_0 = arith.constant 0 : i32
    return %arg0, %c0_i32 : i32, i32
  }
  func.func @transform_1(%arg0: i32) -> (i32, i32) {
    %c0_i32 = arith.constant 0 : i32
    %c0_i32_0 = arith.constant 0 : i32
    %c0_i32_1 = arith.constant 0 : i32
    return %c0_i32, %c0_i32_0 : i32, i32
  }
  func.func @transform_2(%arg0: i32) -> (i32, i32) {
    %c0_i32 = arith.constant 0 : i32
    %c0_i32_0 = arith.constant 0 : i32
    %c0_i32_1 = arith.constant 0 : i32
    return %c0_i32, %c0_i32_0 : i32, i32
  }
  func.func @transform_3(%arg0: i32) -> (i32, i32) {
    %c0_i32 = arith.constant 0 : i32
    %c0_i32_0 = arith.constant 0 : i32
    return %arg0, %c0_i32 : i32, i32
  }
}

module attributes {stable_mosaic.version = 11 : i64} {
  func.func @_back_kernel(%arg0: i32, %arg1: memref<35x128xbf16, #tpu.memory_space<vmem>>, %arg2: memref<35x128xf32, #tpu.memory_space<vmem>>, %arg3: memref<35x128xf32, #tpu.memory_space<vmem>>, %arg4: memref<35x128xf32, #tpu.memory_space<vmem>>, %arg5: memref<35x128xf32, #tpu.memory_space<vmem>>) attributes {dimension_semantics = [#tpu.dimension_semantics<parallel>], iteration_bounds = array<i64: 1>, scalar_prefetch = 0 : i64, scratch_operands = 0 : i64, tpu.core_type = #tpu.core_type<tc>, window_params = [{transform_indices = @transform_0, window_bounds = array<i64: 35, 128>}, {transform_indices = @transform_1, window_bounds = array<i64: 35, 128>}, {transform_indices = @transform_2, window_bounds = array<i64: 35, 128>}, {transform_indices = @transform_3, window_bounds = array<i64: 35, 128>}, {transform_indices = @transform_4, window_bounds = array<i64: 35, 128>}]} {
    %c0 = arith.constant 0 : index
    %c0_0 = arith.constant 0 : index
    %0 = vector.load %arg1[%c0, %c0_0] : memref<35x128xbf16, #tpu.memory_space<vmem>>, vector<35x128xbf16>
    %1 = arith.extf %0 : vector<35x128xbf16> to vector<35x128xf32>
    %cst = arith.constant 2.000000e+01 : f32
    %2 = vector.broadcast %cst : f32 to vector<35x128xf32>
    %3 = arith.mulf %1, %2 : vector<35x128xf32>
    %cst_1 = arith.constant -3.000000e+01 : f32
    %4 = vector.broadcast %cst_1 : f32 to vector<35x128xf32>
    %5 = arith.addf %3, %4 : vector<35x128xf32>
    %cst_2 = arith.constant 0.115129255 : f32
    %6 = vector.broadcast %cst_2 : f32 to vector<35x128xf32>
    %7 = arith.mulf %5, %6 : vector<35x128xf32>
    %8 = math.exp %7 : vector<35x128xf32>
    %c0_3 = arith.constant 0 : index
    %c0_4 = arith.constant 0 : index
    %9 = vector.load %arg2[%c0_3, %c0_4] : memref<35x128xf32, #tpu.memory_space<vmem>>, vector<35x128xf32>
    %10 = arith.mulf %8, %9 : vector<35x128xf32>
    %c0_5 = arith.constant 0 : index
    %c0_6 = arith.constant 0 : index
    %11 = vector.load %arg4[%c0_5, %c0_6] : memref<35x128xf32, #tpu.memory_space<vmem>>, vector<35x128xf32>
    tpu.vector_store %arg4[%c0_5, %c0_6], %10 {strides = array<i32>} : memref<35x128xf32, #tpu.memory_space<vmem>>, vector<35x128xf32>,
    %c0_7 = arith.constant 0 : index
    %c0_8 = arith.constant 0 : index
    %12 = vector.load %arg3[%c0_7, %c0_8] : memref<35x128xf32, #tpu.memory_space<vmem>>, vector<35x128xf32>
    %13 = arith.mulf %8, %12 : vector<35x128xf32>
    %c0_9 = arith.constant 0 : index
    %c0_10 = arith.constant 0 : index
    %14 = vector.load %arg5[%c0_9, %c0_10] : memref<35x128xf32, #tpu.memory_space<vmem>>, vector<35x128xf32>
    tpu.vector_store %arg5[%c0_9, %c0_10], %13 {strides = array<i32>} : memref<35x128xf32, #tpu.memory_space<vmem>>, vector<35x128xf32>,
    return
  }
  func.func @transform_0(%arg0: i32) -> (i32, i32) {
    %c0_i32 = arith.constant 0 : i32
    %c0_i32_0 = arith.constant 0 : i32
    return %arg0, %c0_i32 : i32, i32
  }
  func.func @transform_1(%arg0: i32) -> (i32, i32) {
    %c0_i32 = arith.constant 0 : i32
    %c0_i32_0 = arith.constant 0 : i32
    return %arg0, %c0_i32 : i32, i32
  }
  func.func @transform_2(%arg0: i32) -> (i32, i32) {
    %c0_i32 = arith.constant 0 : i32
    %c0_i32_0 = arith.constant 0 : i32
    return %arg0, %c0_i32 : i32, i32
  }
  func.func @transform_3(%arg0: i32) -> (i32, i32) {
    %c0_i32 = arith.constant 0 : i32
    %c0_i32_0 = arith.constant 0 : i32
    return %arg0, %c0_i32 : i32, i32
  }
  func.func @transform_4(%arg0: i32) -> (i32, i32) {
    %c0_i32 = arith.constant 0 : i32
    %c0_i32_0 = arith.constant 0 : i32
    return %arg0, %c0_i32 : i32, i32
  }
}

module attributes {stable_mosaic.version = 11 : i64} {
  func.func @_mm_kernel(%arg0: i32, %arg1: memref<132x72xf32, #tpu.memory_space<vmem>>, %arg2: memref<72x128xf32, #tpu.memory_space<vmem>>, %arg3: memref<132x128xf32, #tpu.memory_space<vmem>>) attributes {dimension_semantics = [#tpu.dimension_semantics<parallel>], iteration_bounds = array<i64: 1>, scalar_prefetch = 0 : i64, scratch_operands = 0 : i64, tpu.core_type = #tpu.core_type<tc>, window_params = [{transform_indices = @transform_0, window_bounds = array<i64: 132, 72>}, {pipeline_mode = #tpu.pipeline_mode<synchronous>, transform_indices = @transform_1, window_bounds = array<i64: 72, 128>}, {transform_indices = @transform_2, window_bounds = array<i64: 132, 128>}]} {
    %c0 = arith.constant 0 : index
    %c0_0 = arith.constant 0 : index
    %0 = vector.load %arg1[%c0, %c0_0] : memref<132x72xf32, #tpu.memory_space<vmem>>, vector<132x72xf32>
    %c0_1 = arith.constant 0 : index
    %c0_2 = arith.constant 0 : index
    %1 = vector.load %arg2[%c0_1, %c0_2] : memref<72x128xf32, #tpu.memory_space<vmem>>, vector<72x128xf32>
    %cst = arith.constant dense<0.000000e+00> : vector<132x128xf32>
    %2 = tpu.matmul %0, %1, %cst {dimension_numbers = #tpu.dot_dimension_numbers<[1], [0], [0], [1], [0, 0, 1, 1], [], []>} : vector<132x72xf32>, vector<72x128xf32>, vector<132x128xf32> -> vector<132x128xf32>
    %c0_3 = arith.constant 0 : index
    %c0_4 = arith.constant 0 : index
    %3 = vector.load %arg3[%c0_3, %c0_4] : memref<132x128xf32, #tpu.memory_space<vmem>>, vector<132x128xf32>
    tpu.vector_store %arg3[%c0_3, %c0_4], %2 {strides = array<i32>} : memref<132x128xf32, #tpu.memory_space<vmem>>, vector<132x128xf32>,
    return
  }
  func.func @transform_0(%arg0: i32) -> (i32, i32) {
    %c0_i32 = arith.constant 0 : i32
    %c0_i32_0 = arith.constant 0 : i32
    return %arg0, %c0_i32 : i32, i32
  }
  func.func @transform_1(%arg0: i32) -> (i32, i32) {
    %c0_i32 = arith.constant 0 : i32
    %c0_i32_0 = arith.constant 0 : i32
    %c0_i32_1 = arith.constant 0 : i32
    return %c0_i32, %c0_i32_0 : i32, i32
  }
  func.func @transform_2(%arg0: i32) -> (i32, i32) {
    %c0_i32 = arith.constant 0 : i32
    %c0_i32_0 = arith.constant 0 : i32
    return %arg0, %c0_i32 : i32, i32
  }
}

</mosaic_0001>

<bundles_post_ra>
// kernel: forward.35
= control target key start
LH: loop header
LB: loop body
LE: loop exit
PB: predicated region body
PF: predicated region fallthrough
CT: control target
= control target key end

     0   :  { %v391_v0 = vmov 0.0|0.0   ;;  %vm392_vm0 = vmmov 0   ;;  %v393_v6 = vmov 0.0   ;;  %vm36_vm1 = vcmask 523264   ;;  %s586_s1 = inlined_call_operand.vmem [shape: f32[64,128], index: 1, kind: input, shape index: {}]   ;;  %s587_s0 = inlined_call_operand.vmem [shape: f32[132,64], index: 0, kind: input, shape index: {}]   ;;  %s588_s2 = inlined_call_operand.vmem [shape: f32[132,128], index: 2, kind: output, shape index: {}]  }
   0x1   :  { %368 = vmatprep.subr.bf16.mxu0 %v391_v0  ;;  %v28_v1 = vld [vmem:[%s586_s1] sm:$0xff]  ;;  %v29_v2 = vld [vmem:[%s586_s1 + $0x8] sm:$0xff]  ;;  %380 = vmatprep.subr.bf16.mxu1 %v391_v0  ;;  %v30_v3 = vld [vmem:[%s586_s1 + $0x10] sm:$0xff] }
   0x2   :  { %v369_v4 = vpack.c.bf16 %v29_v2, %v28_v1  ;;  %v31_v5 = vld [vmem:[%s586_s1 + $0x18] sm:$0xff]  ;;  %317 = vmatprep.mubr.msk.f32.mxu0 %vm392_vm0, %v393_v6  ;;  %344 = vmatprep.mubr.msk.f32.mxu1 %vm392_vm0, %v393_v6  ;;  %v32_v8 = vld [vmem:[%s586_s1 + $0x20] sm:$0xff]  ;;  %v33_v9 = vld [vmem:[%s586_s1 + $0x28] sm:$0xff] }
   0x3   :  { %v372_v7 = vpack.c.bf16 %v31_v5, %v30_v3  ;;  %v375_v10 = vpack.c.bf16 %v33_v9, %v32_v8  ;;  %v34_v11 = vld [vmem:[%s586_s1 + $0x30] sm:$0xff]  ;;  %v35_v12 = vld [vmem:[%s586_s1 + $0x38] sm:$0xff]  ;;  %v11_v14 = vld [vmem:[%s587_s0] sm:$0xff] }
   0x4   :  { %370 = vmatpush3.bf16.msra.mxu0 %v369_v4  ;;  %384 = vmatpush3.bf16.msra.mxu1 %v369_v4  ;;  %v378_v13 = vpack.c.bf16 %v35_v12, %v34_v11  ;;  %v20_v15 = vld [vmem:[%s587_s0 + $0x48] sm:$0xff]  ;;  %v21_v17 = vld [vmem:[%s587_s0 + $0x50] sm:$0xff]  ;;  %v22_v19 = vld [vmem:[%s587_s0 + $0x58] sm:$0xff] }
   0x5   :  { %371 = vmatprep.subr.bf16.mxu0 %v391_v0  ;;  %381 = vmatprep.subr.bf16.mxu1 %v391_v0  ;;  %v12_v16 = vld [vmem:[%s587_s0 + $0x8] sm:$0xff]  ;;  %v13_v18 = vld [vmem:[%s587_s0 + $0x10] sm:$0xff]  ;;  %v14_v20 = vld [vmem:[%s587_s0 + $0x18] sm:$0xff] }
   0x6   :  { %v23_v21 = vld [vmem:[%s587_s0 + $0x60] sm:$0xff]  ;;  %v24_v23 = vld [vmem:[%s587_s0 + $0x68] sm:$0xff]  ;;  %v25_v25 = vld [vmem:[%s587_s0 + $0x70] sm:$0xff] }
   0x7   :  { %v15_v22 = vld [vmem:[%s587_s0 + $0x20] sm:$0xff]  ;;  %v16_v24 = vld [vmem:[%s587_s0 + $0x28] sm:$0xff]  ;;  %v17_v26 = vld [vmem:[%s587_s0 + $0x30] sm:$0xff] }
   0x8   :  { %373 = vmatpush3.bf16.msra.mxu0 %v372_v7  ;;  %385 = vmatpush3.bf16.msra.mxu1 %v372_v7  ;;  %v26_v27 = vld [vmem:[%s587_s0 + $0x78] sm:$0xff]  ;;  %v27_v29 = vld [vmem:[%s587_s0 + $0x80] sm:$0xf] }
   0x9   :  { %374 = vmatprep.subr.bf16.mxu0 %v391_v0  ;;  %382 = vmatprep.subr.bf16.mxu1 %v391_v0  ;;  %v18_v28 = vld [vmem:[%s587_s0 + $0x38] sm:$0xff]  ;;  %v19_v30 = vld [vmem:[%s587_s0 + $0x40] sm:$0xff] }
   0xc   :  { %376 = vmatpush3.bf16.msra.mxu0 %v375_v10  ;;  %386 = vmatpush3.bf16.msra.mxu1 %v375_v10 }
   0xd   :  { %377 = vmatprep.subr.bf16.mxu0 %v391_v0  ;;  %383 = vmatprep.subr.bf16.mxu1 %v391_v0 }
  0x10   :  { %379 = vmatpush3.bf16.msra.mxu0 %v378_v13  ;;  %387 = vmatpush3.bf16.msra.mxu1 %v378_v13 }
  0x13   :  { %318 = vmatmul.mubr.msk.f32.vlgmr.msra.gmra.mrb[0].mxu0 %vm36_vm1, %v11_v14  ;;  %345 = vmatmul.mubr.msk.f32.vlgmr.msra.gmra.mrb[0].mxu1 %vm36_vm1, %v20_v15 }
  0x14   :  { %320 = vmatprep.mubr.msk.f32.mxu0 %vm392_vm0, %v393_v6  ;;  %347 = vmatprep.mubr.msk.f32.mxu1 %vm392_vm0, %v393_v6 }
  0x17   :  { %321 = vmatmul.mubr.msk.f32.gmra.mrb[2].mxu0 %vm36_vm1, %v12_v16  ;;  %348 = vmatmul.mubr.msk.f32.gmra.mrb[2].mxu1 %vm36_vm1, %v21_v17 }
  0x18   :  { %323 = vmatprep.mubr.msk.f32.mxu0 %vm392_vm0, %v393_v6  ;;  %350 = vmatprep.mubr.msk.f32.mxu1 %vm392_vm0, %v393_v6 }
  0x1b   :  { %324 = vmatmul.mubr.msk.f32.gmra.mrb[4].mxu0 %vm36_vm1, %v13_v18  ;;  %351 = vmatmul.mubr.msk.f32.gmra.mrb[4].mxu1 %vm36_vm1, %v22_v19 }
  0x1c   :  { %326 = vmatprep.mubr.msk.f32.mxu0 %vm392_vm0, %v393_v6  ;;  %353 = vmatprep.mubr.msk.f32.mxu1 %vm392_vm0, %v393_v6 }
  0x1f   :  { %327 = vmatmul.mubr.msk.f32.gmra.mrb[6].mxu0 %vm36_vm1, %v14_v20  ;;  %354 = vmatmul.mubr.msk.f32.gmra.mrb[6].mxu1 %vm36_vm1, %v23_v21 }
  0x20   :  { %329 = vmatprep.mubr.msk.f32.mxu0 %vm392_vm0, %v393_v6  ;;  %356 = vmatprep.mubr.msk.f32.mxu1 %vm392_vm0, %v393_v6 }
  0x23   :  { %330 = vmatmul.mubr.msk.f32.gmra.mrb[8].mxu0 %vm36_vm1, %v15_v22  ;;  %357 = vmatmul.mubr.msk.f32.gmra.mrb[8].mxu1 %vm36_vm1, %v24_v23 }
  0x24   :  { %332 = vmatprep.mubr.msk.f32.mxu0 %vm392_vm0, %v393_v6  ;;  %359 = vmatprep.mubr.msk.f32.mxu1 %vm392_vm0, %v393_v6 }
  0x27   :  { %333 = vmatmul.mubr.msk.f32.gmra.mrb[10].mxu0 %vm36_vm1, %v16_v24  ;;  %360 = vmatmul.mubr.msk.f32.gmra.mrb[10].mxu1 %vm36_vm1, %v25_v25 }
  0x28   :  { %335 = vmatprep.mubr.msk.f32.mxu0 %vm392_vm0, %v393_v6  ;;  %362 = vmatprep.mubr.msk.f32.mxu1 %vm392_vm0, %v393_v6 }
  0x2b   :  { %336 = vmatmul.mubr.msk.f32.gmra.mrb[12].mxu0 %vm36_vm1, %v17_v26  ;;  %363 = vmatmul.mubr.msk.f32.gmra.mrb[12].mxu1 %vm36_vm1, %v26_v27 }
  0x2c   :  { %338 = vmatprep.mubr.msk.f32.mxu0 %vm392_vm0, %v393_v6  ;;  %365 = vmatprep.mubr.msk.f32.mxu1 %vm392_vm0, %v393_v6 }
  0x2f   :  { %339 = vmatmul.mubr.msk.f32.gmra.mrb[14].mxu0 %vm36_vm1, %v18_v28  ;;  %366 = vmatmul.mubr.msk.f32.gmra.mrb[14].mxu1 %vm36_vm1, %v27_v29 }
  0x30   :  { %341 = vmatprep.mubr.msk.f32.mxu0 %vm392_vm0, %v393_v6 }
  0x33   :  { %342 = vmatmul.mubr.msk.f32.gmra.mrb[16].mxu0 %vm36_vm1, %v19_v30 }
  0xe6   :  { %v154_v31 = vpop.f32.mrb[0].mxu0  ;;  %v199_v32 = vpop.f32.mrb[0].mxu1 }
  0xe7   :  { %238 = vst [vmem:[%s588_s2] sm:$0xff] %v154_v31  ;;  %v319_v33 = vpop.f32.mrb[1].mxu0  ;;  %247 = vst [vmem:[%s588_s2 + $0x48] sm:$0xff] %v199_v32  ;;  %v346_v34 = vpop.f32.mrb[1].mxu1 }
  0xea   :  { %v159_v35 = vpop.f32.mrb[2].mxu0  ;;  %v204_v36 = vpop.f32.mrb[2].mxu1 }
  0xeb   :  { %239 = vst [vmem:[%s588_s2 + $0x8] sm:$0xff] %v159_v35  ;;  %v322_v37 = vpop.f32.mrb[3].mxu0  ;;  %248 = vst [vmem:[%s588_s2 + $0x50] sm:$0xff] %v204_v36  ;;  %v349_v38 = vpop.f32.mrb[3].mxu1 }
  0xee   :  { %v164_v39 = vpop.f32.mrb[4].mxu0  ;;  %v209_v40 = vpop.f32.mrb[4].mxu1 }
  0xef   :  { %240 = vst [vmem:[%s588_s2 + $0x10] sm:$0xff] %v164_v39  ;;  %v325_v41 = vpop.f32.mrb[5].mxu0  ;;  %249 = vst [vmem:[%s588_s2 + $0x58] sm:$0xff] %v209_v40  ;;  %v352_v42 = vpop.f32.mrb[5].mxu1 }
  0xf2   :  { %v169_v43 = vpop.f32.mrb[6].mxu0  ;;  %v214_v44 = vpop.f32.mrb[6].mxu1 }
  0xf3   :  { %241 = vst [vmem:[%s588_s2 + $0x18] sm:$0xff] %v169_v43  ;;  %v328_v45 = vpop.f32.mrb[7].mxu0  ;;  %250 = vst [vmem:[%s588_s2 + $0x60] sm:$0xff] %v214_v44  ;;  %v355_v46 = vpop.f32.mrb[7].mxu1 }
  0xf6   :  { %v174_v47 = vpop.f32.mrb[8].mxu0  ;;  %v219_v48 = vpop.f32.mrb[8].mxu1 }
  0xf7   :  { %242 = vst [vmem:[%s588_s2 + $0x20] sm:$0xff] %v174_v47  ;;  %v331_v49 = vpop.f32.mrb[9].mxu0  ;;  %251 = vst [vmem:[%s588_s2 + $0x68] sm:$0xff] %v219_v48  ;;  %v358_v50 = vpop.f32.mrb[9].mxu1 }
  0xfa   :  { %v179_v51 = vpop.f32.mrb[10].mxu0  ;;  %v224_v52 = vpop.f32.mrb[10].mxu1 }
  0xfb   :  { %243 = vst [vmem:[%s588_s2 + $0x28] sm:$0xff] %v179_v51  ;;  %v334_v53 = vpop.f32.mrb[11].mxu0  ;;  %252 = vst [vmem:[%s588_s2 + $0x70] sm:$0xff] %v224_v52  ;;  %v361_v54 = vpop.f32.mrb[11].mxu1 }
  0xfe   :  { %v184_v55 = vpop.f32.mrb[12].mxu0  ;;  %v229_v56 = vpop.f32.mrb[12].mxu1 }
  0xff   :  { %244 = vst [vmem:[%s588_s2 + $0x30] sm:$0xff] %v184_v55  ;;  %v337_v57 = vpop.f32.mrb[13].mxu0  ;;  %253 = vst [vmem:[%s588_s2 + $0x78] sm:$0xff] %v229_v56  ;;  %v364_v58 = vpop.f32.mrb[13].mxu1 }
 0x102   :  { %v189_v59 = vpop.f32.mrb[14].mxu0  ;;  %v234_v60 = vpop.f32.mrb[14].mxu1 }
 0x103   :  { %245 = vst [vmem:[%s588_s2 + $0x38] sm:$0xff] %v189_v59  ;;  %v340_v61 = vpop.f32.mrb[15].mxu0  ;;  %254 = vst [vmem:[%s588_s2 + $0x80] sm:$0xf] %v234_v60  ;;  %v367_v62 = vpop.f32.mrb[15].mxu1 }
 0x106   :  { %v194_v63 = vpop.f32.mrb[16].mxu0 }
 0x107   :  { %246 = vst [vmem:[%s588_s2 + $0x40] sm:$0xff] %v194_v63  ;;  %v343_v0 = vpop.f32.mrb[17].mxu0 }

// kernel: forward.36
= control target key start
LH: loop header
LB: loop body
LE: loop exit
PB: predicated region body
PF: predicated region fallthrough
CT: control target
= control target key end

     0   :  { %s666_s0 = inlined_call_operand.vmem [shape: f32[35,128], index: 0, kind: input, shape index: {}]   ;;  %s667_s1 = inlined_call_operand.vmem [shape: f32[35,128], index: 1, kind: input, shape index: {}]   ;;  %s668_s3 = inlined_call_operand.vmem [shape: f32[35,128], index: 3, kind: output, shape index: {1}]   ;;  %s669_s4 = inlined_call_operand.vmem [shape: f32[35,128], index: 4, kind: output, shape index: {2}]   ;;  %s670_s2 = inlined_call_operand.vmem [shape: bf16[35,128], index: 2, kind: output, shape index: {0}]  }
   0x1   :  { %v359_v0 = vld [vmem:[%s666_s0] sm:$0xff]  ;;  %v364_v1 = vld [vmem:[%s666_s0 + $0x8] sm:$0xff]  ;;  %v385_v7 = vld [vmem:[%s666_s0 + $0x10] sm:$0xff] }
   0x2   :  { %v369_v2 = vld [vmem:[%s667_s1] sm:$0xff]  ;;  %v374_v3 = vld [vmem:[%s667_s1 + $0x8] sm:$0xff]  ;;  %v24_v4 = vmul.f32 %v359_v0, %v359_v0  ;;  %v25_v5 = vmul.f32 %v364_v1, %v364_v1  ;;  %v390_v8 = vld [vmem:[%s666_s0 + $0x18] sm:$0xff]  ;;  %v393_v9 = vadd.f32 1e-07, %v359_v0  ;;  %v26_v13 = vmul.f32 %v385_v7, %v385_v7 }
   0x3   :  { %v29_v6 = vmul.f32 %v369_v2, %v369_v2  ;;  %v30_v10 = vmul.f32 %v374_v3, %v374_v3  ;;  %v400_v11 = vld [vmem:[%s667_s1 + $0x10] sm:$0xff]  ;;  %v405_v12 = vld [vmem:[%s667_s1 + $0x18] sm:$0xff]  ;;  %v27_v14 = vmul.f32 %v390_v8, %v390_v8  ;;  %v414_v15 = vld [vmem:[%s666_s0 + $0x20] sm:$0x7]  ;;  %v447_v28 = vadd.f32 1e-07, %v364_v1 }
   0x4   :  { %v31_v17 = vmul.f32 %v400_v11, %v400_v11  ;;  %v420_v18 = vmul.f32 %v405_v12, %v405_v12  ;;  %v425_v19 = vld [vmem:[%s667_s1 + $0x20] sm:$0x7]  ;;  %v28_v20 = vmul.f32 %v414_v15, %v414_v15  ;;  %v141_v23 = vmul.f32 %v393_v9, %v393_v9 }
   0x5   :  { %v34_v16 = vadd.f32 %v29_v6, %v24_v4  ;;  %v35_v21 = vadd.f32 %v30_v10, %v25_v5  ;;  %v431_v22 = vmul.f32 %v425_v19, %v425_v19  ;;  %v450_v29 = vadd.f32 1e-07, %v385_v7 }
   0x6   :  { %v435_v24 = vadd.f32 %v31_v17, %v26_v13  ;;  %v438_v25 = vadd.f32 %v420_v18, %v27_v14  ;;  %v443_v27 = vadd.f32 %v141_v23, %v29_v6  ;;  %v142_v32 = vmul.f32 %v447_v28, %v447_v28 }
   0x7   :  { %290 = vrsqrt.f32 %v34_v16  ;;  %v441_v26 = vadd.f32 %v431_v22, %v28_v20  ;;  %vm41_vm0 = vcmp.eq.f32.partialorder %v34_v16, inf  ;;  %vm43_vm1 = vcmp.eq.f32.partialorder %v34_v16, 0.0 }
   0x8   :  { %292 = vrsqrt.f32 %v35_v21  ;;  %v44_v30 = vand.u32 2147483648, %v34_v16  ;;  %vm48_vm2 = vcmp.eq.f32.partialorder %v35_v21, inf  ;;  %vm50_vm3 = vcmp.eq.f32.partialorder %v35_v21, 0.0 }
   0x9   :  { %294 = vrsqrt.f32 %v435_v24  ;;  %v51_v31 = vand.u32 2147483648, %v35_v21  ;;  %vm55_vm4 = vcmp.eq.f32.partialorder %v435_v24, inf  ;;  %v143_v33 = vmul.f32 %v450_v29, %v450_v29 }
   0xa   :  { %296 = vrsqrt.f32 %v438_v25  ;;  %vm57_vm5 = vcmp.eq.f32.partialorder %v435_v24, 0.0  ;;  %v58_v34 = vand.u32 2147483648, %v435_v24  ;;  %vm62_vm6 = vcmp.eq.f32.partialorder %v438_v25, inf }
   0xb   :  { %298 = vrsqrt.f32 %v441_v26  ;;  %vm201_vm7 = vcmp.lt.f32.partialorder %v359_v0, 0.0  ;;  %vm206_vm8 = vcmp.ge.f32.partialorder %v393_v9, 0.0  ;;  %v466_v35 = vadd.f32 1e-07, %v390_v8 }
   0xc   :  { %300 = vrsqrt.f32 %v443_v27  ;;  %vm64_vm9 = vcmp.eq.f32.partialorder %v438_v25, 0.0  ;;  %v65_v37 = vand.u32 2147483648, %v438_v25  ;;  %v470_v38 = vadd.f32 %v142_v32, %v30_v10 }
   0xd   :  { %vm202_vm10 = vcmp.lt.f32.partialorder %v364_v1, 0.0  ;;  %v473_v39 = vadd.f32 %v143_v33, %v31_v17  ;;  %vm69_vm11 = vcmp.eq.f32.partialorder %v441_v26, inf  ;;  %vm71_vm12 = vcmp.eq.f32.partialorder %v441_v26, 0.0 }
   0xe   :  { %v72_v42 = vand.u32 2147483648, %v441_v26  ;;  %vm153_vm13 = vcmp.eq.f32.partialorder %v443_v27, inf  ;;  %302 = vrsqrt.f32 %v470_v38  ;;  %v144_v44 = vmul.f32 %v466_v35, %v466_v35 }
   0xf   :  { %vm155_vm14 = vcmp.eq.f32.partialorder %v443_v27, 0.0  ;;  %304 = vrsqrt.f32 %v473_v39  ;;  %v486_v46 = vadd.f32 1e-07, %v414_v15  ;;  %v156_v50 = vand.u32 2147483648, %v443_v27 }
  0x10   :  { %vm207_vm15 = vcmp.ge.f32.partialorder %v447_v28, 0.0  ;;  %v498_v58 = vadd.f32 %v144_v44, %v420_v18 }
  0x11   :  { %v291_v36 = vpop.eup %290  ;;  %v145_v62 = vmul.f32 %v486_v46, %v486_v46 }
  0x12   :  { %v293_v40 = vpop.eup %292  ;;  %v40_v41 = vmul.f32 %v291_v36, %v34_v16 }
  0x13   :  { %v47_v43 = vmul.f32 %v293_v40, %v35_v21  ;;  %v295_v47 = vpop.eup %294 }
  0x14   :  { %v42_v45 = vsel %vm41_vm0, %v34_v16, %v40_v41  ;;  %v297_v51 = vpop.eup %296  ;;  %v54_v54 = vmul.f32 %v295_v47, %v435_v24  ;;  %vm203_vm0 = vcmp.lt.f32.partialorder %v385_v7, 0.0 }
  0x15   :  { %v45_v48 = vsel %vm43_vm1, %v44_v30, %v42_v45  ;;  %v49_v49 = vsel %vm48_vm2, %v35_v21, %v47_v43  ;;  %v299_v55 = vpop.eup %298  ;;  %v61_v57 = vmul.f32 %v297_v51, %v438_v25  ;;  %vm208_vm1 = vcmp.ge.f32.partialorder %v450_v29, 0.0  ;;  %vm527_vm2 = vmand %vm201_vm7, %vm206_vm8 }
  0x16   :  { %v52_v52 = vsel %vm50_vm3, %v51_v31, %v49_v49  ;;  %v74_v53 = vmax.f32 %v45_v48, 1e-10  ;;  %v301_v59 = vpop.eup %300  ;;  %v56_v60 = vsel %vm55_vm4, %v435_v24, %v54_v54  ;;  %v68_v61 = vmul.f32 %v299_v55, %v441_v26  ;;  %vm213_vm7 = vmand %vm203_vm0, %vm208_vm1 }
  0x17   :  { %v75_v56 = vmax.f32 %v52_v52, 1e-10  ;;  %v59_v63 = vsel %vm57_vm5, %v58_v34, %v56_v60  ;;  %v63_v4 = vsel %vm62_vm6, %v438_v25, %v61_v57  ;;  %v152_v5 = vmul.f32 %v301_v59, %v443_v27  ;;  %vm539_vm5 = vmand %vm202_vm10, %vm207_vm15 }
  0x18   :  { %306 = vlog2.f32 %v74_v53  ;;  %v66_v6 = vsel %vm64_vm9, %v65_v37, %v63_v4  ;;  %v76_v10 = vmax.f32 %v59_v63, 1e-10  ;;  %v70_v13 = vsel %vm69_vm11, %v441_v26, %v68_v61  ;;  %v303_v0 = vpop.eup %302 }
  0x19   :  { %308 = vlog2.f32 %v75_v56  ;;  %v77_v14 = vmax.f32 %v66_v6, 1e-10  ;;  %v73_v16 = vsel %vm71_vm12, %v72_v42, %v70_v13  ;;  %v154_v17 = vsel %vm153_vm13, %v443_v27, %v152_v5  ;;  %v305_v26 = vpop.eup %304 }
  0x1a   :  { %310 = vrsqrt.f32 %v498_v58  ;;  %vm160_vm3 = vcmp.eq.f32.partialorder %v470_v38, inf  ;;  %v78_v20 = vmax.f32 %v73_v16, 1e-10  ;;  %v157_v21 = vsel %vm155_vm14, %v156_v50, %v154_v17 }
  0x1b   :  { %312 = vlog2.f32 %v76_v10  ;;  %vm162_vm4 = vcmp.eq.f32.partialorder %v470_v38, 0.0  ;;  %v186_v24 = vmax.f32 %v157_v21, 1e-20  ;;  %v163_v25 = vand.u32 2147483648, %v470_v38 }
  0x1c   :  { %314 = vlog2.f32 %v77_v14  ;;  %vm167_vm6 = vcmp.eq.f32.partialorder %v473_v39, inf  ;;  %v159_v1 = vmul.f32 %v303_v0, %v470_v38  ;;  %v170_v27 = vand.u32 2147483648, %v473_v39 }
  0x1d   :  { %316 = vlog2.f32 %v78_v20  ;;  %v552_v30 = vadd.f32 %v145_v62, %v431_v22  ;;  %v330_v31 = vmov 1.0   ;;  %v166_v33 = vmul.f32 %v305_v26, %v473_v39 }
  0x1e   :  { %318 = vrcp.f32 %v186_v24  ;;  %v216_v32 = vsel %vm527_vm2, -1.0, %v330_v31  ;;  %vm169_vm8 = vcmp.eq.f32.partialorder %v473_v39, 0.0  ;;  %v161_v7 = vsel %vm160_vm3, %v470_v38, %v159_v1 }
  0x1f   :  { %v217_v34 = vsel %vm539_vm5, -1.0, %v330_v31  ;;  %v218_v22 = vsel %vm213_vm7, -1.0, %v330_v31  ;;  %320 = vrsqrt.f32 %v552_v30  ;;  %v164_v36 = vsel %vm162_vm4, %v163_v25, %v161_v7 }
  0x20   :  { %v168_v37 = vsel %vm167_vm6, %v473_v39, %v166_v33  ;;  %v221_v41 = vmul.f32 %v216_v32, %v393_v9  ;;  %v187_v42 = vmax.f32 %v164_v36, 1e-20  ;;  %vm204_vm9 = vcmp.lt.f32.partialorder %v390_v8, 0.0 }
  0x21   :  { %v171_v43 = vsel %vm169_vm8, %v170_v27, %v168_v37  ;;  %v575_v47 = vmul.f32 %v217_v34, %v447_v28  ;;  %v578_v38 = vmul.f32 %v218_v22, %v450_v29  ;;  %vm174_vm10 = vcmp.eq.f32.partialorder %v498_v58, inf  ;;  %v133_v37 = vld [vmem:[%s670_s2 + $0x10] sm:$0x3] }
  0x22   :  { %v307_v40 = vpop.eup %306  ;;  %v188_v48 = vmax.f32 %v171_v43, 1e-20  ;;  %322 = vrcp.f32 %v187_v42  ;;  %v177_v9 = vand.u32 2147483648, %v498_v58  ;;  %vm130_vm11 = vcmask 1041408  }
  0x23   :  { %v309_v44 = vpop.eup %308  ;;  %v80_v45 = vmul.f32 0.6931472, %v307_v40  ;;  %vm176_vm12 = vcmp.eq.f32.partialorder %v498_v58, 0.0  ;;  %vm209_vm13 = vcmp.ge.f32.partialorder %v466_v35, 0.0  ;;  %vm181_vm14 = vcmp.eq.f32.partialorder %v552_v30, inf }
  0x24   :  { %v311_v49 = vpop.eup %310  ;;  %v82_v50 = vmul.f32 0.6931472, %v309_v44  ;;  %324 = vrcp.f32 %v188_v48  ;;  %vm183_vm15 = vcmp.eq.f32.partialorder %v552_v30, 0.0  ;;  %v236_v56 = vmul.f32 %v216_v32, %v369_v2  ;;  %vm600_vm1 = vmand %vm204_vm9, %vm209_vm13 }
  0x25   :  { %v89_v39 = vmul.f32 8.685889, %v80_v45  ;;  %v173_v51 = vmul.f32 %v311_v49, %v498_v58  ;;  %v313_v28 = vpop.eup %312  ;;  %v184_v62 = vand.u32 2147483648, %v552_v30  ;;  %v237_v10 = vmul.f32 %v217_v34, %v374_v3 }
  0x26   :  { %v90_v52 = vmul.f32 8.685889, %v82_v50  ;;  %v315_v29 = vpop.eup %314  ;;  %v84_v54 = vmul.f32 0.6931472, %v313_v28  ;;  %v238_v24 = vmul.f32 %v218_v22, %v400_v11  ;;  %vm131_vm0 = vsmask.f32 1280 }
  0x27   :  { %v263_v53 = vadd.f32 30.0, %v89_v39  ;;  %v175_v55 = vsel %vm174_vm10, %v498_v58, %v173_v51  ;;  %v317_v57 = vpop.eup %316  ;;  %v86_v60 = vmul.f32 0.6931472, %v315_v29  ;;  %vm205_vm2 = vcmp.lt.f32.partialorder %v414_v15, 0.0  ;;  %vm132_vm4 = vmand %vm130_vm11, %vm131_vm0 }
  0x28   :  { %v264_v59 = vadd.f32 30.0, %v90_v52  ;;  %v178_v61 = vsel %vm176_vm12, %v177_v9, %v175_v55  ;;  %v319_v63 = vpop.eup %318  ;;  %v91_v5 = vmul.f32 8.685889, %v84_v54  ;;  %v88_v6 = vmul.f32 0.6931472, %v317_v57 }
  0x29   :  { %v100_v4 = vmul.f32 0.05, %v263_v53  ;;  %v321_v13 = vpop.eup %320  ;;  %v92_v16 = vmul.f32 8.685889, %v86_v60  ;;  %v226_v17 = vmul.f32 %v319_v63, %v221_v41  ;;  %v189_v18 = vmax.f32 %v178_v61, 1e-20 }
  0x2a   :  { %v101_v14 = vmul.f32 0.05, %v264_v59  ;;  %v265_v58 = vadd.f32 30.0, %v91_v5  ;;  %v93_v20 = vmul.f32 8.685889, %v88_v6  ;;  %v180_v2 = vmul.f32 %v321_v13, %v552_v30 }
  0x2b   :  { %v241_v21 = vmul.f32 %v319_v63, %v236_v56  ;;  %v266_v0 = vadd.f32 30.0, %v92_v16  ;;  %231 = vst [vmem:[%s668_s3] sm:$0xff] %v226_v17  ;;  %326 = vrcp.f32 %v189_v18  ;;  %vm210_vm3 = vcmp.ge.f32.partialorder %v486_v46, 0.0 }
  0x2c   :  { %v281_v23 = vpack.c.bf16 %v101_v14, %v100_v4  ;;  %v102_v3 = vmul.f32 0.05, %v265_v58  ;;  %v267_v25 = vadd.f32 30.0, %v93_v20  ;;  %v182_v1 = vsel %vm181_vm14, %v552_v30, %v180_v2  ;;  %v323_v11 = vpop.eup %322  ;;  %vm215_vm5 = vmand %vm205_vm2, %vm210_vm3 }
  0x2d   :  { %246 = vst [vmem:[%s669_s4] sm:$0xff] %v241_v21  ;;  %v103_v27 = vmul.f32 0.05, %v266_v0  ;;  %v185_v8 = vsel %vm183_vm15, %v184_v62, %v182_v1  ;;  %v227_v7 = vmul.f32 %v323_v11, %v575_v47  ;;  %v242_v22 = vmul.f32 %v323_v11, %v237_v10 }
  0x2e   :  { %282 = vst [vmem:[%s670_s2] sm:$0xff] %v281_v23   ;;  %v325_v32 = vpop.eup %324  ;;  %v104_v33 = vmul.f32 0.05, %v267_v25  ;;  %v190_v34 = vmax.f32 %v185_v8, 1e-20  ;;  %v219_v40 = vsel %vm600_vm1, -1.0, %v330_v31  ;;  %v220_v47 = vsel %vm215_vm5, -1.0, %v330_v31 }
  0x2f   :  { %v286_v36 = vpack.c.bf16 %v103_v27, %v102_v3  ;;  %v228_v30 = vmul.f32 %v325_v32, %v578_v38  ;;  %v243_v41 = vmul.f32 %v325_v32, %v238_v24  ;;  %232 = vst [vmem:[%s668_s3 + $0x8] sm:$0xff] %v227_v7  ;;  %247 = vst [vmem:[%s669_s4 + $0x8] sm:$0xff] %v242_v22 }
  0x30   :  { %v277_v42 = vpack.c.bf16 %v104_v33, %v104_v33  ;;  %328 = vrcp.f32 %v190_v34  ;;  %v224_v44 = vmul.f32 %v219_v40, %v466_v35  ;;  %v239_v45 = vmul.f32 %v219_v40, %v405_v12 }
  0x31   :  { %288 = vst [vmem:[%s670_s2 + $0x8] sm:$0xff] %v286_v36   ;;  %233 = vst [vmem:[%s668_s3 + $0x10] sm:$0xff] %v228_v30  ;;  %v225_v15 = vmul.f32 %v220_v47, %v486_v46  ;;  %v240_v50 = vmul.f32 %v220_v47, %v425_v19 }
  0x32   :  { %248 = vst [vmem:[%s669_s4 + $0x10] sm:$0xff] %v243_v41  ;;  %v134_v43 = vsel %vm132_vm4, %v277_v42, %v133_v37 }
  0x33   :  { %135 = vst [vmem:[%s670_s2 + $0x10] sm:$0x3] %v134_v43 }
  0x35   :  { %v327_v48 = vpop.eup %326 }
  0x36   :  { %v229_v38 = vmul.f32 %v327_v48, %v224_v44  ;;  %v244_v49 = vmul.f32 %v327_v48, %v239_v45 }
  0x38   :  { %234 = vst [vmem:[%s668_s3 + $0x18] sm:$0xff] %v229_v38  ;;  %249 = vst [vmem:[%s669_s4 + $0x18] sm:$0xff] %v244_v49 }
  0x3a   :  { %v329_v12 = vpop.eup %328 }
  0x3b   :  { %v230_v35 = vmul.f32 %v329_v12, %v225_v15  ;;  %v245_v9 = vmul.f32 %v329_v12, %v240_v50 }
  0x3d   :  { %235 = vst [vmem:[%s668_s3 + $0x20] sm:$0x7] %v230_v35  ;;  %250 = vst [vmem:[%s669_s4 + $0x20] sm:$0x7] %v245_v9 }

// kernel: forward.37
= control target key start
LH: loop header
LB: loop body
LE: loop exit
PB: predicated region body
PF: predicated region fallthrough
CT: control target
= control target key end

     0   :  { %s1053_s12 = smov 0   ;;  %s1172_s0 = inlined_call_operand.vmem [shape: bf16[2304,32], index: 0, kind: input, shape index: {}]   ;;  %s1173_s1 = inlined_call_operand.vmem [shape: bf16[32,128], index: 1, kind: input, shape index: {}]   ;;  %s1174_s2 = inlined_call_operand.vmem [shape: f32[1,128], index: 2, kind: input, shape index: {}]   ;;  %s1175_s3 = inlined_call_operand.vmem [shape: bf16[2304,128], index: 3, kind: output, shape index: {}]  }
   0x1 LB: > { %s736_s13 = sadd.s32 4294967295, %s1031_s12   ;;  %p740_p0 = scmp.ge.s32.totalorder %s1031_s12, 1  ;;  %s1031_s12 = sphi %s1053_s12, %s13_s12  }
   0x2   : > { %p138_p1 = scmp.lt.s32.totalorder %s1031_s12, 10 }
   0x4   : > { %p139_p2 = pnand %p740_p0, %p138_p1 }
   0x5   : > { %v1007_v0 = vld [vmem:[%s1173_s1] sm:$0xff] (!%p139_p2)   ;;  %s741_s16 = sshll.u32 (!%p139_p2), %s736_s13, 5  ;;  %v1008_v1 = vld [vmem:[%s1173_s1 + $0x8] sm:$0xff] (!%p139_p2)   ;;  %vm310_vm0 = vcmask (!%p139_p2), 261120  }
   0x6   : > { %142 = sbr.rel (%p139_p2) target bundleno = 263 (0x107), region = 32  ;;  %p163_p3 = scmp.lt.s32.totalorder (!%p139_p2), %s741_s16, 287  ;;  %959 = vmatprep.subr.bf16.mxu0 (!%p139_p2), %v1007_v0  ;;  %995 = vmatprep.subr.bf16.mxu1 (!%p139_p2), %v1007_v0  ;;  %v1112_v19 = vld [vmem:[%s1174_s2] ss:$0 sm:$0xff] (!%p139_p2) }
   0x7   : > { %960 = vmatpush3.bf16.msra.mxu0 (!%p139_p2), %v1007_v0  ;;  %997 = vmatpush3.bf16.msra.mxu1 (!%p139_p2), %v1007_v0 }
   0x8   : > { %961 = vmatprep.subr.bf16.mxu0 (!%p139_p2), %v1008_v1  ;;  %996 = vmatprep.subr.bf16.mxu1 (!%p139_p2), %v1008_v1 }
   0xb   : > { %962 = vmatpush3.bf16.msra.mxu0 (!%p139_p2), %v1008_v1  ;;  %998 = vmatpush3.bf16.msra.mxu1 (!%p139_p2), %v1008_v1 }
   0xd   : > { %s1177_s16 = smov (!%p163_p3, %s741_s16), 287 }
   0xe   : > { %s742_s19 = sshll.u32 %s1177_s16, 2 }
   0xf   : > { %s1075_s22 = scalar_lea.vmem %s1172_s0, %s742_s19  ;;  %s1123_s27 = scalar_lea.vmem %s1175_s3, %s742_s19 }
  0x10   : > { %v1009_v2 = vld [vmem:[%s1075_s22] sm:$0xff]   ;;  %v1011_v4 = vld [vmem:[%s1075_s22 + $0x8] sm:$0xff]   ;;  %v1013_v6 = vld [vmem:[%s1075_s22 + $0x10] sm:$0xff]  }
  0x11   : > { %v1010_v3 = vld [vmem:[%s1075_s22 + $0x40] sm:$0xff]   ;;  %963 = vmatprep.mubr.msk.bf16.mxu0 %vm310_vm0, %v1009_v2  ;;  %v1012_v5 = vld [vmem:[%s1075_s22 + $0x48] sm:$0xff]   ;;  %v1014_v7 = vld [vmem:[%s1075_s22 + $0x50] sm:$0xff]  }
  0x12   : > { %979 = vmatprep.mubr.msk.bf16.mxu1 %vm310_vm0, %v1010_v3  ;;  %964 = vmatmul.mubr.msk.bf16.vlgmr.msra.gmra.mrb[0].mxu0 %vm310_vm0, %v1011_v4  ;;  %v1015_v8 = vld [vmem:[%s1075_s22 + $0x18] sm:$0xff]   ;;  %v1017_v10 = vld [vmem:[%s1075_s22 + $0x20] sm:$0xff]   ;;  %v1019_v12 = vld [vmem:[%s1075_s22 + $0x28] sm:$0xff]  }
  0x13   : > { %980 = vmatmul.mubr.msk.bf16.vlgmr.msra.gmra.mrb[0].mxu1 %vm310_vm0, %v1012_v5  ;;  %967 = vmatprep.mubr.msk.bf16.mxu0 %vm310_vm0, %v1013_v6  ;;  %v1016_v9 = vld [vmem:[%s1075_s22 + $0x58] sm:$0xff]   ;;  %v1018_v11 = vld [vmem:[%s1075_s22 + $0x60] sm:$0xff]   ;;  %v1020_v13 = vld [vmem:[%s1075_s22 + $0x68] sm:$0xff]  }
  0x14   : > { %983 = vmatprep.mubr.msk.bf16.mxu1 %vm310_vm0, %v1014_v7  ;;  %v1021_v14 = vld [vmem:[%s1075_s22 + $0x30] sm:$0xff]   ;;  %v1023_v16 = vld [vmem:[%s1075_s22 + $0x38] sm:$0xff]  }
  0x15   : > { %v1022_v15 = vld [vmem:[%s1075_s22 + $0x70] sm:$0xff]   ;;  %v1024_v17 = vld [vmem:[%s1075_s22 + $0x78] sm:$0xff]  }
  0x1a   : > { %968 = vmatmul.mubr.msk.bf16.gmra.mrb[4].mxu0 %vm310_vm0, %v1015_v8 }
  0x1b   : > { %984 = vmatmul.mubr.msk.bf16.gmra.mrb[4].mxu1 %vm310_vm0, %v1016_v9  ;;  %971 = vmatprep.mubr.msk.bf16.mxu0 %vm310_vm0, %v1017_v10 }
  0x1c   : > { %987 = vmatprep.mubr.msk.bf16.mxu1 %vm310_vm0, %v1018_v11 }
  0x22   : > { %972 = vmatmul.mubr.msk.bf16.gmra.mrb[8].mxu0 %vm310_vm0, %v1019_v12 }
  0x23   : > { %988 = vmatmul.mubr.msk.bf16.gmra.mrb[8].mxu1 %vm310_vm0, %v1020_v13  ;;  %975 = vmatprep.mubr.msk.bf16.mxu0 %vm310_vm0, %v1021_v14 }
  0x24   : > { %991 = vmatprep.mubr.msk.bf16.mxu1 %vm310_vm0, %v1022_v15 }
  0x2a   : > { %976 = vmatmul.mubr.msk.bf16.gmra.mrb[12].mxu0 %vm310_vm0, %v1023_v16 }
  0x2b   : > { %992 = vmatmul.mubr.msk.bf16.gmra.mrb[12].mxu1 %vm310_vm0, %v1024_v17 }
  0xe5   : > { %v965_v18 = vpop.f32.mrb[0].mxu0 }
  0xe6   : > { %v981_v20 = vpop.f32.mrb[0].mxu1  ;;  %v393_v21 = vpop.f32.mrb[1].mxu0  ;;  %v402_v24 = vadd.f32 %v965_v18, %v1112_v19 }
  0xe7   : > { %v457_v22 = vpop.f32.mrb[1].mxu1  ;;  %v966_v23 = vpop.f32.mrb[2].mxu0  ;;  %v466_v28 = vadd.f32 %v981_v20, %v1112_v19  ;;  %v394_v29 = vadd.f32 %v1112_v19, %v393_v21 }
  0xe8   : > { %v405_v25 = vadd.f32 %v966_v23, %v1112_v19  ;;  %v982_v26 = vpop.f32.mrb[2].mxu1  ;;  %v396_v27 = vpop.f32.mrb[3].mxu0  ;;  %v458_v33 = vadd.f32 %v1112_v19, %v457_v22 }
  0xe9   : > { %v469_v30 = vadd.f32 %v982_v26, %v1112_v19  ;;  %v397_v31 = vadd.f32 %v1112_v19, %v396_v27  ;;  %v460_v32 = vpop.f32.mrb[3].mxu1 }
  0xea   : > { %v854_v34 = vpack.c.bf16 %v405_v25, %v402_v24  ;;  %v461_v35 = vadd.f32 %v1112_v19, %v460_v32 }
  0xeb   : > { %v894_v36 = vpack.c.bf16 %v469_v30, %v466_v28  ;;  %v849_v37 = vpack.c.bf16 %v397_v31, %v394_v29 }
  0xec   : > { %926 = vst [vmem:[%s1123_s27 + $0x8] sm:$0xff] %v854_v34   ;;  %v889_v38 = vpack.c.bf16 %v461_v35, %v458_v33 }
  0xed   : > { %934 = vst [vmem:[%s1123_s27 + $0x48] sm:$0xff] %v894_v36   ;;  %850 = vst [vmem:[%s1123_s27] sm:$0xff] %v849_v37   ;;  %v969_v39 = vpop.f32.mrb[4].mxu0 }
  0xee   : > { %933 = vst [vmem:[%s1123_s27 + $0x40] sm:$0xff] %v889_v38   ;;  %v985_v40 = vpop.f32.mrb[4].mxu1  ;;  %v409_v41 = vpop.f32.mrb[5].mxu0  ;;  %v418_v44 = vadd.f32 %v969_v39, %v1112_v19 }
  0xef   : > { %v473_v42 = vpop.f32.mrb[5].mxu1  ;;  %v970_v43 = vpop.f32.mrb[6].mxu0  ;;  %v482_v48 = vadd.f32 %v985_v40, %v1112_v19  ;;  %v410_v49 = vadd.f32 %v1112_v19, %v409_v41 }
  0xf0   : > { %v421_v45 = vadd.f32 %v970_v43, %v1112_v19  ;;  %v986_v46 = vpop.f32.mrb[6].mxu1  ;;  %v412_v47 = vpop.f32.mrb[7].mxu0  ;;  %v474_v53 = vadd.f32 %v1112_v19, %v473_v42 }
  0xf1   : > { %v485_v50 = vadd.f32 %v986_v46, %v1112_v19  ;;  %v413_v51 = vadd.f32 %v1112_v19, %v412_v47  ;;  %v476_v52 = vpop.f32.mrb[7].mxu1 }
  0xf2   : > { %v864_v54 = vpack.c.bf16 %v421_v45, %v418_v44  ;;  %v477_v55 = vadd.f32 %v1112_v19, %v476_v52 }
  0xf3   : > { %v904_v56 = vpack.c.bf16 %v485_v50, %v482_v48  ;;  %v859_v57 = vpack.c.bf16 %v413_v51, %v410_v49 }
  0xf4   : > { %928 = vst [vmem:[%s1123_s27 + $0x18] sm:$0xff] %v864_v54   ;;  %v899_v58 = vpack.c.bf16 %v477_v55, %v474_v53 }
  0xf5   : > { %936 = vst [vmem:[%s1123_s27 + $0x58] sm:$0xff] %v904_v56   ;;  %927 = vst [vmem:[%s1123_s27 + $0x10] sm:$0xff] %v859_v57   ;;  %v973_v59 = vpop.f32.mrb[8].mxu0 }
  0xf6   : > { %935 = vst [vmem:[%s1123_s27 + $0x50] sm:$0xff] %v899_v58   ;;  %v989_v60 = vpop.f32.mrb[8].mxu1  ;;  %v425_v61 = vpop.f32.mrb[9].mxu0  ;;  %v434_v0 = vadd.f32 %v973_v59, %v1112_v19 }
  0xf7   : > { %v489_v62 = vpop.f32.mrb[9].mxu1  ;;  %v974_v63 = vpop.f32.mrb[10].mxu0  ;;  %v498_v4 = vadd.f32 %v989_v60, %v1112_v19  ;;  %v426_v5 = vadd.f32 %v1112_v19, %v425_v61 }
  0xf8   : > { %v437_v1 = vadd.f32 %v974_v63, %v1112_v19  ;;  %v990_v2 = vpop.f32.mrb[10].mxu1  ;;  %v428_v3 = vpop.f32.mrb[11].mxu0  ;;  %v490_v9 = vadd.f32 %v1112_v19, %v489_v62 }
  0xf9   : > { %v501_v6 = vadd.f32 %v990_v2, %v1112_v19  ;;  %v429_v7 = vadd.f32 %v1112_v19, %v428_v3  ;;  %v492_v8 = vpop.f32.mrb[11].mxu1 }
  0xfa   : > { %v874_v10 = vpack.c.bf16 %v437_v1, %v434_v0  ;;  %v493_v11 = vadd.f32 %v1112_v19, %v492_v8 }
  0xfb   : > { %v914_v12 = vpack.c.bf16 %v501_v6, %v498_v4  ;;  %v869_v13 = vpack.c.bf16 %v429_v7, %v426_v5 }
  0xfc   : > { %930 = vst [vmem:[%s1123_s27 + $0x28] sm:$0xff] %v874_v10   ;;  %v909_v14 = vpack.c.bf16 %v493_v11, %v490_v9 }
  0xfd   : > { %938 = vst [vmem:[%s1123_s27 + $0x68] sm:$0xff] %v914_v12   ;;  %929 = vst [vmem:[%s1123_s27 + $0x20] sm:$0xff] %v869_v13   ;;  %v977_v15 = vpop.f32.mrb[12].mxu0 }
  0xfe   : > { %937 = vst [vmem:[%s1123_s27 + $0x60] sm:$0xff] %v909_v14   ;;  %v993_v16 = vpop.f32.mrb[12].mxu1  ;;  %v441_v17 = vpop.f32.mrb[13].mxu0  ;;  %v450_v21 = vadd.f32 %v977_v15, %v1112_v19 }
  0xff   : > { %v505_v18 = vpop.f32.mrb[13].mxu1  ;;  %v978_v20 = vpop.f32.mrb[14].mxu0  ;;  %v514_v25 = vadd.f32 %v993_v16, %v1112_v19  ;;  %v442_v26 = vadd.f32 %v1112_v19, %v441_v17 }
 0x100   : > { %v453_v22 = vadd.f32 %v978_v20, %v1112_v19  ;;  %v994_v23 = vpop.f32.mrb[14].mxu1  ;;  %v444_v24 = vpop.f32.mrb[15].mxu0  ;;  %v506_v30 = vadd.f32 %v1112_v19, %v505_v18 }
 0x101   : > { %v517_v27 = vadd.f32 %v994_v23, %v1112_v19  ;;  %v445_v28 = vadd.f32 %v1112_v19, %v444_v24  ;;  %v508_v29 = vpop.f32.mrb[15].mxu1 }
 0x102   : > { %v884_v31 = vpack.c.bf16 %v453_v22, %v450_v21  ;;  %v509_v32 = vadd.f32 %v1112_v19, %v508_v29 }
 0x103   : > { %v924_v33 = vpack.c.bf16 %v517_v27, %v514_v25  ;;  %v879_v34 = vpack.c.bf16 %v445_v28, %v442_v26 }
 0x104   : > { %932 = vst [vmem:[%s1123_s27 + $0x38] sm:$0xff] %v884_v31   ;;  %v919_v35 = vpack.c.bf16 %v509_v32, %v506_v30 }
 0x105   : > { %940 = vst [vmem:[%s1123_s27 + $0x78] sm:$0xff] %v924_v33   ;;  %931 = vst [vmem:[%s1123_s27 + $0x30] sm:$0xff] %v879_v34  }
 0x106   : > { %939 = vst [vmem:[%s1123_s27 + $0x70] sm:$0xff] %v919_v35  }
 0x107 PF: > { %s13_s12 = sadd.s32 1, %s1031_s12  }
 0x108   : > { %p10_p4 = scmp.ge.s32.totalorder %s13_s12, 11  }
 0x10a   :  { %12 = sbr.rel (!%p10_p4) target bundleno = 1 (0x1), region = 62 }

// kernel: forward.38
= control target key start
LH: loop header
LB: loop body
LE: loop exit
PB: predicated region body
PF: predicated region fallthrough
CT: control target
= control target key end

     0   :  { %s1098_s12 = smov 0   ;;  %s1226_s0 = inlined_call_operand.vmem [shape: bf16[2304,80], index: 0, kind: input, shape index: {}]   ;;  %s1227_s1 = inlined_call_operand.vmem [shape: bf16[80,128], index: 1, kind: input, shape index: {}]   ;;  %s1228_s2 = inlined_call_operand.vmem [shape: f32[1,128], index: 2, kind: input, shape index: {}]   ;;  %s1229_s3 = inlined_call_operand.vmem [shape: bf16[2304,128], index: 3, kind: output, shape index: {}]  }
   0x1 LB: > { %s760_s13 = sadd.s32 4294967295, %s1076_s12   ;;  %p764_p0 = scmp.ge.s32.totalorder %s1076_s12, 1  ;;  %s1076_s12 = sphi %s1098_s12, %s13_s12  }
   0x2   : > { %p138_p1 = scmp.lt.s32.totalorder %s1076_s12, 10 }
   0x4   : > { %p139_p2 = pnand %p764_p0, %p138_p1 }
   0x5   : > { %v1049_v0 = vld [vmem:[%s1227_s1] sm:$0xff] (!%p139_p2)   ;;  %s765_s16 = sshll.u32 (!%p139_p2), %s760_s13, 5  ;;  %v1050_v1 = vld [vmem:[%s1227_s1 + $0x8] sm:$0xff] (!%p139_p2)   ;;  %v1051_v2 = vld [vmem:[%s1227_s1 + $0x10] sm:$0xff] (!%p139_p2)   ;;  %vm334_vm0 = vcmask (!%p139_p2), 654336  }
   0x6   : > { %142 = sbr.rel (%p139_p2) target bundleno = 270 (0x10e), region = 32  ;;  %p163_p3 = scmp.lt.s32.totalorder (!%p139_p2), %s765_s16, 287  ;;  %989 = vmatprep.subr.bf16.mxu0 (!%p139_p2), %v1049_v0  ;;  %1031 = vmatprep.subr.bf16.mxu1 (!%p139_p2), %v1049_v0  ;;  %v1052_v3 = vld [vmem:[%s1227_s1 + $0x18] sm:$0xff] (!%p139_p2)   ;;  %v1053_v6 = vld [vmem:[%s1227_s1 + $0x20] sm:$0xff] (!%p139_p2)  }
   0x7   : > { %990 = vmatpush3.bf16.msra.mxu0 (!%p139_p2), %v1049_v0  ;;  %1036 = vmatpush3.bf16.msra.mxu1 (!%p139_p2), %v1049_v0  ;;  %v1166_v22 = vld [vmem:[%s1228_s2] ss:$0 sm:$0xff] (!%p139_p2) }
   0x8   : > { %991 = vmatprep.subr.bf16.mxu0 (!%p139_p2), %v1050_v1  ;;  %1032 = vmatprep.subr.bf16.mxu1 (!%p139_p2), %v1050_v1 }
   0xb   : > { %992 = vmatpush3.bf16.msra.mxu0 (!%p139_p2), %v1050_v1  ;;  %1037 = vmatpush3.bf16.msra.mxu1 (!%p139_p2), %v1050_v1 }
   0xc   : > { %993 = vmatprep.subr.bf16.mxu0 (!%p139_p2), %v1051_v2  ;;  %1033 = vmatprep.subr.bf16.mxu1 (!%p139_p2), %v1051_v2 }
   0xd   : > { %s1231_s16 = smov (!%p163_p3, %s765_s16), 287 }
   0xe   : > { %s766_s21 = sshll.u32 %s1231_s16, 2 }
   0xf   : > { %s1126_s26 = scalar_lea.vmem %s1226_s0, %s766_s21  ;;  %994 = vmatpush3.bf16.msra.mxu0 %v1051_v2  ;;  %1038 = vmatpush3.bf16.msra.mxu1 %v1051_v2  ;;  %s1179_s6 = scalar_lea.vmem %s1229_s3, %s766_s21 }
  0x10   : > { %v1054_v4 = vld [vmem:[%s1126_s26] sm:$0xff]   ;;  %995 = vmatprep.subr.bf16.mxu0 %v1052_v3  ;;  %1034 = vmatprep.subr.bf16.mxu1 %v1052_v3  ;;  %v1056_v7 = vld [vmem:[%s1126_s26 + $0x8] sm:$0xff]   ;;  %v1058_v9 = vld [vmem:[%s1126_s26 + $0x10] sm:$0xff]  }
  0x11   : > { %v1055_v5 = vld [vmem:[%s1126_s26 + $0x40] sm:$0xff]   ;;  %999 = vmatprep.mubr.msk.bf16.mxu0 %vm334_vm0, %v1054_v4  ;;  %v1057_v8 = vld [vmem:[%s1126_s26 + $0x48] sm:$0xff]   ;;  %v1059_v10 = vld [vmem:[%s1126_s26 + $0x50] sm:$0xff]  }
  0x12   : > { %1015 = vmatprep.mubr.msk.bf16.mxu1 %vm334_vm0, %v1055_v5  ;;  %v1060_v11 = vld [vmem:[%s1126_s26 + $0x18] sm:$0xff]   ;;  %v1062_v13 = vld [vmem:[%s1126_s26 + $0x20] sm:$0xff]   ;;  %v1064_v15 = vld [vmem:[%s1126_s26 + $0x28] sm:$0xff]  }
  0x13   : > { %996 = vmatpush3.bf16.msra.mxu0 %v1052_v3  ;;  %1039 = vmatpush3.bf16.msra.mxu1 %v1052_v3  ;;  %v1061_v12 = vld [vmem:[%s1126_s26 + $0x58] sm:$0xff]   ;;  %v1063_v14 = vld [vmem:[%s1126_s26 + $0x60] sm:$0xff]   ;;  %v1065_v16 = vld [vmem:[%s1126_s26 + $0x68] sm:$0xff]  }
  0x14   : > { %997 = vmatprep.subr.bf16.mxu0 %v1053_v6  ;;  %1035 = vmatprep.subr.bf16.mxu1 %v1053_v6  ;;  %v1066_v17 = vld [vmem:[%s1126_s26 + $0x30] sm:$0xff]   ;;  %v1068_v19 = vld [vmem:[%s1126_s26 + $0x38] sm:$0xff]  }
  0x15   : > { %v1067_v18 = vld [vmem:[%s1126_s26 + $0x70] sm:$0xff]   ;;  %v1069_v20 = vld [vmem:[%s1126_s26 + $0x78] sm:$0xff]  }
  0x17   : > { %998 = vmatpush3.bf16.msra.mxu0 %v1053_v6  ;;  %1040 = vmatpush3.bf16.msra.mxu1 %v1053_v6 }
  0x1a   : > { %1000 = vmatmul.mubr.msk.bf16.vlgmr.msra.gmra.mrb[0].mxu0 %vm334_vm0, %v1056_v7  ;;  %1016 = vmatmul.mubr.msk.bf16.vlgmr.msra.gmra.mrb[0].mxu1 %vm334_vm0, %v1057_v8 }
  0x1b   : > { %1003 = vmatprep.mubr.msk.bf16.mxu0 %vm334_vm0, %v1058_v9  ;;  %1019 = vmatprep.mubr.msk.bf16.mxu1 %vm334_vm0, %v1059_v10 }
  0x22   : > { %1004 = vmatmul.mubr.msk.bf16.gmra.mrb[4].mxu0 %vm334_vm0, %v1060_v11  ;;  %1020 = vmatmul.mubr.msk.bf16.gmra.mrb[4].mxu1 %vm334_vm0, %v1061_v12 }
  0x23   : > { %1007 = vmatprep.mubr.msk.bf16.mxu0 %vm334_vm0, %v1062_v13  ;;  %1023 = vmatprep.mubr.msk.bf16.mxu1 %vm334_vm0, %v1063_v14 }
  0x2a   : > { %1008 = vmatmul.mubr.msk.bf16.gmra.mrb[8].mxu0 %vm334_vm0, %v1064_v15  ;;  %1024 = vmatmul.mubr.msk.bf16.gmra.mrb[8].mxu1 %vm334_vm0, %v1065_v16 }
  0x2b   : > { %1011 = vmatprep.mubr.msk.bf16.mxu0 %vm334_vm0, %v1066_v17  ;;  %1027 = vmatprep.mubr.msk.bf16.mxu1 %vm334_vm0, %v1067_v18 }
  0x32   : > { %1012 = vmatmul.mubr.msk.bf16.gmra.mrb[12].mxu0 %vm334_vm0, %v1068_v19  ;;  %1028 = vmatmul.mubr.msk.bf16.gmra.mrb[12].mxu1 %vm334_vm0, %v1069_v20 }
  0xed   : > { %v1001_v21 = vpop.f32.mrb[0].mxu0  ;;  %v1017_v23 = vpop.f32.mrb[0].mxu1 }
  0xee   : > { %v417_v24 = vpop.f32.mrb[1].mxu0  ;;  %v481_v25 = vpop.f32.mrb[1].mxu1  ;;  %v426_v28 = vadd.f32 %v1001_v21, %v1166_v22  ;;  %v490_v29 = vadd.f32 %v1017_v23, %v1166_v22 }
  0xef   : > { %v1002_v26 = vpop.f32.mrb[2].mxu0  ;;  %v1018_v27 = vpop.f32.mrb[2].mxu1  ;;  %v418_v34 = vadd.f32 %v1166_v22, %v417_v24  ;;  %v482_v35 = vadd.f32 %v1166_v22, %v481_v25 }
  0xf0   : > { %v429_v30 = vadd.f32 %v1002_v26, %v1166_v22  ;;  %v493_v31 = vadd.f32 %v1018_v27, %v1166_v22  ;;  %v420_v32 = vpop.f32.mrb[3].mxu0  ;;  %v484_v33 = vpop.f32.mrb[3].mxu1 }
  0xf1   : > { %v421_v36 = vadd.f32 %v1166_v22, %v420_v32  ;;  %v485_v37 = vadd.f32 %v1166_v22, %v484_v33 }
  0xf2   : > { %v881_v38 = vpack.c.bf16 %v429_v30, %v426_v28  ;;  %v921_v39 = vpack.c.bf16 %v493_v31, %v490_v29 }
  0xf3   : > { %v876_v40 = vpack.c.bf16 %v421_v36, %v418_v34  ;;  %v916_v41 = vpack.c.bf16 %v485_v37, %v482_v35 }
  0xf4   : > { %953 = vst [vmem:[%s1179_s6 + $0x8] sm:$0xff] %v881_v38   ;;  %961 = vst [vmem:[%s1179_s6 + $0x48] sm:$0xff] %v921_v39  }
  0xf5   : > { %877 = vst [vmem:[%s1179_s6] sm:$0xff] %v876_v40   ;;  %960 = vst [vmem:[%s1179_s6 + $0x40] sm:$0xff] %v916_v41   ;;  %v1005_v42 = vpop.f32.mrb[4].mxu0  ;;  %v1021_v43 = vpop.f32.mrb[4].mxu1 }
  0xf6   : > { %v433_v44 = vpop.f32.mrb[5].mxu0  ;;  %v497_v45 = vpop.f32.mrb[5].mxu1  ;;  %v442_v48 = vadd.f32 %v1005_v42, %v1166_v22  ;;  %v506_v49 = vadd.f32 %v1021_v43, %v1166_v22 }
  0xf7   : > { %v1006_v46 = vpop.f32.mrb[6].mxu0  ;;  %v1022_v47 = vpop.f32.mrb[6].mxu1  ;;  %v434_v54 = vadd.f32 %v1166_v22, %v433_v44  ;;  %v498_v55 = vadd.f32 %v1166_v22, %v497_v45 }
  0xf8   : > { %v445_v50 = vadd.f32 %v1006_v46, %v1166_v22  ;;  %v509_v51 = vadd.f32 %v1022_v47, %v1166_v22  ;;  %v436_v52 = vpop.f32.mrb[7].mxu0  ;;  %v500_v53 = vpop.f32.mrb[7].mxu1 }
  0xf9   : > { %v437_v56 = vadd.f32 %v1166_v22, %v436_v52  ;;  %v501_v57 = vadd.f32 %v1166_v22, %v500_v53 }
  0xfa   : > { %v891_v58 = vpack.c.bf16 %v445_v50, %v442_v48  ;;  %v931_v59 = vpack.c.bf16 %v509_v51, %v506_v49 }
  0xfb   : > { %v886_v60 = vpack.c.bf16 %v437_v56, %v434_v54  ;;  %v926_v61 = vpack.c.bf16 %v501_v57, %v498_v55 }
  0xfc   : > { %955 = vst [vmem:[%s1179_s6 + $0x18] sm:$0xff] %v891_v58   ;;  %963 = vst [vmem:[%s1179_s6 + $0x58] sm:$0xff] %v931_v59  }
  0xfd   : > { %954 = vst [vmem:[%s1179_s6 + $0x10] sm:$0xff] %v886_v60   ;;  %962 = vst [vmem:[%s1179_s6 + $0x50] sm:$0xff] %v926_v61   ;;  %v1009_v62 = vpop.f32.mrb[8].mxu0  ;;  %v1025_v63 = vpop.f32.mrb[8].mxu1 }
  0xfe   : > { %v449_v0 = vpop.f32.mrb[9].mxu0  ;;  %v513_v1 = vpop.f32.mrb[9].mxu1  ;;  %v458_v4 = vadd.f32 %v1009_v62, %v1166_v22  ;;  %v522_v5 = vadd.f32 %v1025_v63, %v1166_v22 }
  0xff   : > { %v1010_v2 = vpop.f32.mrb[10].mxu0  ;;  %v1026_v3 = vpop.f32.mrb[10].mxu1  ;;  %v450_v10 = vadd.f32 %v1166_v22, %v449_v0  ;;  %v514_v11 = vadd.f32 %v1166_v22, %v513_v1 }
 0x100   : > { %v461_v6 = vadd.f32 %v1010_v2, %v1166_v22  ;;  %v525_v7 = vadd.f32 %v1026_v3, %v1166_v22  ;;  %v452_v8 = vpop.f32.mrb[11].mxu0  ;;  %v516_v9 = vpop.f32.mrb[11].mxu1 }
 0x101   : > { %v453_v12 = vadd.f32 %v1166_v22, %v452_v8  ;;  %v517_v13 = vadd.f32 %v1166_v22, %v516_v9 }
 0x102   : > { %v901_v14 = vpack.c.bf16 %v461_v6, %v458_v4  ;;  %v941_v15 = vpack.c.bf16 %v525_v7, %v522_v5 }
 0x103   : > { %v896_v16 = vpack.c.bf16 %v453_v12, %v450_v10  ;;  %v936_v17 = vpack.c.bf16 %v517_v13, %v514_v11 }
 0x104   : > { %957 = vst [vmem:[%s1179_s6 + $0x28] sm:$0xff] %v901_v14   ;;  %965 = vst [vmem:[%s1179_s6 + $0x68] sm:$0xff] %v941_v15  }
 0x105   : > { %956 = vst [vmem:[%s1179_s6 + $0x20] sm:$0xff] %v896_v16   ;;  %964 = vst [vmem:[%s1179_s6 + $0x60] sm:$0xff] %v936_v17   ;;  %v1013_v18 = vpop.f32.mrb[12].mxu0  ;;  %v1029_v19 = vpop.f32.mrb[12].mxu1 }
 0x106   : > { %v465_v20 = vpop.f32.mrb[13].mxu0  ;;  %v529_v21 = vpop.f32.mrb[13].mxu1  ;;  %v474_v25 = vadd.f32 %v1013_v18, %v1166_v22  ;;  %v538_v26 = vadd.f32 %v1029_v19, %v1166_v22 }
 0x107   : > { %v1014_v23 = vpop.f32.mrb[14].mxu0  ;;  %v1030_v24 = vpop.f32.mrb[14].mxu1  ;;  %v466_v31 = vadd.f32 %v1166_v22, %v465_v20  ;;  %v530_v32 = vadd.f32 %v1166_v22, %v529_v21 }
 0x108   : > { %v477_v27 = vadd.f32 %v1014_v23, %v1166_v22  ;;  %v541_v28 = vadd.f32 %v1030_v24, %v1166_v22  ;;  %v468_v29 = vpop.f32.mrb[15].mxu0  ;;  %v532_v30 = vpop.f32.mrb[15].mxu1 }
 0x109   : > { %v469_v33 = vadd.f32 %v1166_v22, %v468_v29  ;;  %v533_v34 = vadd.f32 %v1166_v22, %v532_v30 }
 0x10a   : > { %v911_v35 = vpack.c.bf16 %v477_v27, %v474_v25  ;;  %v951_v36 = vpack.c.bf16 %v541_v28, %v538_v26 }
 0x10b   : > { %v906_v37 = vpack.c.bf16 %v469_v33, %v466_v31  ;;  %v946_v38 = vpack.c.bf16 %v533_v34, %v530_v32 }
 0x10c   : > { %959 = vst [vmem:[%s1179_s6 + $0x38] sm:$0xff] %v911_v35   ;;  %967 = vst [vmem:[%s1179_s6 + $0x78] sm:$0xff] %v951_v36  }
 0x10d   : > { %958 = vst [vmem:[%s1179_s6 + $0x30] sm:$0xff] %v906_v37   ;;  %966 = vst [vmem:[%s1179_s6 + $0x70] sm:$0xff] %v946_v38  }
 0x10e PF: > { %s13_s12 = sadd.s32 1, %s1076_s12  }
 0x10f   : > { %p10_p4 = scmp.ge.s32.totalorder %s13_s12, 11  }
 0x111   :  { %12 = sbr.rel (!%p10_p4) target bundleno = 1 (0x1), region = 62 }

// kernel: forward.39
= control target key start
LH: loop header
LB: loop body
LE: loop exit
PB: predicated region body
PF: predicated region fallthrough
CT: control target
= control target key end

     0   :  { %s1098_s12 = smov 0   ;;  %s1226_s0 = inlined_call_operand.vmem [shape: bf16[512,80], index: 0, kind: input, shape index: {}]   ;;  %s1227_s1 = inlined_call_operand.vmem [shape: bf16[80,128], index: 1, kind: input, shape index: {}]   ;;  %s1228_s2 = inlined_call_operand.vmem [shape: f32[1,128], index: 2, kind: input, shape index: {}]   ;;  %s1229_s3 = inlined_call_operand.vmem [shape: bf16[512,128], index: 3, kind: output, shape index: {}]  }
   0x1 LB: > { %s760_s13 = sadd.s32 4294967295, %s1076_s12   ;;  %p764_p0 = scmp.ge.s32.totalorder %s1076_s12, 1  ;;  %s1076_s12 = sphi %s1098_s12, %s13_s12  }
   0x2   : > { %p138_p1 = scmp.lt.s32.totalorder %s1076_s12, 3 }
   0x4   : > { %p139_p2 = pnand %p764_p0, %p138_p1 }
   0x5   : > { %v1049_v0 = vld [vmem:[%s1227_s1] sm:$0xff] (!%p139_p2)   ;;  %s765_s16 = sshll.u32 (!%p139_p2), %s760_s13, 5  ;;  %v1050_v1 = vld [vmem:[%s1227_s1 + $0x8] sm:$0xff] (!%p139_p2)   ;;  %v1051_v2 = vld [vmem:[%s1227_s1 + $0x10] sm:$0xff] (!%p139_p2)   ;;  %vm334_vm0 = vcmask (!%p139_p2), 654336  }
   0x6   : > { %142 = sbr.rel (%p139_p2) target bundleno = 270 (0x10e), region = 32  ;;  %p163_p3 = scmp.lt.s32.totalorder (!%p139_p2), %s765_s16, 63  ;;  %989 = vmatprep.subr.bf16.mxu0 (!%p139_p2), %v1049_v0  ;;  %1031 = vmatprep.subr.bf16.mxu1 (!%p139_p2), %v1049_v0  ;;  %v1052_v3 = vld [vmem:[%s1227_s1 + $0x18] sm:$0xff] (!%p139_p2)   ;;  %v1053_v6 = vld [vmem:[%s1227_s1 + $0x20] sm:$0xff] (!%p139_p2)  }
   0x7   : > { %990 = vmatpush3.bf16.msra.mxu0 (!%p139_p2), %v1049_v0  ;;  %1036 = vmatpush3.bf16.msra.mxu1 (!%p139_p2), %v1049_v0  ;;  %v1166_v22 = vld [vmem:[%s1228_s2] ss:$0 sm:$0xff] (!%p139_p2) }
   0x8   : > { %991 = vmatprep.subr.bf16.mxu0 (!%p139_p2), %v1050_v1  ;;  %1032 = vmatprep.subr.bf16.mxu1 (!%p139_p2), %v1050_v1 }
   0xb   : > { %992 = vmatpush3.bf16.msra.mxu0 (!%p139_p2), %v1050_v1  ;;  %1037 = vmatpush3.bf16.msra.mxu1 (!%p139_p2), %v1050_v1 }
   0xc   : > { %993 = vmatprep.subr.bf16.mxu0 (!%p139_p2), %v1051_v2  ;;  %1033 = vmatprep.subr.bf16.mxu1 (!%p139_p2), %v1051_v2 }
   0xd   : > { %s1231_s16 = smov (!%p163_p3, %s765_s16), 63 }
   0xe   : > { %s766_s21 = sshll.u32 %s1231_s16, 2 }
   0xf   : > { %s1126_s26 = scalar_lea.vmem %s1226_s0, %s766_s21  ;;  %994 = vmatpush3.bf16.msra.mxu0 %v1051_v2  ;;  %1038 = vmatpush3.bf16.msra.mxu1 %v1051_v2  ;;  %s1179_s6 = scalar_lea.vmem %s1229_s3, %s766_s21 }
  0x10   : > { %v1054_v4 = vld [vmem:[%s1126_s26] sm:$0xff]   ;;  %995 = vmatprep.subr.bf16.mxu0 %v1052_v3  ;;  %1034 = vmatprep.subr.bf16.mxu1 %v1052_v3  ;;  %v1056_v7 = vld [vmem:[%s1126_s26 + $0x8] sm:$0xff]   ;;  %v1058_v9 = vld [vmem:[%s1126_s26 + $0x10] sm:$0xff]  }
  0x11   : > { %v1055_v5 = vld [vmem:[%s1126_s26 + $0x40] sm:$0xff]   ;;  %999 = vmatprep.mubr.msk.bf16.mxu0 %vm334_vm0, %v1054_v4  ;;  %v1057_v8 = vld [vmem:[%s1126_s26 + $0x48] sm:$0xff]   ;;  %v1059_v10 = vld [vmem:[%s1126_s26 + $0x50] sm:$0xff]  }
  0x12   : > { %1015 = vmatprep.mubr.msk.bf16.mxu1 %vm334_vm0, %v1055_v5  ;;  %v1060_v11 = vld [vmem:[%s1126_s26 + $0x18] sm:$0xff]   ;;  %v1062_v13 = vld [vmem:[%s1126_s26 + $0x20] sm:$0xff]   ;;  %v1064_v15 = vld [vmem:[%s1126_s26 + $0x28] sm:$0xff]  }
  0x13   : > { %996 = vmatpush3.bf16.msra.mxu0 %v1052_v3  ;;  %1039 = vmatpush3.bf16.msra.mxu1 %v1052_v3  ;;  %v1061_v12 = vld [vmem:[%s1126_s26 + $0x58] sm:$0xff]   ;;  %v1063_v14 = vld [vmem:[%s1126_s26 + $0x60] sm:$0xff]   ;;  %v1065_v16 = vld [vmem:[%s1126_s26 + $0x68] sm:$0xff]  }
  0x14   : > { %997 = vmatprep.subr.bf16.mxu0 %v1053_v6  ;;  %1035 = vmatprep.subr.bf16.mxu1 %v1053_v6  ;;  %v1066_v17 = vld [vmem:[%s1126_s26 + $0x30] sm:$0xff]   ;;  %v1068_v19 = vld [vmem:[%s1126_s26 + $0x38] sm:$0xff]  }
  0x15   : > { %v1067_v18 = vld [vmem:[%s1126_s26 + $0x70] sm:$0xff]   ;;  %v1069_v20 = vld [vmem:[%s1126_s26 + $0x78] sm:$0xff]  }
  0x17   : > { %998 = vmatpush3.bf16.msra.mxu0 %v1053_v6  ;;  %1040 = vmatpush3.bf16.msra.mxu1 %v1053_v6 }
  0x1a   : > { %1000 = vmatmul.mubr.msk.bf16.vlgmr.msra.gmra.mrb[0].mxu0 %vm334_vm0, %v1056_v7  ;;  %1016 = vmatmul.mubr.msk.bf16.vlgmr.msra.gmra.mrb[0].mxu1 %vm334_vm0, %v1057_v8 }
  0x1b   : > { %1003 = vmatprep.mubr.msk.bf16.mxu0 %vm334_vm0, %v1058_v9  ;;  %1019 = vmatprep.mubr.msk.bf16.mxu1 %vm334_vm0, %v1059_v10 }
  0x22   : > { %1004 = vmatmul.mubr.msk.bf16.gmra.mrb[4].mxu0 %vm334_vm0, %v1060_v11  ;;  %1020 = vmatmul.mubr.msk.bf16.gmra.mrb[4].mxu1 %vm334_vm0, %v1061_v12 }
  0x23   : > { %1007 = vmatprep.mubr.msk.bf16.mxu0 %vm334_vm0, %v1062_v13  ;;  %1023 = vmatprep.mubr.msk.bf16.mxu1 %vm334_vm0, %v1063_v14 }
  0x2a   : > { %1008 = vmatmul.mubr.msk.bf16.gmra.mrb[8].mxu0 %vm334_vm0, %v1064_v15  ;;  %1024 = vmatmul.mubr.msk.bf16.gmra.mrb[8].mxu1 %vm334_vm0, %v1065_v16 }
  0x2b   : > { %1011 = vmatprep.mubr.msk.bf16.mxu0 %vm334_vm0, %v1066_v17  ;;  %1027 = vmatprep.mubr.msk.bf16.mxu1 %vm334_vm0, %v1067_v18 }
  0x32   : > { %1012 = vmatmul.mubr.msk.bf16.gmra.mrb[12].mxu0 %vm334_vm0, %v1068_v19  ;;  %1028 = vmatmul.mubr.msk.bf16.gmra.mrb[12].mxu1 %vm334_vm0, %v1069_v20 }
  0xed   : > { %v1001_v21 = vpop.f32.mrb[0].mxu0  ;;  %v1017_v23 = vpop.f32.mrb[0].mxu1 }
  0xee   : > { %v417_v24 = vpop.f32.mrb[1].mxu0  ;;  %v481_v25 = vpop.f32.mrb[1].mxu1  ;;  %v426_v28 = vadd.f32 %v1001_v21, %v1166_v22  ;;  %v490_v29 = vadd.f32 %v1017_v23, %v1166_v22 }
  0xef   : > { %v1002_v26 = vpop.f32.mrb[2].mxu0  ;;  %v1018_v27 = vpop.f32.mrb[2].mxu1  ;;  %v418_v34 = vadd.f32 %v1166_v22, %v417_v24  ;;  %v482_v35 = vadd.f32 %v1166_v22, %v481_v25 }
  0xf0   : > { %v429_v30 = vadd.f32 %v1002_v26, %v1166_v22  ;;  %v493_v31 = vadd.f32 %v1018_v27, %v1166_v22  ;;  %v420_v32 = vpop.f32.mrb[3].mxu0  ;;  %v484_v33 = vpop.f32.mrb[3].mxu1 }
  0xf1   : > { %v421_v36 = vadd.f32 %v1166_v22, %v420_v32  ;;  %v485_v37 = vadd.f32 %v1166_v22, %v484_v33 }
  0xf2   : > { %v881_v38 = vpack.c.bf16 %v429_v30, %v426_v28  ;;  %v921_v39 = vpack.c.bf16 %v493_v31, %v490_v29 }
  0xf3   : > { %v876_v40 = vpack.c.bf16 %v421_v36, %v418_v34  ;;  %v916_v41 = vpack.c.bf16 %v485_v37, %v482_v35 }
  0xf4   : > { %953 = vst [vmem:[%s1179_s6 + $0x8] sm:$0xff] %v881_v38   ;;  %961 = vst [vmem:[%s1179_s6 + $0x48] sm:$0xff] %v921_v39  }
  0xf5   : > { %877 = vst [vmem:[%s1179_s6] sm:$0xff] %v876_v40   ;;  %960 = vst [vmem:[%s1179_s6 + $0x40] sm:$0xff] %v916_v41   ;;  %v1005_v42 = vpop.f32.mrb[4].mxu0  ;;  %v1021_v43 = vpop.f32.mrb[4].mxu1 }
  0xf6   : > { %v433_v44 = vpop.f32.mrb[5].mxu0  ;;  %v497_v45 = vpop.f32.mrb[5].mxu1  ;;  %v442_v48 = vadd.f32 %v1005_v42, %v1166_v22  ;;  %v506_v49 = vadd.f32 %v1021_v43, %v1166_v22 }
  0xf7   : > { %v1006_v46 = vpop.f32.mrb[6].mxu0  ;;  %v1022_v47 = vpop.f32.mrb[6].mxu1  ;;  %v434_v54 = vadd.f32 %v1166_v22, %v433_v44  ;;  %v498_v55 = vadd.f32 %v1166_v22, %v497_v45 }
  0xf8   : > { %v445_v50 = vadd.f32 %v1006_v46, %v1166_v22  ;;  %v509_v51 = vadd.f32 %v1022_v47, %v1166_v22  ;;  %v436_v52 = vpop.f32.mrb[7].mxu0  ;;  %v500_v53 = vpop.f32.mrb[7].mxu1 }
  0xf9   : > { %v437_v56 = vadd.f32 %v1166_v22, %v436_v52  ;;  %v501_v57 = vadd.f32 %v1166_v22, %v500_v53 }
  0xfa   : > { %v891_v58 = vpack.c.bf16 %v445_v50, %v442_v48  ;;  %v931_v59 = vpack.c.bf16 %v509_v51, %v506_v49 }
  0xfb   : > { %v886_v60 = vpack.c.bf16 %v437_v56, %v434_v54  ;;  %v926_v61 = vpack.c.bf16 %v501_v57, %v498_v55 }
  0xfc   : > { %955 = vst [vmem:[%s1179_s6 + $0x18] sm:$0xff] %v891_v58   ;;  %963 = vst [vmem:[%s1179_s6 + $0x58] sm:$0xff] %v931_v59  }
  0xfd   : > { %954 = vst [vmem:[%s1179_s6 + $0x10] sm:$0xff] %v886_v60   ;;  %962 = vst [vmem:[%s1179_s6 + $0x50] sm:$0xff] %v926_v61   ;;  %v1009_v62 = vpop.f32.mrb[8].mxu0  ;;  %v1025_v63 = vpop.f32.mrb[8].mxu1 }
  0xfe   : > { %v449_v0 = vpop.f32.mrb[9].mxu0  ;;  %v513_v1 = vpop.f32.mrb[9].mxu1  ;;  %v458_v4 = vadd.f32 %v1009_v62, %v1166_v22  ;;  %v522_v5 = vadd.f32 %v1025_v63, %v1166_v22 }
  0xff   : > { %v1010_v2 = vpop.f32.mrb[10].mxu0  ;;  %v1026_v3 = vpop.f32.mrb[10].mxu1  ;;  %v450_v10 = vadd.f32 %v1166_v22, %v449_v0  ;;  %v514_v11 = vadd.f32 %v1166_v22, %v513_v1 }
 0x100   : > { %v461_v6 = vadd.f32 %v1010_v2, %v1166_v22  ;;  %v525_v7 = vadd.f32 %v1026_v3, %v1166_v22  ;;  %v452_v8 = vpop.f32.mrb[11].mxu0  ;;  %v516_v9 = vpop.f32.mrb[11].mxu1 }
 0x101   : > { %v453_v12 = vadd.f32 %v1166_v22, %v452_v8  ;;  %v517_v13 = vadd.f32 %v1166_v22, %v516_v9 }
 0x102   : > { %v901_v14 = vpack.c.bf16 %v461_v6, %v458_v4  ;;  %v941_v15 = vpack.c.bf16 %v525_v7, %v522_v5 }
 0x103   : > { %v896_v16 = vpack.c.bf16 %v453_v12, %v450_v10  ;;  %v936_v17 = vpack.c.bf16 %v517_v13, %v514_v11 }
 0x104   : > { %957 = vst [vmem:[%s1179_s6 + $0x28] sm:$0xff] %v901_v14   ;;  %965 = vst [vmem:[%s1179_s6 + $0x68] sm:$0xff] %v941_v15  }
 0x105   : > { %956 = vst [vmem:[%s1179_s6 + $0x20] sm:$0xff] %v896_v16   ;;  %964 = vst [vmem:[%s1179_s6 + $0x60] sm:$0xff] %v936_v17   ;;  %v1013_v18 = vpop.f32.mrb[12].mxu0  ;;  %v1029_v19 = vpop.f32.mrb[12].mxu1 }
 0x106   : > { %v465_v20 = vpop.f32.mrb[13].mxu0  ;;  %v529_v21 = vpop.f32.mrb[13].mxu1  ;;  %v474_v25 = vadd.f32 %v1013_v18, %v1166_v22  ;;  %v538_v26 = vadd.f32 %v1029_v19, %v1166_v22 }
 0x107   : > { %v1014_v23 = vpop.f32.mrb[14].mxu0  ;;  %v1030_v24 = vpop.f32.mrb[14].mxu1  ;;  %v466_v31 = vadd.f32 %v1166_v22, %v465_v20  ;;  %v530_v32 = vadd.f32 %v1166_v22, %v529_v21 }
 0x108   : > { %v477_v27 = vadd.f32 %v1014_v23, %v1166_v22  ;;  %v541_v28 = vadd.f32 %v1030_v24, %v1166_v22  ;;  %v468_v29 = vpop.f32.mrb[15].mxu0  ;;  %v532_v30 = vpop.f32.mrb[15].mxu1 }
 0x109   : > { %v469_v33 = vadd.f32 %v1166_v22, %v468_v29  ;;  %v533_v34 = vadd.f32 %v1166_v22, %v532_v30 }
 0x10a   : > { %v911_v35 = vpack.c.bf16 %v477_v27, %v474_v25  ;;  %v951_v36 = vpack.c.bf16 %v541_v28, %v538_v26 }
 0x10b   : > { %v906_v37 = vpack.c.bf16 %v469_v33, %v466_v31  ;;  %v946_v38 = vpack.c.bf16 %v533_v34, %v530_v32 }
 0x10c   : > { %959 = vst [vmem:[%s1179_s6 + $0x38] sm:$0xff] %v911_v35   ;;  %967 = vst [vmem:[%s1179_s6 + $0x78] sm:$0xff] %v951_v36  }
 0x10d   : > { %958 = vst [vmem:[%s1179_s6 + $0x30] sm:$0xff] %v906_v37   ;;  %966 = vst [vmem:[%s1179_s6 + $0x70] sm:$0xff] %v946_v38  }
 0x10e PF: > { %s13_s12 = sadd.s32 1, %s1076_s12  }
 0x10f   : > { %p10_p4 = scmp.ge.s32.totalorder %s13_s12, 4  }
 0x111   :  { %12 = sbr.rel (!%p10_p4) target bundleno = 1 (0x1), region = 62 }

// kernel: forward.40
= control target key start
LH: loop header
LB: loop body
LE: loop exit
PB: predicated region body
PF: predicated region fallthrough
CT: control target
= control target key end

     0   :  { %s1202_s12 = smov 0   ;;  %s1355_s0 = inlined_call_operand.vmem [shape: bf16[512,144], index: 0, kind: input, shape index: {}]   ;;  %s1356_s1 = inlined_call_operand.vmem [shape: bf16[144,128], index: 1, kind: input, shape index: {}]   ;;  %s1357_s2 = inlined_call_operand.vmem [shape: f32[1,128], index: 2, kind: input, shape index: {}]   ;;  %s1358_s3 = inlined_call_operand.vmem [shape: bf16[512,128], index: 3, kind: output, shape index: {}]  }
   0x1 LB: > { %s859_s13 = sadd.s32 4294967295, %s1179_s12   ;;  %p863_p0 = scmp.ge.s32.totalorder %s1179_s12, 1  ;;  %s1179_s12 = sphi %s1202_s12, %s13_s12  }
   0x2   : > { %p139_p1 = scmp.lt.s32.totalorder %s1179_s12, 3 }
   0x4   : > { %p140_p2 = pnand %p863_p0, %p139_p1 }
   0x5   : > { %v1116_v0 = vld [vmem:[%s1356_s1] sm:$0xff] (!%p140_p2)   ;;  %v1181_v1 = vmov (!%p140_p2), 0   ;;  %s864_s16 = sshll.u32 (!%p140_p2), %s859_s13, 5  ;;  %v1117_v2 = vld [vmem:[%s1356_s1 + $0x8] sm:$0xff] (!%p140_p2)   ;;  %v1118_v3 = vld [vmem:[%s1356_s1 + $0x10] sm:$0xff] (!%p140_p2)   ;;  %vm433_vm0 = vcmask (!%p140_p2), 130048  }
   0x6   : > { %143 = sbr.rel (%p140_p2) target bundleno = 317 (0x13d), region = 32  ;;  %482 = vmatprep.subr.bf16.mxu0 (!%p140_p2), %v1181_v1  ;;  %1089 = vmatprep.subr.bf16.mxu1 (!%p140_p2), %v1181_v1  ;;  %p165_p3 = scmp.lt.s32.totalorder (!%p140_p2), %s864_s16, 63  ;;  %v1119_v4 = vld [vmem:[%s1356_s1 + $0x18] sm:$0xff] (!%p140_p2)   ;;  %v1120_v7 = vld [vmem:[%s1356_s1 + $0x20] sm:$0xff] (!%p140_p2)   ;;  %v1121_v8 = vld [vmem:[%s1356_s1 + $0x28] sm:$0xff] (!%p140_p2)  }
   0x7   : > { %483 = vmatpush1.bf16.msra.mxu0 (!%p140_p2), %v1116_v0  ;;  %1098 = vmatpush1.bf16.msra.mxu1 (!%p140_p2), %v1116_v0  ;;  %v1122_v9 = vld [vmem:[%s1356_s1 + $0x30] sm:$0xff] (!%p140_p2)   ;;  %v1123_v10 = vld [vmem:[%s1356_s1 + $0x38] sm:$0xff] (!%p140_p2)   ;;  %v1124_v11 = vld [vmem:[%s1356_s1 + $0x40] sm:$0xff] (!%p140_p2)  }
   0x8   : > { %484 = vmatprep.subr.bf16.mxu0 (!%p140_p2), %v1181_v1  ;;  %1090 = vmatprep.subr.bf16.mxu1 (!%p140_p2), %v1181_v1  ;;  %v1296_v42 = vld [vmem:[%s1357_s2] ss:$0 sm:$0xff] (!%p140_p2) }
   0xb   : > { %485 = vmatpush1.bf16.msra.mxu0 (!%p140_p2), %v1117_v2  ;;  %1099 = vmatpush1.bf16.msra.mxu1 (!%p140_p2), %v1117_v2 }
   0xc   : > { %486 = vmatprep.subr.bf16.mxu0 (!%p140_p2), %v1181_v1  ;;  %1091 = vmatprep.subr.bf16.mxu1 (!%p140_p2), %v1181_v1 }
   0xd   : > { %s1360_s16 = smov (!%p165_p3, %s864_s16), 63 }
   0xe   : > { %s961_s21 = sshll.u32 %s1360_s16, 3  ;;  %s868_s13 = sshll.u32 %s1360_s16, 2 }
   0xf   : > { %s1225_s24 = scalar_lea.vmem %s1355_s0, %s961_s21  ;;  %487 = vmatpush1.bf16.msra.mxu0 %v1118_v3  ;;  %1100 = vmatpush1.bf16.msra.mxu1 %v1118_v3  ;;  %s1306_s17 = scalar_lea.vmem %s1358_s3, %s868_s13 }
  0x10   : > { %v1127_v5 = vld [vmem:[%s1225_s24 + $0x4] ss:$8 sps:$4 sm:$0xff]   ;;  %488 = vmatprep.subr.bf16.mxu0 %v1181_v1  ;;  %1092 = vmatprep.subr.bf16.mxu1 %v1181_v1  ;;  %v1125_v12 = vld [vmem:[%s1225_s24] ss:$8 sps:$4 sm:$0xff]   ;;  %v1131_v14 = vld [vmem:[%s1225_s24 + $0x14] ss:$8 sps:$4 sm:$0xff]  }
  0x11   : > { %v1130_v6 = vld [vmem:[%s1225_s24 + $0x84] ss:$8 sps:$4 sm:$0xff]   ;;  %911 = vmatprep.mubr.msk.bf16.mxu0 %vm433_vm0, %v1127_v5  ;;  %v1128_v13 = vld [vmem:[%s1225_s24 + $0x80] ss:$8 sps:$4 sm:$0xff]   ;;  %v1133_v15 = vld [vmem:[%s1225_s24 + $0x94] ss:$8 sps:$4 sm:$0xff]  }
  0x12   : > { %919 = vmatprep.mubr.msk.bf16.mxu1 %vm433_vm0, %v1130_v6  ;;  %v1135_v16 = vld [vmem:[%s1225_s24 + $0x10] ss:$8 sps:$4 sm:$0xff]   ;;  %v1137_v18 = vld [vmem:[%s1225_s24 + $0x24] ss:$8 sps:$4 sm:$0xff]   ;;  %v1141_v20 = vld [vmem:[%s1225_s24 + $0x20] ss:$8 sps:$4 sm:$0xff]  }
  0x13   : > { %489 = vmatpush1.bf16.msra.mxu0 %v1119_v4  ;;  %1101 = vmatpush1.bf16.msra.mxu1 %v1119_v4  ;;  %v1136_v17 = vld [vmem:[%s1225_s24 + $0x90] ss:$8 sps:$4 sm:$0xff]   ;;  %v1139_v19 = vld [vmem:[%s1225_s24 + $0xa4] ss:$8 sps:$4 sm:$0xff]   ;;  %v1142_v21 = vld [vmem:[%s1225_s24 + $0xa0] ss:$8 sps:$4 sm:$0xff]  }
  0x14   : > { %490 = vmatprep.subr.bf16.mxu0 %v1181_v1  ;;  %1093 = vmatprep.subr.bf16.mxu1 %v1181_v1  ;;  %v1143_v22 = vld [vmem:[%s1225_s24 + $0x34] ss:$8 sps:$4 sm:$0xff]   ;;  %v1147_v24 = vld [vmem:[%s1225_s24 + $0x30] ss:$8 sps:$4 sm:$0xff]   ;;  %v1149_v26 = vld [vmem:[%s1225_s24 + $0x44] ss:$8 sps:$4 sm:$0xff]  }
  0x15   : > { %v1145_v23 = vld [vmem:[%s1225_s24 + $0xb4] ss:$8 sps:$4 sm:$0xff]   ;;  %v1148_v25 = vld [vmem:[%s1225_s24 + $0xb0] ss:$8 sps:$4 sm:$0xff]   ;;  %v1151_v27 = vld [vmem:[%s1225_s24 + $0xc4] ss:$8 sps:$4 sm:$0xff]  }
  0x16   : > { %v1153_v28 = vld [vmem:[%s1225_s24 + $0x40] ss:$8 sps:$4 sm:$0xff]   ;;  %v1155_v30 = vld [vmem:[%s1225_s24 + $0x54] ss:$8 sps:$4 sm:$0xff]   ;;  %v1159_v32 = vld [vmem:[%s1225_s24 + $0x50] ss:$8 sps:$4 sm:$0xff]  }
  0x17   : > { %491 = vmatpush1.bf16.msra.mxu0 %v1120_v7  ;;  %1102 = vmatpush1.bf16.msra.mxu1 %v1120_v7  ;;  %v1154_v29 = vld [vmem:[%s1225_s24 + $0xc0] ss:$8 sps:$4 sm:$0xff]   ;;  %v1157_v31 = vld [vmem:[%s1225_s24 + $0xd4] ss:$8 sps:$4 sm:$0xff]   ;;  %v1160_v33 = vld [vmem:[%s1225_s24 + $0xd0] ss:$8 sps:$4 sm:$0xff]  }
  0x18   : > { %492 = vmatprep.subr.bf16.mxu0 %v1181_v1  ;;  %1094 = vmatprep.subr.bf16.mxu1 %v1181_v1  ;;  %v1161_v34 = vld [vmem:[%s1225_s24 + $0x64] ss:$8 sps:$4 sm:$0xff]   ;;  %v1165_v36 = vld [vmem:[%s1225_s24 + $0x60] ss:$8 sps:$4 sm:$0xff]   ;;  %v1167_v38 = vld [vmem:[%s1225_s24 + $0x74] ss:$8 sps:$4 sm:$0xff]  }
  0x19   : > { %v1163_v35 = vld [vmem:[%s1225_s24 + $0xe4] ss:$8 sps:$4 sm:$0xff]   ;;  %v1166_v37 = vld [vmem:[%s1225_s24 + $0xe0] ss:$8 sps:$4 sm:$0xff]   ;;  %v1169_v39 = vld [vmem:[%s1225_s24 + $0xf4] ss:$8 sps:$4 sm:$0xff]  }
  0x1a   : > { %v1171_v40 = vld [vmem:[%s1225_s24 + $0x70] ss:$8 sps:$4 sm:$0xff]  }
  0x1b   : > { %493 = vmatpush1.bf16.msra.mxu0 %v1121_v8  ;;  %1103 = vmatpush1.bf16.msra.mxu1 %v1121_v8  ;;  %v1172_v41 = vld [vmem:[%s1225_s24 + $0xf0] ss:$8 sps:$4 sm:$0xff]  }
  0x1c   : > { %494 = vmatprep.subr.bf16.mxu0 %v1181_v1  ;;  %1095 = vmatprep.subr.bf16.mxu1 %v1181_v1 }
  0x1f   : > { %495 = vmatpush1.bf16.msra.mxu0 %v1122_v9  ;;  %1104 = vmatpush1.bf16.msra.mxu1 %v1122_v9 }
  0x20   : > { %496 = vmatprep.subr.bf16.mxu0 %v1181_v1  ;;  %1096 = vmatprep.subr.bf16.mxu1 %v1181_v1 }
  0x23   : > { %497 = vmatpush1.bf16.msra.mxu0 %v1123_v10  ;;  %1105 = vmatpush1.bf16.msra.mxu1 %v1123_v10 }
  0x24   : > { %498 = vmatprep.subr.bf16.mxu0 %v1181_v1  ;;  %1097 = vmatprep.subr.bf16.mxu1 %v1181_v1 }
  0x27   : > { %499 = vmatpush1.bf16.msra.mxu0 %v1124_v11  ;;  %1106 = vmatpush1.bf16.msra.mxu1 %v1124_v11 }
  0x2a   : > { %515 = vmatmul.mubr.bf16.vlgmr.msra.gmra.mrb[0].mxu0 %v1125_v12  ;;  %579 = vmatmul.mubr.bf16.vlgmr.msra.gmra.mrb[0].mxu1 %v1128_v13 }
  0x2b   : > { %912 = vmatprep.mubr.msk.bf16.mxu0 %vm433_vm0, %v1131_v14  ;;  %920 = vmatprep.mubr.msk.bf16.mxu1 %vm433_vm0, %v1133_v15 }
  0x32   : > { %523 = vmatmul.mubr.bf16.gmra.mrb[4].mxu0 %v1135_v16  ;;  %587 = vmatmul.mubr.bf16.gmra.mrb[4].mxu1 %v1136_v17 }
  0x33   : > { %913 = vmatprep.mubr.msk.bf16.mxu0 %vm433_vm0, %v1137_v18  ;;  %921 = vmatprep.mubr.msk.bf16.mxu1 %vm433_vm0, %v1139_v19 }
  0x3a   : > { %531 = vmatmul.mubr.bf16.gmra.mrb[8].mxu0 %v1141_v20  ;;  %595 = vmatmul.mubr.bf16.gmra.mrb[8].mxu1 %v1142_v21 }
  0x3b   : > { %914 = vmatprep.mubr.msk.bf16.mxu0 %vm433_vm0, %v1143_v22  ;;  %922 = vmatprep.mubr.msk.bf16.mxu1 %vm433_vm0, %v1145_v23 }
  0x42   : > { %539 = vmatmul.mubr.bf16.gmra.mrb[12].mxu0 %v1147_v24  ;;  %603 = vmatmul.mubr.bf16.gmra.mrb[12].mxu1 %v1148_v25 }
  0x43   : > { %915 = vmatprep.mubr.msk.bf16.mxu0 %vm433_vm0, %v1149_v26  ;;  %923 = vmatprep.mubr.msk.bf16.mxu1 %vm433_vm0, %v1151_v27 }
  0x4a   : > { %547 = vmatmul.mubr.bf16.gmra.mrb[16].mxu0 %v1153_v28  ;;  %611 = vmatmul.mubr.bf16.gmra.mrb[16].mxu1 %v1154_v29 }
  0x4b   : > { %916 = vmatprep.mubr.msk.bf16.mxu0 %vm433_vm0, %v1155_v30  ;;  %924 = vmatprep.mubr.msk.bf16.mxu1 %vm433_vm0, %v1157_v31 }
  0x52   : > { %555 = vmatmul.mubr.bf16.gmra.mrb[20].mxu0 %v1159_v32  ;;  %619 = vmatmul.mubr.bf16.gmra.mrb[20].mxu1 %v1160_v33 }
  0x53   : > { %917 = vmatprep.mubr.msk.bf16.mxu0 %vm433_vm0, %v1161_v34  ;;  %925 = vmatprep.mubr.msk.bf16.mxu1 %vm433_vm0, %v1163_v35 }
  0x5a   : > { %563 = vmatmul.mubr.bf16.gmra.mrb[24].mxu0 %v1165_v36  ;;  %627 = vmatmul.mubr.bf16.gmra.mrb[24].mxu1 %v1166_v37 }
  0x5b   : > { %918 = vmatprep.mubr.msk.bf16.mxu0 %vm433_vm0, %v1167_v38  ;;  %926 = vmatprep.mubr.msk.bf16.mxu1 %vm433_vm0, %v1169_v39 }
  0x62   : > { %571 = vmatmul.mubr.bf16.gmra.mrb[28].mxu0 %v1171_v40  ;;  %635 = vmatmul.mubr.bf16.gmra.mrb[28].mxu1 %v1172_v41 }
  0xfd   : > { %v516_v43 = vpop.f32.mrb[0].mxu0  ;;  %v580_v44 = vpop.f32.mrb[0].mxu1 }
  0xfe   : > { %v518_v45 = vpop.f32.mrb[1].mxu0  ;;  %v582_v46 = vpop.f32.mrb[1].mxu1  ;;  %v517_v49 = vadd.f32 %v1296_v42, %v516_v43  ;;  %v581_v50 = vadd.f32 %v1296_v42, %v580_v44 }
  0xff   : > { %v519_v47 = vpop.f32.mrb[2].mxu0  ;;  %v583_v48 = vpop.f32.mrb[2].mxu1 }
 0x100   : > { %v520_v51 = vadd.f32 %v1296_v42, %v519_v47  ;;  %v584_v52 = vadd.f32 %v1296_v42, %v583_v48  ;;  %v521_v53 = vpop.f32.mrb[3].mxu0  ;;  %v585_v54 = vpop.f32.mrb[3].mxu1 }
 0x102   : > { %v997_v55 = vpack.c.bf16 %v520_v51, %v517_v49  ;;  %v1037_v56 = vpack.c.bf16 %v584_v52, %v581_v50 }
 0x104   : > { %998 = vst [vmem:[%s1306_s17] sm:$0xff] %v997_v55   ;;  %1081 = vst [vmem:[%s1306_s17 + $0x40] sm:$0xff] %v1037_v56  }
 0x105   : > { %v524_v57 = vpop.f32.mrb[4].mxu0  ;;  %v588_v58 = vpop.f32.mrb[4].mxu1 }
 0x106   : > { %v526_v59 = vpop.f32.mrb[5].mxu0  ;;  %v590_v60 = vpop.f32.mrb[5].mxu1  ;;  %v525_v63 = vadd.f32 %v1296_v42, %v524_v57  ;;  %v589_v0 = vadd.f32 %v1296_v42, %v588_v58 }
 0x107   : > { %v527_v61 = vpop.f32.mrb[6].mxu0  ;;  %v591_v62 = vpop.f32.mrb[6].mxu1 }
 0x108   : > { %v528_v1 = vadd.f32 %v1296_v42, %v527_v61  ;;  %v592_v2 = vadd.f32 %v1296_v42, %v591_v62  ;;  %v529_v3 = vpop.f32.mrb[7].mxu0  ;;  %v593_v4 = vpop.f32.mrb[7].mxu1 }
 0x10a   : > { %v1002_v5 = vpack.c.bf16 %v528_v1, %v525_v63  ;;  %v1042_v6 = vpack.c.bf16 %v592_v2, %v589_v0 }
 0x10c   : > { %1074 = vst [vmem:[%s1306_s17 + $0x8] sm:$0xff] %v1002_v5   ;;  %1082 = vst [vmem:[%s1306_s17 + $0x48] sm:$0xff] %v1042_v6  }
 0x10d   : > { %v532_v7 = vpop.f32.mrb[8].mxu0  ;;  %v596_v8 = vpop.f32.mrb[8].mxu1 }
 0x10e   : > { %v534_v9 = vpop.f32.mrb[9].mxu0  ;;  %v598_v10 = vpop.f32.mrb[9].mxu1  ;;  %v533_v13 = vadd.f32 %v1296_v42, %v532_v7  ;;  %v597_v14 = vadd.f32 %v1296_v42, %v596_v8 }
 0x10f   : > { %v535_v11 = vpop.f32.mrb[10].mxu0  ;;  %v599_v12 = vpop.f32.mrb[10].mxu1 }
 0x110   : > { %v536_v15 = vadd.f32 %v1296_v42, %v535_v11  ;;  %v600_v16 = vadd.f32 %v1296_v42, %v599_v12  ;;  %v537_v17 = vpop.f32.mrb[11].mxu0  ;;  %v601_v18 = vpop.f32.mrb[11].mxu1 }
 0x112   : > { %v1007_v19 = vpack.c.bf16 %v536_v15, %v533_v13  ;;  %v1047_v20 = vpack.c.bf16 %v600_v16, %v597_v14 }
 0x114   : > { %1075 = vst [vmem:[%s1306_s17 + $0x10] sm:$0xff] %v1007_v19   ;;  %1083 = vst [vmem:[%s1306_s17 + $0x50] sm:$0xff] %v1047_v20  }
 0x115   : > { %v540_v21 = vpop.f32.mrb[12].mxu0  ;;  %v604_v22 = vpop.f32.mrb[12].mxu1 }
 0x116   : > { %v542_v23 = vpop.f32.mrb[13].mxu0  ;;  %v606_v24 = vpop.f32.mrb[13].mxu1  ;;  %v541_v27 = vadd.f32 %v1296_v42, %v540_v21  ;;  %v605_v28 = vadd.f32 %v1296_v42, %v604_v22 }
 0x117   : > { %v543_v25 = vpop.f32.mrb[14].mxu0  ;;  %v607_v26 = vpop.f32.mrb[14].mxu1 }
 0x118   : > { %v544_v29 = vadd.f32 %v1296_v42, %v543_v25  ;;  %v608_v30 = vadd.f32 %v1296_v42, %v607_v26  ;;  %v545_v31 = vpop.f32.mrb[15].mxu0  ;;  %v609_v32 = vpop.f32.mrb[15].mxu1 }
 0x11a   : > { %v1012_v33 = vpack.c.bf16 %v544_v29, %v541_v27  ;;  %v1052_v34 = vpack.c.bf16 %v608_v30, %v605_v28 }
 0x11c   : > { %1076 = vst [vmem:[%s1306_s17 + $0x18] sm:$0xff] %v1012_v33   ;;  %1084 = vst [vmem:[%s1306_s17 + $0x58] sm:$0xff] %v1052_v34  }
 0x11d   : > { %v548_v35 = vpop.f32.mrb[16].mxu0  ;;  %v612_v36 = vpop.f32.mrb[16].mxu1 }
 0x11e   : > { %v550_v37 = vpop.f32.mrb[17].mxu0  ;;  %v614_v38 = vpop.f32.mrb[17].mxu1  ;;  %v549_v41 = vadd.f32 %v1296_v42, %v548_v35  ;;  %v613_v43 = vadd.f32 %v1296_v42, %v612_v36 }
 0x11f   : > { %v551_v39 = vpop.f32.mrb[18].mxu0  ;;  %v615_v40 = vpop.f32.mrb[18].mxu1 }
 0x120   : > { %v552_v44 = vadd.f32 %v1296_v42, %v551_v39  ;;  %v616_v45 = vadd.f32 %v1296_v42, %v615_v40  ;;  %v553_v46 = vpop.f32.mrb[19].mxu0  ;;  %v617_v47 = vpop.f32.mrb[19].mxu1 }
 0x122   : > { %v1017_v48 = vpack.c.bf16 %v552_v44, %v549_v41  ;;  %v1057_v49 = vpack.c.bf16 %v616_v45, %v613_v43 }
 0x124   : > { %1077 = vst [vmem:[%s1306_s17 + $0x20] sm:$0xff] %v1017_v48   ;;  %1085 = vst [vmem:[%s1306_s17 + $0x60] sm:$0xff] %v1057_v49  }
 0x125   : > { %v556_v50 = vpop.f32.mrb[20].mxu0  ;;  %v620_v51 = vpop.f32.mrb[20].mxu1 }
 0x126   : > { %v558_v52 = vpop.f32.mrb[21].mxu0  ;;  %v622_v53 = vpop.f32.mrb[21].mxu1  ;;  %v557_v56 = vadd.f32 %v1296_v42, %v556_v50  ;;  %v621_v57 = vadd.f32 %v1296_v42, %v620_v51 }
 0x127   : > { %v559_v54 = vpop.f32.mrb[22].mxu0  ;;  %v623_v55 = vpop.f32.mrb[22].mxu1 }
 0x128   : > { %v560_v58 = vadd.f32 %v1296_v42, %v559_v54  ;;  %v624_v59 = vadd.f32 %v1296_v42, %v623_v55  ;;  %v561_v60 = vpop.f32.mrb[23].mxu0  ;;  %v625_v61 = vpop.f32.mrb[23].mxu1 }
 0x12a   : > { %v1022_v62 = vpack.c.bf16 %v560_v58, %v557_v56  ;;  %v1062_v63 = vpack.c.bf16 %v624_v59, %v621_v57 }
 0x12c   : > { %1078 = vst [vmem:[%s1306_s17 + $0x28] sm:$0xff] %v1022_v62   ;;  %1086 = vst [vmem:[%s1306_s17 + $0x68] sm:$0xff] %v1062_v63  }
 0x12d   : > { %v564_v0 = vpop.f32.mrb[24].mxu0  ;;  %v628_v1 = vpop.f32.mrb[24].mxu1 }
 0x12e   : > { %v566_v2 = vpop.f32.mrb[25].mxu0  ;;  %v630_v3 = vpop.f32.mrb[25].mxu1  ;;  %v565_v6 = vadd.f32 %v1296_v42, %v564_v0  ;;  %v629_v7 = vadd.f32 %v1296_v42, %v628_v1 }
 0x12f   : > { %v567_v4 = vpop.f32.mrb[26].mxu0  ;;  %v631_v5 = vpop.f32.mrb[26].mxu1 }
 0x130   : > { %v568_v8 = vadd.f32 %v1296_v42, %v567_v4  ;;  %v632_v9 = vadd.f32 %v1296_v42, %v631_v5  ;;  %v569_v10 = vpop.f32.mrb[27].mxu0  ;;  %v633_v11 = vpop.f32.mrb[27].mxu1 }
 0x132   : > { %v1027_v12 = vpack.c.bf16 %v568_v8, %v565_v6  ;;  %v1067_v13 = vpack.c.bf16 %v632_v9, %v629_v7 }
 0x134   : > { %1079 = vst [vmem:[%s1306_s17 + $0x30] sm:$0xff] %v1027_v12   ;;  %1087 = vst [vmem:[%s1306_s17 + $0x70] sm:$0xff] %v1067_v13  }
 0x135   : > { %v572_v14 = vpop.f32.mrb[28].mxu0  ;;  %v636_v15 = vpop.f32.mrb[28].mxu1 }
 0x136   : > { %v574_v16 = vpop.f32.mrb[29].mxu0  ;;  %v638_v17 = vpop.f32.mrb[29].mxu1  ;;  %v573_v20 = vadd.f32 %v1296_v42, %v572_v14  ;;  %v637_v21 = vadd.f32 %v1296_v42, %v636_v15 }
 0x137   : > { %v575_v18 = vpop.f32.mrb[30].mxu0  ;;  %v639_v19 = vpop.f32.mrb[30].mxu1 }
 0x138   : > { %v576_v22 = vadd.f32 %v1296_v42, %v575_v18  ;;  %v640_v23 = vadd.f32 %v1296_v42, %v639_v19  ;;  %v577_v24 = vpop.f32.mrb[31].mxu0  ;;  %v641_v25 = vpop.f32.mrb[31].mxu1 }
 0x13a   : > { %v1032_v26 = vpack.c.bf16 %v576_v22, %v573_v20  ;;  %v1072_v27 = vpack.c.bf16 %v640_v23, %v637_v21 }
 0x13c   : > { %1080 = vst [vmem:[%s1306_s17 + $0x38] sm:$0xff] %v1032_v26   ;;  %1088 = vst [vmem:[%s1306_s17 + $0x78] sm:$0xff] %v1072_v27  }
 0x13d PF: > { %s13_s12 = sadd.s32 1, %s1179_s12  }
 0x13e   : > { %p10_p4 = scmp.ge.s32.totalorder %s13_s12, 4  }
 0x140   :  { %12 = sbr.rel (!%p10_p4) target bundleno = 1 (0x1), region = 62 }

// kernel: forward.41
= control target key start
LH: loop header
LB: loop body
LE: loop exit
PB: predicated region body
PF: predicated region fallthrough
CT: control target
= control target key end

     0   :  { %v553_v0 = vmov 0   ;;  %vm182_vm0 = vcmask 130048   ;;  %s684_s1 = inlined_call_operand.vmem [shape: bf16[144,128], index: 1, kind: input, shape index: {}]   ;;  %s685_s0 = inlined_call_operand.vmem [shape: bf16[128,144], index: 0, kind: input, shape index: {}]   ;;  %s686_s2 = inlined_call_operand.vmem [shape: f32[1,128], index: 2, kind: input, shape index: {}]   ;;  %s687_s3 = inlined_call_operand.vmem [shape: bf16[128,128], index: 3, kind: output, shape index: {}]  }
   0x1   :  { %207 = vmatprep.subr.bf16.mxu0 %v553_v0  ;;  %501 = vmatprep.subr.bf16.mxu1 %v553_v0  ;;  %v520_v1 = vld [vmem:[%s684_s1] sm:$0xff]   ;;  %v521_v2 = vld [vmem:[%s684_s1 + $0x8] sm:$0xff]   ;;  %v522_v3 = vld [vmem:[%s684_s1 + $0x10] sm:$0xff]  }
   0x2   :  { %208 = vmatpush1.bf16.msra.mxu0 %v520_v1  ;;  %510 = vmatpush1.bf16.msra.mxu1 %v520_v1  ;;  %v523_v4 = vld [vmem:[%s684_s1 + $0x18] sm:$0xff]   ;;  %v531_v5 = vld [vmem:[%s685_s0 + $0x4] ss:$8 sps:$4 sm:$0xff]   ;;  %v526_v9 = vld [vmem:[%s684_s1 + $0x30] sm:$0xff]  }
   0x3   :  { %209 = vmatprep.subr.bf16.mxu0 %v553_v0  ;;  %502 = vmatprep.subr.bf16.mxu1 %v553_v0  ;;  %v534_v6 = vld [vmem:[%s685_s0 + $0x44] ss:$8 sps:$4 sm:$0xff]   ;;  %v527_v10 = vld [vmem:[%s684_s1 + $0x38] sm:$0xff]   ;;  %v529_v12 = vld [vmem:[%s685_s0] ss:$8 sps:$4 sm:$0xff]  }
   0x4   :  { %414 = vmatprep.mubr.msk.bf16.mxu0 %vm182_vm0, %v531_v5  ;;  %418 = vmatprep.mubr.msk.bf16.mxu1 %vm182_vm0, %v534_v6  ;;  %v524_v7 = vld [vmem:[%s684_s1 + $0x20] sm:$0xff]   ;;  %v525_v8 = vld [vmem:[%s684_s1 + $0x28] sm:$0xff]   ;;  %v535_v14 = vld [vmem:[%s685_s0 + $0x14] ss:$8 sps:$4 sm:$0xff]  }
   0x5   :  { %v528_v11 = vld [vmem:[%s684_s1 + $0x40] sm:$0xff]   ;;  %v537_v15 = vld [vmem:[%s685_s0 + $0x54] ss:$8 sps:$4 sm:$0xff]   ;;  %v539_v16 = vld [vmem:[%s685_s0 + $0x10] ss:$8 sps:$4 sm:$0xff]  }
   0x6   :  { %210 = vmatpush1.bf16.msra.mxu0 %v521_v2  ;;  %511 = vmatpush1.bf16.msra.mxu1 %v521_v2  ;;  %v532_v13 = vld [vmem:[%s685_s0 + $0x40] ss:$8 sps:$4 sm:$0xff]   ;;  %v540_v17 = vld [vmem:[%s685_s0 + $0x50] ss:$8 sps:$4 sm:$0xff]   ;;  %v541_v18 = vld [vmem:[%s685_s0 + $0x24] ss:$8 sps:$4 sm:$0xff]  }
   0x7   :  { %211 = vmatprep.subr.bf16.mxu0 %v553_v0  ;;  %503 = vmatprep.subr.bf16.mxu1 %v553_v0  ;;  %v543_v19 = vld [vmem:[%s685_s0 + $0x64] ss:$8 sps:$4 sm:$0xff]   ;;  %v545_v20 = vld [vmem:[%s685_s0 + $0x20] ss:$8 sps:$4 sm:$0xff]   ;;  %v547_v22 = vld [vmem:[%s685_s0 + $0x34] ss:$8 sps:$4 sm:$0xff]  }
   0x8   :  { %v546_v21 = vld [vmem:[%s685_s0 + $0x60] ss:$8 sps:$4 sm:$0xff]   ;;  %v549_v23 = vld [vmem:[%s685_s0 + $0x74] ss:$8 sps:$4 sm:$0xff]   ;;  %v551_v24 = vld [vmem:[%s685_s0 + $0x30] ss:$8 sps:$4 sm:$0xff]  }
   0x9   :  { %v552_v25 = vld [vmem:[%s685_s0 + $0x70] ss:$8 sps:$4 sm:$0xff]   ;;  %v388_v26 = vld [vmem:[%s686_s2] ss:$0 sm:$0xff] }
   0xa   :  { %212 = vmatpush1.bf16.msra.mxu0 %v522_v3  ;;  %512 = vmatpush1.bf16.msra.mxu1 %v522_v3 }
   0xb   :  { %213 = vmatprep.subr.bf16.mxu0 %v553_v0  ;;  %504 = vmatprep.subr.bf16.mxu1 %v553_v0 }
   0xe   :  { %214 = vmatpush1.bf16.msra.mxu0 %v523_v4  ;;  %513 = vmatpush1.bf16.msra.mxu1 %v523_v4 }
   0xf   :  { %215 = vmatprep.subr.bf16.mxu0 %v553_v0  ;;  %505 = vmatprep.subr.bf16.mxu1 %v553_v0 }
  0x12   :  { %216 = vmatpush1.bf16.msra.mxu0 %v524_v7  ;;  %514 = vmatpush1.bf16.msra.mxu1 %v524_v7 }
  0x13   :  { %217 = vmatprep.subr.bf16.mxu0 %v553_v0  ;;  %506 = vmatprep.subr.bf16.mxu1 %v553_v0 }
  0x16   :  { %218 = vmatpush1.bf16.msra.mxu0 %v525_v8  ;;  %515 = vmatpush1.bf16.msra.mxu1 %v525_v8 }
  0x17   :  { %219 = vmatprep.subr.bf16.mxu0 %v553_v0  ;;  %507 = vmatprep.subr.bf16.mxu1 %v553_v0 }
  0x1a   :  { %220 = vmatpush1.bf16.msra.mxu0 %v526_v9  ;;  %516 = vmatpush1.bf16.msra.mxu1 %v526_v9 }
  0x1b   :  { %221 = vmatprep.subr.bf16.mxu0 %v553_v0  ;;  %508 = vmatprep.subr.bf16.mxu1 %v553_v0 }
  0x1e   :  { %222 = vmatpush1.bf16.msra.mxu0 %v527_v10  ;;  %517 = vmatpush1.bf16.msra.mxu1 %v527_v10 }
  0x1f   :  { %223 = vmatprep.subr.bf16.mxu0 %v553_v0  ;;  %509 = vmatprep.subr.bf16.mxu1 %v553_v0 }
  0x22   :  { %224 = vmatpush1.bf16.msra.mxu0 %v528_v11  ;;  %518 = vmatpush1.bf16.msra.mxu1 %v528_v11 }
  0x25   :  { %240 = vmatmul.mubr.bf16.vlgmr.msra.gmra.mrb[0].mxu0 %v529_v12  ;;  %272 = vmatmul.mubr.bf16.vlgmr.msra.gmra.mrb[0].mxu1 %v532_v13 }
  0x26   :  { %415 = vmatprep.mubr.msk.bf16.mxu0 %vm182_vm0, %v535_v14  ;;  %419 = vmatprep.mubr.msk.bf16.mxu1 %vm182_vm0, %v537_v15 }
  0x2d   :  { %248 = vmatmul.mubr.bf16.gmra.mrb[4].mxu0 %v539_v16  ;;  %280 = vmatmul.mubr.bf16.gmra.mrb[4].mxu1 %v540_v17 }
  0x2e   :  { %416 = vmatprep.mubr.msk.bf16.mxu0 %vm182_vm0, %v541_v18  ;;  %420 = vmatprep.mubr.msk.bf16.mxu1 %vm182_vm0, %v543_v19 }
  0x35   :  { %256 = vmatmul.mubr.bf16.gmra.mrb[8].mxu0 %v545_v20  ;;  %288 = vmatmul.mubr.bf16.gmra.mrb[8].mxu1 %v546_v21 }
  0x36   :  { %417 = vmatprep.mubr.msk.bf16.mxu0 %vm182_vm0, %v547_v22  ;;  %421 = vmatprep.mubr.msk.bf16.mxu1 %vm182_vm0, %v549_v23 }
  0x3d   :  { %264 = vmatmul.mubr.bf16.gmra.mrb[12].mxu0 %v551_v24  ;;  %296 = vmatmul.mubr.bf16.gmra.mrb[12].mxu1 %v552_v25 }
  0xf8   :  { %v241_v27 = vpop.f32.mrb[0].mxu0  ;;  %v273_v28 = vpop.f32.mrb[0].mxu1 }
  0xf9   :  { %v243_v29 = vpop.f32.mrb[1].mxu0  ;;  %v275_v30 = vpop.f32.mrb[1].mxu1  ;;  %v242_v33 = vadd.f32 %v388_v26, %v241_v27  ;;  %v274_v34 = vadd.f32 %v388_v26, %v273_v28 }
  0xfa   :  { %v244_v31 = vpop.f32.mrb[2].mxu0  ;;  %v276_v32 = vpop.f32.mrb[2].mxu1 }
  0xfb   :  { %v245_v35 = vadd.f32 %v388_v26, %v244_v31  ;;  %v277_v36 = vadd.f32 %v388_v26, %v276_v32  ;;  %v246_v37 = vpop.f32.mrb[3].mxu0  ;;  %v278_v38 = vpop.f32.mrb[3].mxu1 }
  0xfd   :  { %v457_v39 = vpack.c.bf16 %v245_v35, %v242_v33  ;;  %v477_v40 = vpack.c.bf16 %v277_v36, %v274_v34 }
  0xff   :  { %458 = vst [vmem:[%s687_s3] sm:$0xff] %v457_v39   ;;  %497 = vst [vmem:[%s687_s3 + $0x20] sm:$0xff] %v477_v40  }
 0x100   :  { %v249_v41 = vpop.f32.mrb[4].mxu0  ;;  %v281_v42 = vpop.f32.mrb[4].mxu1 }
 0x101   :  { %v251_v43 = vpop.f32.mrb[5].mxu0  ;;  %v283_v44 = vpop.f32.mrb[5].mxu1  ;;  %v250_v47 = vadd.f32 %v388_v26, %v249_v41  ;;  %v282_v48 = vadd.f32 %v388_v26, %v281_v42 }
 0x102   :  { %v252_v45 = vpop.f32.mrb[6].mxu0  ;;  %v284_v46 = vpop.f32.mrb[6].mxu1 }
 0x103   :  { %v253_v49 = vadd.f32 %v388_v26, %v252_v45  ;;  %v285_v50 = vadd.f32 %v388_v26, %v284_v46  ;;  %v254_v51 = vpop.f32.mrb[7].mxu0  ;;  %v286_v52 = vpop.f32.mrb[7].mxu1 }
 0x105   :  { %v462_v53 = vpack.c.bf16 %v253_v49, %v250_v47  ;;  %v482_v54 = vpack.c.bf16 %v285_v50, %v282_v48 }
 0x107   :  { %494 = vst [vmem:[%s687_s3 + $0x8] sm:$0xff] %v462_v53   ;;  %498 = vst [vmem:[%s687_s3 + $0x28] sm:$0xff] %v482_v54  }
 0x108   :  { %v257_v55 = vpop.f32.mrb[8].mxu0  ;;  %v289_v56 = vpop.f32.mrb[8].mxu1 }
 0x109   :  { %v259_v57 = vpop.f32.mrb[9].mxu0  ;;  %v291_v58 = vpop.f32.mrb[9].mxu1  ;;  %v258_v61 = vadd.f32 %v388_v26, %v257_v55  ;;  %v290_v62 = vadd.f32 %v388_v26, %v289_v56 }
 0x10a   :  { %v260_v59 = vpop.f32.mrb[10].mxu0  ;;  %v292_v60 = vpop.f32.mrb[10].mxu1 }
 0x10b   :  { %v261_v63 = vadd.f32 %v388_v26, %v260_v59  ;;  %v293_v0 = vadd.f32 %v388_v26, %v292_v60  ;;  %v262_v1 = vpop.f32.mrb[11].mxu0  ;;  %v294_v2 = vpop.f32.mrb[11].mxu1 }
 0x10d   :  { %v467_v3 = vpack.c.bf16 %v261_v63, %v258_v61  ;;  %v487_v4 = vpack.c.bf16 %v293_v0, %v290_v62 }
 0x10f   :  { %495 = vst [vmem:[%s687_s3 + $0x10] sm:$0xff] %v467_v3   ;;  %499 = vst [vmem:[%s687_s3 + $0x30] sm:$0xff] %v487_v4  }
 0x110   :  { %v265_v5 = vpop.f32.mrb[12].mxu0  ;;  %v297_v6 = vpop.f32.mrb[12].mxu1 }
 0x111   :  { %v267_v7 = vpop.f32.mrb[13].mxu0  ;;  %v299_v8 = vpop.f32.mrb[13].mxu1  ;;  %v266_v11 = vadd.f32 %v388_v26, %v265_v5  ;;  %v298_v12 = vadd.f32 %v388_v26, %v297_v6 }
 0x112   :  { %v268_v9 = vpop.f32.mrb[14].mxu0  ;;  %v300_v10 = vpop.f32.mrb[14].mxu1 }
 0x113   :  { %v269_v13 = vadd.f32 %v388_v26, %v268_v9  ;;  %v301_v14 = vadd.f32 %v388_v26, %v300_v10  ;;  %v270_v15 = vpop.f32.mrb[15].mxu0  ;;  %v302_v16 = vpop.f32.mrb[15].mxu1 }
 0x115   :  { %v472_v17 = vpack.c.bf16 %v269_v13, %v266_v11  ;;  %v492_v18 = vpack.c.bf16 %v301_v14, %v298_v12 }
 0x117   :  { %496 = vst [vmem:[%s687_s3 + $0x18] sm:$0xff] %v472_v17   ;;  %500 = vst [vmem:[%s687_s3 + $0x38] sm:$0xff] %v492_v18  }

// kernel: forward.42
= control target key start
LH: loop header
LB: loop body
LE: loop exit
PB: predicated region body
PF: predicated region fallthrough
CT: control target
= control target key end

     0   :  { %vm318_vm0 = vcmask 261120   ;;  %s1122_s1 = inlined_call_operand.vmem [shape: bf16[288,128], index: 1, kind: input, shape index: {}]   ;;  %s1123_s0 = inlined_call_operand.vmem [shape: bf16[128,288], index: 0, kind: input, shape index: {}]   ;;  %s1124_s2 = inlined_call_operand.vmem [shape: f32[1,128], index: 2, kind: input, shape index: {}]   ;;  %s1125_s3 = inlined_call_operand.vmem [shape: bf16[128,128], index: 3, kind: output, shape index: {}]  }
   0x1   :  { %v861_v0 = vld [vmem:[%s1122_s1 + $0x40] sm:$0xff]   ;;  %v863_v2 = vld [vmem:[%s1122_s1 + $0x48] sm:$0xff]   ;;  %v865_v4 = vld [vmem:[%s1122_s1 + $0x50] sm:$0xff]  }
   0x2   :  { %v862_v1 = vld [vmem:[%s1122_s1] sm:$0xff]   ;;  %751 = vmatprep.subr.bf16.mxu0 %v861_v0  ;;  %845 = vmatprep.subr.bf16.mxu1 %v861_v0  ;;  %v864_v3 = vld [vmem:[%s1122_s1 + $0x8] sm:$0xff]   ;;  %v866_v5 = vld [vmem:[%s1122_s1 + $0x10] sm:$0xff]  }
   0x3   :  { %752 = vmatpush3.bf16.msra.mxu0 %v862_v1  ;;  %853 = vmatpush3.bf16.msra.mxu1 %v862_v1  ;;  %v867_v6 = vld [vmem:[%s1122_s1 + $0x58] sm:$0xff]   ;;  %v869_v8 = vld [vmem:[%s1122_s1 + $0x60] sm:$0xff]   ;;  %v871_v10 = vld [vmem:[%s1122_s1 + $0x68] sm:$0xff]  }
   0x4   :  { %753 = vmatprep.subr.bf16.mxu0 %v863_v2  ;;  %846 = vmatprep.subr.bf16.mxu1 %v863_v2  ;;  %v868_v7 = vld [vmem:[%s1122_s1 + $0x18] sm:$0xff]   ;;  %v870_v9 = vld [vmem:[%s1122_s1 + $0x20] sm:$0xff]   ;;  %v872_v13 = vld [vmem:[%s1122_s1 + $0x28] sm:$0xff]  }
   0x5   :  { %v879_v11 = vld [vmem:[%s1123_s0 + $0x4] ss:$12 sps:$4 sm:$0xff]   ;;  %v882_v12 = vld [vmem:[%s1123_s0 + $0x94] ss:$12 sps:$4 sm:$0xff]   ;;  %v875_v16 = vld [vmem:[%s1122_s1 + $0x78] sm:$0xff]  }
   0x6   :  { %v873_v14 = vld [vmem:[%s1122_s1 + $0x70] sm:$0xff]   ;;  %375 = vmatprep.mubr.bf16.mxu0 %v879_v11  ;;  %423 = vmatprep.mubr.bf16.mxu1 %v882_v12  ;;  %v876_v17 = vld [vmem:[%s1122_s1 + $0x38] sm:$0xff]   ;;  %v877_v18 = vld [vmem:[%s1123_s0] ss:$12 sps:$4 sm:$0xff]  }
   0x7   :  { %754 = vmatpush3.bf16.msra.mxu0 %v864_v3  ;;  %854 = vmatpush3.bf16.msra.mxu1 %v864_v3  ;;  %v874_v15 = vld [vmem:[%s1122_s1 + $0x30] sm:$0xff]   ;;  %v883_v19 = vld [vmem:[%s1122_s1 + $0x80] sm:$0xff]   ;;  %v884_v21 = vld [vmem:[%s1123_s0 + $0x1c] ss:$12 sps:$4 sm:$0xff]  }
   0x8   :  { %755 = vmatprep.subr.bf16.mxu0 %v865_v4  ;;  %847 = vmatprep.subr.bf16.mxu1 %v865_v4  ;;  %v880_v20 = vld [vmem:[%s1123_s0 + $0x90] ss:$12 sps:$4 sm:$0xff]   ;;  %v886_v22 = vld [vmem:[%s1123_s0 + $0xac] ss:$12 sps:$4 sm:$0xff]   ;;  %v889_v25 = vld [vmem:[%s1123_s0 + $0xa8] ss:$12 sps:$4 sm:$0xff]  }
   0x9   :  { %v890_v23 = vld [vmem:[%s1122_s1 + $0x88] sm:$0xff]   ;;  %v888_v24 = vld [vmem:[%s1123_s0 + $0x18] ss:$12 sps:$4 sm:$0xff]   ;;  %v891_v26 = vld [vmem:[%s1123_s0 + $0x34] ss:$12 sps:$4 sm:$0xff]  }
   0xa   :  { %v893_v27 = vld [vmem:[%s1123_s0 + $0x8] ss:$12 sps:$4 sm:$0xff]   ;;  %v894_v28 = vld [vmem:[%s1123_s0 + $0x30] ss:$12 sps:$4 sm:$0xff]   ;;  %v895_v29 = vld [vmem:[%s1123_s0 + $0x20] ss:$12 sps:$4 sm:$0xff]  }
   0xb   :  { %756 = vmatpush3.bf16.msra.mxu0 %v866_v5  ;;  %855 = vmatpush3.bf16.msra.mxu1 %v866_v5  ;;  %v896_v30 = vld [vmem:[%s1123_s0 + $0x4c] ss:$12 sps:$4 sm:$0xff]   ;;  %v899_v32 = vld [vmem:[%s1123_s0 + $0x48] ss:$12 sps:$4 sm:$0xff]   ;;  %v900_v33 = vld [vmem:[%s1123_s0 + $0x50] ss:$12 sps:$4 sm:$0xff]  }
   0xc   :  { %757 = vmatprep.subr.bf16.mxu0 %v867_v6  ;;  %848 = vmatprep.subr.bf16.mxu1 %v867_v6  ;;  %v898_v31 = vld [vmem:[%s1123_s0 + $0x38] ss:$12 sps:$4 sm:$0xff]   ;;  %v903_v35 = vld [vmem:[%s1123_s0 + $0x68] ss:$12 sps:$4 sm:$0xff]   ;;  %v904_v36 = vld [vmem:[%s1123_s0 + $0x60] ss:$12 sps:$4 sm:$0xff]  }
   0xd   :  { %v901_v34 = vld [vmem:[%s1123_s0 + $0x64] ss:$12 sps:$4 sm:$0xff]   ;;  %v905_v37 = vld [vmem:[%s1123_s0 + $0x80] ss:$12 sps:$4 sm:$0xff]   ;;  %v906_v38 = vld [vmem:[%s1123_s0 + $0x7c] ss:$12 sps:$4 sm:$0xff]  }
   0xe   :  { %v908_v39 = vld [vmem:[%s1123_s0 + $0x98] ss:$12 sps:$4 sm:$0xff]   ;;  %v910_v41 = vld [vmem:[%s1123_s0 + $0xb0] ss:$12 sps:$4 sm:$0xff]   ;;  %v1076_v2 = vld [vmem:[%s1124_s2] ss:$0 sm:$0xff] }
   0xf   :  { %758 = vmatpush3.bf16.msra.mxu0 %v868_v7  ;;  %856 = vmatpush3.bf16.msra.mxu1 %v868_v7  ;;  %v909_v40 = vld [vmem:[%s1123_s0 + $0x78] ss:$12 sps:$4 sm:$0xff]  }
  0x10   :  { %759 = vmatprep.subr.bf16.mxu0 %v869_v8  ;;  %849 = vmatprep.subr.bf16.mxu1 %v869_v8 }
  0x13   :  { %760 = vmatpush3.bf16.msra.mxu0 %v870_v9  ;;  %857 = vmatpush3.bf16.msra.mxu1 %v870_v9 }
  0x14   :  { %761 = vmatprep.subr.bf16.mxu0 %v871_v10  ;;  %850 = vmatprep.subr.bf16.mxu1 %v871_v10 }
  0x17   :  { %762 = vmatpush3.bf16.msra.mxu0 %v872_v13  ;;  %858 = vmatpush3.bf16.msra.mxu1 %v872_v13 }
  0x18   :  { %763 = vmatprep.subr.bf16.mxu0 %v873_v14  ;;  %851 = vmatprep.subr.bf16.mxu1 %v873_v14 }
  0x1b   :  { %764 = vmatpush3.bf16.msra.mxu0 %v874_v15  ;;  %859 = vmatpush3.bf16.msra.mxu1 %v874_v15 }
  0x1c   :  { %765 = vmatprep.subr.bf16.mxu0 %v875_v16  ;;  %852 = vmatprep.subr.bf16.mxu1 %v875_v16 }
  0x1f   :  { %766 = vmatpush3.bf16.msra.mxu0 %v876_v17  ;;  %860 = vmatpush3.bf16.msra.mxu1 %v876_v17 }
  0x20   :  { %825 = vmatprep.subr.bf16.mxu1 %v883_v19 }
  0x22   :  { %376 = vmatmul.mubr.bf16.vlgmr.msra.gmra.mrb[0].mxu0 %v877_v18  ;;  %424 = vmatmul.mubr.bf16.vlgmr.msra.gmra.mrb[0].mxu1 %v880_v20 }
  0x23   :  { %826 = vmatpush3.bf16.msra.mxu1 %v883_v19  ;;  %383 = vmatprep.mubr.bf16.mxu0 %v884_v21 }
  0x24   :  { %431 = vmatprep.mubr.bf16.mxu1 %v886_v22  ;;  %827 = vmatprep.subr.bf16.mxu1 %v890_v23 }
  0x27   :  { %828 = vmatpush3.bf16.msra.mxu1 %v890_v23 }
  0x2a   :  { %384 = vmatmul.mubr.bf16.gmra.mrb[4].mxu0 %v888_v24  ;;  %432 = vmatmul.mubr.bf16.gmra.mrb[4].mxu1 %v889_v25 }
  0x2b   :  { %391 = vmatprep.mubr.bf16.mxu0 %v891_v26  ;;  %829 = vmatprep.mubr.msk.bf16.mxu1 %vm318_vm0, %v893_v27 }
  0x32   :  { %392 = vmatmul.mubr.bf16.gmra.mrb[8].mxu0 %v894_v28  ;;  %830 = vmatmul.mubr.msk.bf16.vlgmr.msra.gmra.mrb[8].mxu1 %vm318_vm0, %v895_v29 }
  0x33   :  { %399 = vmatprep.mubr.bf16.mxu0 %v896_v30  ;;  %833 = vmatprep.mubr.msk.bf16.mxu1 %vm318_vm0, %v898_v31 }
  0x3a   :  { %400 = vmatmul.mubr.bf16.gmra.mrb[12].mxu0 %v899_v32  ;;  %834 = vmatmul.mubr.msk.bf16.gmra.mrb[12].mxu1 %vm318_vm0, %v900_v33 }
  0x3b   :  { %407 = vmatprep.mubr.bf16.mxu0 %v901_v34  ;;  %837 = vmatprep.mubr.msk.bf16.mxu1 %vm318_vm0, %v903_v35 }
  0x42   :  { %408 = vmatmul.mubr.bf16.gmra.mrb[16].mxu0 %v904_v36  ;;  %838 = vmatmul.mubr.msk.bf16.gmra.mrb[16].mxu1 %vm318_vm0, %v905_v37 }
  0x43   :  { %415 = vmatprep.mubr.bf16.mxu0 %v906_v38  ;;  %841 = vmatprep.mubr.msk.bf16.mxu1 %vm318_vm0, %v908_v39 }
  0x4a   :  { %416 = vmatmul.mubr.bf16.gmra.mrb[20].mxu0 %v909_v40  ;;  %842 = vmatmul.mubr.msk.bf16.gmra.mrb[20].mxu1 %vm318_vm0, %v910_v41 }
  0xf5   :  { %v767_v42 = vpop.f32.mrb[0].mxu0  ;;  %v803_v43 = vpop.f32.mrb[0].mxu1 }
  0xf6   :  { %v768_v44 = vpop.f32.mrb[1].mxu0  ;;  %v804_v45 = vpop.f32.mrb[1].mxu1 }
  0xf7   :  { %v769_v46 = vadd.f32 %v768_v44, %v767_v42  ;;  %v770_v47 = vpop.f32.mrb[2].mxu0  ;;  %v1065_v48 = vadd.f32 %v804_v45, %v803_v43  ;;  %v806_v49 = vpop.f32.mrb[2].mxu1 }
  0xf8   :  { %v771_v50 = vpop.f32.mrb[3].mxu0  ;;  %v807_v51 = vpop.f32.mrb[3].mxu1 }
  0xf9   :  { %v772_v52 = vadd.f32 %v771_v50, %v770_v47  ;;  %v1067_v53 = vadd.f32 %v807_v51, %v806_v49  ;;  %v378_v6 = vadd.f32 %v769_v46, %v1076_v2 }
  0xfb   :  { %v381_v15 = vadd.f32 %v772_v52, %v1076_v2 }
  0xfd   :  { %v773_v54 = vpop.f32.mrb[4].mxu0  ;;  %v809_v55 = vpop.f32.mrb[4].mxu1 }
  0xfe   :  { %v774_v56 = vpop.f32.mrb[5].mxu0  ;;  %v810_v57 = vpop.f32.mrb[5].mxu1 }
  0xff   :  { %v775_v58 = vadd.f32 %v774_v56, %v773_v54  ;;  %v776_v59 = vpop.f32.mrb[6].mxu0  ;;  %v1069_v60 = vadd.f32 %v810_v57, %v809_v55  ;;  %v812_v61 = vpop.f32.mrb[6].mxu1 }
 0x100   :  { %v777_v62 = vpop.f32.mrb[7].mxu0  ;;  %v813_v63 = vpop.f32.mrb[7].mxu1 }
 0x101   :  { %v778_v0 = vadd.f32 %v777_v62, %v776_v59  ;;  %v1071_v1 = vadd.f32 %v813_v63, %v812_v61  ;;  %v386_v3 = vadd.f32 %v775_v58, %v1076_v2  ;;  %v434_v58 = vadd.f32 %v1069_v60, %v1076_v2 }
 0x102   :  { %v426_v63 = vadd.f32 %v1065_v48, %v1076_v2  ;;  %v429_v60 = vadd.f32 %v1067_v53, %v1076_v2 }
 0x103   :  { %v389_v10 = vadd.f32 %v778_v0, %v1076_v2 }
 0x105   :  { %v779_v4 = vpop.f32.mrb[8].mxu0  ;;  %v831_v5 = vpop.f32.mrb[8].mxu1 }
 0x106   :  { %v483_v7 = vadd.f32 %v831_v5, %v386_v3  ;;  %v780_v8 = vpop.f32.mrb[9].mxu0  ;;  %v474_v9 = vpop.f32.mrb[9].mxu1  ;;  %v437_v5 = vadd.f32 %v1071_v1, %v1076_v2 }
 0x107   :  { %v781_v11 = vadd.f32 %v780_v8, %v779_v4  ;;  %v475_v12 = vadd.f32 %v474_v9, %v378_v6  ;;  %v782_v13 = vpop.f32.mrb[10].mxu0  ;;  %v832_v14 = vpop.f32.mrb[10].mxu1 }
 0x108   :  { %v486_v16 = vadd.f32 %v832_v14, %v389_v10  ;;  %v783_v17 = vpop.f32.mrb[11].mxu0  ;;  %v477_v18 = vpop.f32.mrb[11].mxu1 }
 0x109   :  { %v784_v19 = vadd.f32 %v783_v17, %v782_v13  ;;  %v478_v20 = vadd.f32 %v477_v18, %v381_v15  ;;  %v394_v25 = vadd.f32 %v781_v11, %v1076_v2 }
 0x10a   :  { %v712_v21 = vpack.c.bf16 %v486_v16, %v483_v7 }
 0x10b   :  { %v707_v22 = vpack.c.bf16 %v478_v20, %v475_v12  ;;  %v397_v32 = vadd.f32 %v784_v19, %v1076_v2 }
 0x10c   :  { %744 = vst [vmem:[%s1125_s3 + $0x8] sm:$0xff] %v712_v21  }
 0x10d   :  { %708 = vst [vmem:[%s1125_s3] sm:$0xff] %v707_v22   ;;  %v785_v23 = vpop.f32.mrb[12].mxu0  ;;  %v835_v24 = vpop.f32.mrb[12].mxu1 }
 0x10e   :  { %v786_v26 = vpop.f32.mrb[13].mxu0  ;;  %v490_v27 = vpop.f32.mrb[13].mxu1 }
 0x10f   :  { %v787_v28 = vadd.f32 %v786_v26, %v785_v23  ;;  %v491_v29 = vadd.f32 %v490_v27, %v394_v25  ;;  %v788_v30 = vpop.f32.mrb[14].mxu0  ;;  %v836_v31 = vpop.f32.mrb[14].mxu1 }
 0x110   :  { %v789_v33 = vpop.f32.mrb[15].mxu0  ;;  %v493_v34 = vpop.f32.mrb[15].mxu1 }
 0x111   :  { %v402_v35 = vadd.f32 %v787_v28, %v1076_v2  ;;  %v790_v36 = vadd.f32 %v789_v33, %v788_v30  ;;  %v494_v37 = vadd.f32 %v493_v34, %v397_v32 }
 0x113   :  { %v499_v38 = vadd.f32 %v835_v24, %v402_v35  ;;  %v405_v39 = vadd.f32 %v790_v36, %v1076_v2  ;;  %v717_v40 = vpack.c.bf16 %v494_v37, %v491_v29 }
 0x115   :  { %v502_v41 = vadd.f32 %v836_v31, %v405_v39  ;;  %745 = vst [vmem:[%s1125_s3 + $0x10] sm:$0xff] %v717_v40   ;;  %v791_v42 = vpop.f32.mrb[16].mxu0  ;;  %v839_v43 = vpop.f32.mrb[16].mxu1 }
 0x116   :  { %v792_v44 = vpop.f32.mrb[17].mxu0  ;;  %v506_v45 = vpop.f32.mrb[17].mxu1 }
 0x117   :  { %v722_v46 = vpack.c.bf16 %v502_v41, %v499_v38  ;;  %v793_v47 = vadd.f32 %v792_v44, %v791_v42  ;;  %v794_v49 = vpop.f32.mrb[18].mxu0  ;;  %v840_v50 = vpop.f32.mrb[18].mxu1 }
 0x118   :  { %v795_v51 = vpop.f32.mrb[19].mxu0  ;;  %v509_v52 = vpop.f32.mrb[19].mxu1 }
 0x119   :  { %746 = vst [vmem:[%s1125_s3 + $0x18] sm:$0xff] %v722_v46   ;;  %v410_v54 = vadd.f32 %v793_v47, %v1076_v2  ;;  %v796_v55 = vadd.f32 %v795_v51, %v794_v49 }
 0x11b   :  { %v507_v56 = vadd.f32 %v506_v45, %v410_v54  ;;  %v413_v57 = vadd.f32 %v796_v55, %v1076_v2 }
 0x11d   :  { %v510_v59 = vadd.f32 %v509_v52, %v413_v57  ;;  %v797_v61 = vpop.f32.mrb[20].mxu0  ;;  %v843_v62 = vpop.f32.mrb[20].mxu1 }
 0x11e   :  { %v531_v0 = vadd.f32 %v843_v62, %v434_v58  ;;  %v798_v3 = vpop.f32.mrb[21].mxu0  ;;  %v522_v4 = vpop.f32.mrb[21].mxu1 }
 0x11f   :  { %v727_v6 = vpack.c.bf16 %v510_v59, %v507_v56  ;;  %v799_v7 = vadd.f32 %v798_v3, %v797_v61  ;;  %v523_v8 = vadd.f32 %v522_v4, %v426_v63  ;;  %v800_v9 = vpop.f32.mrb[22].mxu0  ;;  %v844_v10 = vpop.f32.mrb[22].mxu1 }
 0x120   :  { %v534_v11 = vadd.f32 %v844_v10, %v437_v5  ;;  %v801_v12 = vpop.f32.mrb[23].mxu0  ;;  %v525_v13 = vpop.f32.mrb[23].mxu1 }
 0x121   :  { %747 = vst [vmem:[%s1125_s3 + $0x20] sm:$0xff] %v727_v6   ;;  %v418_v48 = vadd.f32 %v799_v7, %v1076_v2  ;;  %v802_v14 = vadd.f32 %v801_v12, %v800_v9  ;;  %v526_v15 = vadd.f32 %v525_v13, %v429_v60 }
 0x122   :  { %v742_v1 = vpack.c.bf16 %v534_v11, %v531_v0 }
 0x123   :  { %v515_v16 = vadd.f32 %v839_v43, %v418_v48  ;;  %v421_v17 = vadd.f32 %v802_v14, %v1076_v2  ;;  %v737_v18 = vpack.c.bf16 %v526_v15, %v523_v8 }
 0x124   :  { %750 = vst [vmem:[%s1125_s3 + $0x38] sm:$0xff] %v742_v1  }
 0x125   :  { %v518_v53 = vadd.f32 %v840_v50, %v421_v17  ;;  %749 = vst [vmem:[%s1125_s3 + $0x30] sm:$0xff] %v737_v18  }
 0x127   :  { %v732_v19 = vpack.c.bf16 %v518_v53, %v515_v16 }
 0x129   :  { %748 = vst [vmem:[%s1125_s3 + $0x28] sm:$0xff] %v732_v19  }

// kernel: forward.43
= control target key start
LH: loop header
LB: loop body
LE: loop exit
PB: predicated region body
PF: predicated region fallthrough
CT: control target
= control target key end

     0   :  { %vm204_vm0 = vcmask 261120   ;;  %s546_s1 = inlined_call_operand.vmem [shape: bf16[288,128], index: 1, kind: input, shape index: {}]   ;;  %s547_s0 = inlined_call_operand.vmem [shape: bf16[32,288], index: 0, kind: input, shape index: {}]   ;;  %s548_s2 = inlined_call_operand.vmem [shape: f32[1,128], index: 2, kind: input, shape index: {}]   ;;  %s549_s3 = inlined_call_operand.vmem [shape: bf16[32,128], index: 3, kind: output, shape index: {}]  }
   0x1   :  { %v419_v0 = vld [vmem:[%s546_s1 + $0x40] sm:$0xff]   ;;  %v421_v2 = vld [vmem:[%s546_s1 + $0x48] sm:$0xff]   ;;  %v423_v4 = vld [vmem:[%s546_s1 + $0x50] sm:$0xff]  }
   0x2   :  { %v420_v1 = vld [vmem:[%s546_s1] sm:$0xff]   ;;  %379 = vmatprep.subr.bf16.mxu0 %v419_v0  ;;  %v422_v3 = vld [vmem:[%s546_s1 + $0x8] sm:$0xff]   ;;  %v424_v5 = vld [vmem:[%s546_s1 + $0x10] sm:$0xff]  }
   0x3   :  { %380 = vmatpush3.bf16.msra.mxu0 %v420_v1  ;;  %v425_v6 = vld [vmem:[%s546_s1 + $0x58] sm:$0xff]   ;;  %v427_v8 = vld [vmem:[%s546_s1 + $0x60] sm:$0xff]   ;;  %v429_v11 = vld [vmem:[%s546_s1 + $0x68] sm:$0xff]  }
   0x4   :  { %381 = vmatprep.subr.bf16.mxu0 %v421_v2  ;;  %v426_v7 = vld [vmem:[%s546_s1 + $0x18] sm:$0xff]   ;;  %v428_v9 = vld [vmem:[%s546_s1 + $0x20] sm:$0xff]   ;;  %v430_v12 = vld [vmem:[%s546_s1 + $0x28] sm:$0xff]  }
   0x5   :  { %v434_v10 = vld [vmem:[%s546_s1 + $0x80] sm:$0xff]   ;;  %v431_v13 = vld [vmem:[%s546_s1 + $0x70] sm:$0xff]   ;;  %v439_v15 = vld [vmem:[%s546_s1 + $0x88] sm:$0xff]  }
   0x6   :  { %411 = vmatprep.subr.bf16.mxu1 %v434_v10  ;;  %v438_v14 = vld [vmem:[%s547_s0 + $0x4] ss:$12 sps:$4 sm:$0xff]   ;;  %v440_v16 = vld [vmem:[%s547_s0 + $0x8] ss:$12 sps:$4 sm:$0xff]   ;;  %v441_v17 = vld [vmem:[%s547_s0 + $0x20] ss:$12 sps:$4 sm:$0xff]  }
   0x7   :  { %382 = vmatpush3.bf16.msra.mxu0 %v422_v3  ;;  %412 = vmatpush3.bf16.msra.mxu1 %v434_v10  ;;  %v432_v18 = vld [vmem:[%s546_s1 + $0x30] sm:$0xff]   ;;  %v433_v19 = vld [vmem:[%s546_s1 + $0x78] sm:$0xff]   ;;  %v436_v21 = vld [vmem:[%s547_s0] ss:$12 sps:$4 sm:$0xff]  }
   0x8   :  { %383 = vmatprep.subr.bf16.mxu0 %v423_v4  ;;  %243 = vmatprep.mubr.bf16.mxu0 %v438_v14  ;;  %v435_v20 = vld [vmem:[%s546_s1 + $0x38] sm:$0xff]   ;;  %v333_v30 = vld [vmem:[%s548_s2] ss:$0 sm:$0xff] }
   0x9   :  { %413 = vmatprep.subr.bf16.mxu1 %v439_v15  ;;  %415 = vmatprep.mubr.msk.bf16.mxu1 %vm204_vm0, %v440_v16  ;;  %v442_v22 = vld [vmem:[%s547_s0 + $0x1c] ss:$12 sps:$4 sm:$0xff]   ;;  %v444_v23 = vld [vmem:[%s547_s0 + $0x18] ss:$12 sps:$4 sm:$0xff]  }
   0xb   :  { %384 = vmatpush3.bf16.msra.mxu0 %v424_v5  ;;  %414 = vmatpush3.bf16.msra.mxu1 %v439_v15 }
   0xc   :  { %385 = vmatprep.subr.bf16.mxu0 %v425_v6 }
   0xe   :  { %416 = vmatmul.mubr.msk.bf16.vlgmr.msra.gmra.mrb[0].mxu1 %vm204_vm0, %v441_v17 }
   0xf   :  { %386 = vmatpush3.bf16.msra.mxu0 %v426_v7 }
  0x10   :  { %387 = vmatprep.subr.bf16.mxu0 %v427_v8 }
  0x13   :  { %388 = vmatpush3.bf16.msra.mxu0 %v428_v9 }
  0x14   :  { %389 = vmatprep.subr.bf16.mxu0 %v429_v11 }
  0x17   :  { %390 = vmatpush3.bf16.msra.mxu0 %v430_v12 }
  0x18   :  { %391 = vmatprep.subr.bf16.mxu0 %v431_v13 }
  0x1b   :  { %392 = vmatpush3.bf16.msra.mxu0 %v432_v18 }
  0x1c   :  { %393 = vmatprep.subr.bf16.mxu0 %v433_v19 }
  0x1f   :  { %394 = vmatpush3.bf16.msra.mxu0 %v435_v20 }
  0x22   :  { %244 = vmatmul.mubr.bf16.vlgmr.msra.gmra.mrb[0].mxu0 %v436_v21 }
  0x23   :  { %251 = vmatprep.mubr.bf16.mxu0 %v442_v22 }
  0x2a   :  { %252 = vmatmul.mubr.bf16.gmra.mrb[4].mxu0 %v444_v23 }
  0xe1   :  { %v417_v24 = vpop.f32.mrb[0].mxu1 }
  0xe2   :  { %v294_v25 = vpop.f32.mrb[1].mxu1 }
  0xe3   :  { %v418_v26 = vpop.f32.mrb[2].mxu1 }
  0xe4   :  { %v297_v27 = vpop.f32.mrb[3].mxu1 }
  0xf5   :  { %v395_v28 = vpop.f32.mrb[0].mxu0 }
  0xf6   :  { %v396_v29 = vpop.f32.mrb[1].mxu0 }
  0xf7   :  { %v397_v31 = vadd.f32 %v396_v29, %v395_v28  ;;  %v398_v32 = vpop.f32.mrb[2].mxu0 }
  0xf8   :  { %v399_v33 = vpop.f32.mrb[3].mxu0 }
  0xf9   :  { %v400_v34 = vadd.f32 %v399_v33, %v398_v32  ;;  %v246_v35 = vadd.f32 %v397_v31, %v333_v30 }
  0xfb   :  { %v295_v36 = vadd.f32 %v294_v25, %v246_v35  ;;  %v249_v37 = vadd.f32 %v400_v34, %v333_v30 }
  0xfd   :  { %v298_v38 = vadd.f32 %v297_v27, %v249_v37  ;;  %v401_v39 = vpop.f32.mrb[4].mxu0 }
  0xfe   :  { %v402_v40 = vpop.f32.mrb[5].mxu0 }
  0xff   :  { %v371_v41 = vpack.c.bf16 %v298_v38, %v295_v36  ;;  %v403_v42 = vadd.f32 %v402_v40, %v401_v39  ;;  %v404_v43 = vpop.f32.mrb[6].mxu0 }
 0x100   :  { %v405_v44 = vpop.f32.mrb[7].mxu0 }
 0x101   :  { %372 = vst [vmem:[%s549_s3] sm:$0xff] %v371_v41   ;;  %v254_v45 = vadd.f32 %v403_v42, %v333_v30  ;;  %v406_v46 = vadd.f32 %v405_v44, %v404_v43 }
 0x103   :  { %v303_v47 = vadd.f32 %v417_v24, %v254_v45  ;;  %v257_v48 = vadd.f32 %v406_v46, %v333_v30 }
 0x105   :  { %v306_v49 = vadd.f32 %v418_v26, %v257_v48 }
 0x107   :  { %v376_v50 = vpack.c.bf16 %v306_v49, %v303_v47 }
 0x109   :  { %378 = vst [vmem:[%s549_s3 + $0x8] sm:$0xff] %v376_v50  }

// kernel: forward.44
= control target key start
LH: loop header
LB: loop body
LE: loop exit
PB: predicated region body
PF: predicated region fallthrough
CT: control target
= control target key end

     0   :  { %vm372_vm0 = vcmask 523264   ;;  %s909_s1 = inlined_call_operand.vmem [shape: bf16[576,128], index: 1, kind: input, shape index: {}]   ;;  %s910_s0 = inlined_call_operand.vmem [shape: bf16[32,576], index: 0, kind: input, shape index: {}]   ;;  %s911_s2 = inlined_call_operand.vmem [shape: f32[1,128], index: 2, kind: input, shape index: {}]   ;;  %s912_s3 = inlined_call_operand.vmem [shape: bf16[32,128], index: 3, kind: output, shape index: {}]  }
   0x1   :  { %v692_v0 = vld [vmem:[%s909_s1 + $0x40] sm:$0xff]   ;;  %v696_v4 = vld [vmem:[%s909_s1 + $0x48] sm:$0xff]   ;;  %v700_v8 = vld [vmem:[%s909_s1 + $0x50] sm:$0xff]  }
   0x2   :  { %v693_v1 = vld [vmem:[%s909_s1] sm:$0xff]   ;;  %618 = vmatprep.subr.bf16.mxu0 %v692_v0  ;;  %v697_v5 = vld [vmem:[%s909_s1 + $0x8] sm:$0xff]   ;;  %v701_v9 = vld [vmem:[%s909_s1 + $0x10] sm:$0xff]  }
   0x3   :  { %v694_v2 = vld [vmem:[%s909_s1 + $0xc0] sm:$0xff]   ;;  %619 = vmatpush3.bf16.msra.mxu0 %v693_v1  ;;  %v698_v6 = vld [vmem:[%s909_s1 + $0xc8] sm:$0xff]   ;;  %v702_v10 = vld [vmem:[%s909_s1 + $0xd0] sm:$0xff]  }
   0x4   :  { %v695_v3 = vld [vmem:[%s909_s1 + $0x80] sm:$0xff]   ;;  %646 = vmatprep.subr.bf16.mxu1 %v694_v2  ;;  %620 = vmatprep.subr.bf16.mxu0 %v696_v4  ;;  %v699_v7 = vld [vmem:[%s909_s1 + $0x88] sm:$0xff]   ;;  %v703_v11 = vld [vmem:[%s909_s1 + $0x90] sm:$0xff]  }
   0x5   :  { %647 = vmatpush3.bf16.msra.mxu1 %v695_v3  ;;  %v704_v12 = vld [vmem:[%s909_s1 + $0x58] sm:$0xff]   ;;  %v708_v16 = vld [vmem:[%s909_s1 + $0x60] sm:$0xff]   ;;  %v712_v20 = vld [vmem:[%s909_s1 + $0x68] sm:$0xff]  }
   0x6   :  { %648 = vmatprep.subr.bf16.mxu1 %v698_v6  ;;  %v705_v13 = vld [vmem:[%s909_s1 + $0x18] sm:$0xff]   ;;  %v709_v17 = vld [vmem:[%s909_s1 + $0x20] sm:$0xff]   ;;  %v713_v21 = vld [vmem:[%s909_s1 + $0x28] sm:$0xff]  }
   0x7   :  { %621 = vmatpush3.bf16.msra.mxu0 %v697_v5  ;;  %v706_v14 = vld [vmem:[%s909_s1 + $0xd8] sm:$0xff]   ;;  %v710_v18 = vld [vmem:[%s909_s1 + $0xe0] sm:$0xff]   ;;  %v714_v22 = vld [vmem:[%s909_s1 + $0xe8] sm:$0xff]  }
   0x8   :  { %622 = vmatprep.subr.bf16.mxu0 %v700_v8  ;;  %v707_v15 = vld [vmem:[%s909_s1 + $0x98] sm:$0xff]   ;;  %v711_v19 = vld [vmem:[%s909_s1 + $0xa0] sm:$0xff]   ;;  %v715_v23 = vld [vmem:[%s909_s1 + $0xa8] sm:$0xff]  }
   0x9   :  { %649 = vmatpush3.bf16.msra.mxu1 %v699_v7  ;;  %v716_v24 = vld [vmem:[%s909_s1 + $0x70] sm:$0xff]   ;;  %v720_v28 = vld [vmem:[%s909_s1 + $0x78] sm:$0xff]   ;;  %v727_v34 = vld [vmem:[%s909_s1 + $0x100] sm:$0xff]  }
   0xa   :  { %650 = vmatprep.subr.bf16.mxu1 %v702_v10  ;;  %v717_v25 = vld [vmem:[%s909_s1 + $0x30] sm:$0xff]   ;;  %v721_v29 = vld [vmem:[%s909_s1 + $0x38] sm:$0xff]   ;;  %v730_v36 = vld [vmem:[%s910_s0 + $0xc] ss:$20 sps:$4 sm:$0xff]  }
   0xb   :  { %623 = vmatpush3.bf16.msra.mxu0 %v701_v9  ;;  %v718_v26 = vld [vmem:[%s909_s1 + $0xf0] sm:$0xff]   ;;  %v722_v30 = vld [vmem:[%s909_s1 + $0xf8] sm:$0xff]   ;;  %v731_v37 = vld [vmem:[%s909_s1 + $0x108] sm:$0xff]   ;;  %460 = vmatprep.mubr.bf16.mxu1 %v730_v36 }
   0xc   :  { %624 = vmatprep.subr.bf16.mxu0 %v704_v12  ;;  %v719_v27 = vld [vmem:[%s909_s1 + $0xb0] sm:$0xff]   ;;  %v725_v32 = vld [vmem:[%s910_s0 + $0x4] ss:$20 sps:$4 sm:$0xff]   ;;  %v728_v35 = vld [vmem:[%s910_s0 + $0x8] ss:$20 sps:$4 sm:$0xff]  }
   0xd   :  { %651 = vmatpush3.bf16.msra.mxu1 %v703_v11  ;;  %v723_v31 = vld [vmem:[%s910_s0] ss:$20 sps:$4 sm:$0xff]   ;;  %v726_v33 = vld [vmem:[%s909_s1 + $0xb8] sm:$0xff]   ;;  %411 = vmatprep.mubr.bf16.mxu0 %v725_v32  ;;  %v738_v42 = vld [vmem:[%s910_s0 + $0x30] ss:$20 sps:$4 sm:$0xff]  }
   0xe   :  { %652 = vmatprep.subr.bf16.mxu1 %v706_v14  ;;  %v732_v38 = vld [vmem:[%s910_s0 + $0x2c] ss:$20 sps:$4 sm:$0xff]   ;;  %v734_v39 = vld [vmem:[%s910_s0 + $0x28] ss:$20 sps:$4 sm:$0xff]   ;;  %v735_v40 = vld [vmem:[%s909_s1 + $0x110] sm:$0xff]  }
   0xf   :  { %625 = vmatpush3.bf16.msra.mxu0 %v705_v13  ;;  %v736_v41 = vld [vmem:[%s910_s0 + $0x34] ss:$20 sps:$4 sm:$0xff]   ;;  %v739_v43 = vld [vmem:[%s909_s1 + $0x118] sm:$0xff]   ;;  %v740_v44 = vld [vmem:[%s910_s0 + $0x10] ss:$20 sps:$4 sm:$0xff]  }
  0x10   :  { %626 = vmatprep.subr.bf16.mxu0 %v708_v16  ;;  %v741_v45 = vld [vmem:[%s910_s0 + $0x38] ss:$20 sps:$4 sm:$0xff]   ;;  %v550_v47 = vld [vmem:[%s911_s2] ss:$0 sm:$0xff] }
  0x11   :  { %653 = vmatpush3.bf16.msra.mxu1 %v707_v15 }
  0x12   :  { %654 = vmatprep.subr.bf16.mxu1 %v710_v18 }
  0x13   :  { %627 = vmatpush3.bf16.msra.mxu0 %v709_v17 }
  0x14   :  { %628 = vmatprep.subr.bf16.mxu0 %v712_v20 }
  0x15   :  { %655 = vmatpush3.bf16.msra.mxu1 %v711_v19 }
  0x16   :  { %656 = vmatprep.subr.bf16.mxu1 %v714_v22 }
  0x17   :  { %629 = vmatpush3.bf16.msra.mxu0 %v713_v21 }
  0x18   :  { %630 = vmatprep.subr.bf16.mxu0 %v716_v24 }
  0x19   :  { %657 = vmatpush3.bf16.msra.mxu1 %v715_v23 }
  0x1a   :  { %658 = vmatprep.subr.bf16.mxu1 %v718_v26 }
  0x1b   :  { %631 = vmatpush3.bf16.msra.mxu0 %v717_v25 }
  0x1c   :  { %632 = vmatprep.subr.bf16.mxu0 %v720_v28 }
  0x1d   :  { %659 = vmatpush3.bf16.msra.mxu1 %v719_v27 }
  0x1e   :  { %660 = vmatprep.subr.bf16.mxu1 %v722_v30 }
  0x1f   :  { %633 = vmatpush3.bf16.msra.mxu0 %v721_v29 }
  0x20   :  { %680 = vmatprep.subr.bf16.mxu0 %v727_v34 }
  0x21   :  { %661 = vmatpush3.bf16.msra.mxu1 %v726_v33 }
  0x22   :  { %412 = vmatmul.mubr.bf16.vlgmr.msra.gmra.mrb[0].mxu0 %v723_v31 }
  0x23   :  { %681 = vmatpush3.bf16.msra.mxu0 %v727_v34  ;;  %419 = vmatprep.mubr.bf16.mxu0 %v732_v38 }
  0x24   :  { %461 = vmatmul.mubr.bf16.vlgmr.msra.gmra.mrb[0].mxu1 %v728_v35  ;;  %682 = vmatprep.subr.bf16.mxu0 %v731_v37 }
  0x25   :  { %468 = vmatprep.mubr.bf16.mxu1 %v736_v41 }
  0x27   :  { %683 = vmatpush3.bf16.msra.mxu0 %v731_v37 }
  0x28   :  { %684 = vmatprep.subr.bf16.mxu0 %v735_v40 }
  0x2a   :  { %420 = vmatmul.mubr.bf16.gmra.mrb[4].mxu0 %v734_v39 }
  0x2b   :  { %688 = vmatprep.mubr.msk.bf16.mxu0 %vm372_vm0, %v740_v44  ;;  %685 = vmatpush3.bf16.msra.mxu0 %v735_v40 }
  0x2c   :  { %469 = vmatmul.mubr.bf16.gmra.mrb[4].mxu1 %v738_v42  ;;  %686 = vmatprep.subr.bf16.mxu0 %v739_v43 }
  0x2f   :  { %687 = vmatpush3.bf16.msra.mxu0 %v739_v43 }
  0x32   :  { %689 = vmatmul.mubr.msk.bf16.vlgmr.msra.gmra.mrb[8].mxu0 %vm372_vm0, %v741_v45 }
  0xf5   :  { %v634_v46 = vpop.f32.mrb[0].mxu0 }
  0xf6   :  { %v635_v48 = vpop.f32.mrb[1].mxu0 }
  0xf7   :  { %v636_v49 = vadd.f32 %v635_v48, %v634_v46  ;;  %v637_v50 = vpop.f32.mrb[2].mxu0  ;;  %v662_v51 = vpop.f32.mrb[0].mxu1 }
  0xf8   :  { %v638_v52 = vpop.f32.mrb[3].mxu0  ;;  %v663_v55 = vpop.f32.mrb[1].mxu1 }
  0xf9   :  { %v414_v53 = vadd.f32 %v636_v49, %v550_v47  ;;  %v639_v54 = vadd.f32 %v638_v52, %v637_v50  ;;  %v664_v56 = vadd.f32 %v663_v55, %v662_v51  ;;  %v665_v57 = vpop.f32.mrb[2].mxu1 }
  0xfa   :  { %v666_v59 = vpop.f32.mrb[3].mxu1 }
  0xfb   :  { %v417_v58 = vadd.f32 %v639_v54, %v550_v47  ;;  %v667_v60 = vadd.f32 %v666_v59, %v665_v57  ;;  %v463_v61 = vadd.f32 %v664_v56, %v414_v53 }
  0xfd   :  { %v640_v62 = vpop.f32.mrb[4].mxu0  ;;  %v466_v0 = vadd.f32 %v667_v60, %v417_v58 }
  0xfe   :  { %v641_v63 = vpop.f32.mrb[5].mxu0 }
  0xff   :  { %v642_v1 = vadd.f32 %v641_v63, %v640_v62  ;;  %v643_v2 = vpop.f32.mrb[6].mxu0  ;;  %v668_v3 = vpop.f32.mrb[4].mxu1 }
 0x100   :  { %v644_v4 = vpop.f32.mrb[7].mxu0  ;;  %v669_v7 = vpop.f32.mrb[5].mxu1 }
 0x101   :  { %v422_v5 = vadd.f32 %v642_v1, %v550_v47  ;;  %v645_v6 = vadd.f32 %v644_v4, %v643_v2  ;;  %v670_v8 = vadd.f32 %v669_v7, %v668_v3  ;;  %v671_v9 = vpop.f32.mrb[6].mxu1 }
 0x102   :  { %v672_v11 = vpop.f32.mrb[7].mxu1 }
 0x103   :  { %v425_v10 = vadd.f32 %v645_v6, %v550_v47  ;;  %v673_v12 = vadd.f32 %v672_v11, %v671_v9  ;;  %v471_v13 = vadd.f32 %v670_v8, %v422_v5 }
 0x105   :  { %v690_v14 = vpop.f32.mrb[8].mxu0  ;;  %v474_v15 = vadd.f32 %v673_v12, %v425_v10 }
 0x106   :  { %v520_v16 = vadd.f32 %v690_v14, %v471_v13  ;;  %v511_v17 = vpop.f32.mrb[9].mxu0 }
 0x107   :  { %v512_v18 = vadd.f32 %v511_v17, %v463_v61  ;;  %v691_v19 = vpop.f32.mrb[10].mxu0 }
 0x108   :  { %v523_v20 = vadd.f32 %v691_v19, %v474_v15  ;;  %v514_v21 = vpop.f32.mrb[11].mxu0 }
 0x109   :  { %v515_v22 = vadd.f32 %v514_v21, %v466_v0 }
 0x10a   :  { %v615_v23 = vpack.c.bf16 %v523_v20, %v520_v16 }
 0x10b   :  { %v610_v24 = vpack.c.bf16 %v515_v22, %v512_v18 }
 0x10c   :  { %617 = vst [vmem:[%s912_s3 + $0x8] sm:$0xff] %v615_v23  }
 0x10d   :  { %611 = vst [vmem:[%s912_s3] sm:$0xff] %v610_v24  }

// kernel: forward.45
= control target key start
LH: loop header
LB: loop body
LE: loop exit
PB: predicated region body
PF: predicated region fallthrough
CT: control target
= control target key end

     0   :  { %v607_v35 = vmov 0.0   ;;  %vm608_vm0 = vmmov 0   ;;  %vm330_vm1 = vcmask 523264   ;;  %s752_s1 = inlined_call_operand.vmem [shape: bf16[576,128], index: 1, kind: input, shape index: {}]   ;;  %s753_s0 = inlined_call_operand.vmem [shape: bf16[8,576], index: 0, kind: input, shape index: {}]   ;;  %s754_s2 = inlined_call_operand.vmem [shape: f32[1,128], index: 2, kind: input, shape index: {}]   ;;  %s755_s3 = inlined_call_operand.vmem [shape: bf16[8,128], index: 3, kind: output, shape index: {}]  }
   0x1   :  { %v566_v0 = vld [vmem:[%s752_s1 + $0x40] sm:$0xff]   ;;  %v570_v4 = vld [vmem:[%s752_s1 + $0x48] sm:$0xff]   ;;  %v574_v8 = vld [vmem:[%s752_s1 + $0x50] sm:$0xff]  }
   0x2   :  { %v567_v1 = vld [vmem:[%s752_s1] sm:$0xff]   ;;  %503 = vmatprep.subr.bf16.mxu0 %v566_v0  ;;  %v571_v5 = vld [vmem:[%s752_s1 + $0x8] sm:$0xff]   ;;  %v575_v9 = vld [vmem:[%s752_s1 + $0x10] sm:$0xff]  }
   0x3   :  { %v568_v2 = vld [vmem:[%s752_s1 + $0xc0] sm:$0xff]   ;;  %504 = vmatpush3.bf16.msra.mxu0 %v567_v1  ;;  %v572_v6 = vld [vmem:[%s752_s1 + $0xc8] sm:$0xff]   ;;  %v576_v10 = vld [vmem:[%s752_s1 + $0xd0] sm:$0xff]  }
   0x4   :  { %v569_v3 = vld [vmem:[%s752_s1 + $0x80] sm:$0xff]   ;;  %525 = vmatprep.subr.bf16.mxu1 %v568_v2  ;;  %505 = vmatprep.subr.bf16.mxu0 %v570_v4  ;;  %v573_v7 = vld [vmem:[%s752_s1 + $0x88] sm:$0xff]   ;;  %v577_v11 = vld [vmem:[%s752_s1 + $0x90] sm:$0xff]  }
   0x5   :  { %526 = vmatpush3.bf16.msra.mxu1 %v569_v3  ;;  %v578_v12 = vld [vmem:[%s752_s1 + $0x58] sm:$0xff]   ;;  %v582_v16 = vld [vmem:[%s752_s1 + $0x60] sm:$0xff]   ;;  %v586_v20 = vld [vmem:[%s752_s1 + $0x68] sm:$0xff]  }
   0x6   :  { %527 = vmatprep.subr.bf16.mxu1 %v572_v6  ;;  %v579_v13 = vld [vmem:[%s752_s1 + $0x18] sm:$0xff]   ;;  %v583_v17 = vld [vmem:[%s752_s1 + $0x20] sm:$0xff]   ;;  %v587_v21 = vld [vmem:[%s752_s1 + $0x28] sm:$0xff]  }
   0x7   :  { %506 = vmatpush3.bf16.msra.mxu0 %v571_v5  ;;  %v580_v14 = vld [vmem:[%s752_s1 + $0xd8] sm:$0xff]   ;;  %v584_v18 = vld [vmem:[%s752_s1 + $0xe0] sm:$0xff]   ;;  %v588_v22 = vld [vmem:[%s752_s1 + $0xe8] sm:$0xff]  }
   0x8   :  { %507 = vmatprep.subr.bf16.mxu0 %v574_v8  ;;  %v581_v15 = vld [vmem:[%s752_s1 + $0x98] sm:$0xff]   ;;  %v585_v19 = vld [vmem:[%s752_s1 + $0xa0] sm:$0xff]   ;;  %v589_v23 = vld [vmem:[%s752_s1 + $0xa8] sm:$0xff]  }
   0x9   :  { %528 = vmatpush3.bf16.msra.mxu1 %v573_v7  ;;  %v590_v24 = vld [vmem:[%s752_s1 + $0x70] sm:$0xff]   ;;  %v594_v28 = vld [vmem:[%s752_s1 + $0x78] sm:$0xff]   ;;  %v15_v31 = vld [vmem:[%s753_s0] sm:$0xff] }
   0xa   :  { %529 = vmatprep.subr.bf16.mxu1 %v576_v10  ;;  %v591_v25 = vld [vmem:[%s752_s1 + $0x30] sm:$0xff]   ;;  %v595_v29 = vld [vmem:[%s752_s1 + $0x38] sm:$0xff]   ;;  %v461_v32 = vcombine.low %v15_v31, %v15_v31  ;;  %v462_v33 = vcombine.high %v15_v31, %v15_v31  ;;  %v16_v36 = vld [vmem:[%s753_s0 + $0x8] sm:$0xff] }
   0xb   :  { %508 = vmatpush3.bf16.msra.mxu0 %v575_v9  ;;  %v592_v26 = vld [vmem:[%s752_s1 + $0xf0] sm:$0xff]   ;;  %v596_v30 = vld [vmem:[%s752_s1 + $0xf8] sm:$0xff]   ;;  %v463_v37 = vcombine.low %v16_v36, %v16_v36  ;;  %v464_v38 = vcombine.high %v16_v36, %v16_v36  ;;  %v603_v39 = vld [vmem:[%s752_s1 + $0x100] sm:$0xff]  }
   0xc   :  { %509 = vmatprep.subr.bf16.mxu0 %v578_v12  ;;  %v593_v27 = vld [vmem:[%s752_s1 + $0xb0] sm:$0xff]   ;;  %v600_v34 = vld [vmem:[%s752_s1 + $0xb8] sm:$0xff]   ;;  %366 = vmatprep.mubr.bf16.mxu0 %v462_v33  ;;  %v604_v40 = vld [vmem:[%s752_s1 + $0x108] sm:$0xff]  }
   0xd   :  { %530 = vmatpush3.bf16.msra.mxu1 %v577_v11  ;;  %406 = vmatprep.mubr.bf16.mxu1 %v464_v38  ;;  %v605_v41 = vld [vmem:[%s752_s1 + $0x110] sm:$0xff]   ;;  %v606_v42 = vld [vmem:[%s752_s1 + $0x118] sm:$0xff]   ;;  %v460_v45 = vld [vmem:[%s754_s2] ss:$0 sm:$0xff] }
   0xe   :  { %531 = vmatprep.subr.bf16.mxu1 %v580_v14  ;;  %v599_v43 = vld [vmem:[%s753_s0 + $0x10] ss:$0 sps:$4 sm:$0xff]  }
   0xf   :  { %510 = vmatpush3.bf16.msra.mxu0 %v579_v13 }
  0x10   :  { %511 = vmatprep.subr.bf16.mxu0 %v582_v16 }
  0x11   :  { %532 = vmatpush3.bf16.msra.mxu1 %v581_v15 }
  0x12   :  { %533 = vmatprep.subr.bf16.mxu1 %v584_v18 }
  0x13   :  { %512 = vmatpush3.bf16.msra.mxu0 %v583_v17 }
  0x14   :  { %513 = vmatprep.subr.bf16.mxu0 %v586_v20 }
  0x15   :  { %534 = vmatpush3.bf16.msra.mxu1 %v585_v19 }
  0x16   :  { %535 = vmatprep.subr.bf16.mxu1 %v588_v22 }
  0x17   :  { %514 = vmatpush3.bf16.msra.mxu0 %v587_v21 }
  0x18   :  { %515 = vmatprep.subr.bf16.mxu0 %v590_v24 }
  0x19   :  { %536 = vmatpush3.bf16.msra.mxu1 %v589_v23 }
  0x1a   :  { %537 = vmatprep.subr.bf16.mxu1 %v592_v26 }
  0x1b   :  { %516 = vmatpush3.bf16.msra.mxu0 %v591_v25 }
  0x1c   :  { %517 = vmatprep.subr.bf16.mxu0 %v594_v28 }
  0x1d   :  { %538 = vmatpush3.bf16.msra.mxu1 %v593_v27 }
  0x1e   :  { %539 = vmatprep.subr.bf16.mxu1 %v596_v30 }
  0x1f   :  { %518 = vmatpush3.bf16.msra.mxu0 %v595_v29 }
  0x20   :  { %552 = vmatprep.subr.bf16.mxu0 %v607_v35 }
  0x21   :  { %540 = vmatpush3.bf16.msra.mxu1 %v600_v34 }
  0x22   :  { %367 = vmatmul.mubr.bf16.vlgmr.msra.gmra.mrb[0].mxu0 %v461_v32 }
  0x23   :  { %553 = vmatpush3.bf16.msra.mxu0 %v603_v39  ;;  %560 = vmatprep.mubr.msk.bf16.mxu0 %vm608_vm0, %v607_v35 }
  0x24   :  { %407 = vmatmul.mubr.bf16.vlgmr.msra.gmra.mrb[0].mxu1 %v463_v37  ;;  %554 = vmatprep.subr.bf16.mxu0 %v607_v35 }
  0x27   :  { %555 = vmatpush3.bf16.msra.mxu0 %v604_v40 }
  0x28   :  { %556 = vmatprep.subr.bf16.mxu0 %v607_v35 }
  0x2b   :  { %557 = vmatpush3.bf16.msra.mxu0 %v605_v41 }
  0x2c   :  { %558 = vmatprep.subr.bf16.mxu0 %v607_v35 }
  0x2f   :  { %559 = vmatpush3.bf16.msra.mxu0 %v606_v42 }
  0x32   :  { %561 = vmatmul.mubr.msk.bf16.vlgmr.msra.gmra.mrb[4].mxu0 %vm330_vm1, %v599_v43 }
  0xf5   :  { %v519_v44 = vpop.f32.mrb[0].mxu0 }
  0xf6   :  { %v520_v46 = vpop.f32.mrb[1].mxu0 }
  0xf7   :  { %v521_v47 = vadd.f32 %v520_v46, %v519_v44  ;;  %v522_v48 = vpop.f32.mrb[2].mxu0  ;;  %v541_v49 = vpop.f32.mrb[0].mxu1 }
  0xf8   :  { %v523_v50 = vpop.f32.mrb[3].mxu0  ;;  %v542_v51 = vpop.f32.mrb[1].mxu1 }
  0xf9   :  { %v369_v52 = vadd.f32 %v521_v47, %v460_v45  ;;  %v543_v53 = vadd.f32 %v542_v51, %v541_v49  ;;  %v544_v54 = vpop.f32.mrb[2].mxu1 }
  0xfa   :  { %v545_v55 = vpop.f32.mrb[3].mxu1 }
  0xfb   :  { %v409_v56 = vadd.f32 %v543_v53, %v369_v52 }
 0x105   :  { %v448_v57 = vpop.f32.mrb[4].mxu0 }
 0x106   :  { %v449_v58 = vadd.f32 %v448_v57, %v409_v56  ;;  %v562_v59 = vpop.f32.mrb[5].mxu0 }
 0x107   :  { %v451_v60 = vpop.f32.mrb[6].mxu0 }
 0x108   :  { %v454_v61 = vpack.c.bf16 %v449_v58, %v449_v58  ;;  %v563_v62 = vpop.f32.mrb[7].mxu0 }
 0x10a   :  { %455 = vst [vmem:[%s755_s3] sm:$0xf] %v454_v61 }

// kernel: forward.46
= control target key start
LH: loop header
LB: loop body
LE: loop exit
PB: predicated region body
PF: predicated region fallthrough
CT: control target
= control target key end

     0   :  { %vm1127_vm0 = vmmov 0   ;;  %s1385_s1 = inlined_call_operand.vmem [shape: bf16[1152,128], index: 1, kind: input, shape index: {}]   ;;  %s1386_s0 = inlined_call_operand.vmem [shape: bf16[8,1152], index: 0, kind: input, shape index: {}]   ;;  %s1387_s2 = inlined_call_operand.vmem [shape: f32[1,128], index: 2, kind: input, shape index: {}]   ;;  %s1388_s3 = inlined_call_operand.vmem [shape: bf16[8,128], index: 3, kind: output, shape index: {}]  }
   0x1   :  { %v1043_v0 = vld [vmem:[%s1385_s1 + $0x40] sm:$0xff]   ;;  %v1047_v4 = vld [vmem:[%s1385_s1 + $0x48] sm:$0xff]   ;;  %v1051_v8 = vld [vmem:[%s1385_s1 + $0x50] sm:$0xff]  }
   0x2   :  { %v1044_v1 = vld [vmem:[%s1385_s1] sm:$0xff]   ;;  %924 = vmatprep.subr.bf16.mxu0 %v1043_v0  ;;  %v1048_v5 = vld [vmem:[%s1385_s1 + $0x8] sm:$0xff]   ;;  %v1052_v9 = vld [vmem:[%s1385_s1 + $0x10] sm:$0xff]  }
   0x3   :  { %v1045_v2 = vld [vmem:[%s1385_s1 + $0xc0] sm:$0xff]   ;;  %925 = vmatpush3.bf16.msra.mxu0 %v1044_v1  ;;  %v1049_v6 = vld [vmem:[%s1385_s1 + $0xc8] sm:$0xff]   ;;  %v1053_v10 = vld [vmem:[%s1385_s1 + $0xd0] sm:$0xff]  }
   0x4   :  { %v1046_v3 = vld [vmem:[%s1385_s1 + $0x80] sm:$0xff]   ;;  %946 = vmatprep.subr.bf16.mxu1 %v1045_v2  ;;  %926 = vmatprep.subr.bf16.mxu0 %v1047_v4  ;;  %v1050_v7 = vld [vmem:[%s1385_s1 + $0x88] sm:$0xff]   ;;  %v1054_v11 = vld [vmem:[%s1385_s1 + $0x90] sm:$0xff]  }
   0x5   :  { %947 = vmatpush3.bf16.msra.mxu1 %v1046_v3  ;;  %v1055_v12 = vld [vmem:[%s1385_s1 + $0x58] sm:$0xff]   ;;  %v1059_v16 = vld [vmem:[%s1385_s1 + $0x60] sm:$0xff]   ;;  %v1063_v20 = vld [vmem:[%s1385_s1 + $0x68] sm:$0xff]  }
   0x6   :  { %948 = vmatprep.subr.bf16.mxu1 %v1049_v6  ;;  %v1056_v13 = vld [vmem:[%s1385_s1 + $0x18] sm:$0xff]   ;;  %v1060_v17 = vld [vmem:[%s1385_s1 + $0x20] sm:$0xff]   ;;  %v1064_v21 = vld [vmem:[%s1385_s1 + $0x28] sm:$0xff]  }
   0x7   :  { %927 = vmatpush3.bf16.msra.mxu0 %v1048_v5  ;;  %v1057_v14 = vld [vmem:[%s1385_s1 + $0xd8] sm:$0xff]   ;;  %v1061_v18 = vld [vmem:[%s1385_s1 + $0xe0] sm:$0xff]   ;;  %v1065_v22 = vld [vmem:[%s1385_s1 + $0xe8] sm:$0xff]  }
   0x8   :  { %928 = vmatprep.subr.bf16.mxu0 %v1051_v8  ;;  %v1058_v15 = vld [vmem:[%s1385_s1 + $0x98] sm:$0xff]   ;;  %v1062_v19 = vld [vmem:[%s1385_s1 + $0xa0] sm:$0xff]   ;;  %v1066_v23 = vld [vmem:[%s1385_s1 + $0xa8] sm:$0xff]  }
   0x9   :  { %949 = vmatpush3.bf16.msra.mxu1 %v1050_v7  ;;  %v1067_v24 = vld [vmem:[%s1385_s1 + $0x70] sm:$0xff]   ;;  %v1071_v28 = vld [vmem:[%s1385_s1 + $0x78] sm:$0xff]   ;;  %v15_v31 = vld [vmem:[%s1386_s0] sm:$0xff] }
   0xa   :  { %950 = vmatprep.subr.bf16.mxu1 %v1053_v10  ;;  %v1068_v25 = vld [vmem:[%s1385_s1 + $0x30] sm:$0xff]   ;;  %v1072_v29 = vld [vmem:[%s1385_s1 + $0x38] sm:$0xff]   ;;  %v843_v32 = vcombine.low %v15_v31, %v15_v31  ;;  %v844_v33 = vcombine.high %v15_v31, %v15_v31  ;;  %v1077_v35 = vld [vmem:[%s1385_s1 + $0x140] sm:$0xff]  }
   0xb   :  { %929 = vmatpush3.bf16.msra.mxu0 %v1052_v9  ;;  %v1069_v26 = vld [vmem:[%s1385_s1 + $0xf0] sm:$0xff]   ;;  %v1073_v30 = vld [vmem:[%s1385_s1 + $0xf8] sm:$0xff]   ;;  %v16_v36 = vld [vmem:[%s1386_s0 + $0x8] sm:$0xff]  ;;  %v1126_v9 = vmov 0.0  }
   0xc   :  { %930 = vmatprep.subr.bf16.mxu0 %v1055_v12  ;;  %v1070_v27 = vld [vmem:[%s1385_s1 + $0xb0] sm:$0xff]   ;;  %v1076_v34 = vld [vmem:[%s1385_s1 + $0xb8] sm:$0xff]   ;;  %667 = vmatprep.mubr.bf16.mxu0 %v844_v33  ;;  %v845_v37 = vcombine.low %v16_v36, %v16_v36  ;;  %v846_v38 = vcombine.high %v16_v36, %v16_v36  ;;  %v1080_v39 = vld [vmem:[%s1385_s1 + $0x100] sm:$0xff]  }
   0xd   :  { %951 = vmatpush3.bf16.msra.mxu1 %v1054_v11  ;;  %v1081_v40 = vld [vmem:[%s1385_s1 + $0x1c0] sm:$0xff]   ;;  %v1083_v42 = vld [vmem:[%s1385_s1 + $0x148] sm:$0xff]   ;;  %v1087_v46 = vld [vmem:[%s1385_s1 + $0x150] sm:$0xff]  }
   0xe   :  { %952 = vmatprep.subr.bf16.mxu1 %v1057_v14  ;;  %707 = vmatprep.mubr.bf16.mxu1 %v846_v38  ;;  %v1082_v41 = vld [vmem:[%s1385_s1 + $0x180] sm:$0xff]   ;;  %v1084_v43 = vld [vmem:[%s1385_s1 + $0x108] sm:$0xff]   ;;  %v1088_v47 = vld [vmem:[%s1385_s1 + $0x110] sm:$0xff]  }
   0xf   :  { %931 = vmatpush3.bf16.msra.mxu0 %v1056_v13  ;;  %v1085_v44 = vld [vmem:[%s1385_s1 + $0x1c8] sm:$0xff]   ;;  %v1089_v48 = vld [vmem:[%s1385_s1 + $0x1d0] sm:$0xff]   ;;  %v1091_v50 = vld [vmem:[%s1385_s1 + $0x158] sm:$0xff]  }
  0x10   :  { %932 = vmatprep.subr.bf16.mxu0 %v1059_v16  ;;  %v1086_v45 = vld [vmem:[%s1385_s1 + $0x188] sm:$0xff]   ;;  %v1090_v49 = vld [vmem:[%s1385_s1 + $0x190] sm:$0xff]   ;;  %v1092_v51 = vld [vmem:[%s1385_s1 + $0x118] sm:$0xff]  }
  0x11   :  { %953 = vmatpush3.bf16.msra.mxu1 %v1058_v15  ;;  %v1093_v52 = vld [vmem:[%s1385_s1 + $0x1d8] sm:$0xff]   ;;  %v1095_v54 = vld [vmem:[%s1385_s1 + $0x160] sm:$0xff]   ;;  %v1099_v58 = vld [vmem:[%s1385_s1 + $0x168] sm:$0xff]  }
  0x12   :  { %954 = vmatprep.subr.bf16.mxu1 %v1061_v18  ;;  %v1094_v53 = vld [vmem:[%s1385_s1 + $0x198] sm:$0xff]   ;;  %v1096_v55 = vld [vmem:[%s1385_s1 + $0x120] sm:$0xff]   ;;  %v1100_v59 = vld [vmem:[%s1385_s1 + $0x128] sm:$0xff]  }
  0x13   :  { %933 = vmatpush3.bf16.msra.mxu0 %v1060_v17  ;;  %v1097_v56 = vld [vmem:[%s1385_s1 + $0x1e0] sm:$0xff]   ;;  %v1101_v60 = vld [vmem:[%s1385_s1 + $0x1e8] sm:$0xff]   ;;  %v1103_v62 = vld [vmem:[%s1385_s1 + $0x170] sm:$0xff]  }
  0x14   :  { %934 = vmatprep.subr.bf16.mxu0 %v1063_v20  ;;  %v1098_v57 = vld [vmem:[%s1385_s1 + $0x1a0] sm:$0xff]   ;;  %v1102_v61 = vld [vmem:[%s1385_s1 + $0x1a8] sm:$0xff]   ;;  %v1104_v63 = vld [vmem:[%s1385_s1 + $0x130] sm:$0xff]  }
  0x15   :  { %955 = vmatpush3.bf16.msra.mxu1 %v1062_v19  ;;  %v1105_v0 = vld [vmem:[%s1385_s1 + $0x1f0] sm:$0xff]   ;;  %v1107_v2 = vld [vmem:[%s1385_s1 + $0x178] sm:$0xff]   ;;  %v1115_v13 = vld [vmem:[%s1385_s1 + $0x200] sm:$0xff]  }
  0x16   :  { %956 = vmatprep.subr.bf16.mxu1 %v1065_v22  ;;  %v1106_v1 = vld [vmem:[%s1385_s1 + $0x1b0] sm:$0xff]   ;;  %v1108_v3 = vld [vmem:[%s1385_s1 + $0x138] sm:$0xff]   ;;  %v1116_v14 = vld [vmem:[%s1385_s1 + $0x208] sm:$0xff]  }
  0x17   :  { %935 = vmatpush3.bf16.msra.mxu0 %v1064_v21  ;;  %v1109_v4 = vld [vmem:[%s1385_s1 + $0x1f8] sm:$0xff]   ;;  %v17_v5 = vld [vmem:[%s1386_s0 + $0x10] sm:$0xff]  ;;  %v1119_v17 = vld [vmem:[%s1385_s1 + $0x220] sm:$0xff]  }
  0x18   :  { %936 = vmatprep.subr.bf16.mxu0 %v1067_v24  ;;  %v847_v6 = vcombine.low %v17_v5, %v17_v5  ;;  %v848_v7 = vcombine.high %v17_v5, %v17_v5  ;;  %v1112_v8 = vld [vmem:[%s1385_s1 + $0x1b8] sm:$0xff]   ;;  %v1117_v15 = vld [vmem:[%s1385_s1 + $0x210] sm:$0xff]   ;;  %v1120_v18 = vld [vmem:[%s1385_s1 + $0x228] sm:$0xff]  }
  0x19   :  { %957 = vmatpush3.bf16.msra.mxu1 %v1066_v23  ;;  %v18_v10 = vld [vmem:[%s1386_s0 + $0x18] sm:$0xff]  ;;  %v1121_v19 = vld [vmem:[%s1385_s1 + $0x230] sm:$0xff]   ;;  %v1123_v21 = vld [vmem:[%s1386_s0 + $0x20] ss:$0 sps:$4 sm:$0xff]  }
  0x1a   :  { %958 = vmatprep.subr.bf16.mxu1 %v1069_v26  ;;  %v849_v11 = vcombine.low %v18_v10, %v18_v10  ;;  %v850_v12 = vcombine.high %v18_v10, %v18_v10  ;;  %v1118_v16 = vld [vmem:[%s1385_s1 + $0x218] sm:$0xff]   ;;  %v842_v23 = vld [vmem:[%s1387_s2] ss:$0 sm:$0xff] }
  0x1b   :  { %937 = vmatpush3.bf16.msra.mxu0 %v1068_v25  ;;  %v1122_v20 = vld [vmem:[%s1385_s1 + $0x238] sm:$0xff]  }
  0x1c   :  { %938 = vmatprep.subr.bf16.mxu0 %v1071_v28 }
  0x1d   :  { %959 = vmatpush3.bf16.msra.mxu1 %v1070_v27 }
  0x1e   :  { %960 = vmatprep.subr.bf16.mxu1 %v1073_v30 }
  0x1f   :  { %939 = vmatpush3.bf16.msra.mxu0 %v1072_v29 }
  0x20   :  { %968 = vmatprep.subr.bf16.mxu0 %v1077_v35 }
  0x21   :  { %961 = vmatpush3.bf16.msra.mxu1 %v1076_v34 }
  0x22   :  { %668 = vmatmul.mubr.bf16.vlgmr.msra.gmra.mrb[0].mxu0 %v843_v32  ;;  %990 = vmatprep.subr.bf16.mxu1 %v1081_v40 }
  0x23   :  { %969 = vmatpush3.bf16.msra.mxu0 %v1080_v39  ;;  %747 = vmatprep.mubr.bf16.mxu0 %v848_v7 }
  0x24   :  { %708 = vmatmul.mubr.bf16.vlgmr.msra.gmra.mrb[0].mxu1 %v845_v37  ;;  %970 = vmatprep.subr.bf16.mxu0 %v1083_v42 }
  0x25   :  { %991 = vmatpush3.bf16.msra.mxu1 %v1082_v41  ;;  %787 = vmatprep.mubr.bf16.mxu1 %v850_v12 }
  0x26   :  { %992 = vmatprep.subr.bf16.mxu1 %v1085_v44 }
  0x27   :  { %971 = vmatpush3.bf16.msra.mxu0 %v1084_v43 }
  0x28   :  { %972 = vmatprep.subr.bf16.mxu0 %v1087_v46 }
  0x29   :  { %993 = vmatpush3.bf16.msra.mxu1 %v1086_v45 }
  0x2a   :  { %994 = vmatprep.subr.bf16.mxu1 %v1089_v48 }
  0x2b   :  { %973 = vmatpush3.bf16.msra.mxu0 %v1088_v47 }
  0x2c   :  { %974 = vmatprep.subr.bf16.mxu0 %v1091_v50 }
  0x2d   :  { %995 = vmatpush3.bf16.msra.mxu1 %v1090_v49 }
  0x2e   :  { %996 = vmatprep.subr.bf16.mxu1 %v1093_v52 }
  0x2f   :  { %975 = vmatpush3.bf16.msra.mxu0 %v1092_v51 }
  0x30   :  { %976 = vmatprep.subr.bf16.mxu0 %v1095_v54 }
  0x31   :  { %997 = vmatpush3.bf16.msra.mxu1 %v1094_v53 }
  0x32   :  { %998 = vmatprep.subr.bf16.mxu1 %v1097_v56 }
  0x33   :  { %977 = vmatpush3.bf16.msra.mxu0 %v1096_v55 }
  0x34   :  { %978 = vmatprep.subr.bf16.mxu0 %v1099_v58 }
  0x35   :  { %999 = vmatpush3.bf16.msra.mxu1 %v1098_v57 }
  0x36   :  { %1000 = vmatprep.subr.bf16.mxu1 %v1101_v60 }
  0x37   :  { %979 = vmatpush3.bf16.msra.mxu0 %v1100_v59 }
  0x38   :  { %980 = vmatprep.subr.bf16.mxu0 %v1103_v62 }
  0x39   :  { %1001 = vmatpush3.bf16.msra.mxu1 %v1102_v61 }
  0x3a   :  { %1002 = vmatprep.subr.bf16.mxu1 %v1105_v0 }
  0x3b   :  { %981 = vmatpush3.bf16.msra.mxu0 %v1104_v63 }
  0x3c   :  { %982 = vmatprep.subr.bf16.mxu0 %v1107_v2 }
  0x3d   :  { %1003 = vmatpush3.bf16.msra.mxu1 %v1106_v1 }
  0x3e   :  { %1004 = vmatprep.subr.bf16.mxu1 %v1109_v4 }
  0x3f   :  { %983 = vmatpush3.bf16.msra.mxu0 %v1108_v3 }
  0x40   :  { %1021 = vmatprep.subr.bf16.mxu0 %v1126_v9 }
  0x41   :  { %1005 = vmatpush3.bf16.msra.mxu1 %v1112_v8 }
  0x42   :  { %748 = vmatmul.mubr.bf16.vlgmr.msra.gmra.mrb[4].mxu0 %v847_v6 }
  0x43   :  { %1022 = vmatpush3.bf16.msra.mxu0 %v1115_v13  ;;  %1037 = vmatprep.mubr.msk.bf16.mxu0 %vm1127_vm0, %v1126_v9 }
  0x44   :  { %788 = vmatmul.mubr.bf16.vlgmr.msra.gmra.mrb[4].mxu1 %v849_v11  ;;  %1023 = vmatprep.subr.bf16.mxu0 %v1126_v9 }
  0x47   :  { %1024 = vmatpush3.bf16.msra.mxu0 %v1116_v14 }
  0x48   :  { %1025 = vmatprep.subr.bf16.mxu0 %v1126_v9 }
  0x4b   :  { %1026 = vmatpush3.bf16.msra.mxu0 %v1117_v15 }
  0x4c   :  { %1027 = vmatprep.subr.bf16.mxu0 %v1126_v9 }
  0x4f   :  { %1028 = vmatpush3.bf16.msra.mxu0 %v1118_v16 }
  0x50   :  { %1029 = vmatprep.subr.bf16.mxu0 %v1126_v9 }
  0x53   :  { %1030 = vmatpush3.bf16.msra.mxu0 %v1119_v17 }
  0x54   :  { %1031 = vmatprep.subr.bf16.mxu0 %v1126_v9 }
  0x57   :  { %1032 = vmatpush3.bf16.msra.mxu0 %v1120_v18 }
  0x58   :  { %1033 = vmatprep.subr.bf16.mxu0 %v1126_v9 }
  0x5b   :  { %1034 = vmatpush3.bf16.msra.mxu0 %v1121_v19 }
  0x5c   :  { %1035 = vmatprep.subr.bf16.mxu0 %v1126_v9 }
  0x5f   :  { %1036 = vmatpush3.bf16.msra.mxu0 %v1122_v20 }
  0x62   :  { %1038 = vmatmul.mubr.bf16.vlgmr.msra.gmra.mrb[8].mxu0 %v1123_v21 }
  0xf5   :  { %v940_v22 = vpop.f32.mrb[0].mxu0 }
  0xf6   :  { %v941_v24 = vpop.f32.mrb[1].mxu0 }
  0xf7   :  { %v942_v25 = vadd.f32 %v941_v24, %v940_v22  ;;  %v943_v26 = vpop.f32.mrb[2].mxu0  ;;  %v962_v27 = vpop.f32.mrb[0].mxu1 }
  0xf8   :  { %v944_v28 = vpop.f32.mrb[3].mxu0  ;;  %v963_v29 = vpop.f32.mrb[1].mxu1 }
  0xf9   :  { %v670_v30 = vadd.f32 %v942_v25, %v842_v23  ;;  %v964_v31 = vadd.f32 %v963_v29, %v962_v27  ;;  %v965_v32 = vpop.f32.mrb[2].mxu1 }
  0xfa   :  { %v966_v33 = vpop.f32.mrb[3].mxu1 }
  0xfb   :  { %v710_v34 = vadd.f32 %v964_v31, %v670_v30 }
 0x115   :  { %v984_v35 = vpop.f32.mrb[4].mxu0 }
 0x116   :  { %v985_v36 = vpop.f32.mrb[5].mxu0 }
 0x117   :  { %v986_v37 = vadd.f32 %v985_v36, %v984_v35  ;;  %v987_v38 = vpop.f32.mrb[6].mxu0  ;;  %v1006_v39 = vpop.f32.mrb[4].mxu1 }
 0x118   :  { %v988_v40 = vpop.f32.mrb[7].mxu0  ;;  %v1007_v41 = vpop.f32.mrb[5].mxu1 }
 0x119   :  { %v750_v42 = vadd.f32 %v986_v37, %v710_v34  ;;  %v1008_v43 = vadd.f32 %v1007_v41, %v1006_v39  ;;  %v1009_v44 = vpop.f32.mrb[6].mxu1 }
 0x11a   :  { %v1010_v45 = vpop.f32.mrb[7].mxu1 }
 0x11b   :  { %v790_v46 = vadd.f32 %v1008_v43, %v750_v42 }
 0x135   :  { %v829_v47 = vpop.f32.mrb[8].mxu0 }
 0x136   :  { %v830_v48 = vadd.f32 %v829_v47, %v790_v46  ;;  %v1039_v49 = vpop.f32.mrb[9].mxu0 }
 0x137   :  { %v832_v50 = vpop.f32.mrb[10].mxu0 }
 0x138   :  { %1124 = vtanh.f32 %v830_v48  ;;  %v1040_v51 = vpop.f32.mrb[11].mxu0 }
 0x142   :  { %v1125_v52 = vpop.eup %1124 }
 0x143   :  { %v836_v53 = vpack.c.bf16 %v1125_v52, %v1125_v52 }
 0x145   :  { %837 = vst [vmem:[%s1388_s3] sm:$0xf] %v836_v53 }

// kernel: forward.47
= control target key start
LH: loop header
LB: loop body
LE: loop exit
PB: predicated region body
PF: predicated region fallthrough
CT: control target
= control target key end

     0   :  { %s46_s0 = inlined_call_operand.vmem [shape: bf16[8,128], index: 0, kind: input, shape index: {}]   ;;  %s47_s1 = inlined_call_operand.vmem [shape: bf16[8,128], index: 1, kind: output, shape index: {}]  }
   0x1   :  { %v8_v0 = vld [vmem:[%s46_s0] sm:$0xf] }
   0x2   :  { %v9_v1 = vunpack.c.l.bf16 %v8_v0 }
   0x4   :  { %10 = vadd.xlane.f32.xlu0 %v9_v1 }
  0x91   :  { %v11_v2 = vpop.xlane.xlu0 %10 }
  0x92   :  { %v13_v3 = vmul.f32 0.0078125, %v11_v2 }
  0x94   :  { %v14_v4 = vsub.f32 %v9_v1, %v13_v3 }
  0x96   :  { %v15_v5 = vmul.f32 %v14_v4, %v14_v4 }
  0x98   :  { %16 = vadd.xlane.f32.xlu0 %v15_v5 }
 0x125   :  { %v17_v6 = vpop.xlane.xlu0 %16 }
 0x126   :  { %v18_v7 = vmul.f32 0.0078125, %v17_v6 }
 0x128   :  { %v19_v8 = vadd.f32 1e-05, %v18_v7 }
 0x12a   :  { %28 = vrsqrt.f32 %v19_v8 }
 0x134   :  { %v29_v9 = vpop.eup %28 }
 0x135   :  { %v21_v10 = vmul.f32 %v29_v9, %v14_v4 }
 0x137   :  { %v22_v11 = vpack.c.bf16 %v21_v10, %v21_v10 }
 0x139   :  { %23 = vst [vmem:[%s47_s1] sm:$0xf] %v22_v11 }

// kernel: forward.48
= control target key start
LH: loop header
LB: loop body
LE: loop exit
PB: predicated region body
PF: predicated region fallthrough
CT: control target
= control target key end

     0   :  { %v512_v1 = vmov 0   ;;  %v53_v35 = vlaneseq  ;;  %s666_s1 = inlined_call_operand.vmem [shape: bf16[128,512], index: 1, kind: input, shape index: {}]   ;;  %s667_s0 = inlined_call_operand.vmem [shape: bf16[32,128], index: 0, kind: input, shape index: {}]   ;;  %s668_s2 = inlined_call_operand.vmem [shape: f32[1,512], index: 2, kind: input, shape index: {}]   ;;  %s669_s3 = inlined_call_operand.vmem [shape: bf16[32,512], index: 3, kind: output, shape index: {}]  }
   0x1   :  { %v462_v0 = vld [vmem:[%s666_s1 + $0x4] ss:$16 sps:$4 sm:$0xff]   ;;  %277 = vmatprep.mubr.bf16.mxu0 %v512_v1  ;;  %330 = vmatprep.mubr.bf16.mxu1 %v512_v1  ;;  %v464_v2 = vld [vmem:[%s666_s1 + $0xc] ss:$16 sps:$4 sm:$0xff]   ;;  %v466_v3 = vld [vmem:[%s666_s1] ss:$16 sps:$4 sm:$0xff]  }
   0x2   :  { %245 = vmatprep.subr.bf16.mxu0 %v462_v0  ;;  %v467_v4 = vld [vmem:[%s666_s1 + $0x8] ss:$16 sps:$4 sm:$0xff]   ;;  %298 = vmatprep.subr.bf16.mxu1 %v464_v2  ;;  %v468_v5 = vld [vmem:[%s666_s1 + $0x24] ss:$16 sps:$4 sm:$0xff]   ;;  %v470_v6 = vld [vmem:[%s666_s1 + $0x2c] ss:$16 sps:$4 sm:$0xff]  }
   0x3   :  { %246 = vmatpush1.bf16.msra.mxu0 %v466_v3  ;;  %299 = vmatpush1.bf16.msra.mxu1 %v467_v4  ;;  %v472_v7 = vld [vmem:[%s666_s1 + $0x20] ss:$16 sps:$4 sm:$0xff]   ;;  %v473_v8 = vld [vmem:[%s666_s1 + $0x28] ss:$16 sps:$4 sm:$0xff]   ;;  %v474_v9 = vld [vmem:[%s666_s1 + $0x44] ss:$16 sps:$4 sm:$0xff]  }
   0x4   :  { %247 = vmatprep.subr.bf16.mxu0 %v468_v5  ;;  %300 = vmatprep.subr.bf16.mxu1 %v470_v6  ;;  %v476_v10 = vld [vmem:[%s666_s1 + $0x4c] ss:$16 sps:$4 sm:$0xff]   ;;  %v478_v11 = vld [vmem:[%s666_s1 + $0x40] ss:$16 sps:$4 sm:$0xff]   ;;  %v479_v12 = vld [vmem:[%s666_s1 + $0x48] ss:$16 sps:$4 sm:$0xff]  }
   0x5   :  { %v480_v13 = vld [vmem:[%s666_s1 + $0x64] ss:$16 sps:$4 sm:$0xff]   ;;  %v482_v14 = vld [vmem:[%s666_s1 + $0x6c] ss:$16 sps:$4 sm:$0xff]   ;;  %v484_v15 = vld [vmem:[%s666_s1 + $0x60] ss:$16 sps:$4 sm:$0xff]  }
   0x6   :  { %v485_v16 = vld [vmem:[%s666_s1 + $0x68] ss:$16 sps:$4 sm:$0xff]   ;;  %v486_v17 = vld [vmem:[%s666_s1 + $0x84] ss:$16 sps:$4 sm:$0xff]   ;;  %v488_v18 = vld [vmem:[%s666_s1 + $0x8c] ss:$16 sps:$4 sm:$0xff]  }
   0x7   :  { %248 = vmatpush1.bf16.msra.mxu0 %v472_v7  ;;  %301 = vmatpush1.bf16.msra.mxu1 %v473_v8  ;;  %v490_v19 = vld [vmem:[%s666_s1 + $0x80] ss:$16 sps:$4 sm:$0xff]   ;;  %v491_v20 = vld [vmem:[%s666_s1 + $0x88] ss:$16 sps:$4 sm:$0xff]   ;;  %v492_v21 = vld [vmem:[%s666_s1 + $0xa4] ss:$16 sps:$4 sm:$0xff]  }
   0x8   :  { %249 = vmatprep.subr.bf16.mxu0 %v474_v9  ;;  %302 = vmatprep.subr.bf16.mxu1 %v476_v10  ;;  %v494_v22 = vld [vmem:[%s666_s1 + $0xac] ss:$16 sps:$4 sm:$0xff]   ;;  %v496_v23 = vld [vmem:[%s666_s1 + $0xa0] ss:$16 sps:$4 sm:$0xff]   ;;  %v497_v24 = vld [vmem:[%s666_s1 + $0xa8] ss:$16 sps:$4 sm:$0xff]  }
   0x9   :  { %v498_v25 = vld [vmem:[%s666_s1 + $0xc4] ss:$16 sps:$4 sm:$0xff]   ;;  %v500_v26 = vld [vmem:[%s666_s1 + $0xcc] ss:$16 sps:$4 sm:$0xff]   ;;  %v502_v27 = vld [vmem:[%s666_s1 + $0xc0] ss:$16 sps:$4 sm:$0xff]  }
   0xa   :  { %v503_v28 = vld [vmem:[%s666_s1 + $0xc8] ss:$16 sps:$4 sm:$0xff]   ;;  %v504_v29 = vld [vmem:[%s666_s1 + $0xe4] ss:$16 sps:$4 sm:$0xff]   ;;  %v506_v30 = vld [vmem:[%s666_s1 + $0xec] ss:$16 sps:$4 sm:$0xff]  }
   0xb   :  { %250 = vmatpush1.bf16.msra.mxu0 %v478_v11  ;;  %303 = vmatpush1.bf16.msra.mxu1 %v479_v12  ;;  %v508_v31 = vld [vmem:[%s666_s1 + $0xe0] ss:$16 sps:$4 sm:$0xff]   ;;  %v509_v32 = vld [vmem:[%s666_s1 + $0xe8] ss:$16 sps:$4 sm:$0xff]   ;;  %v54_v36 = vshrl.u32 %v53_v35, 7 }
   0xc   :  { %251 = vmatprep.subr.bf16.mxu0 %v480_v13  ;;  %304 = vmatprep.subr.bf16.mxu1 %v482_v14  ;;  %v510_v33 = vld [vmem:[%s667_s0] sm:$0xff]   ;;  %v511_v34 = vld [vmem:[%s667_s0 + $0x8] sm:$0xff]  }
   0xd   :  { %v55_v37 = vsub.s32 0, %v54_v36  ;;  %v63_v38 = vsub.s32 2, %v54_v36  ;;  %v51_v39 = vld [vmem:[%s668_s2] sm:$0xf]  ;;  %v59_v40 = vsub.s32 1, %v54_v36  ;;  %v67_v41 = vsub.s32 3, %v54_v36 }
   0xf   :  { %252 = vmatpush1.bf16.msra.mxu0 %v484_v15  ;;  %305 = vmatpush1.bf16.msra.mxu1 %v485_v16  ;;  %v56_v42 = vrot.slane %v51_v39, %v55_v37  ;;  %v64_v43 = vrot.slane %v51_v39, %v63_v38  ;;  %v60_v44 = vrot.slane %v51_v39, %v59_v40 }
  0x10   :  { %253 = vmatprep.subr.bf16.mxu0 %v486_v17  ;;  %306 = vmatprep.subr.bf16.mxu1 %v488_v18  ;;  %v68_v45 = vrot.slane %v51_v39, %v67_v41 }
  0x13   :  { %254 = vmatpush1.bf16.msra.mxu0 %v490_v19  ;;  %307 = vmatpush1.bf16.msra.mxu1 %v491_v20 }
  0x14   :  { %255 = vmatprep.subr.bf16.mxu0 %v492_v21  ;;  %308 = vmatprep.subr.bf16.mxu1 %v494_v22 }
  0x17   :  { %256 = vmatpush1.bf16.msra.mxu0 %v496_v23  ;;  %309 = vmatpush1.bf16.msra.mxu1 %v497_v24 }
  0x18   :  { %257 = vmatprep.subr.bf16.mxu0 %v498_v25  ;;  %310 = vmatprep.subr.bf16.mxu1 %v500_v26 }
  0x1b   :  { %258 = vmatpush1.bf16.msra.mxu0 %v502_v27  ;;  %311 = vmatpush1.bf16.msra.mxu1 %v503_v28 }
  0x1c   :  { %259 = vmatprep.subr.bf16.mxu0 %v504_v29  ;;  %312 = vmatprep.subr.bf16.mxu1 %v506_v30 }
  0x1f   :  { %260 = vmatpush1.bf16.msra.mxu0 %v508_v31  ;;  %313 = vmatpush1.bf16.msra.mxu1 %v509_v32 }
  0x22   :  { %278 = vmatmul.mubr.bf16.vlgmr.msra.gmra.mrb[0].mxu0 %v510_v33  ;;  %331 = vmatmul.mubr.bf16.vlgmr.msra.gmra.mrb[0].mxu1 %v510_v33 }
  0x23   :  { %287 = vmatprep.mubr.bf16.mxu0 %v512_v1  ;;  %340 = vmatprep.mubr.bf16.mxu1 %v512_v1 }
  0x2a   :  { %288 = vmatmul.mubr.bf16.gmra.mrb[4].mxu0 %v511_v34  ;;  %341 = vmatmul.mubr.bf16.gmra.mrb[4].mxu1 %v511_v34 }
  0xf5   :  { %v279_v46 = vpop.f32.mrb[0].mxu0  ;;  %v332_v47 = vpop.f32.mrb[0].mxu1 }
  0xf6   :  { %v280_v48 = vadd.f32 %v279_v46, %v56_v42  ;;  %v333_v49 = vadd.f32 %v332_v47, %v64_v43  ;;  %v281_v50 = vpop.f32.mrb[1].mxu0  ;;  %v334_v51 = vpop.f32.mrb[1].mxu1 }
  0xf7   :  { %v282_v52 = vadd.f32 %v281_v50, %v60_v44  ;;  %v335_v53 = vadd.f32 %v334_v51, %v68_v45  ;;  %v283_v54 = vpop.f32.mrb[2].mxu0  ;;  %v336_v55 = vpop.f32.mrb[2].mxu1 }
  0xf8   :  { %v284_v56 = vadd.f32 %v283_v54, %v56_v42  ;;  %v337_v57 = vadd.f32 %v336_v55, %v64_v43  ;;  %v285_v58 = vpop.f32.mrb[3].mxu0  ;;  %v338_v59 = vpop.f32.mrb[3].mxu1 }
  0xf9   :  { %v453_v60 = vpack.c.bf16 %v282_v52, %v280_v48  ;;  %v454_v61 = vpack.c.bf16 %v335_v53, %v333_v49  ;;  %v286_v62 = vadd.f32 %v285_v58, %v60_v44  ;;  %v339_v63 = vadd.f32 %v338_v59, %v68_v45 }
  0xfb   :  { %399 = vst [vmem:[%s669_s3] sm:$0xff] %v453_v60  ;;  %400 = vst [vmem:[%s669_s3 + $0x8] sm:$0xff] %v454_v61  ;;  %v455_v0 = vpack.c.bf16 %v286_v62, %v284_v56  ;;  %v456_v1 = vpack.c.bf16 %v339_v63, %v337_v57 }
  0xfd   :  { %401 = vst [vmem:[%s669_s3 + $0x10] sm:$0xff] %v455_v0  ;;  %402 = vst [vmem:[%s669_s3 + $0x18] sm:$0xff] %v456_v1  ;;  %v289_v2 = vpop.f32.mrb[4].mxu0  ;;  %v342_v3 = vpop.f32.mrb[4].mxu1 }
  0xfe   :  { %v290_v4 = vadd.f32 %v289_v2, %v56_v42  ;;  %v343_v5 = vadd.f32 %v342_v3, %v64_v43  ;;  %v291_v6 = vpop.f32.mrb[5].mxu0  ;;  %v344_v7 = vpop.f32.mrb[5].mxu1 }
  0xff   :  { %v292_v8 = vadd.f32 %v291_v6, %v60_v44  ;;  %v345_v9 = vadd.f32 %v344_v7, %v68_v45  ;;  %v293_v10 = vpop.f32.mrb[6].mxu0  ;;  %v346_v11 = vpop.f32.mrb[6].mxu1 }
 0x100   :  { %v294_v12 = vadd.f32 %v293_v10, %v56_v42  ;;  %v347_v13 = vadd.f32 %v346_v11, %v64_v43  ;;  %v295_v14 = vpop.f32.mrb[7].mxu0  ;;  %v348_v15 = vpop.f32.mrb[7].mxu1 }
 0x101   :  { %v457_v16 = vpack.c.bf16 %v292_v8, %v290_v4  ;;  %v458_v17 = vpack.c.bf16 %v345_v9, %v343_v5  ;;  %v296_v18 = vadd.f32 %v295_v14, %v60_v44  ;;  %v349_v19 = vadd.f32 %v348_v15, %v68_v45 }
 0x103   :  { %403 = vst [vmem:[%s669_s3 + $0x20] sm:$0xff] %v457_v16  ;;  %404 = vst [vmem:[%s669_s3 + $0x28] sm:$0xff] %v458_v17  ;;  %v459_v20 = vpack.c.bf16 %v296_v18, %v294_v12  ;;  %v460_v21 = vpack.c.bf16 %v349_v19, %v347_v13 }
 0x105   :  { %405 = vst [vmem:[%s669_s3 + $0x30] sm:$0xff] %v459_v20  ;;  %406 = vst [vmem:[%s669_s3 + $0x38] sm:$0xff] %v460_v21 }

// kernel: forward.49
= control target key start
LH: loop header
LB: loop body
LE: loop exit
PB: predicated region body
PF: predicated region fallthrough
CT: control target
= control target key end

     0   :  { %vm12_vm0 = vcmask 523264   ;;  %v1073_v1 = vmov 0   ;;  %v1074_v2 = vmov 0.0   ;;  %s1075_s13 = smov 64   ;;  %s1347_s1 = inlined_call_operand.vmem [shape: bf16[2,64,256], index: 1, kind: input, shape index: {}]   ;;  %s1348_s0 = inlined_call_operand.vmem [shape: bf16[4,8,512], index: 0, kind: input, shape index: {}]   ;;  %s1349_s2 = inlined_call_operand.vmem [shape: bf16[4,8,128], index: 2, kind: output, shape index: {}]  }
   0x1   :  { %v1094_v0 = vld [vmem:[%s1347_s1 + $0x4] ss:$8 sps:$4 sm:$0xff]   ;;  %114 = vmatprep.mubr.bf16.mxu0 %v1073_v1  ;;  %206 = vmatprep.mubr.bf16.mxu1 %v1073_v1  ;;  %13 = vst.msk [vmem:[#allocation2] sm:$0xff] %vm12_vm0, %v1074_v2  ;;  %14 = vst.msk [vmem:[#allocation3] sm:$0xff] %vm12_vm0, %v1074_v2  ;;  %v1111_v4 = vld [vmem:[%s1347_s1] ss:$8 sps:$4 sm:$0xff]  }
   0x2   :  { %15 = vst.msk [vmem:[#allocation4] sm:$0xff] %vm12_vm0, %v1074_v2  ;;  %16 = vst.msk [vmem:[#allocation5] sm:$0xff] %vm12_vm0, %v1074_v2  ;;  %v1105_v3 = vld [vmem:[%s1347_s1 + $0x44] ss:$8 sps:$4 sm:$0xff]   ;;  %82 = vmatprep.subr.bf16.mxu0 %v1094_v0  ;;  %v1116_v5 = vld [vmem:[%s1347_s1 + $0x40] ss:$8 sps:$4 sm:$0xff]  }
   0x3   :  { %174 = vmatprep.subr.bf16.mxu1 %v1105_v3  ;;  %v1122_v6 = vld [vmem:[%s1347_s1 + $0x14] ss:$8 sps:$4 sm:$0xff]   ;;  %83 = vmatpush1.bf16.msra.mxu0 %v1111_v4  ;;  %v1134_v8 = vld [vmem:[%s1347_s1 + $0x10] ss:$8 sps:$4 sm:$0xff]   ;;  %v1146_v10 = vld [vmem:[%s1347_s1 + $0x24] ss:$8 sps:$4 sm:$0xff]  }
   0x4   :  { %175 = vmatpush1.bf16.msra.mxu1 %v1116_v5  ;;  %v1129_v7 = vld [vmem:[%s1347_s1 + $0x54] ss:$8 sps:$4 sm:$0xff]   ;;  %84 = vmatprep.subr.bf16.mxu0 %v1122_v6  ;;  %v1140_v9 = vld [vmem:[%s1347_s1 + $0x50] ss:$8 sps:$4 sm:$0xff]   ;;  %v1151_v11 = vld [vmem:[%s1347_s1 + $0x64] ss:$8 sps:$4 sm:$0xff]  }
   0x5   :  { %176 = vmatprep.subr.bf16.mxu1 %v1129_v7  ;;  %v1156_v12 = vld [vmem:[%s1347_s1 + $0x20] ss:$8 sps:$4 sm:$0xff]   ;;  %v1168_v14 = vld [vmem:[%s1347_s1 + $0x34] ss:$8 sps:$4 sm:$0xff]   ;;  %v1180_v16 = vld [vmem:[%s1347_s1 + $0x30] ss:$8 sps:$4 sm:$0xff]  }
   0x6   :  { %v1161_v13 = vld [vmem:[%s1347_s1 + $0x60] ss:$8 sps:$4 sm:$0xff]   ;;  %v1175_v15 = vld [vmem:[%s1347_s1 + $0x74] ss:$8 sps:$4 sm:$0xff]   ;;  %v1187_v18 = vld [vmem:[%s1347_s1 + $0x70] ss:$8 sps:$4 sm:$0xff]  }
   0x7   :  { %85 = vmatpush1.bf16.msra.mxu0 %v1134_v8  ;;  %v34_v24 = vld [vmem:[%s1348_s0] sm:$0xff]  ;;  %v892_v25 = vld [vmem:[%s1348_s0 + $0x38] sm:$0xff] }
   0x8   :  { %177 = vmatpush1.bf16.msra.mxu1 %v1140_v9  ;;  %86 = vmatprep.subr.bf16.mxu0 %v1146_v10  ;;  %v37_v19 = vld [vmem:[#allocation2] sm:$0xff]  ;;  %v217_v23 = vld [vmem:[#allocation3] sm:$0xff]  ;;  %v35_v26 = vunpack.c.l.bf16 %v34_v24  ;;  %v127_v27 = vunpack.c.l.bf16 %v892_v25  ;;  %v36_v40 = vunpack.c.h.bf16 %v34_v24  ;;  %v128_v41 = vunpack.c.h.bf16 %v892_v25 }
   0x9   :  { %178 = vmatprep.subr.bf16.mxu1 %v1151_v11  ;;  %v244_v17 = vld [vmem:[#allocation5] sm:$0xff]  ;;  %v129_v20 = vld [vmem:[#allocation4] sm:$0xff]  ;;  %v38_v21 = vpack.c.bf16 %v37_v19, %v37_v19  ;;  %232 = vrot.lane.b32.xlu1 %v217_v23, %s1075_s13 }
   0xa   :  { %259 = vrot.lane.b32.xlu0 %v244_v17, %s1075_s13  ;;  %v130_v22 = vpack.c.bf16 %v129_v20, %v129_v20 }
   0xb   :  { %87 = vmatpush1.bf16.msra.mxu0 %v1156_v12 }
   0xc   :  { %179 = vmatpush1.bf16.msra.mxu1 %v1161_v13  ;;  %88 = vmatprep.subr.bf16.mxu0 %v1168_v14 }
   0xd   :  { %180 = vmatprep.subr.bf16.mxu1 %v1175_v15 }
   0xf   :  { %89 = vmatpush1.bf16.msra.mxu0 %v1180_v16 }
  0x10   :  { %181 = vmatpush1.bf16.msra.mxu1 %v1187_v18  ;;  %303 = vmatprep.subr.bf16.mxu0 %v1094_v0 }
  0x11   :  { %355 = vmatprep.subr.bf16.mxu1 %v1105_v3 }
  0x12   :  { %891 = vmatmul.mubr.msk.bf16.vlgmr.msra.gmra.mrb[0].mxu0 %vm12_vm0, %v38_v21 }
  0x13   :  { %901 = vmatmul.mubr.msk.bf16.vlgmr.msra.gmra.mrb[0].mxu1 %vm12_vm0, %v130_v22  ;;  %304 = vmatpush1.bf16.msra.mxu0 %v1111_v4 }
  0x14   :  { %356 = vmatpush1.bf16.msra.mxu1 %v1116_v5  ;;  %305 = vmatprep.subr.bf16.mxu0 %v1122_v6 }
  0x15   :  { %357 = vmatprep.subr.bf16.mxu1 %v1129_v7  ;;  %335 = vmatprep.mubr.bf16.mxu0 %v1073_v1 }
  0x16   :  { %387 = vmatprep.mubr.bf16.mxu1 %v1073_v1 }
  0x17   :  { %306 = vmatpush1.bf16.msra.mxu0 %v1134_v8 }
  0x18   :  { %358 = vmatpush1.bf16.msra.mxu1 %v1140_v9  ;;  %307 = vmatprep.subr.bf16.mxu0 %v1146_v10 }
  0x19   :  { %359 = vmatprep.subr.bf16.mxu1 %v1151_v11 }
  0x1b   :  { %308 = vmatpush1.bf16.msra.mxu0 %v1156_v12 }
  0x1c   :  { %360 = vmatpush1.bf16.msra.mxu1 %v1161_v13  ;;  %309 = vmatprep.subr.bf16.mxu0 %v1168_v14 }
  0x1d   :  { %361 = vmatprep.subr.bf16.mxu1 %v1175_v15 }
  0x1f   :  { %310 = vmatpush1.bf16.msra.mxu0 %v1180_v16 }
  0x20   :  { %362 = vmatpush1.bf16.msra.mxu1 %v1187_v18  ;;  %484 = vmatprep.subr.bf16.mxu0 %v1094_v0 }
  0x21   :  { %535 = vmatprep.subr.bf16.mxu1 %v1105_v3 }
  0x7b   :  { %v233_v57 = vpop.permute.xlu1 %232 }
  0x7c   :  { %v260_v60 = vpop.permute.xlu0 %259 }
  0xe5   :  { %v116_v28 = vpop.f32.mrb[0].mxu0 }
  0xe6   :  { %v208_v29 = vpop.f32.mrb[0].mxu1  ;;  %v123_v30 = vadd.f32 %v116_v28, %v35_v26  ;;  %v118_v33 = vpop.f32.mrb[1].mxu0 }
  0xe7   :  { %v215_v31 = vadd.f32 %v208_v29, %v127_v27  ;;  %v210_v32 = vpop.f32.mrb[1].mxu1  ;;  %v120_v35 = vpop.f32.mrb[2].mxu0  ;;  %v124_v42 = vadd.f32 %v118_v33, %v36_v40 }
  0xe8   :  { %v212_v34 = vpop.f32.mrb[2].mxu1  ;;  %v902_v36 = vmul.f32 -1.442695, %v123_v30  ;;  %v121_v39 = vpop.f32.mrb[3].mxu0  ;;  %v216_v43 = vadd.f32 %v210_v32, %v128_v41 }
  0xe9   :  { %v904_v37 = vmul.f32 -1.442695, %v215_v31  ;;  %v213_v38 = vpop.f32.mrb[3].mxu1  ;;  %v903_v55 = vmul.f32 -1.442695, %v124_v42 }
  0xea   :  { %977 = vpow2.f32 %v902_v36  ;;  %v905_v54 = vmul.f32 -1.442695, %v216_v43  ;;  %v908_v38 = vld [vmem:[%s1348_s0 + $0x28] sm:$0xff] }
  0xeb   :  { %979 = vpow2.f32 %v904_v37  ;;  %v906_v37 = vld [vmem:[%s1348_s0 + $0x10] sm:$0xff]  ;;  %v348_v40 = vunpack.c.l.bf16 %v908_v38 }
  0xec   :  { %981 = vtanh.f32 %v124_v42  ;;  %v296_v39 = vunpack.c.l.bf16 %v906_v37 }
  0xed   :  { %983 = vtanh.f32 %v216_v43 }
  0xf4   :  { %v978_v44 = vpop.eup %977 }
  0xf5   :  { %v980_v45 = vpop.eup %979  ;;  %v221_v46 = vadd.f32 1.0, %v978_v44 }
  0xf6   :  { %v248_v47 = vadd.f32 1.0, %v980_v45  ;;  %v982_v48 = vpop.eup %981 }
  0xf7   :  { %985 = vrcp.f32 %v221_v46  ;;  %v984_v49 = vpop.eup %983 }
  0xf8   :  { %987 = vrcp.f32 %v248_v47 }
  0xf9   :  { %989 = vpow2.f32 %v905_v54 }
  0xfa   :  { %991 = vpow2.f32 %v903_v55 }
 0x101   :  { %v986_v50 = vpop.eup %985 }
 0x102   :  { %v988_v51 = vpop.eup %987  ;;  %v236_v52 = vmul.f32 %v986_v50, %v982_v48  ;;  %v235_v61 = vmul.f32 %v986_v50, %v233_v57 }
 0x103   :  { %v263_v53 = vmul.f32 %v988_v51, %v984_v49  ;;  %v990_v56 = vpop.eup %989  ;;  %v262_v63 = vmul.f32 %v988_v51, %v260_v60  ;;  %v297_v51 = vunpack.c.h.bf16 %v906_v37 }
 0x104   :  { %238 = vrot.lane.b32.xlu1 %v236_v52, %s1075_s13  ;;  %v992_v58 = vpop.eup %991  ;;  %v255_v59 = vadd.f32 1.0, %v990_v56  ;;  %v349_v52 = vunpack.c.h.bf16 %v908_v38 }
 0x105   :  { %265 = vrot.lane.b32.xlu0 %v263_v53, %s1075_s13  ;;  %v228_v62 = vadd.f32 1.0, %v992_v58 }
 0x106   :  { %993 = vrcp.f32 %v255_v59 }
 0x107   :  { %995 = vrcp.f32 %v228_v62 }
 0x110   :  { %v994_v21 = vpop.eup %993 }
 0x111   :  { %v996_v22 = vpop.eup %995 }
 0x176   :  { %v239_v2 = vpop.permute.xlu1 %238 }
 0x177   :  { %v266_v17 = vpop.permute.xlu0 %265  ;;  %v241_v19 = vadd.f32 %v239_v2, %v235_v61 }
 0x178   :  { %v268_v20 = vadd.f32 %v266_v17, %v262_v63 }
 0x179   :  { %997 = vtanh.f32 %v241_v19 }
 0x17a   :  { %999 = vtanh.f32 %v268_v20 }
 0x183   :  { %v998_v23 = vpop.eup %997 }
 0x184   :  { %v1000_v24 = vpop.eup %999  ;;  %v243_v25 = vmul.f32 %v998_v23, %v996_v22 }
 0x185   :  { %v270_v26 = vmul.f32 %v1000_v24, %v994_v21 }
 0x186   :  { %272 = vrot.lane.b32.xlu1 %v243_v25, %s1075_s13 }
 0x187   :  { %282 = vrot.lane.b32.xlu0 %v270_v26, %s1075_s13 }
 0x18a   :  { %277 = vrot.lane.b32.xlu1 %v241_v19, %s1075_s13 }
 0x18b   :  { %287 = vrot.lane.b32.xlu0 %v268_v20, %s1075_s13 }
 0x1f8   :  { %v273_v27 = vpop.permute.xlu1 %272 }
 0x1f9   :  { %v283_v28 = vpop.permute.xlu0 %282  ;;  %275 = vst.msk [vmem:[#allocation2] sm:$0xff] %vm12_vm0, %v273_v27  ;;  %291 = vst.msk [vmem:[#allocation6] sm:$0xff] %vm12_vm0, %v273_v27 }
 0x1fa   :  { %285 = vst.msk [vmem:[#allocation4] sm:$0xff] %vm12_vm0, %v283_v28  ;;  %293 = vst.msk [vmem:[#allocation7 + $0x18] sm:$0xff] %vm12_vm0, %v283_v28 }
 0x1fc   :  { %v278_v29 = vpop.permute.xlu1 %277 }
 0x1fd   :  { %v288_v30 = vpop.permute.xlu0 %287  ;;  %280 = vst.msk [vmem:[#allocation3] sm:$0xff] %vm12_vm0, %v278_v29 }
 0x1fe   :  { %290 = vst.msk [vmem:[#allocation5] sm:$0xff] %vm12_vm0, %v288_v30 }
 0x200   :  { %v298_v31 = vld [vmem:[#allocation2] sm:$0xff] }
 0x201   :  { %v299_v32 = vpack.c.bf16 %v298_v31, %v298_v31  ;;  %v350_v33 = vld [vmem:[#allocation4] sm:$0xff] }
 0x202   :  { %v351_v34 = vpack.c.bf16 %v350_v33, %v350_v33 }
 0x203   :  { %907 = vmatmul.mubr.msk.bf16.vlgmr.msra.gmra.mrb[4].mxu0 %vm12_vm0, %v299_v32 }
 0x204   :  { %909 = vmatmul.mubr.msk.bf16.vlgmr.msra.gmra.mrb[4].mxu1 %vm12_vm0, %v351_v34  ;;  %485 = vmatpush1.bf16.msra.mxu0 %v1111_v4  ;;  %v398_v36 = vld [vmem:[#allocation3] sm:$0xff] }
 0x205   :  { %v425_v35 = vld [vmem:[#allocation5] sm:$0xff]  ;;  %536 = vmatpush1.bf16.msra.mxu1 %v1116_v5  ;;  %486 = vmatprep.subr.bf16.mxu0 %v1122_v6 }
 0x206   :  { %440 = vrot.lane.b32.xlu0 %v425_v35, %s1075_s13  ;;  %537 = vmatprep.subr.bf16.mxu1 %v1129_v7 }
 0x207   :  { %567 = vmatprep.mubr.bf16.mxu1 %v1073_v1  ;;  %516 = vmatprep.mubr.bf16.mxu0 %v1073_v1 }
 0x208   :  { %487 = vmatpush1.bf16.msra.mxu0 %v1134_v8 }
 0x209   :  { %538 = vmatpush1.bf16.msra.mxu1 %v1140_v9  ;;  %488 = vmatprep.subr.bf16.mxu0 %v1146_v10 }
 0x20a   :  { %413 = vrot.lane.b32.xlu0 %v398_v36, %s1075_s13  ;;  %539 = vmatprep.subr.bf16.mxu1 %v1151_v11 }
 0x20c   :  { %489 = vmatpush1.bf16.msra.mxu0 %v1156_v12 }
 0x20d   :  { %540 = vmatpush1.bf16.msra.mxu1 %v1161_v13  ;;  %490 = vmatprep.subr.bf16.mxu0 %v1168_v14 }
 0x20e   :  { %541 = vmatprep.subr.bf16.mxu1 %v1175_v15 }
 0x210   :  { %491 = vmatpush1.bf16.msra.mxu0 %v1180_v16 }
 0x211   :  { %542 = vmatpush1.bf16.msra.mxu1 %v1187_v18  ;;  %664 = vmatprep.subr.bf16.mxu0 %v1094_v0 }
 0x212   :  { %715 = vmatprep.subr.bf16.mxu1 %v1105_v3 }
 0x278   :  { %v441_v21 = vpop.permute.xlu0 %440 }
 0x27c   :  { %v414_v27 = vpop.permute.xlu0 %413 }
 0x2d6   :  { %v337_v41 = vpop.f32.mrb[4].mxu0 }
 0x2d7   :  { %v344_v42 = vadd.f32 %v337_v41, %v296_v39  ;;  %v389_v43 = vpop.f32.mrb[4].mxu1  ;;  %v339_v44 = vpop.f32.mrb[5].mxu0 }
 0x2d8   :  { %v396_v45 = vadd.f32 %v389_v43, %v348_v40  ;;  %v391_v46 = vpop.f32.mrb[5].mxu1  ;;  %v341_v47 = vpop.f32.mrb[6].mxu0  ;;  %v345_v53 = vadd.f32 %v339_v44, %v297_v51 }
 0x2d9   :  { %v910_v0 = vmul.f32 -1.442695, %v344_v42  ;;  %v393_v48 = vpop.f32.mrb[6].mxu1  ;;  %v342_v3 = vpop.f32.mrb[7].mxu0  ;;  %v397_v54 = vadd.f32 %v391_v46, %v349_v52 }
 0x2da   :  { %v912_v49 = vmul.f32 -1.442695, %v396_v45  ;;  %v394_v50 = vpop.f32.mrb[7].mxu1  ;;  %v911_v19 = vmul.f32 -1.442695, %v345_v53 }
 0x2db   :  { %1001 = vpow2.f32 %v910_v0  ;;  %v913_v17 = vmul.f32 -1.442695, %v397_v54 }
 0x2dc   :  { %1003 = vpow2.f32 %v912_v49 }
 0x2dd   :  { %1005 = vtanh.f32 %v345_v53 }
 0x2de   :  { %1007 = vtanh.f32 %v397_v54 }
 0x2e5   :  { %v1002_v55 = vpop.eup %1001 }
 0x2e6   :  { %v1004_v56 = vpop.eup %1003  ;;  %v402_v57 = vadd.f32 1.0, %v1002_v55 }
 0x2e7   :  { %v429_v58 = vadd.f32 1.0, %v1004_v56  ;;  %v1006_v59 = vpop.eup %1005 }
 0x2e8   :  { %1009 = vrcp.f32 %v402_v57  ;;  %v1008_v60 = vpop.eup %1007 }
 0x2e9   :  { %1011 = vrcp.f32 %v429_v58 }
 0x2ea   :  { %1013 = vpow2.f32 %v913_v17 }
 0x2eb   :  { %1015 = vpow2.f32 %v911_v19 }
 0x2f2   :  { %v1010_v61 = vpop.eup %1009 }
 0x2f3   :  { %v1012_v62 = vpop.eup %1011  ;;  %v417_v63 = vmul.f32 %v1010_v61, %v1006_v59  ;;  %v416_v29 = vmul.f32 %v1010_v61, %v414_v27 }
 0x2f4   :  { %v444_v2 = vmul.f32 %v1012_v62, %v1008_v60  ;;  %v1014_v20 = vpop.eup %1013  ;;  %v443_v24 = vmul.f32 %v1012_v62, %v441_v21 }
 0x2f5   :  { %v436_v22 = vadd.f32 1.0, %v1014_v20  ;;  %v1016_v23 = vpop.eup %1015 }
 0x2f6   :  { %446 = vrot.lane.b32.xlu1 %v444_v2, %s1075_s13  ;;  %v409_v28 = vadd.f32 1.0, %v1016_v23 }
 0x2f7   :  { %1017 = vrcp.f32 %v436_v22 }
 0x2fa   :  { %419 = vrot.lane.b32.xlu1 %v417_v63, %s1075_s13 }
 0x301   :  { %v1018_v32 = vpop.eup %1017 }
 0x368   :  { %v447_v25 = vpop.permute.xlu1 %446 }
 0x369   :  { %v449_v26 = vadd.f32 %v447_v25, %v443_v24 }
 0x36b   :  { %1019 = vtanh.f32 %v449_v26 }
 0x36c   :  { %v420_v30 = vpop.permute.xlu1 %419  ;;  %1021 = vrcp.f32 %v409_v28 }
 0x36d   :  { %v422_v31 = vadd.f32 %v420_v30, %v416_v29 }
 0x36f   :  { %1023 = vtanh.f32 %v422_v31 }
 0x375   :  { %v1020_v33 = vpop.eup %1019 }
 0x376   :  { %v451_v34 = vmul.f32 %v1020_v33, %v1018_v32  ;;  %v1022_v35 = vpop.eup %1021 }
 0x378   :  { %463 = vrot.lane.b32.xlu0 %v451_v34, %s1075_s13 }
 0x379   :  { %v1024_v36 = vpop.eup %1023 }
 0x37a   :  { %v424_v37 = vmul.f32 %v1024_v36, %v1022_v35 }
 0x37c   :  { %468 = vrot.lane.b32.xlu0 %v449_v26, %s1075_s13  ;;  %453 = vrot.lane.b32.xlu1 %v424_v37, %s1075_s13 }
 0x380   :  { %458 = vrot.lane.b32.xlu1 %v422_v31, %s1075_s13 }
 0x3ea   :  { %v464_v38 = vpop.permute.xlu0 %463 }
 0x3eb   :  { %466 = vst.msk [vmem:[#allocation4] sm:$0xff] %vm12_vm0, %v464_v38  ;;  %475 = vst.msk [vmem:[#allocation7 + $0x10] sm:$0xff] %vm12_vm0, %v464_v38 }
 0x3ee   :  { %v469_v39 = vpop.permute.xlu0 %468  ;;  %v454_v40 = vpop.permute.xlu1 %453 }
 0x3ef   :  { %471 = vst.msk [vmem:[#allocation5] sm:$0xff] %vm12_vm0, %v469_v39  ;;  %456 = vst.msk [vmem:[#allocation2] sm:$0xff] %vm12_vm0, %v454_v40 }
 0x3f0   :  { %473 = vst.msk [vmem:[#allocation6 + $0x8] sm:$0xff] %vm12_vm0, %v454_v40 }
 0x3f2   :  { %v459_v41 = vpop.permute.xlu1 %458  ;;  %v530_v42 = vld [vmem:[#allocation4] sm:$0xff] }
 0x3f3   :  { %461 = vst.msk [vmem:[#allocation3] sm:$0xff] %vm12_vm0, %v459_v41  ;;  %v531_v43 = vpack.c.bf16 %v530_v42, %v530_v42 }
 0x3f5   :  { %917 = vmatmul.mubr.msk.bf16.vlgmr.msra.gmra.mrb[8].mxu1 %vm12_vm0, %v531_v43 }
 0x3f6   :  { %v605_v44 = vld [vmem:[#allocation5] sm:$0xff]  ;;  %v479_v45 = vld [vmem:[#allocation2] sm:$0xff]  ;;  %716 = vmatpush1.bf16.msra.mxu1 %v1116_v5  ;;  %747 = vmatprep.mubr.bf16.mxu1 %v1073_v1 }
 0x3f7   :  { %620 = vrot.lane.b32.xlu0 %v605_v44, %s1075_s13  ;;  %v480_v46 = vpack.c.bf16 %v479_v45, %v479_v45  ;;  %717 = vmatprep.subr.bf16.mxu1 %v1129_v7  ;;  %v914_v5 = vld [vmem:[%s1348_s0 + $0x20] sm:$0xff]  ;;  %v707_v44 = vld [vmem:[%s1348_s0 + $0x8] sm:$0xff] }
 0x3f8   :  { %v478_v49 = vunpack.c.h.bf16 %v914_v5  ;;  %v708_v45 = vunpack.c.l.bf16 %v707_v44 }
 0x3f9   :  { %915 = vmatmul.mubr.msk.bf16.vlgmr.msra.gmra.mrb[8].mxu0 %vm12_vm0, %v480_v46  ;;  %v922_v46 = vld [vmem:[%s1348_s0 + $0x30] sm:$0xff] }
 0x3fa   :  { %v578_v47 = vld [vmem:[#allocation3] sm:$0xff]  ;;  %665 = vmatpush1.bf16.msra.mxu0 %v1111_v4  ;;  %718 = vmatpush1.bf16.msra.mxu1 %v1140_v9  ;;  %v477_v9 = vunpack.c.l.bf16 %v914_v5  ;;  %v657_v5 = vunpack.c.l.bf16 %v922_v46 }
 0x3fb   :  { %593 = vrot.lane.b32.xlu0 %v578_v47, %s1075_s13  ;;  %666 = vmatprep.subr.bf16.mxu0 %v1122_v6 }
 0x3fc   :  { %719 = vmatprep.subr.bf16.mxu1 %v1151_v11  ;;  %696 = vmatprep.mubr.bf16.mxu0 %v1073_v1  ;;  %v916_v1 = vld [vmem:[%s1348_s0 + $0x18] sm:$0xff] }
 0x3fd   :  { %v528_v4 = vunpack.c.l.bf16 %v916_v1  ;;  %v529_v48 = vunpack.c.h.bf16 %v916_v1 }
 0x3fe   :  { %667 = vmatpush1.bf16.msra.mxu0 %v1134_v8  ;;  %720 = vmatpush1.bf16.msra.mxu1 %v1161_v13 }
 0x3ff   :  { %668 = vmatprep.subr.bf16.mxu0 %v1146_v10  ;;  %721 = vmatprep.subr.bf16.mxu1 %v1175_v15 }
 0x402   :  { %669 = vmatpush1.bf16.msra.mxu0 %v1156_v12  ;;  %722 = vmatpush1.bf16.msra.mxu1 %v1187_v18 }
 0x403   :  { %670 = vmatprep.subr.bf16.mxu0 %v1168_v14 }
 0x406   :  { %671 = vmatpush1.bf16.msra.mxu0 %v1180_v16 }
 0x469   :  { %v621_v2 = vpop.permute.xlu0 %620 }
 0x46d   :  { %v594_v23 = vpop.permute.xlu0 %593 }
 0x4c8   :  { %v569_v6 = vpop.f32.mrb[8].mxu1 }
 0x4c9   :  { %v576_v7 = vadd.f32 %v569_v6, %v528_v4  ;;  %v571_v8 = vpop.f32.mrb[9].mxu1 }
 0x4ca   :  { %v573_v10 = vpop.f32.mrb[10].mxu1  ;;  %v577_v3 = vadd.f32 %v571_v8, %v529_v48 }
 0x4cb   :  { %v920_v11 = vmul.f32 -1.442695, %v576_v7  ;;  %v574_v12 = vpop.f32.mrb[11].mxu1 }
 0x4cc   :  { %v518_v13 = vpop.f32.mrb[8].mxu0  ;;  %v921_v61 = vmul.f32 -1.442695, %v577_v3 }
 0x4cd   :  { %1025 = vpow2.f32 %v920_v11  ;;  %v525_v14 = vadd.f32 %v518_v13, %v477_v9  ;;  %v520_v15 = vpop.f32.mrb[9].mxu0 }
 0x4ce   :  { %v522_v16 = vpop.f32.mrb[10].mxu0  ;;  %v526_v52 = vadd.f32 %v520_v15, %v478_v49  ;;  %v709_v15 = vunpack.c.h.bf16 %v707_v44 }
 0x4cf   :  { %v918_v18 = vmul.f32 -1.442695, %v525_v14  ;;  %v523_v0 = vpop.f32.mrb[11].mxu0 }
 0x4d0   :  { %v919_v62 = vmul.f32 -1.442695, %v526_v52 }
 0x4d1   :  { %1027 = vpow2.f32 %v918_v18  ;;  %v658_v18 = vunpack.c.h.bf16 %v922_v46 }
 0x4d2   :  { %1029 = vtanh.f32 %v577_v3 }
 0x4d7   :  { %v1026_v50 = vpop.eup %1025 }
 0x4d8   :  { %v609_v51 = vadd.f32 1.0, %v1026_v50 }
 0x4da   :  { %1031 = vrcp.f32 %v609_v51 }
 0x4db   :  { %v1028_v53 = vpop.eup %1027  ;;  %1033 = vtanh.f32 %v526_v52 }
 0x4dc   :  { %v582_v54 = vadd.f32 1.0, %v1028_v53  ;;  %v1030_v55 = vpop.eup %1029 }
 0x4de   :  { %1035 = vrcp.f32 %v582_v54 }
 0x4df   :  { %1037 = vpow2.f32 %v921_v61 }
 0x4e0   :  { %1039 = vpow2.f32 %v919_v62 }
 0x4e4   :  { %v1032_v56 = vpop.eup %1031 }
 0x4e5   :  { %v624_v57 = vmul.f32 %v1032_v56, %v1030_v55  ;;  %v1034_v58 = vpop.eup %1033  ;;  %v623_v20 = vmul.f32 %v1032_v56, %v621_v2 }
 0x4e7   :  { %626 = vrot.lane.b32.xlu1 %v624_v57, %s1075_s13 }
 0x4e8   :  { %v1036_v59 = vpop.eup %1035 }
 0x4e9   :  { %v597_v60 = vmul.f32 %v1036_v59, %v1034_v58  ;;  %v1038_v63 = vpop.eup %1037  ;;  %v596_v25 = vmul.f32 %v1036_v59, %v594_v23 }
 0x4ea   :  { %v616_v17 = vadd.f32 1.0, %v1038_v63  ;;  %v1040_v19 = vpop.eup %1039 }
 0x4eb   :  { %599 = vrot.lane.b32.xlu1 %v597_v60, %s1075_s13  ;;  %v589_v24 = vadd.f32 1.0, %v1040_v19 }
 0x4ec   :  { %1041 = vrcp.f32 %v616_v17 }
 0x4f6   :  { %v1042_v28 = vpop.eup %1041 }
 0x559   :  { %v627_v21 = vpop.permute.xlu1 %626 }
 0x55a   :  { %v629_v22 = vadd.f32 %v627_v21, %v623_v20 }
 0x55c   :  { %1043 = vtanh.f32 %v629_v22 }
 0x55d   :  { %v600_v26 = vpop.permute.xlu1 %599  ;;  %1045 = vrcp.f32 %v589_v24 }
 0x55e   :  { %v602_v27 = vadd.f32 %v600_v26, %v596_v25 }
 0x560   :  { %1047 = vtanh.f32 %v602_v27 }
 0x566   :  { %v1044_v29 = vpop.eup %1043 }
 0x567   :  { %v631_v30 = vmul.f32 %v1044_v29, %v1042_v28  ;;  %v1046_v31 = vpop.eup %1045 }
 0x569   :  { %643 = vrot.lane.b32.xlu0 %v631_v30, %s1075_s13  ;;  %v841_v30 = vld [vmem:[#allocation7 + $0x10] sm:$0xff] }
 0x56a   :  { %v1048_v32 = vpop.eup %1047 }
 0x56b   :  { %v604_v33 = vmul.f32 %v1048_v32, %v1046_v31  ;;  %v842_v31 = vld [vmem:[#allocation7 + $0x18] sm:$0xff] }
 0x56c   :  { %v943_v32 = vpack.i.bf16 %v842_v31, %v841_v30 }
 0x56d   :  { %648 = vrot.lane.b32.xlu0 %v629_v22, %s1075_s13  ;;  %633 = vrot.lane.b32.xlu1 %v604_v33, %s1075_s13 }
 0x571   :  { %638 = vrot.lane.b32.xlu1 %v602_v27, %s1075_s13 }
 0x5db   :  { %v644_v34 = vpop.permute.xlu0 %643 }
 0x5dc   :  { %646 = vst.msk [vmem:[#allocation4] sm:$0xff] %vm12_vm0, %v644_v34  ;;  %655 = vst.msk [vmem:[#allocation7 + $0x8] sm:$0xff] %vm12_vm0, %v644_v34 }
 0x5df   :  { %v649_v35 = vpop.permute.xlu0 %648  ;;  %v634_v36 = vpop.permute.xlu1 %633 }
 0x5e0   :  { %651 = vst.msk [vmem:[#allocation5] sm:$0xff] %vm12_vm0, %v649_v35  ;;  %636 = vst.msk [vmem:[#allocation2] sm:$0xff] %vm12_vm0, %v634_v36 }
 0x5e1   :  { %653 = vst.msk [vmem:[#allocation6 + $0x10] sm:$0xff] %vm12_vm0, %v634_v36 }
 0x5e3   :  { %v639_v37 = vpop.permute.xlu1 %638  ;;  %v710_v38 = vld [vmem:[#allocation4] sm:$0xff] }
 0x5e4   :  { %641 = vst.msk [vmem:[#allocation3] sm:$0xff] %vm12_vm0, %v639_v37  ;;  %v711_v39 = vpack.c.bf16 %v710_v38, %v710_v38  ;;  %v840_v37 = vld [vmem:[#allocation7 + $0x8] sm:$0xff] }
 0x5e6   :  { %924 = vmatmul.mubr.msk.bf16.vlgmr.msra.gmra.mrb[12].mxu1 %vm12_vm0, %v711_v39 }
 0x5e7   :  { %v785_v40 = vld [vmem:[#allocation5] sm:$0xff]  ;;  %v659_v41 = vld [vmem:[#allocation2] sm:$0xff] }
 0x5e8   :  { %800 = vrot.lane.b32.xlu0 %v785_v40, %s1075_s13  ;;  %v660_v42 = vpack.c.bf16 %v659_v41, %v659_v41  ;;  %v837_v41 = vld [vmem:[#allocation6 + $0x10] sm:$0xff] }
 0x5ea   :  { %923 = vmatmul.mubr.msk.bf16.vlgmr.msra.gmra.mrb[12].mxu0 %vm12_vm0, %v660_v42 }
 0x5eb   :  { %v758_v43 = vld [vmem:[#allocation3] sm:$0xff] }
 0x5ec   :  { %773 = vrot.lane.b32.xlu0 %v758_v43, %s1075_s13 }
 0x65a   :  { %v801_v60 = vpop.permute.xlu0 %800 }
 0x65e   :  { %v774_v19 = vpop.permute.xlu0 %773 }
 0x6b9   :  { %v749_v47 = vpop.f32.mrb[12].mxu1 }
 0x6ba   :  { %v756_v1 = vadd.f32 %v749_v47, %v708_v45  ;;  %v751_v4 = vpop.f32.mrb[13].mxu1 }
 0x6bb   :  { %v753_v6 = vpop.f32.mrb[14].mxu1  ;;  %v757_v16 = vadd.f32 %v751_v4, %v709_v15 }
 0x6bc   :  { %v927_v7 = vmul.f32 -1.442695, %v756_v1  ;;  %v754_v8 = vpop.f32.mrb[15].mxu1  ;;  %v836_v6 = vld [vmem:[#allocation6 + $0x8] sm:$0xff] }
 0x6bd   :  { %v698_v9 = vpop.f32.mrb[12].mxu0  ;;  %v928_v57 = vmul.f32 -1.442695, %v757_v16 }
 0x6be   :  { %1049 = vpow2.f32 %v927_v7  ;;  %v705_v10 = vadd.f32 %v698_v9, %v657_v5  ;;  %v700_v11 = vpop.f32.mrb[13].mxu0  ;;  %v835_v5 = vld [vmem:[#allocation6] sm:$0xff] }
 0x6bf   :  { %v702_v12 = vpop.f32.mrb[14].mxu0  ;;  %v706_v3 = vadd.f32 %v700_v11, %v658_v18 }
 0x6c0   :  { %v925_v13 = vmul.f32 -1.442695, %v705_v10  ;;  %v703_v14 = vpop.f32.mrb[15].mxu0 }
 0x6c1   :  { %v926_v58 = vmul.f32 -1.442695, %v706_v3 }
 0x6c2   :  { %1051 = vpow2.f32 %v925_v13 }
 0x6c3   :  { %1053 = vtanh.f32 %v757_v16 }
 0x6c8   :  { %v1050_v0 = vpop.eup %1049 }
 0x6c9   :  { %v789_v48 = vadd.f32 1.0, %v1050_v0 }
 0x6cb   :  { %1055 = vrcp.f32 %v789_v48 }
 0x6cc   :  { %v1052_v49 = vpop.eup %1051  ;;  %1057 = vtanh.f32 %v706_v3 }
 0x6cd   :  { %v762_v50 = vadd.f32 1.0, %v1052_v49  ;;  %v1054_v51 = vpop.eup %1053 }
 0x6cf   :  { %1059 = vrcp.f32 %v762_v50 }
 0x6d0   :  { %1061 = vpow2.f32 %v928_v57 }
 0x6d1   :  { %1063 = vpow2.f32 %v926_v58 }
 0x6d5   :  { %v1056_v52 = vpop.eup %1055 }
 0x6d6   :  { %v804_v53 = vmul.f32 %v1056_v52, %v1054_v51  ;;  %v1058_v54 = vpop.eup %1057  ;;  %v803_v63 = vmul.f32 %v1056_v52, %v801_v60 }
 0x6d8   :  { %806 = vrot.lane.b32.xlu1 %v804_v53, %s1075_s13 }
 0x6d9   :  { %v1060_v55 = vpop.eup %1059 }
 0x6da   :  { %v777_v56 = vmul.f32 %v1060_v55, %v1058_v54  ;;  %v1062_v59 = vpop.eup %1061  ;;  %v776_v21 = vmul.f32 %v1060_v55, %v774_v19 }
 0x6db   :  { %v796_v61 = vadd.f32 1.0, %v1062_v59  ;;  %v1064_v62 = vpop.eup %1063 }
 0x6dc   :  { %779 = vrot.lane.b32.xlu1 %v777_v56, %s1075_s13  ;;  %v769_v20 = vadd.f32 1.0, %v1064_v62 }
 0x6dd   :  { %1065 = vrcp.f32 %v796_v61 }
 0x6e7   :  { %v1066_v24 = vpop.eup %1065 }
 0x74a   :  { %v807_v2 = vpop.permute.xlu1 %806 }
 0x74b   :  { %v809_v17 = vadd.f32 %v807_v2, %v803_v63 }
 0x74d   :  { %1067 = vtanh.f32 %v809_v17 }
 0x74e   :  { %v780_v22 = vpop.permute.xlu1 %779  ;;  %1069 = vrcp.f32 %v769_v20 }
 0x74f   :  { %v782_v23 = vadd.f32 %v780_v22, %v776_v21 }
 0x751   :  { %1071 = vtanh.f32 %v782_v23 }
 0x757   :  { %v1068_v25 = vpop.eup %1067 }
 0x758   :  { %v811_v26 = vmul.f32 %v1068_v25, %v1066_v24  ;;  %v1070_v27 = vpop.eup %1069 }
 0x75a   :  { %823 = vrot.lane.b32.xlu0 %v811_v26, %s1075_s13 }
 0x75b   :  { %v1072_v28 = vpop.eup %1071 }
 0x75c   :  { %v784_v29 = vmul.f32 %v1072_v28, %v1070_v27 }
 0x75e   :  { %813 = vrot.lane.b32.xlu1 %v784_v29, %s1075_s13 }
 0x762   :  { %944 = vrot.lane.b32.xlu1 %v943_v32, %s1075_s13 }
 0x766   :  { %828 = vrot.lane.b32.xlu1 %v809_v17, %s1075_s13 }
 0x7cc   :  { %v824_v33 = vpop.permute.xlu0 %823 }
 0x7cd   :  { %826 = vst.msk [vmem:[#allocation4] sm:$0xff] %vm12_vm0, %v824_v33  ;;  %834 = vst.msk [vmem:[#allocation7] sm:$0xff] %vm12_vm0, %v824_v33 }
 0x7d0   :  { %v814_v34 = vpop.permute.xlu1 %813 }
 0x7d1   :  { %816 = vst.msk [vmem:[#allocation2] sm:$0xff] %vm12_vm0, %v814_v34  ;;  %833 = vst.msk [vmem:[#allocation6 + $0x18] sm:$0xff] %vm12_vm0, %v814_v34 }
 0x7d4   :  { %v945_v35 = vpop.permute.xlu1 %944  ;;  %v839_v36 = vld [vmem:[#allocation7] sm:$0xff] }
 0x7d5   :  { %v946_v38 = vunpack.i.l.bf16 %v945_v35  ;;  %v948_v39 = vpack.i.bf16 %v840_v37, %v839_v36  ;;  %v947_v40 = vunpack.i.h.bf16 %v945_v35 }
 0x7d7   :  { %949 = vrot.lane.b32.xlu0 %v948_v39, %s1075_s13  ;;  %v861_v45 = vsel %vm12_vm0, %v837_v41, %v946_v38 }
 0x7d8   :  { %v838_v42 = vld [vmem:[#allocation6 + $0x18] sm:$0xff]  ;;  %v829_v43 = vpop.permute.xlu1 %828 }
 0x7d9   :  { %v862_v44 = vsel %vm12_vm0, %v838_v42, %v947_v40  ;;  %831 = vst.msk [vmem:[#allocation5] sm:$0xff] %vm12_vm0, %v829_v43 }
 0x7da   :  { %v937_v46 = vpack.c.bf16 %v862_v44, %v861_v45 }
 0x7db   :  { %818 = vrot.lane.b32.xlu0 %v782_v23, %s1075_s13 }
 0x7dc   :  { %939 = vst [vmem:[%s1349_s2 + $0x8] sm:$0xff] %v937_v46  }
 0x849   :  { %v950_v47 = vpop.permute.xlu0 %949 }
 0x84a   :  { %v952_v1 = vunpack.i.h.bf16 %v950_v47  ;;  %v951_v4 = vunpack.i.l.bf16 %v950_v47 }
 0x84c   :  { %v860_v7 = vsel %vm12_vm0, %v836_v6, %v952_v1  ;;  %v859_v8 = vsel %vm12_vm0, %v835_v5, %v951_v4 }
 0x84d   :  { %v932_v9 = vpack.c.bf16 %v860_v7, %v859_v8  ;;  %v819_v10 = vpop.permute.xlu0 %818 }
 0x84e   :  { %821 = vst.msk [vmem:[#allocation3] sm:$0xff] %vm12_vm0, %v819_v10 }
 0x84f   :  { %933 = vst [vmem:[%s1349_s2] sm:$0xff] %v932_v9  }

// kernel: forward.54
= control target key start
LH: loop header
LB: loop body
LE: loop exit
PB: predicated region body
PF: predicated region fallthrough
CT: control target
= control target key end

     0   :  { %s930_s1 = inlined_call_operand.vmem [shape: bf16[512,128], index: 1, kind: input, shape index: {}]   ;;  %s931_s0 = inlined_call_operand.vmem [shape: bf16[50,512], index: 0, kind: input, shape index: {}]   ;;  %s932_s2 = inlined_call_operand.vmem [shape: f32[1,128], index: 2, kind: input, shape index: {}]   ;;  %s933_s3 = inlined_call_operand.vmem [shape: bf16[50,128], index: 3, kind: output, shape index: {}]  }
   0x1   :  { %v694_v0 = vld [vmem:[%s930_s1 + $0x40] sm:$0xff]   ;;  %v698_v4 = vld [vmem:[%s930_s1 + $0x48] sm:$0xff]   ;;  %v702_v8 = vld [vmem:[%s930_s1 + $0x50] sm:$0xff]  }
   0x2   :  { %v695_v1 = vld [vmem:[%s930_s1 + $0xc0] sm:$0xff]   ;;  %614 = vmatprep.subr.bf16.mxu0 %v694_v0  ;;  %v699_v5 = vld [vmem:[%s930_s1 + $0xc8] sm:$0xff]   ;;  %v703_v9 = vld [vmem:[%s930_s1 + $0xd0] sm:$0xff]  }
   0x3   :  { %v696_v2 = vld [vmem:[%s930_s1] sm:$0xff]   ;;  %654 = vmatprep.subr.bf16.mxu1 %v695_v1  ;;  %v700_v6 = vld [vmem:[%s930_s1 + $0x8] sm:$0xff]   ;;  %v704_v10 = vld [vmem:[%s930_s1 + $0x10] sm:$0xff]  }
   0x4   :  { %v697_v3 = vld [vmem:[%s930_s1 + $0x80] sm:$0xff]   ;;  %615 = vmatpush3.bf16.msra.mxu0 %v696_v2  ;;  %v701_v7 = vld [vmem:[%s930_s1 + $0x88] sm:$0xff]   ;;  %v705_v11 = vld [vmem:[%s930_s1 + $0x90] sm:$0xff]  }
   0x5   :  { %655 = vmatpush3.bf16.msra.mxu1 %v697_v3  ;;  %616 = vmatprep.subr.bf16.mxu0 %v698_v4  ;;  %v706_v12 = vld [vmem:[%s930_s1 + $0x58] sm:$0xff]   ;;  %v710_v16 = vld [vmem:[%s930_s1 + $0x60] sm:$0xff]   ;;  %v714_v20 = vld [vmem:[%s930_s1 + $0x68] sm:$0xff]  }
   0x6   :  { %656 = vmatprep.subr.bf16.mxu1 %v699_v5  ;;  %v707_v13 = vld [vmem:[%s930_s1 + $0xd8] sm:$0xff]   ;;  %v711_v17 = vld [vmem:[%s930_s1 + $0xe0] sm:$0xff]   ;;  %v715_v21 = vld [vmem:[%s930_s1 + $0xe8] sm:$0xff]  }
   0x7   :  { %v708_v14 = vld [vmem:[%s930_s1 + $0x18] sm:$0xff]   ;;  %v712_v18 = vld [vmem:[%s930_s1 + $0x20] sm:$0xff]   ;;  %v716_v22 = vld [vmem:[%s930_s1 + $0x28] sm:$0xff]  }
   0x8   :  { %617 = vmatpush3.bf16.msra.mxu0 %v700_v6  ;;  %v709_v15 = vld [vmem:[%s930_s1 + $0x98] sm:$0xff]   ;;  %v713_v19 = vld [vmem:[%s930_s1 + $0xa0] sm:$0xff]   ;;  %v717_v23 = vld [vmem:[%s930_s1 + $0xa8] sm:$0xff]  }
   0x9   :  { %657 = vmatpush3.bf16.msra.mxu1 %v701_v7  ;;  %618 = vmatprep.subr.bf16.mxu0 %v702_v8  ;;  %v718_v24 = vld [vmem:[%s930_s1 + $0x70] sm:$0xff]   ;;  %v722_v28 = vld [vmem:[%s930_s1 + $0x78] sm:$0xff]   ;;  %v27_v42 = vld [vmem:[%s931_s0 + $0x60] sm:$0x11] }
   0xa   :  { %658 = vmatprep.subr.bf16.mxu1 %v703_v9  ;;  %v719_v25 = vld [vmem:[%s930_s1 + $0xf0] sm:$0xff]   ;;  %v723_v29 = vld [vmem:[%s930_s1 + $0xf8] sm:$0xff]   ;;  %v28_v43 = vld [vmem:[%s931_s0 + $0x68] sm:$0x11]  ;;  %v548_v46 = vcombine.high %v27_v42, %v27_v42  ;;  %v547_v48 = vcombine.low %v27_v42, %v27_v42 }
   0xb   :  { %v720_v26 = vld [vmem:[%s930_s1 + $0x30] sm:$0xff]   ;;  %v724_v30 = vld [vmem:[%s930_s1 + $0x38] sm:$0xff]   ;;  %v550_v47 = vcombine.high %v28_v43, %v28_v43  ;;  %v549_v49 = vcombine.low %v28_v43, %v28_v43  ;;  %v909_v52 = vld [vmem:[%s932_s2] ss:$0 sm:$0xff] }
   0xc   :  { %619 = vmatpush3.bf16.msra.mxu0 %v704_v10  ;;  %v721_v27 = vld [vmem:[%s930_s1 + $0xb0] sm:$0xff]   ;;  %v725_v31 = vld [vmem:[%s930_s1 + $0xb8] sm:$0xff]  }
   0xd   :  { %659 = vmatpush3.bf16.msra.mxu1 %v705_v11  ;;  %620 = vmatprep.subr.bf16.mxu0 %v706_v12  ;;  %v726_v32 = vld [vmem:[%s931_s0] ss:$16 sps:$4 sm:$0xff]   ;;  %v728_v33 = vld [vmem:[%s931_s0 + $0x4] ss:$16 sps:$4 sm:$0xff]   ;;  %v729_v34 = vld [vmem:[%s931_s0 + $0x8] ss:$16 sps:$4 sm:$0xff]  }
   0xe   :  { %660 = vmatprep.subr.bf16.mxu1 %v707_v13  ;;  %v731_v35 = vld [vmem:[%s931_s0 + $0xc] ss:$16 sps:$4 sm:$0xff]   ;;  %398 = vmatprep.mubr.bf16.mxu0 %v728_v33  ;;  %v732_v36 = vld [vmem:[%s931_s0 + $0x24] ss:$16 sps:$4 sm:$0xff]   ;;  %v736_v38 = vld [vmem:[%s931_s0 + $0x20] ss:$16 sps:$4 sm:$0xff]  }
   0xf   :  { %462 = vmatprep.mubr.bf16.mxu1 %v731_v35  ;;  %v734_v37 = vld [vmem:[%s931_s0 + $0x2c] ss:$16 sps:$4 sm:$0xff]   ;;  %v737_v39 = vld [vmem:[%s931_s0 + $0x28] ss:$16 sps:$4 sm:$0xff]   ;;  %v738_v40 = vld [vmem:[%s931_s0 + $0x44] ss:$16 sps:$4 sm:$0xff]  }
  0x10   :  { %621 = vmatpush3.bf16.msra.mxu0 %v708_v14  ;;  %v740_v41 = vld [vmem:[%s931_s0 + $0x4c] ss:$16 sps:$4 sm:$0xff]   ;;  %v742_v44 = vld [vmem:[%s931_s0 + $0x40] ss:$16 sps:$4 sm:$0xff]   ;;  %v743_v45 = vld [vmem:[%s931_s0 + $0x48] ss:$16 sps:$4 sm:$0xff]  }
  0x11   :  { %661 = vmatpush3.bf16.msra.mxu1 %v709_v15  ;;  %622 = vmatprep.subr.bf16.mxu0 %v710_v16 }
  0x12   :  { %662 = vmatprep.subr.bf16.mxu1 %v711_v17 }
  0x14   :  { %623 = vmatpush3.bf16.msra.mxu0 %v712_v18 }
  0x15   :  { %663 = vmatpush3.bf16.msra.mxu1 %v713_v19  ;;  %624 = vmatprep.subr.bf16.mxu0 %v714_v20 }
  0x16   :  { %664 = vmatprep.subr.bf16.mxu1 %v715_v21 }
  0x18   :  { %625 = vmatpush3.bf16.msra.mxu0 %v716_v22 }
  0x19   :  { %665 = vmatpush3.bf16.msra.mxu1 %v717_v23  ;;  %626 = vmatprep.subr.bf16.mxu0 %v718_v24 }
  0x1a   :  { %666 = vmatprep.subr.bf16.mxu1 %v719_v25 }
  0x1c   :  { %627 = vmatpush3.bf16.msra.mxu0 %v720_v26 }
  0x1d   :  { %667 = vmatpush3.bf16.msra.mxu1 %v721_v27  ;;  %628 = vmatprep.subr.bf16.mxu0 %v722_v28 }
  0x1e   :  { %668 = vmatprep.subr.bf16.mxu1 %v723_v29 }
  0x20   :  { %629 = vmatpush3.bf16.msra.mxu0 %v724_v30 }
  0x21   :  { %669 = vmatpush3.bf16.msra.mxu1 %v725_v31 }
  0x23   :  { %399 = vmatmul.mubr.bf16.vlgmr.msra.gmra.mrb[0].mxu0 %v726_v32 }
  0x24   :  { %463 = vmatmul.mubr.bf16.vlgmr.msra.gmra.mrb[0].mxu1 %v729_v34  ;;  %406 = vmatprep.mubr.bf16.mxu0 %v732_v36 }
  0x25   :  { %470 = vmatprep.mubr.bf16.mxu1 %v734_v37 }
  0x2b   :  { %407 = vmatmul.mubr.bf16.gmra.mrb[4].mxu0 %v736_v38 }
  0x2c   :  { %471 = vmatmul.mubr.bf16.gmra.mrb[4].mxu1 %v737_v39  ;;  %414 = vmatprep.mubr.bf16.mxu0 %v738_v40 }
  0x2d   :  { %478 = vmatprep.mubr.bf16.mxu1 %v740_v41 }
  0x33   :  { %415 = vmatmul.mubr.bf16.gmra.mrb[8].mxu0 %v742_v44 }
  0x34   :  { %479 = vmatmul.mubr.bf16.gmra.mrb[8].mxu1 %v743_v45  ;;  %422 = vmatprep.mubr.bf16.mxu0 %v548_v46 }
  0x35   :  { %486 = vmatprep.mubr.bf16.mxu1 %v550_v47 }
  0x3b   :  { %423 = vmatmul.mubr.bf16.gmra.mrb[12].mxu0 %v547_v48 }
  0x3c   :  { %487 = vmatmul.mubr.bf16.gmra.mrb[12].mxu1 %v549_v49 }
  0xf6   :  { %v630_v50 = vpop.f32.mrb[0].mxu0 }
  0xf7   :  { %v670_v51 = vpop.f32.mrb[0].mxu1  ;;  %v631_v53 = vpop.f32.mrb[1].mxu0 }
  0xf8   :  { %v632_v54 = vadd.f32 %v631_v53, %v630_v50  ;;  %v671_v55 = vpop.f32.mrb[1].mxu1  ;;  %v633_v56 = vpop.f32.mrb[2].mxu0 }
  0xf9   :  { %v672_v57 = vadd.f32 %v671_v55, %v670_v51  ;;  %v673_v58 = vpop.f32.mrb[2].mxu1  ;;  %v634_v59 = vpop.f32.mrb[3].mxu0 }
  0xfa   :  { %v401_v60 = vadd.f32 %v632_v54, %v909_v52  ;;  %v635_v61 = vadd.f32 %v634_v59, %v633_v56  ;;  %v674_v62 = vpop.f32.mrb[3].mxu1 }
  0xfb   :  { %v675_v63 = vadd.f32 %v674_v62, %v673_v58 }
  0xfc   :  { %v465_v0 = vadd.f32 %v672_v57, %v401_v60  ;;  %v404_v1 = vadd.f32 %v635_v61, %v909_v52 }
  0xfe   :  { %v468_v2 = vadd.f32 %v675_v63, %v404_v1  ;;  %v636_v3 = vpop.f32.mrb[4].mxu0 }
  0xff   :  { %v676_v4 = vpop.f32.mrb[4].mxu1  ;;  %v637_v5 = vpop.f32.mrb[5].mxu0 }
 0x100   :  { %v600_v6 = vpack.c.bf16 %v468_v2, %v465_v0  ;;  %v638_v7 = vadd.f32 %v637_v5, %v636_v3  ;;  %v677_v8 = vpop.f32.mrb[5].mxu1  ;;  %v639_v9 = vpop.f32.mrb[6].mxu0 }
 0x101   :  { %v678_v10 = vadd.f32 %v677_v8, %v676_v4  ;;  %v679_v11 = vpop.f32.mrb[6].mxu1  ;;  %v640_v12 = vpop.f32.mrb[7].mxu0 }
 0x102   :  { %601 = vst [vmem:[%s933_s3] sm:$0xff] %v600_v6   ;;  %v409_v13 = vadd.f32 %v638_v7, %v909_v52  ;;  %v641_v14 = vadd.f32 %v640_v12, %v639_v9  ;;  %v680_v15 = vpop.f32.mrb[7].mxu1 }
 0x103   :  { %v681_v16 = vadd.f32 %v680_v15, %v679_v11 }
 0x104   :  { %v473_v17 = vadd.f32 %v678_v10, %v409_v13  ;;  %v412_v18 = vadd.f32 %v641_v14, %v909_v52 }
 0x106   :  { %v476_v19 = vadd.f32 %v681_v16, %v412_v18  ;;  %v642_v20 = vpop.f32.mrb[8].mxu0 }
 0x107   :  { %v682_v21 = vpop.f32.mrb[8].mxu1  ;;  %v643_v22 = vpop.f32.mrb[9].mxu0 }
 0x108   :  { %v605_v23 = vpack.c.bf16 %v476_v19, %v473_v17  ;;  %v644_v24 = vadd.f32 %v643_v22, %v642_v20  ;;  %v683_v25 = vpop.f32.mrb[9].mxu1  ;;  %v645_v26 = vpop.f32.mrb[10].mxu0 }
 0x109   :  { %v684_v27 = vadd.f32 %v683_v25, %v682_v21  ;;  %v685_v28 = vpop.f32.mrb[10].mxu1  ;;  %v646_v29 = vpop.f32.mrb[11].mxu0 }
 0x10a   :  { %612 = vst [vmem:[%s933_s3 + $0x8] sm:$0xff] %v605_v23   ;;  %v417_v30 = vadd.f32 %v644_v24, %v909_v52  ;;  %v647_v31 = vadd.f32 %v646_v29, %v645_v26  ;;  %v686_v32 = vpop.f32.mrb[11].mxu1 }
 0x10b   :  { %v687_v33 = vadd.f32 %v686_v32, %v685_v28 }
 0x10c   :  { %v481_v34 = vadd.f32 %v684_v27, %v417_v30  ;;  %v420_v35 = vadd.f32 %v647_v31, %v909_v52 }
 0x10e   :  { %v484_v36 = vadd.f32 %v687_v33, %v420_v35  ;;  %v648_v37 = vpop.f32.mrb[12].mxu0 }
 0x10f   :  { %v688_v38 = vpop.f32.mrb[12].mxu1  ;;  %v649_v39 = vpop.f32.mrb[13].mxu0 }
 0x110   :  { %v610_v40 = vpack.c.bf16 %v484_v36, %v481_v34  ;;  %v650_v41 = vadd.f32 %v649_v39, %v648_v37  ;;  %v689_v42 = vpop.f32.mrb[13].mxu1  ;;  %v651_v43 = vpop.f32.mrb[14].mxu0 }
 0x111   :  { %v690_v44 = vadd.f32 %v689_v42, %v688_v38  ;;  %v691_v45 = vpop.f32.mrb[14].mxu1  ;;  %v652_v46 = vpop.f32.mrb[15].mxu0 }
 0x112   :  { %613 = vst [vmem:[%s933_s3 + $0x10] sm:$0xff] %v610_v40   ;;  %v425_v47 = vadd.f32 %v650_v41, %v909_v52  ;;  %v692_v48 = vpop.f32.mrb[15].mxu1 }
 0x114   :  { %v489_v49 = vadd.f32 %v690_v44, %v425_v47 }
 0x116   :  { %v596_v50 = vpack.c.bf16 %v489_v49, %v489_v49 }
 0x118   :  { %529 = vst [vmem:[%s933_s3 + $0x18] sm:$0x1] %v596_v50 }

// kernel: forward.55
= control target key start
LH: loop header
LB: loop body
LE: loop exit
PB: predicated region body
PF: predicated region fallthrough
CT: control target
= control target key end

     0   :  { %s1628_s1 = inlined_call_operand.vmem [shape: bf16[1152,128], index: 1, kind: input, shape index: {}]   ;;  %s1629_s0 = inlined_call_operand.vmem [shape: bf16[32,1152], index: 0, kind: input, shape index: {}]   ;;  %s1630_s2 = inlined_call_operand.vmem [shape: f32[1,128], index: 2, kind: input, shape index: {}]   ;;  %s1631_s3 = inlined_call_operand.vmem [shape: bf16[32,128], index: 3, kind: output, shape index: {}]  }
   0x1   :  { %v1231_v0 = vld [vmem:[%s1628_s1 + $0x40] sm:$0xff]   ;;  %v1235_v4 = vld [vmem:[%s1628_s1 + $0x48] sm:$0xff]   ;;  %v1239_v8 = vld [vmem:[%s1628_s1 + $0x50] sm:$0xff]  }
   0x2   :  { %v1232_v1 = vld [vmem:[%s1628_s1] sm:$0xff]   ;;  %1089 = vmatprep.subr.bf16.mxu0 %v1231_v0  ;;  %v1236_v5 = vld [vmem:[%s1628_s1 + $0x8] sm:$0xff]   ;;  %v1240_v9 = vld [vmem:[%s1628_s1 + $0x10] sm:$0xff]  }
   0x3   :  { %v1233_v2 = vld [vmem:[%s1628_s1 + $0xc0] sm:$0xff]   ;;  %1090 = vmatpush3.bf16.msra.mxu0 %v1232_v1  ;;  %v1237_v6 = vld [vmem:[%s1628_s1 + $0xc8] sm:$0xff]   ;;  %v1241_v10 = vld [vmem:[%s1628_s1 + $0xd0] sm:$0xff]  }
   0x4   :  { %v1234_v3 = vld [vmem:[%s1628_s1 + $0x80] sm:$0xff]   ;;  %1117 = vmatprep.subr.bf16.mxu1 %v1233_v2  ;;  %1091 = vmatprep.subr.bf16.mxu0 %v1235_v4  ;;  %v1238_v7 = vld [vmem:[%s1628_s1 + $0x88] sm:$0xff]   ;;  %v1242_v11 = vld [vmem:[%s1628_s1 + $0x90] sm:$0xff]  }
   0x5   :  { %1118 = vmatpush3.bf16.msra.mxu1 %v1234_v3  ;;  %v1243_v12 = vld [vmem:[%s1628_s1 + $0x58] sm:$0xff]   ;;  %v1247_v16 = vld [vmem:[%s1628_s1 + $0x60] sm:$0xff]   ;;  %v1251_v20 = vld [vmem:[%s1628_s1 + $0x68] sm:$0xff]  }
   0x6   :  { %1119 = vmatprep.subr.bf16.mxu1 %v1237_v6  ;;  %v1244_v13 = vld [vmem:[%s1628_s1 + $0x18] sm:$0xff]   ;;  %v1248_v17 = vld [vmem:[%s1628_s1 + $0x20] sm:$0xff]   ;;  %v1252_v21 = vld [vmem:[%s1628_s1 + $0x28] sm:$0xff]  }
   0x7   :  { %1092 = vmatpush3.bf16.msra.mxu0 %v1236_v5  ;;  %v1245_v14 = vld [vmem:[%s1628_s1 + $0xd8] sm:$0xff]   ;;  %v1249_v18 = vld [vmem:[%s1628_s1 + $0xe0] sm:$0xff]   ;;  %v1253_v22 = vld [vmem:[%s1628_s1 + $0xe8] sm:$0xff]  }
   0x8   :  { %1093 = vmatprep.subr.bf16.mxu0 %v1239_v8  ;;  %v1246_v15 = vld [vmem:[%s1628_s1 + $0x98] sm:$0xff]   ;;  %v1250_v19 = vld [vmem:[%s1628_s1 + $0xa0] sm:$0xff]   ;;  %v1254_v23 = vld [vmem:[%s1628_s1 + $0xa8] sm:$0xff]  }
   0x9   :  { %1120 = vmatpush3.bf16.msra.mxu1 %v1238_v7  ;;  %v1255_v24 = vld [vmem:[%s1628_s1 + $0x70] sm:$0xff]   ;;  %v1259_v28 = vld [vmem:[%s1628_s1 + $0x78] sm:$0xff]   ;;  %v1262_v31 = vld [vmem:[%s1629_s0] ss:$36 sps:$4 sm:$0xff]  }
   0xa   :  { %1121 = vmatprep.subr.bf16.mxu1 %v1241_v10  ;;  %v1256_v25 = vld [vmem:[%s1628_s1 + $0x30] sm:$0xff]   ;;  %v1260_v29 = vld [vmem:[%s1628_s1 + $0x38] sm:$0xff]   ;;  %v1264_v32 = vld [vmem:[%s1629_s0 + $0x4] ss:$36 sps:$4 sm:$0xff]  }
   0xb   :  { %1094 = vmatpush3.bf16.msra.mxu0 %v1240_v9  ;;  %v1257_v26 = vld [vmem:[%s1628_s1 + $0xf0] sm:$0xff]   ;;  %v1261_v30 = vld [vmem:[%s1628_s1 + $0xf8] sm:$0xff]   ;;  %742 = vmatprep.mubr.bf16.mxu0 %v1264_v32  ;;  %v1266_v34 = vld [vmem:[%s1628_s1 + $0x140] sm:$0xff]  }
   0xc   :  { %1095 = vmatprep.subr.bf16.mxu0 %v1243_v12  ;;  %v1258_v27 = vld [vmem:[%s1628_s1 + $0xb0] sm:$0xff]   ;;  %v1265_v33 = vld [vmem:[%s1628_s1 + $0xb8] sm:$0xff]   ;;  %v1267_v35 = vld [vmem:[%s1629_s0 + $0x8] ss:$36 sps:$4 sm:$0xff]  }
   0xd   :  { %1122 = vmatpush3.bf16.msra.mxu1 %v1242_v11  ;;  %v1269_v36 = vld [vmem:[%s1629_s0 + $0xc] ss:$36 sps:$4 sm:$0xff]   ;;  %v1270_v37 = vld [vmem:[%s1628_s1 + $0x100] sm:$0xff]   ;;  %v1281_v48 = vld [vmem:[%s1628_s1 + $0x158] sm:$0xff]  }
   0xe   :  { %1123 = vmatprep.subr.bf16.mxu1 %v1245_v14  ;;  %791 = vmatprep.mubr.bf16.mxu1 %v1269_v36  ;;  %v1271_v38 = vld [vmem:[%s1628_s1 + $0x1c0] sm:$0xff]   ;;  %v1273_v40 = vld [vmem:[%s1628_s1 + $0x148] sm:$0xff]   ;;  %v1277_v44 = vld [vmem:[%s1628_s1 + $0x150] sm:$0xff]  }
   0xf   :  { %1096 = vmatpush3.bf16.msra.mxu0 %v1244_v13  ;;  %v1272_v39 = vld [vmem:[%s1628_s1 + $0x180] sm:$0xff]   ;;  %v1274_v41 = vld [vmem:[%s1628_s1 + $0x108] sm:$0xff]   ;;  %v1278_v45 = vld [vmem:[%s1628_s1 + $0x110] sm:$0xff]  }
  0x10   :  { %1097 = vmatprep.subr.bf16.mxu0 %v1247_v16  ;;  %v1275_v42 = vld [vmem:[%s1628_s1 + $0x1c8] sm:$0xff]   ;;  %v1279_v46 = vld [vmem:[%s1628_s1 + $0x1d0] sm:$0xff]   ;;  %v1282_v49 = vld [vmem:[%s1628_s1 + $0x118] sm:$0xff]  }
  0x11   :  { %1124 = vmatpush3.bf16.msra.mxu1 %v1246_v15  ;;  %v1276_v43 = vld [vmem:[%s1628_s1 + $0x188] sm:$0xff]   ;;  %v1280_v47 = vld [vmem:[%s1628_s1 + $0x190] sm:$0xff]   ;;  %v1283_v50 = vld [vmem:[%s1628_s1 + $0x1d8] sm:$0xff]  }
  0x12   :  { %1125 = vmatprep.subr.bf16.mxu1 %v1249_v18  ;;  %v1284_v51 = vld [vmem:[%s1628_s1 + $0x198] sm:$0xff]   ;;  %v1285_v52 = vld [vmem:[%s1628_s1 + $0x160] sm:$0xff]   ;;  %v1289_v56 = vld [vmem:[%s1628_s1 + $0x168] sm:$0xff]  }
  0x13   :  { %1098 = vmatpush3.bf16.msra.mxu0 %v1248_v17  ;;  %v1286_v53 = vld [vmem:[%s1628_s1 + $0x120] sm:$0xff]   ;;  %v1290_v57 = vld [vmem:[%s1629_s0 + $0x4c] ss:$36 sps:$4 sm:$0xff]   ;;  %v1295_v61 = vld [vmem:[%s1629_s0 + $0x54] ss:$36 sps:$4 sm:$0xff]  }
  0x14   :  { %1099 = vmatprep.subr.bf16.mxu0 %v1251_v20  ;;  %v1287_v54 = vld [vmem:[%s1628_s1 + $0x1e0] sm:$0xff]   ;;  %v1292_v58 = vld [vmem:[%s1628_s1 + $0x128] sm:$0xff]   ;;  %v1298_v63 = vld [vmem:[%s1629_s0 + $0x50] ss:$36 sps:$4 sm:$0xff]  }
  0x15   :  { %1126 = vmatpush3.bf16.msra.mxu1 %v1250_v19  ;;  %v1288_v55 = vld [vmem:[%s1628_s1 + $0x1a0] sm:$0xff]   ;;  %v1293_v59 = vld [vmem:[%s1629_s0 + $0x48] ss:$36 sps:$4 sm:$0xff]   ;;  %v1299_v0 = vld [vmem:[%s1628_s1 + $0x170] sm:$0xff]  }
  0x16   :  { %1127 = vmatprep.subr.bf16.mxu1 %v1253_v22  ;;  %v1294_v60 = vld [vmem:[%s1628_s1 + $0x1e8] sm:$0xff]   ;;  %v1300_v1 = vld [vmem:[%s1628_s1 + $0x130] sm:$0xff]   ;;  %v1303_v4 = vld [vmem:[%s1628_s1 + $0x178] sm:$0xff]  }
  0x17   :  { %1100 = vmatpush3.bf16.msra.mxu0 %v1252_v21  ;;  %v1297_v62 = vld [vmem:[%s1628_s1 + $0x1a8] sm:$0xff]   ;;  %v1301_v2 = vld [vmem:[%s1628_s1 + $0x1f0] sm:$0xff]   ;;  %v1304_v5 = vld [vmem:[%s1628_s1 + $0x138] sm:$0xff]  }
  0x18   :  { %1101 = vmatprep.subr.bf16.mxu0 %v1255_v24  ;;  %v1302_v3 = vld [vmem:[%s1628_s1 + $0x1b0] sm:$0xff]   ;;  %v1305_v6 = vld [vmem:[%s1628_s1 + $0x1f8] sm:$0xff]   ;;  %v1310_v10 = vld [vmem:[%s1628_s1 + $0x200] sm:$0xff]  }
  0x19   :  { %1128 = vmatpush3.bf16.msra.mxu1 %v1254_v23  ;;  %v1306_v7 = vld [vmem:[%s1629_s0 + $0x10] ss:$36 sps:$4 sm:$0xff]   ;;  %v1309_v9 = vld [vmem:[%s1628_s1 + $0x1b8] sm:$0xff]   ;;  %v1314_v13 = vld [vmem:[%s1628_s1 + $0x208] sm:$0xff]  }
  0x1a   :  { %1129 = vmatprep.subr.bf16.mxu1 %v1257_v26  ;;  %v1308_v8 = vld [vmem:[%s1629_s0 + $0x14] ss:$36 sps:$4 sm:$0xff]   ;;  %v1313_v12 = vld [vmem:[%s1629_s0 + $0x1c] ss:$36 sps:$4 sm:$0xff]   ;;  %v1319_v17 = vld [vmem:[%s1629_s0 + $0x64] ss:$36 sps:$4 sm:$0xff]  }
  0x1b   :  { %1102 = vmatpush3.bf16.msra.mxu0 %v1256_v25  ;;  %v1311_v11 = vld [vmem:[%s1629_s0 + $0x18] ss:$36 sps:$4 sm:$0xff]   ;;  %v1318_v16 = vld [vmem:[%s1628_s1 + $0x210] sm:$0xff]   ;;  %v1321_v18 = vld [vmem:[%s1629_s0 + $0x60] ss:$36 sps:$4 sm:$0xff]  }
  0x1c   :  { %1103 = vmatprep.subr.bf16.mxu0 %v1259_v28  ;;  %v1315_v14 = vld [vmem:[%s1629_s0 + $0x5c] ss:$36 sps:$4 sm:$0xff]   ;;  %v1324_v22 = vld [vmem:[%s1628_s1 + $0x228] sm:$0xff]   ;;  %v1325_v23 = vld [vmem:[%s1628_s1 + $0x230] sm:$0xff]  }
  0x1d   :  { %1130 = vmatpush3.bf16.msra.mxu1 %v1258_v27  ;;  %v1317_v15 = vld [vmem:[%s1629_s0 + $0x58] ss:$36 sps:$4 sm:$0xff]   ;;  %v1323_v20 = vld [vmem:[%s1628_s1 + $0x220] sm:$0xff]   ;;  %v1328_v25 = vld [vmem:[%s1629_s0 + $0x68] ss:$36 sps:$4 sm:$0xff]  }
  0x1e   :  { %1131 = vmatprep.subr.bf16.mxu1 %v1261_v30  ;;  %v1322_v19 = vld [vmem:[%s1628_s1 + $0x218] sm:$0xff]   ;;  %v1327_v21 = vld [vmem:[%s1629_s0 + $0x20] ss:$36 sps:$4 sm:$0xff]  }
  0x1f   :  { %1104 = vmatpush3.bf16.msra.mxu0 %v1260_v29  ;;  %v1326_v24 = vld [vmem:[%s1628_s1 + $0x238] sm:$0xff]   ;;  %v979_v27 = vld [vmem:[%s1630_s2] ss:$0 sm:$0xff] }
  0x20   :  { %1145 = vmatprep.subr.bf16.mxu0 %v1266_v34 }
  0x21   :  { %1132 = vmatpush3.bf16.msra.mxu1 %v1265_v33 }
  0x22   :  { %743 = vmatmul.mubr.bf16.vlgmr.msra.gmra.mrb[0].mxu0 %v1262_v31  ;;  %1173 = vmatprep.subr.bf16.mxu1 %v1271_v38 }
  0x23   :  { %1146 = vmatpush3.bf16.msra.mxu0 %v1270_v37  ;;  %750 = vmatprep.mubr.bf16.mxu0 %v1290_v57 }
  0x24   :  { %792 = vmatmul.mubr.bf16.vlgmr.msra.gmra.mrb[0].mxu1 %v1267_v35  ;;  %1147 = vmatprep.subr.bf16.mxu0 %v1273_v40 }
  0x25   :  { %1174 = vmatpush3.bf16.msra.mxu1 %v1272_v39  ;;  %799 = vmatprep.mubr.bf16.mxu1 %v1295_v61 }
  0x26   :  { %1175 = vmatprep.subr.bf16.mxu1 %v1275_v42 }
  0x27   :  { %1148 = vmatpush3.bf16.msra.mxu0 %v1274_v41 }
  0x28   :  { %1149 = vmatprep.subr.bf16.mxu0 %v1277_v44 }
  0x29   :  { %1176 = vmatpush3.bf16.msra.mxu1 %v1276_v43 }
  0x2a   :  { %1177 = vmatprep.subr.bf16.mxu1 %v1279_v46  ;;  %751 = vmatmul.mubr.bf16.gmra.mrb[4].mxu0 %v1293_v59 }
  0x2b   :  { %1150 = vmatpush3.bf16.msra.mxu0 %v1278_v45  ;;  %840 = vmatprep.mubr.bf16.mxu0 %v1308_v8 }
  0x2c   :  { %1151 = vmatprep.subr.bf16.mxu0 %v1281_v48  ;;  %800 = vmatmul.mubr.bf16.gmra.mrb[4].mxu1 %v1298_v63 }
  0x2d   :  { %1178 = vmatpush3.bf16.msra.mxu1 %v1280_v47  ;;  %889 = vmatprep.mubr.bf16.mxu1 %v1313_v12 }
  0x2e   :  { %1179 = vmatprep.subr.bf16.mxu1 %v1283_v50 }
  0x2f   :  { %1152 = vmatpush3.bf16.msra.mxu0 %v1282_v49 }
  0x30   :  { %1153 = vmatprep.subr.bf16.mxu0 %v1285_v52 }
  0x31   :  { %1180 = vmatpush3.bf16.msra.mxu1 %v1284_v51 }
  0x32   :  { %1181 = vmatprep.subr.bf16.mxu1 %v1287_v54 }
  0x33   :  { %1154 = vmatpush3.bf16.msra.mxu0 %v1286_v53 }
  0x34   :  { %1155 = vmatprep.subr.bf16.mxu0 %v1289_v56 }
  0x35   :  { %1182 = vmatpush3.bf16.msra.mxu1 %v1288_v55 }
  0x36   :  { %1183 = vmatprep.subr.bf16.mxu1 %v1294_v60 }
  0x37   :  { %1156 = vmatpush3.bf16.msra.mxu0 %v1292_v58 }
  0x38   :  { %1157 = vmatprep.subr.bf16.mxu0 %v1299_v0 }
  0x39   :  { %1184 = vmatpush3.bf16.msra.mxu1 %v1297_v62 }
  0x3a   :  { %1185 = vmatprep.subr.bf16.mxu1 %v1301_v2 }
  0x3b   :  { %1158 = vmatpush3.bf16.msra.mxu0 %v1300_v1 }
  0x3c   :  { %1159 = vmatprep.subr.bf16.mxu0 %v1303_v4 }
  0x3d   :  { %1186 = vmatpush3.bf16.msra.mxu1 %v1302_v3 }
  0x3e   :  { %1187 = vmatprep.subr.bf16.mxu1 %v1305_v6 }
  0x3f   :  { %1160 = vmatpush3.bf16.msra.mxu0 %v1304_v5 }
  0x40   :  { %1211 = vmatprep.subr.bf16.mxu0 %v1310_v10 }
  0x41   :  { %1188 = vmatpush3.bf16.msra.mxu1 %v1309_v9 }
  0x42   :  { %841 = vmatmul.mubr.bf16.vlgmr.msra.gmra.mrb[8].mxu0 %v1306_v7 }
  0x43   :  { %1212 = vmatpush3.bf16.msra.mxu0 %v1310_v10  ;;  %848 = vmatprep.mubr.bf16.mxu0 %v1315_v14 }
  0x44   :  { %890 = vmatmul.mubr.bf16.vlgmr.msra.gmra.mrb[8].mxu1 %v1311_v11  ;;  %1213 = vmatprep.subr.bf16.mxu0 %v1314_v13 }
  0x45   :  { %897 = vmatprep.mubr.bf16.mxu1 %v1319_v17 }
  0x47   :  { %1214 = vmatpush3.bf16.msra.mxu0 %v1314_v13 }
  0x48   :  { %1215 = vmatprep.subr.bf16.mxu0 %v1318_v16 }
  0x4a   :  { %849 = vmatmul.mubr.bf16.gmra.mrb[12].mxu0 %v1317_v15 }
  0x4b   :  { %1216 = vmatpush3.bf16.msra.mxu0 %v1318_v16  ;;  %1227 = vmatprep.mubr.bf16.mxu0 %v1327_v21 }
  0x4c   :  { %898 = vmatmul.mubr.bf16.gmra.mrb[12].mxu1 %v1321_v18  ;;  %1217 = vmatprep.subr.bf16.mxu0 %v1322_v19 }
  0x4f   :  { %1218 = vmatpush3.bf16.msra.mxu0 %v1322_v19 }
  0x50   :  { %1219 = vmatprep.subr.bf16.mxu0 %v1323_v20 }
  0x53   :  { %1220 = vmatpush3.bf16.msra.mxu0 %v1323_v20 }
  0x54   :  { %1221 = vmatprep.subr.bf16.mxu0 %v1324_v22 }
  0x57   :  { %1222 = vmatpush3.bf16.msra.mxu0 %v1324_v22 }
  0x58   :  { %1223 = vmatprep.subr.bf16.mxu0 %v1325_v23 }
  0x5b   :  { %1224 = vmatpush3.bf16.msra.mxu0 %v1325_v23 }
  0x5c   :  { %1225 = vmatprep.subr.bf16.mxu0 %v1326_v24 }
  0x5f   :  { %1226 = vmatpush3.bf16.msra.mxu0 %v1326_v24 }
  0x62   :  { %1228 = vmatmul.mubr.bf16.vlgmr.msra.gmra.mrb[16].mxu0 %v1328_v25 }
  0xf5   :  { %v1105_v26 = vpop.f32.mrb[0].mxu0 }
  0xf6   :  { %v1106_v28 = vpop.f32.mrb[1].mxu0 }
  0xf7   :  { %v1107_v29 = vadd.f32 %v1106_v28, %v1105_v26  ;;  %v1108_v30 = vpop.f32.mrb[2].mxu0  ;;  %v1133_v31 = vpop.f32.mrb[0].mxu1 }
  0xf8   :  { %v1109_v32 = vpop.f32.mrb[3].mxu0  ;;  %v1134_v35 = vpop.f32.mrb[1].mxu1 }
  0xf9   :  { %v745_v33 = vadd.f32 %v1107_v29, %v979_v27  ;;  %v1110_v34 = vadd.f32 %v1109_v32, %v1108_v30  ;;  %v1135_v36 = vadd.f32 %v1134_v35, %v1133_v31  ;;  %v1136_v37 = vpop.f32.mrb[2].mxu1 }
  0xfa   :  { %v1137_v39 = vpop.f32.mrb[3].mxu1 }
  0xfb   :  { %v748_v38 = vadd.f32 %v1110_v34, %v979_v27  ;;  %v794_v40 = vadd.f32 %v1135_v36, %v745_v33  ;;  %v1138_v41 = vadd.f32 %v1137_v39, %v1136_v37 }
  0xfd   :  { %v797_v42 = vadd.f32 %v1138_v41, %v748_v38  ;;  %v1111_v43 = vpop.f32.mrb[4].mxu0 }
  0xfe   :  { %v1112_v44 = vpop.f32.mrb[5].mxu0 }
  0xff   :  { %v1113_v45 = vadd.f32 %v1112_v44, %v1111_v43  ;;  %v1114_v46 = vpop.f32.mrb[6].mxu0  ;;  %v1139_v47 = vpop.f32.mrb[4].mxu1 }
 0x100   :  { %v1115_v48 = vpop.f32.mrb[7].mxu0  ;;  %v1140_v51 = vpop.f32.mrb[5].mxu1 }
 0x101   :  { %v753_v49 = vadd.f32 %v1113_v45, %v979_v27  ;;  %v1116_v50 = vadd.f32 %v1115_v48, %v1114_v46  ;;  %v1141_v52 = vadd.f32 %v1140_v51, %v1139_v47  ;;  %v1142_v53 = vpop.f32.mrb[6].mxu1 }
 0x102   :  { %v1143_v55 = vpop.f32.mrb[7].mxu1 }
 0x103   :  { %v756_v54 = vadd.f32 %v1116_v50, %v979_v27  ;;  %v802_v56 = vadd.f32 %v1141_v52, %v753_v49  ;;  %v1144_v57 = vadd.f32 %v1143_v55, %v1142_v53 }
 0x105   :  { %v805_v58 = vadd.f32 %v1144_v57, %v756_v54 }
 0x115   :  { %v1161_v59 = vpop.f32.mrb[8].mxu0 }
 0x116   :  { %v1162_v60 = vpop.f32.mrb[9].mxu0 }
 0x117   :  { %v1163_v61 = vadd.f32 %v1162_v60, %v1161_v59  ;;  %v1164_v62 = vpop.f32.mrb[10].mxu0  ;;  %v1189_v63 = vpop.f32.mrb[8].mxu1 }
 0x118   :  { %v1165_v0 = vpop.f32.mrb[11].mxu0  ;;  %v1190_v3 = vpop.f32.mrb[9].mxu1 }
 0x119   :  { %v843_v1 = vadd.f32 %v1163_v61, %v794_v40  ;;  %v1166_v2 = vadd.f32 %v1165_v0, %v1164_v62  ;;  %v1191_v4 = vadd.f32 %v1190_v3, %v1189_v63  ;;  %v1192_v5 = vpop.f32.mrb[10].mxu1 }
 0x11a   :  { %v1193_v7 = vpop.f32.mrb[11].mxu1 }
 0x11b   :  { %v846_v6 = vadd.f32 %v1166_v2, %v797_v42  ;;  %v1194_v8 = vadd.f32 %v1193_v7, %v1192_v5  ;;  %v892_v9 = vadd.f32 %v1191_v4, %v843_v1 }
 0x11d   :  { %v1167_v10 = vpop.f32.mrb[12].mxu0  ;;  %v895_v12 = vadd.f32 %v1194_v8, %v846_v6 }
 0x11e   :  { %v1168_v11 = vpop.f32.mrb[13].mxu0 }
 0x11f   :  { %v1169_v13 = vadd.f32 %v1168_v11, %v1167_v10  ;;  %v1170_v14 = vpop.f32.mrb[14].mxu0  ;;  %v1195_v15 = vpop.f32.mrb[12].mxu1 }
 0x120   :  { %v1171_v16 = vpop.f32.mrb[15].mxu0  ;;  %v1196_v19 = vpop.f32.mrb[13].mxu1 }
 0x121   :  { %v851_v17 = vadd.f32 %v1169_v13, %v802_v56  ;;  %v1172_v18 = vadd.f32 %v1171_v16, %v1170_v14  ;;  %v1197_v20 = vadd.f32 %v1196_v19, %v1195_v15  ;;  %v1198_v21 = vpop.f32.mrb[14].mxu1 }
 0x122   :  { %v1199_v23 = vpop.f32.mrb[15].mxu1 }
 0x123   :  { %v854_v22 = vadd.f32 %v1172_v18, %v805_v58  ;;  %v1200_v24 = vadd.f32 %v1199_v23, %v1198_v21  ;;  %v900_v25 = vadd.f32 %v1197_v20, %v851_v17 }
 0x125   :  { %v903_v26 = vadd.f32 %v1200_v24, %v854_v22 }
 0x135   :  { %v1229_v27 = vpop.f32.mrb[16].mxu0 }
 0x136   :  { %v949_v28 = vadd.f32 %v1229_v27, %v900_v25  ;;  %v940_v29 = vpop.f32.mrb[17].mxu0 }
 0x137   :  { %v941_v30 = vadd.f32 %v940_v29, %v892_v9  ;;  %v1230_v31 = vpop.f32.mrb[18].mxu0 }
 0x138   :  { %v952_v32 = vadd.f32 %v1230_v31, %v903_v26  ;;  %v943_v33 = vpop.f32.mrb[19].mxu0 }
 0x139   :  { %v944_v34 = vadd.f32 %v943_v33, %v895_v12 }
 0x13a   :  { %v1086_v35 = vpack.c.bf16 %v952_v32, %v949_v28 }
 0x13b   :  { %v1081_v36 = vpack.c.bf16 %v944_v34, %v941_v30 }
 0x13c   :  { %1088 = vst [vmem:[%s1631_s3 + $0x8] sm:$0xff] %v1086_v35  }
 0x13d   :  { %1082 = vst [vmem:[%s1631_s3] sm:$0xff] %v1081_v36  }

// kernel: forward.57
= control target key start
LH: loop header
LB: loop body
LE: loop exit
PB: predicated region body
PF: predicated region fallthrough
CT: control target
= control target key end

     0   :  { %s984_s1 = inlined_call_operand.vmem [shape: bf16[256,128], index: 1, kind: input, shape index: {}]   ;;  %s985_s0 = inlined_call_operand.vmem [shape: bf16[162,256], index: 0, kind: input, shape index: {}]   ;;  %s986_s2 = inlined_call_operand.vmem [shape: f32[1,128], index: 2, kind: input, shape index: {}]   ;;  %s987_s3 = inlined_call_operand.vmem [shape: bf16[162,128], index: 3, kind: output, shape index: {}]  }
   0x1   :  { %v746_v0 = vld [vmem:[%s984_s1 + $0x40] sm:$0xff]   ;;  %v748_v2 = vld [vmem:[%s984_s1 + $0x48] sm:$0xff]   ;;  %v750_v4 = vld [vmem:[%s984_s1 + $0x50] sm:$0xff]  }
   0x2   :  { %v747_v1 = vld [vmem:[%s984_s1] sm:$0xff]   ;;  %648 = vmatprep.subr.bf16.mxu0 %v746_v0  ;;  %730 = vmatprep.subr.bf16.mxu1 %v746_v0  ;;  %v749_v3 = vld [vmem:[%s984_s1 + $0x8] sm:$0xff]   ;;  %v751_v5 = vld [vmem:[%s984_s1 + $0x10] sm:$0xff]  }
   0x3   :  { %649 = vmatpush3.bf16.msra.mxu0 %v747_v1  ;;  %738 = vmatpush3.bf16.msra.mxu1 %v747_v1  ;;  %v752_v6 = vld [vmem:[%s984_s1 + $0x58] sm:$0xff]   ;;  %v754_v8 = vld [vmem:[%s984_s1 + $0x60] sm:$0xff]   ;;  %v756_v10 = vld [vmem:[%s984_s1 + $0x68] sm:$0xff]  }
   0x4   :  { %650 = vmatprep.subr.bf16.mxu0 %v748_v2  ;;  %731 = vmatprep.subr.bf16.mxu1 %v748_v2  ;;  %v753_v7 = vld [vmem:[%s984_s1 + $0x18] sm:$0xff]   ;;  %v755_v9 = vld [vmem:[%s984_s1 + $0x20] sm:$0xff]   ;;  %v757_v13 = vld [vmem:[%s984_s1 + $0x28] sm:$0xff]  }
   0x5   :  { %v764_v11 = vld [vmem:[%s985_s0 + $0x4] ss:$8 sps:$4 sm:$0xff]   ;;  %v758_v14 = vld [vmem:[%s984_s1 + $0x70] sm:$0xff]   ;;  %v760_v16 = vld [vmem:[%s984_s1 + $0x78] sm:$0xff]  }
   0x6   :  { %v767_v12 = vld [vmem:[%s985_s0 + $0x64] ss:$8 sps:$4 sm:$0xff]   ;;  %310 = vmatprep.mubr.bf16.mxu0 %v764_v11  ;;  %v759_v15 = vld [vmem:[%s984_s1 + $0x30] sm:$0xff]   ;;  %v761_v17 = vld [vmem:[%s984_s1 + $0x38] sm:$0xff]  }
   0x7   :  { %651 = vmatpush3.bf16.msra.mxu0 %v749_v3  ;;  %739 = vmatpush3.bf16.msra.mxu1 %v749_v3  ;;  %v762_v18 = vld [vmem:[%s985_s0] ss:$8 sps:$4 sm:$0xff]   ;;  %v768_v20 = vld [vmem:[%s985_s0 + $0x14] ss:$8 sps:$4 sm:$0xff]   ;;  %v770_v22 = vld [vmem:[%s985_s0 + $0x10] ss:$8 sps:$4 sm:$0xff]  }
   0x8   :  { %652 = vmatprep.subr.bf16.mxu0 %v750_v4  ;;  %732 = vmatprep.subr.bf16.mxu1 %v750_v4  ;;  %v765_v19 = vld [vmem:[%s985_s0 + $0x60] ss:$8 sps:$4 sm:$0xff]   ;;  %v771_v21 = vld [vmem:[%s985_s0 + $0x74] ss:$8 sps:$4 sm:$0xff]   ;;  %v775_v23 = vld [vmem:[%s985_s0 + $0x70] ss:$8 sps:$4 sm:$0xff]  }
   0x9   :  { %358 = vmatprep.mubr.bf16.mxu1 %v767_v12  ;;  %v773_v24 = vld [vmem:[%s985_s0 + $0x24] ss:$8 sps:$4 sm:$0xff]   ;;  %v776_v26 = vld [vmem:[%s985_s0 + $0x20] ss:$8 sps:$4 sm:$0xff]   ;;  %v779_v28 = vld [vmem:[%s985_s0 + $0x34] ss:$8 sps:$4 sm:$0xff]  }
   0xa   :  { %v777_v25 = vld [vmem:[%s985_s0 + $0x84] ss:$8 sps:$4 sm:$0xff]   ;;  %v781_v27 = vld [vmem:[%s985_s0 + $0x80] ss:$8 sps:$4 sm:$0xff]   ;;  %v783_v29 = vld [vmem:[%s985_s0 + $0x94] ss:$8 sps:$4 sm:$0xff]  }
   0xb   :  { %653 = vmatpush3.bf16.msra.mxu0 %v751_v5  ;;  %740 = vmatpush3.bf16.msra.mxu1 %v751_v5  ;;  %v35_v30 = vld [vmem:[%s985_s0 + $0xa0] sm:$0x11]  ;;  %v782_v31 = vld [vmem:[%s985_s0 + $0x30] ss:$8 sps:$4 sm:$0xff]   ;;  %v790_v37 = vld [vmem:[%s985_s0 + $0x54] ss:$8 sps:$4 sm:$0xff]  }
   0xc   :  { %654 = vmatprep.subr.bf16.mxu0 %v752_v6  ;;  %733 = vmatprep.subr.bf16.mxu1 %v752_v6  ;;  %v787_v32 = vld [vmem:[%s985_s0 + $0x90] ss:$8 sps:$4 sm:$0xff]   ;;  %v785_v33 = vld [vmem:[%s985_s0 + $0x44] ss:$8 sps:$4 sm:$0xff]   ;;  %v530_v34 = vcombine.high %v35_v30, %v35_v30  ;;  %v788_v35 = vld [vmem:[%s985_s0 + $0x40] ss:$8 sps:$4 sm:$0xff]   ;;  %v529_v36 = vcombine.low %v35_v30, %v35_v30 }
   0xd   :  { %v793_v38 = vld [vmem:[%s985_s0 + $0x50] ss:$8 sps:$4 sm:$0xff]   ;;  %v928_v47 = vld [vmem:[%s986_s2] ss:$0 sm:$0xff] }
   0xf   :  { %655 = vmatpush3.bf16.msra.mxu0 %v753_v7  ;;  %741 = vmatpush3.bf16.msra.mxu1 %v753_v7 }
  0x10   :  { %656 = vmatprep.subr.bf16.mxu0 %v754_v8  ;;  %734 = vmatprep.subr.bf16.mxu1 %v754_v8 }
  0x13   :  { %657 = vmatpush3.bf16.msra.mxu0 %v755_v9  ;;  %742 = vmatpush3.bf16.msra.mxu1 %v755_v9 }
  0x14   :  { %658 = vmatprep.subr.bf16.mxu0 %v756_v10  ;;  %735 = vmatprep.subr.bf16.mxu1 %v756_v10 }
  0x17   :  { %659 = vmatpush3.bf16.msra.mxu0 %v757_v13  ;;  %743 = vmatpush3.bf16.msra.mxu1 %v757_v13 }
  0x18   :  { %660 = vmatprep.subr.bf16.mxu0 %v758_v14  ;;  %736 = vmatprep.subr.bf16.mxu1 %v758_v14 }
  0x1b   :  { %661 = vmatpush3.bf16.msra.mxu0 %v759_v15  ;;  %744 = vmatpush3.bf16.msra.mxu1 %v759_v15 }
  0x1c   :  { %662 = vmatprep.subr.bf16.mxu0 %v760_v16  ;;  %737 = vmatprep.subr.bf16.mxu1 %v760_v16 }
  0x1f   :  { %663 = vmatpush3.bf16.msra.mxu0 %v761_v17  ;;  %745 = vmatpush3.bf16.msra.mxu1 %v761_v17 }
  0x22   :  { %311 = vmatmul.mubr.bf16.vlgmr.msra.gmra.mrb[0].mxu0 %v762_v18  ;;  %359 = vmatmul.mubr.bf16.vlgmr.msra.gmra.mrb[0].mxu1 %v765_v19 }
  0x23   :  { %318 = vmatprep.mubr.bf16.mxu0 %v768_v20  ;;  %366 = vmatprep.mubr.bf16.mxu1 %v771_v21 }
  0x2a   :  { %319 = vmatmul.mubr.bf16.gmra.mrb[4].mxu0 %v770_v22  ;;  %367 = vmatmul.mubr.bf16.gmra.mrb[4].mxu1 %v775_v23 }
  0x2b   :  { %326 = vmatprep.mubr.bf16.mxu0 %v773_v24  ;;  %374 = vmatprep.mubr.bf16.mxu1 %v777_v25 }
  0x32   :  { %327 = vmatmul.mubr.bf16.gmra.mrb[8].mxu0 %v776_v26  ;;  %375 = vmatmul.mubr.bf16.gmra.mrb[8].mxu1 %v781_v27 }
  0x33   :  { %334 = vmatprep.mubr.bf16.mxu0 %v779_v28  ;;  %382 = vmatprep.mubr.bf16.mxu1 %v783_v29 }
  0x3a   :  { %335 = vmatmul.mubr.bf16.gmra.mrb[12].mxu0 %v782_v31  ;;  %383 = vmatmul.mubr.bf16.gmra.mrb[12].mxu1 %v787_v32 }
  0x3b   :  { %342 = vmatprep.mubr.bf16.mxu0 %v785_v33  ;;  %390 = vmatprep.mubr.bf16.mxu1 %v530_v34 }
  0x42   :  { %343 = vmatmul.mubr.bf16.gmra.mrb[16].mxu0 %v788_v35  ;;  %391 = vmatmul.mubr.bf16.gmra.mrb[16].mxu1 %v529_v36 }
  0x43   :  { %350 = vmatprep.mubr.bf16.mxu0 %v790_v37 }
  0x4a   :  { %351 = vmatmul.mubr.bf16.gmra.mrb[20].mxu0 %v793_v38 }
  0xf5   :  { %v664_v39 = vpop.f32.mrb[0].mxu0  ;;  %v700_v40 = vpop.f32.mrb[0].mxu1 }
  0xf6   :  { %v665_v41 = vpop.f32.mrb[1].mxu0  ;;  %v701_v42 = vpop.f32.mrb[1].mxu1 }
  0xf7   :  { %v666_v43 = vadd.f32 %v665_v41, %v664_v39  ;;  %v667_v44 = vpop.f32.mrb[2].mxu0  ;;  %v702_v45 = vadd.f32 %v701_v42, %v700_v40  ;;  %v703_v46 = vpop.f32.mrb[2].mxu1 }
  0xf8   :  { %v668_v48 = vpop.f32.mrb[3].mxu0  ;;  %v704_v49 = vpop.f32.mrb[3].mxu1 }
  0xf9   :  { %v669_v50 = vadd.f32 %v668_v48, %v667_v44  ;;  %v361_v51 = vadd.f32 %v702_v45, %v928_v47  ;;  %v705_v52 = vadd.f32 %v704_v49, %v703_v46  ;;  %v313_v53 = vadd.f32 %v666_v43, %v928_v47 }
  0xfb   :  { %v316_v54 = vadd.f32 %v669_v50, %v928_v47  ;;  %v364_v55 = vadd.f32 %v705_v52, %v928_v47 }
  0xfd   :  { %v592_v56 = vpack.c.bf16 %v316_v54, %v313_v53  ;;  %v670_v57 = vpop.f32.mrb[4].mxu0  ;;  %v622_v58 = vpack.c.bf16 %v364_v55, %v361_v51  ;;  %v706_v59 = vpop.f32.mrb[4].mxu1 }
  0xfe   :  { %v671_v60 = vpop.f32.mrb[5].mxu0  ;;  %v707_v61 = vpop.f32.mrb[5].mxu1 }
  0xff   :  { %593 = vst [vmem:[%s987_s3] sm:$0xff] %v592_v56   ;;  %v672_v62 = vadd.f32 %v671_v60, %v670_v57  ;;  %v673_v63 = vpop.f32.mrb[6].mxu0  ;;  %644 = vst [vmem:[%s987_s3 + $0x30] sm:$0xff] %v622_v58   ;;  %v708_v0 = vadd.f32 %v707_v61, %v706_v59  ;;  %v709_v1 = vpop.f32.mrb[6].mxu1 }
 0x100   :  { %v674_v2 = vpop.f32.mrb[7].mxu0  ;;  %v710_v3 = vpop.f32.mrb[7].mxu1 }
 0x101   :  { %v675_v4 = vadd.f32 %v674_v2, %v673_v63  ;;  %v369_v5 = vadd.f32 %v708_v0, %v928_v47  ;;  %v711_v6 = vadd.f32 %v710_v3, %v709_v1  ;;  %v321_v7 = vadd.f32 %v672_v62, %v928_v47 }
 0x103   :  { %v324_v8 = vadd.f32 %v675_v4, %v928_v47  ;;  %v372_v9 = vadd.f32 %v711_v6, %v928_v47 }
 0x105   :  { %v597_v10 = vpack.c.bf16 %v324_v8, %v321_v7  ;;  %v676_v11 = vpop.f32.mrb[8].mxu0  ;;  %v627_v12 = vpack.c.bf16 %v372_v9, %v369_v5  ;;  %v712_v13 = vpop.f32.mrb[8].mxu1 }
 0x106   :  { %v677_v14 = vpop.f32.mrb[9].mxu0  ;;  %v713_v15 = vpop.f32.mrb[9].mxu1 }
 0x107   :  { %639 = vst [vmem:[%s987_s3 + $0x8] sm:$0xff] %v597_v10   ;;  %v678_v16 = vadd.f32 %v677_v14, %v676_v11  ;;  %v679_v17 = vpop.f32.mrb[10].mxu0  ;;  %645 = vst [vmem:[%s987_s3 + $0x38] sm:$0xff] %v627_v12   ;;  %v714_v18 = vadd.f32 %v713_v15, %v712_v13  ;;  %v715_v19 = vpop.f32.mrb[10].mxu1 }
 0x108   :  { %v680_v20 = vpop.f32.mrb[11].mxu0  ;;  %v716_v21 = vpop.f32.mrb[11].mxu1 }
 0x109   :  { %v681_v22 = vadd.f32 %v680_v20, %v679_v17  ;;  %v377_v23 = vadd.f32 %v714_v18, %v928_v47  ;;  %v717_v24 = vadd.f32 %v716_v21, %v715_v19  ;;  %v329_v25 = vadd.f32 %v678_v16, %v928_v47 }
 0x10b   :  { %v332_v26 = vadd.f32 %v681_v22, %v928_v47  ;;  %v380_v27 = vadd.f32 %v717_v24, %v928_v47 }
 0x10d   :  { %v602_v28 = vpack.c.bf16 %v332_v26, %v329_v25  ;;  %v682_v29 = vpop.f32.mrb[12].mxu0  ;;  %v632_v30 = vpack.c.bf16 %v380_v27, %v377_v23  ;;  %v718_v31 = vpop.f32.mrb[12].mxu1 }
 0x10e   :  { %v683_v32 = vpop.f32.mrb[13].mxu0  ;;  %v719_v33 = vpop.f32.mrb[13].mxu1 }
 0x10f   :  { %640 = vst [vmem:[%s987_s3 + $0x10] sm:$0xff] %v602_v28   ;;  %v684_v34 = vadd.f32 %v683_v32, %v682_v29  ;;  %v685_v35 = vpop.f32.mrb[14].mxu0  ;;  %646 = vst [vmem:[%s987_s3 + $0x40] sm:$0xff] %v632_v30   ;;  %v720_v36 = vadd.f32 %v719_v33, %v718_v31  ;;  %v721_v37 = vpop.f32.mrb[14].mxu1 }
 0x110   :  { %v686_v38 = vpop.f32.mrb[15].mxu0  ;;  %v722_v39 = vpop.f32.mrb[15].mxu1 }
 0x111   :  { %v687_v40 = vadd.f32 %v686_v38, %v685_v35  ;;  %v385_v41 = vadd.f32 %v720_v36, %v928_v47  ;;  %v723_v42 = vadd.f32 %v722_v39, %v721_v37  ;;  %v337_v43 = vadd.f32 %v684_v34, %v928_v47 }
 0x113   :  { %v340_v44 = vadd.f32 %v687_v40, %v928_v47  ;;  %v388_v45 = vadd.f32 %v723_v42, %v928_v47 }
 0x115   :  { %v607_v46 = vpack.c.bf16 %v340_v44, %v337_v43  ;;  %v688_v48 = vpop.f32.mrb[16].mxu0  ;;  %v637_v49 = vpack.c.bf16 %v388_v45, %v385_v41  ;;  %v724_v50 = vpop.f32.mrb[16].mxu1 }
 0x116   :  { %v689_v51 = vpop.f32.mrb[17].mxu0  ;;  %v725_v52 = vpop.f32.mrb[17].mxu1 }
 0x117   :  { %641 = vst [vmem:[%s987_s3 + $0x18] sm:$0xff] %v607_v46   ;;  %v690_v53 = vadd.f32 %v689_v51, %v688_v48  ;;  %v691_v54 = vpop.f32.mrb[18].mxu0  ;;  %647 = vst [vmem:[%s987_s3 + $0x48] sm:$0xff] %v637_v49   ;;  %v726_v55 = vadd.f32 %v725_v52, %v724_v50  ;;  %v727_v56 = vpop.f32.mrb[18].mxu1 }
 0x118   :  { %v692_v57 = vpop.f32.mrb[19].mxu0  ;;  %v728_v58 = vpop.f32.mrb[19].mxu1 }
 0x119   :  { %v693_v59 = vadd.f32 %v692_v57, %v691_v54  ;;  %v393_v60 = vadd.f32 %v726_v55, %v928_v47  ;;  %v345_v61 = vadd.f32 %v690_v53, %v928_v47 }
 0x11b   :  { %v348_v62 = vadd.f32 %v693_v59, %v928_v47  ;;  %v588_v63 = vpack.c.bf16 %v393_v60, %v393_v60 }
 0x11d   :  { %v612_v0 = vpack.c.bf16 %v348_v62, %v345_v61  ;;  %v694_v1 = vpop.f32.mrb[20].mxu0  ;;  %503 = vst [vmem:[%s987_s3 + $0x50] sm:$0x1] %v588_v63 }
 0x11e   :  { %v695_v2 = vpop.f32.mrb[21].mxu0 }
 0x11f   :  { %642 = vst [vmem:[%s987_s3 + $0x20] sm:$0xff] %v612_v0   ;;  %v696_v3 = vadd.f32 %v695_v2, %v694_v1  ;;  %v697_v4 = vpop.f32.mrb[22].mxu0 }
 0x120   :  { %v698_v5 = vpop.f32.mrb[23].mxu0 }
 0x121   :  { %v699_v6 = vadd.f32 %v698_v5, %v697_v4  ;;  %v353_v7 = vadd.f32 %v696_v3, %v928_v47 }
 0x123   :  { %v356_v8 = vadd.f32 %v699_v6, %v928_v47 }
 0x125   :  { %v617_v9 = vpack.c.bf16 %v356_v8, %v353_v7 }
 0x127   :  { %643 = vst [vmem:[%s987_s3 + $0x28] sm:$0xff] %v617_v9  }

// kernel: forward.58
= control target key start
LH: loop header
LB: loop body
LE: loop exit
PB: predicated region body
PF: predicated region fallthrough
CT: control target
= control target key end

     0   :  { %vm558_vm0 = vcmask 523264   ;;  %s1714_s1 = inlined_call_operand.vmem [shape: bf16[576,128], index: 1, kind: input, shape index: {}]   ;;  %s1715_s0 = inlined_call_operand.vmem [shape: bf16[128,576], index: 0, kind: input, shape index: {}]   ;;  %s1716_s2 = inlined_call_operand.vmem [shape: f32[1,128], index: 2, kind: input, shape index: {}]   ;;  %s1717_s3 = inlined_call_operand.vmem [shape: bf16[128,128], index: 3, kind: output, shape index: {}]  }
   0x1   :  { %v1294_v0 = vld [vmem:[%s1714_s1 + $0x40] sm:$0xff]   ;;  %v1298_v4 = vld [vmem:[%s1714_s1 + $0x48] sm:$0xff]   ;;  %v1302_v8 = vld [vmem:[%s1714_s1 + $0x50] sm:$0xff]  }
   0x2   :  { %v1295_v1 = vld [vmem:[%s1714_s1 + $0xc0] sm:$0xff]   ;;  %1122 = vmatprep.subr.bf16.mxu0 %v1294_v0  ;;  %v1299_v5 = vld [vmem:[%s1714_s1 + $0xc8] sm:$0xff]   ;;  %v1303_v9 = vld [vmem:[%s1714_s1 + $0xd0] sm:$0xff]  }
   0x3   :  { %v1296_v2 = vld [vmem:[%s1714_s1] sm:$0xff]   ;;  %1186 = vmatprep.subr.bf16.mxu1 %v1295_v1  ;;  %v1300_v6 = vld [vmem:[%s1714_s1 + $0x8] sm:$0xff]   ;;  %v1304_v10 = vld [vmem:[%s1714_s1 + $0x10] sm:$0xff]  }
   0x4   :  { %v1297_v3 = vld [vmem:[%s1714_s1 + $0x80] sm:$0xff]   ;;  %1123 = vmatpush3.bf16.msra.mxu0 %v1296_v2  ;;  %v1301_v7 = vld [vmem:[%s1714_s1 + $0x88] sm:$0xff]   ;;  %v1305_v11 = vld [vmem:[%s1714_s1 + $0x90] sm:$0xff]  }
   0x5   :  { %1187 = vmatpush3.bf16.msra.mxu1 %v1297_v3  ;;  %1124 = vmatprep.subr.bf16.mxu0 %v1298_v4  ;;  %v1306_v12 = vld [vmem:[%s1714_s1 + $0x58] sm:$0xff]   ;;  %v1310_v16 = vld [vmem:[%s1714_s1 + $0x60] sm:$0xff]   ;;  %v1314_v20 = vld [vmem:[%s1714_s1 + $0x68] sm:$0xff]  }
   0x6   :  { %1188 = vmatprep.subr.bf16.mxu1 %v1299_v5  ;;  %v1307_v13 = vld [vmem:[%s1714_s1 + $0xd8] sm:$0xff]   ;;  %v1311_v17 = vld [vmem:[%s1714_s1 + $0xe0] sm:$0xff]   ;;  %v1315_v21 = vld [vmem:[%s1714_s1 + $0xe8] sm:$0xff]  }
   0x7   :  { %v1308_v14 = vld [vmem:[%s1714_s1 + $0x18] sm:$0xff]   ;;  %v1312_v18 = vld [vmem:[%s1714_s1 + $0x20] sm:$0xff]   ;;  %v1316_v22 = vld [vmem:[%s1714_s1 + $0x28] sm:$0xff]  }
   0x8   :  { %1125 = vmatpush3.bf16.msra.mxu0 %v1300_v6  ;;  %v1309_v15 = vld [vmem:[%s1714_s1 + $0x98] sm:$0xff]   ;;  %v1313_v19 = vld [vmem:[%s1714_s1 + $0xa0] sm:$0xff]   ;;  %v1317_v23 = vld [vmem:[%s1714_s1 + $0xa8] sm:$0xff]  }
   0x9   :  { %1189 = vmatpush3.bf16.msra.mxu1 %v1301_v7  ;;  %1126 = vmatprep.subr.bf16.mxu0 %v1302_v8  ;;  %v1318_v24 = vld [vmem:[%s1714_s1 + $0x70] sm:$0xff]   ;;  %v1322_v28 = vld [vmem:[%s1714_s1 + $0x78] sm:$0xff]   ;;  %v1331_v35 = vld [vmem:[%s1715_s0 + $0xc] ss:$20 sps:$4 sm:$0xff]  }
   0xa   :  { %1190 = vmatprep.subr.bf16.mxu1 %v1303_v9  ;;  %v1319_v25 = vld [vmem:[%s1714_s1 + $0xf0] sm:$0xff]   ;;  %v1323_v29 = vld [vmem:[%s1714_s1 + $0xf8] sm:$0xff]   ;;  %v1332_v36 = vld [vmem:[%s1714_s1 + $0x100] sm:$0xff]   ;;  %712 = vmatprep.mubr.bf16.mxu1 %v1331_v35 }
   0xb   :  { %v1320_v26 = vld [vmem:[%s1714_s1 + $0x30] sm:$0xff]   ;;  %v1324_v30 = vld [vmem:[%s1714_s1 + $0x38] sm:$0xff]   ;;  %v1333_v37 = vld [vmem:[%s1715_s0 + $0x2c] ss:$20 sps:$4 sm:$0xff]  }
   0xc   :  { %1127 = vmatpush3.bf16.msra.mxu0 %v1304_v10  ;;  %v1321_v27 = vld [vmem:[%s1714_s1 + $0xb0] sm:$0xff]   ;;  %v1325_v31 = vld [vmem:[%s1714_s1 + $0xb8] sm:$0xff]   ;;  %v1345_v42 = vld [vmem:[%s1714_s1 + $0x108] sm:$0xff]  }
   0xd   :  { %1191 = vmatpush3.bf16.msra.mxu1 %v1305_v11  ;;  %1128 = vmatprep.subr.bf16.mxu0 %v1306_v12  ;;  %v1326_v32 = vld [vmem:[%s1715_s0] ss:$20 sps:$4 sm:$0xff]   ;;  %v1328_v33 = vld [vmem:[%s1715_s0 + $0x4] ss:$20 sps:$4 sm:$0xff]   ;;  %v1329_v34 = vld [vmem:[%s1715_s0 + $0x8] ss:$20 sps:$4 sm:$0xff]  }
   0xe   :  { %1192 = vmatprep.subr.bf16.mxu1 %v1307_v13  ;;  %615 = vmatprep.mubr.bf16.mxu0 %v1328_v33  ;;  %v1335_v38 = vld [vmem:[%s1715_s0 + $0x34] ss:$20 sps:$4 sm:$0xff]   ;;  %v1338_v40 = vld [vmem:[%s1715_s0 + $0x30] ss:$20 sps:$4 sm:$0xff]   ;;  %v1344_v45 = vld [vmem:[%s1715_s0 + $0x58] ss:$20 sps:$4 sm:$0xff]  }
   0xf   :  { %v1337_v39 = vld [vmem:[%s1715_s0 + $0x28] ss:$20 sps:$4 sm:$0xff]   ;;  %v1343_v44 = vld [vmem:[%s1715_s0 + $0x50] ss:$20 sps:$4 sm:$0xff]   ;;  %v1350_v50 = vld [vmem:[%s1715_s0 + $0x78] ss:$20 sps:$4 sm:$0xff]  }
  0x10   :  { %1129 = vmatpush3.bf16.msra.mxu0 %v1308_v14  ;;  %v1339_v41 = vld [vmem:[%s1715_s0 + $0x54] ss:$20 sps:$4 sm:$0xff]   ;;  %v1341_v43 = vld [vmem:[%s1715_s0 + $0x5c] ss:$20 sps:$4 sm:$0xff]   ;;  %v1348_v48 = vld [vmem:[%s1715_s0 + $0x84] ss:$20 sps:$4 sm:$0xff]  }
  0x11   :  { %1193 = vmatpush3.bf16.msra.mxu1 %v1309_v15  ;;  %1130 = vmatprep.subr.bf16.mxu0 %v1310_v16  ;;  %v1358_v46 = vld [vmem:[%s1714_s1 + $0x110] sm:$0xff]   ;;  %v1371_v49 = vld [vmem:[%s1714_s1 + $0x118] sm:$0xff]   ;;  %v1354_v53 = vld [vmem:[%s1715_s0 + $0xac] ss:$20 sps:$4 sm:$0xff]  }
  0x12   :  { %1194 = vmatprep.subr.bf16.mxu1 %v1311_v17  ;;  %v1346_v47 = vld [vmem:[%s1715_s0 + $0x7c] ss:$20 sps:$4 sm:$0xff]   ;;  %v1351_v51 = vld [vmem:[%s1715_s0 + $0x80] ss:$20 sps:$4 sm:$0xff]   ;;  %v1352_v52 = vld [vmem:[%s1715_s0 + $0xa4] ss:$20 sps:$4 sm:$0xff]  }
  0x13   :  { %v1356_v54 = vld [vmem:[%s1715_s0 + $0xa0] ss:$20 sps:$4 sm:$0xff]   ;;  %v1357_v55 = vld [vmem:[%s1715_s0 + $0xa8] ss:$20 sps:$4 sm:$0xff]   ;;  %v1364_v59 = vld [vmem:[%s1715_s0 + $0xd0] ss:$20 sps:$4 sm:$0xff]  }
  0x14   :  { %1131 = vmatpush3.bf16.msra.mxu0 %v1312_v18  ;;  %v1359_v56 = vld [vmem:[%s1715_s0 + $0xcc] ss:$20 sps:$4 sm:$0xff]   ;;  %v1361_v57 = vld [vmem:[%s1715_s0 + $0xd4] ss:$20 sps:$4 sm:$0xff]   ;;  %v1367_v61 = vld [vmem:[%s1715_s0 + $0xfc] ss:$20 sps:$4 sm:$0xff]  }
  0x15   :  { %1195 = vmatpush3.bf16.msra.mxu1 %v1313_v19  ;;  %1132 = vmatprep.subr.bf16.mxu0 %v1314_v20  ;;  %v1363_v58 = vld [vmem:[%s1715_s0 + $0xc8] ss:$20 sps:$4 sm:$0xff]   ;;  %v1369_v62 = vld [vmem:[%s1715_s0 + $0xf0] ss:$20 sps:$4 sm:$0xff]   ;;  %v1370_v63 = vld [vmem:[%s1715_s0 + $0xf8] ss:$20 sps:$4 sm:$0xff]  }
  0x16   :  { %1196 = vmatprep.subr.bf16.mxu1 %v1315_v21  ;;  %v1365_v60 = vld [vmem:[%s1715_s0 + $0xf4] ss:$20 sps:$4 sm:$0xff]   ;;  %v1372_v0 = vld [vmem:[%s1715_s0 + $0x11c] ss:$20 sps:$4 sm:$0xff]   ;;  %v1374_v1 = vld [vmem:[%s1715_s0 + $0x124] ss:$20 sps:$4 sm:$0xff]  }
  0x17   :  { %v1376_v2 = vld [vmem:[%s1715_s0 + $0x118] ss:$20 sps:$4 sm:$0xff]   ;;  %v1377_v3 = vld [vmem:[%s1715_s0 + $0x120] ss:$20 sps:$4 sm:$0xff]   ;;  %v1378_v4 = vld [vmem:[%s1715_s0 + $0x10] ss:$20 sps:$4 sm:$0xff]  }
  0x18   :  { %1133 = vmatpush3.bf16.msra.mxu0 %v1316_v22  ;;  %v1379_v5 = vld [vmem:[%s1715_s0 + $0xb0] ss:$20 sps:$4 sm:$0xff]   ;;  %v1380_v6 = vld [vmem:[%s1715_s0 + $0x38] ss:$20 sps:$4 sm:$0xff]   ;;  %v1382_v8 = vld [vmem:[%s1715_s0 + $0x60] ss:$20 sps:$4 sm:$0xff]  }
  0x19   :  { %1197 = vmatpush3.bf16.msra.mxu1 %v1317_v23  ;;  %1134 = vmatprep.subr.bf16.mxu0 %v1318_v24  ;;  %v1381_v7 = vld [vmem:[%s1715_s0 + $0xd8] ss:$20 sps:$4 sm:$0xff]   ;;  %v1383_v9 = vld [vmem:[%s1715_s0 + $0x100] ss:$20 sps:$4 sm:$0xff]   ;;  %v1384_v10 = vld [vmem:[%s1715_s0 + $0x88] ss:$20 sps:$4 sm:$0xff]  }
  0x1a   :  { %1198 = vmatprep.subr.bf16.mxu1 %v1319_v25  ;;  %v1385_v11 = vld [vmem:[%s1715_s0 + $0x128] ss:$20 sps:$4 sm:$0xff]   ;;  %v1645_v14 = vld [vmem:[%s1716_s2] ss:$0 sm:$0xff] }
  0x1c   :  { %1135 = vmatpush3.bf16.msra.mxu0 %v1320_v26 }
  0x1d   :  { %1199 = vmatpush3.bf16.msra.mxu1 %v1321_v27  ;;  %1136 = vmatprep.subr.bf16.mxu0 %v1322_v28 }
  0x1e   :  { %1200 = vmatprep.subr.bf16.mxu1 %v1323_v29 }
  0x20   :  { %1137 = vmatpush3.bf16.msra.mxu0 %v1324_v30 }
  0x21   :  { %1201 = vmatpush3.bf16.msra.mxu1 %v1325_v31  ;;  %1262 = vmatprep.subr.bf16.mxu0 %v1332_v36 }
  0x22   :  { %1286 = vmatprep.subr.bf16.mxu1 %v1332_v36 }
  0x23   :  { %616 = vmatmul.mubr.bf16.vlgmr.msra.gmra.mrb[0].mxu0 %v1326_v32 }
  0x24   :  { %713 = vmatmul.mubr.bf16.vlgmr.msra.gmra.mrb[0].mxu1 %v1329_v34  ;;  %1263 = vmatpush3.bf16.msra.mxu0 %v1332_v36 }
  0x25   :  { %1290 = vmatpush3.bf16.msra.mxu1 %v1332_v36  ;;  %623 = vmatprep.mubr.bf16.mxu0 %v1333_v37 }
  0x26   :  { %720 = vmatprep.mubr.bf16.mxu1 %v1335_v38  ;;  %1264 = vmatprep.subr.bf16.mxu0 %v1345_v42 }
  0x27   :  { %1287 = vmatprep.subr.bf16.mxu1 %v1345_v42 }
  0x28   :  { %1265 = vmatpush3.bf16.msra.mxu0 %v1345_v42 }
  0x29   :  { %1291 = vmatpush3.bf16.msra.mxu1 %v1345_v42  ;;  %1266 = vmatprep.subr.bf16.mxu0 %v1358_v46 }
  0x2a   :  { %1288 = vmatprep.subr.bf16.mxu1 %v1358_v46 }
  0x2b   :  { %624 = vmatmul.mubr.bf16.gmra.mrb[4].mxu0 %v1337_v39 }
  0x2c   :  { %721 = vmatmul.mubr.bf16.gmra.mrb[4].mxu1 %v1338_v40  ;;  %631 = vmatprep.mubr.bf16.mxu0 %v1339_v41 }
  0x2d   :  { %728 = vmatprep.mubr.bf16.mxu1 %v1341_v43  ;;  %1267 = vmatpush3.bf16.msra.mxu0 %v1358_v46 }
  0x2e   :  { %1292 = vmatpush3.bf16.msra.mxu1 %v1358_v46  ;;  %1268 = vmatprep.subr.bf16.mxu0 %v1371_v49 }
  0x2f   :  { %1289 = vmatprep.subr.bf16.mxu1 %v1371_v49 }
  0x31   :  { %1269 = vmatpush3.bf16.msra.mxu0 %v1371_v49 }
  0x32   :  { %1293 = vmatpush3.bf16.msra.mxu1 %v1371_v49 }
  0x33   :  { %632 = vmatmul.mubr.bf16.gmra.mrb[8].mxu0 %v1343_v44 }
  0x34   :  { %729 = vmatmul.mubr.bf16.gmra.mrb[8].mxu1 %v1344_v45  ;;  %639 = vmatprep.mubr.bf16.mxu0 %v1346_v47 }
  0x35   :  { %736 = vmatprep.mubr.bf16.mxu1 %v1348_v48 }
  0x3b   :  { %640 = vmatmul.mubr.bf16.gmra.mrb[12].mxu0 %v1350_v50 }
  0x3c   :  { %737 = vmatmul.mubr.bf16.gmra.mrb[12].mxu1 %v1351_v51  ;;  %647 = vmatprep.mubr.bf16.mxu0 %v1352_v52 }
  0x3d   :  { %744 = vmatprep.mubr.bf16.mxu1 %v1354_v53 }
  0x43   :  { %648 = vmatmul.mubr.bf16.gmra.mrb[16].mxu0 %v1356_v54 }
  0x44   :  { %745 = vmatmul.mubr.bf16.gmra.mrb[16].mxu1 %v1357_v55  ;;  %655 = vmatprep.mubr.bf16.mxu0 %v1359_v56 }
  0x45   :  { %752 = vmatprep.mubr.bf16.mxu1 %v1361_v57 }
  0x4b   :  { %656 = vmatmul.mubr.bf16.gmra.mrb[20].mxu0 %v1363_v58 }
  0x4c   :  { %753 = vmatmul.mubr.bf16.gmra.mrb[20].mxu1 %v1364_v59  ;;  %663 = vmatprep.mubr.bf16.mxu0 %v1365_v60 }
  0x4d   :  { %760 = vmatprep.mubr.bf16.mxu1 %v1367_v61 }
  0x53   :  { %664 = vmatmul.mubr.bf16.gmra.mrb[24].mxu0 %v1369_v62 }
  0x54   :  { %761 = vmatmul.mubr.bf16.gmra.mrb[24].mxu1 %v1370_v63  ;;  %671 = vmatprep.mubr.bf16.mxu0 %v1372_v0 }
  0x55   :  { %768 = vmatprep.mubr.bf16.mxu1 %v1374_v1 }
  0x5b   :  { %672 = vmatmul.mubr.bf16.gmra.mrb[28].mxu0 %v1376_v2 }
  0x5c   :  { %769 = vmatmul.mubr.bf16.gmra.mrb[28].mxu1 %v1377_v3  ;;  %1270 = vmatprep.mubr.msk.bf16.mxu0 %vm558_vm0, %v1378_v4 }
  0x5d   :  { %1278 = vmatprep.mubr.msk.bf16.mxu1 %vm558_vm0, %v1379_v5 }
  0x63   :  { %1271 = vmatmul.mubr.msk.bf16.vlgmr.msra.gmra.mrb[32].mxu0 %vm558_vm0, %v1380_v6 }
  0x64   :  { %1279 = vmatmul.mubr.msk.bf16.vlgmr.msra.gmra.mrb[32].mxu1 %vm558_vm0, %v1381_v7  ;;  %1274 = vmatprep.mubr.msk.bf16.mxu0 %vm558_vm0, %v1382_v8 }
  0x65   :  { %1282 = vmatprep.mubr.msk.bf16.mxu1 %vm558_vm0, %v1383_v9 }
  0x6b   :  { %1275 = vmatmul.mubr.msk.bf16.gmra.mrb[36].mxu0 %vm558_vm0, %v1384_v10 }
  0x6c   :  { %1283 = vmatmul.mubr.msk.bf16.gmra.mrb[36].mxu1 %vm558_vm0, %v1385_v11 }
  0xf6   :  { %v1138_v12 = vpop.f32.mrb[0].mxu0 }
  0xf7   :  { %v1202_v13 = vpop.f32.mrb[0].mxu1  ;;  %v1139_v15 = vpop.f32.mrb[1].mxu0 }
  0xf8   :  { %v1140_v16 = vadd.f32 %v1139_v15, %v1138_v12  ;;  %v1203_v17 = vpop.f32.mrb[1].mxu1  ;;  %v1141_v18 = vpop.f32.mrb[2].mxu0 }
  0xf9   :  { %v1204_v19 = vadd.f32 %v1203_v17, %v1202_v13  ;;  %v1205_v20 = vpop.f32.mrb[2].mxu1  ;;  %v1142_v21 = vpop.f32.mrb[3].mxu0 }
  0xfa   :  { %v618_v22 = vadd.f32 %v1140_v16, %v1645_v14  ;;  %v1143_v23 = vadd.f32 %v1142_v21, %v1141_v18  ;;  %v1206_v24 = vpop.f32.mrb[3].mxu1 }
  0xfb   :  { %v1207_v25 = vadd.f32 %v1206_v24, %v1205_v20 }
  0xfc   :  { %v621_v26 = vadd.f32 %v1143_v23, %v1645_v14  ;;  %v1649_v27 = vadd.f32 %v1204_v19, %v618_v22 }
  0xfe   :  { %v1144_v28 = vpop.f32.mrb[4].mxu0  ;;  %v1651_v29 = vadd.f32 %v1207_v25, %v621_v26 }
  0xff   :  { %v1208_v30 = vpop.f32.mrb[4].mxu1  ;;  %v1145_v31 = vpop.f32.mrb[5].mxu0 }
 0x100   :  { %v1146_v32 = vadd.f32 %v1145_v31, %v1144_v28  ;;  %v1209_v33 = vpop.f32.mrb[5].mxu1  ;;  %v1147_v34 = vpop.f32.mrb[6].mxu0 }
 0x101   :  { %v1210_v35 = vadd.f32 %v1209_v33, %v1208_v30  ;;  %v1211_v36 = vpop.f32.mrb[6].mxu1  ;;  %v1148_v37 = vpop.f32.mrb[7].mxu0 }
 0x102   :  { %v626_v38 = vadd.f32 %v1146_v32, %v1645_v14  ;;  %v1149_v39 = vadd.f32 %v1148_v37, %v1147_v34  ;;  %v1212_v40 = vpop.f32.mrb[7].mxu1 }
 0x103   :  { %v1213_v41 = vadd.f32 %v1212_v40, %v1211_v36 }
 0x104   :  { %v629_v42 = vadd.f32 %v1149_v39, %v1645_v14  ;;  %v1655_v43 = vadd.f32 %v1210_v35, %v626_v38 }
 0x106   :  { %v1150_v44 = vpop.f32.mrb[8].mxu0  ;;  %v1657_v45 = vadd.f32 %v1213_v41, %v629_v42 }
 0x107   :  { %v1214_v46 = vpop.f32.mrb[8].mxu1  ;;  %v1151_v47 = vpop.f32.mrb[9].mxu0 }
 0x108   :  { %v1152_v48 = vadd.f32 %v1151_v47, %v1150_v44  ;;  %v1215_v49 = vpop.f32.mrb[9].mxu1  ;;  %v1153_v50 = vpop.f32.mrb[10].mxu0 }
 0x109   :  { %v1216_v51 = vadd.f32 %v1215_v49, %v1214_v46  ;;  %v1217_v52 = vpop.f32.mrb[10].mxu1  ;;  %v1154_v53 = vpop.f32.mrb[11].mxu0 }
 0x10a   :  { %v634_v54 = vadd.f32 %v1152_v48, %v1645_v14  ;;  %v1155_v55 = vadd.f32 %v1154_v53, %v1153_v50  ;;  %v1218_v56 = vpop.f32.mrb[11].mxu1 }
 0x10b   :  { %v1219_v57 = vadd.f32 %v1218_v56, %v1217_v52 }
 0x10c   :  { %v637_v58 = vadd.f32 %v1155_v55, %v1645_v14  ;;  %v1661_v59 = vadd.f32 %v1216_v51, %v634_v54 }
 0x10e   :  { %v1156_v60 = vpop.f32.mrb[12].mxu0  ;;  %v1663_v61 = vadd.f32 %v1219_v57, %v637_v58 }
 0x10f   :  { %v1220_v62 = vpop.f32.mrb[12].mxu1  ;;  %v1157_v63 = vpop.f32.mrb[13].mxu0 }
 0x110   :  { %v1158_v0 = vadd.f32 %v1157_v63, %v1156_v60  ;;  %v1221_v1 = vpop.f32.mrb[13].mxu1  ;;  %v1159_v2 = vpop.f32.mrb[14].mxu0 }
 0x111   :  { %v1222_v3 = vadd.f32 %v1221_v1, %v1220_v62  ;;  %v1223_v4 = vpop.f32.mrb[14].mxu1  ;;  %v1160_v5 = vpop.f32.mrb[15].mxu0 }
 0x112   :  { %v642_v6 = vadd.f32 %v1158_v0, %v1645_v14  ;;  %v1161_v7 = vadd.f32 %v1160_v5, %v1159_v2  ;;  %v1224_v8 = vpop.f32.mrb[15].mxu1 }
 0x113   :  { %v1225_v9 = vadd.f32 %v1224_v8, %v1223_v4 }
 0x114   :  { %v645_v10 = vadd.f32 %v1161_v7, %v1645_v14  ;;  %v1667_v11 = vadd.f32 %v1222_v3, %v642_v6 }
 0x116   :  { %v1162_v12 = vpop.f32.mrb[16].mxu0  ;;  %v1669_v13 = vadd.f32 %v1225_v9, %v645_v10 }
 0x117   :  { %v1226_v15 = vpop.f32.mrb[16].mxu1  ;;  %v1163_v16 = vpop.f32.mrb[17].mxu0 }
 0x118   :  { %v1164_v17 = vadd.f32 %v1163_v16, %v1162_v12  ;;  %v1227_v18 = vpop.f32.mrb[17].mxu1  ;;  %v1165_v19 = vpop.f32.mrb[18].mxu0 }
 0x119   :  { %v1228_v20 = vadd.f32 %v1227_v18, %v1226_v15  ;;  %v1229_v21 = vpop.f32.mrb[18].mxu1  ;;  %v1166_v22 = vpop.f32.mrb[19].mxu0 }
 0x11a   :  { %v650_v23 = vadd.f32 %v1164_v17, %v1645_v14  ;;  %v1167_v24 = vadd.f32 %v1166_v22, %v1165_v19  ;;  %v1230_v25 = vpop.f32.mrb[19].mxu1 }
 0x11b   :  { %v1231_v26 = vadd.f32 %v1230_v25, %v1229_v21 }
 0x11c   :  { %v653_v28 = vadd.f32 %v1167_v24, %v1645_v14  ;;  %v747_v30 = vadd.f32 %v1228_v20, %v650_v23 }
 0x11e   :  { %v1168_v31 = vpop.f32.mrb[20].mxu0  ;;  %v1673_v32 = vadd.f32 %v1231_v26, %v653_v28 }
 0x11f   :  { %v1232_v33 = vpop.f32.mrb[20].mxu1  ;;  %v1169_v34 = vpop.f32.mrb[21].mxu0 }
 0x120   :  { %v1170_v35 = vadd.f32 %v1169_v34, %v1168_v31  ;;  %v1233_v36 = vpop.f32.mrb[21].mxu1  ;;  %v1171_v37 = vpop.f32.mrb[22].mxu0 }
 0x121   :  { %v1234_v38 = vadd.f32 %v1233_v36, %v1232_v33  ;;  %v1235_v39 = vpop.f32.mrb[22].mxu1  ;;  %v1172_v40 = vpop.f32.mrb[23].mxu0 }
 0x122   :  { %v658_v41 = vadd.f32 %v1170_v35, %v1645_v14  ;;  %v1173_v42 = vadd.f32 %v1172_v40, %v1171_v37  ;;  %v1236_v44 = vpop.f32.mrb[23].mxu1 }
 0x123   :  { %v1237_v46 = vadd.f32 %v1236_v44, %v1235_v39 }
 0x124   :  { %v661_v47 = vadd.f32 %v1173_v42, %v1645_v14  ;;  %v755_v48 = vadd.f32 %v1234_v38, %v658_v41 }
 0x126   :  { %v1174_v49 = vpop.f32.mrb[24].mxu0  ;;  %v758_v50 = vadd.f32 %v1237_v46, %v661_v47 }
 0x127   :  { %v1238_v51 = vpop.f32.mrb[24].mxu1  ;;  %v1175_v52 = vpop.f32.mrb[25].mxu0 }
 0x128   :  { %v1176_v53 = vadd.f32 %v1175_v52, %v1174_v49  ;;  %v1239_v54 = vpop.f32.mrb[25].mxu1  ;;  %v1177_v55 = vpop.f32.mrb[26].mxu0 }
 0x129   :  { %v1240_v56 = vadd.f32 %v1239_v54, %v1238_v51  ;;  %v1241_v57 = vpop.f32.mrb[26].mxu1  ;;  %v1178_v58 = vpop.f32.mrb[27].mxu0 }
 0x12a   :  { %v666_v60 = vadd.f32 %v1176_v53, %v1645_v14  ;;  %v1179_v62 = vadd.f32 %v1178_v58, %v1177_v55  ;;  %v1242_v63 = vpop.f32.mrb[27].mxu1 }
 0x12b   :  { %v1243_v0 = vadd.f32 %v1242_v63, %v1241_v57 }
 0x12c   :  { %v669_v1 = vadd.f32 %v1179_v62, %v1645_v14  ;;  %v763_v2 = vadd.f32 %v1240_v56, %v666_v60 }
 0x12e   :  { %v1180_v3 = vpop.f32.mrb[28].mxu0  ;;  %v766_v4 = vadd.f32 %v1243_v0, %v669_v1 }
 0x12f   :  { %v1244_v5 = vpop.f32.mrb[28].mxu1  ;;  %v1181_v6 = vpop.f32.mrb[29].mxu0 }
 0x130   :  { %v1182_v7 = vadd.f32 %v1181_v6, %v1180_v3  ;;  %v1245_v8 = vpop.f32.mrb[29].mxu1  ;;  %v1183_v9 = vpop.f32.mrb[30].mxu0 }
 0x131   :  { %v1246_v10 = vadd.f32 %v1245_v8, %v1244_v5  ;;  %v1247_v12 = vpop.f32.mrb[30].mxu1  ;;  %v1184_v15 = vpop.f32.mrb[31].mxu0 }
 0x132   :  { %v674_v16 = vadd.f32 %v1182_v7, %v1645_v14  ;;  %v1185_v17 = vadd.f32 %v1184_v15, %v1183_v9  ;;  %v1248_v18 = vpop.f32.mrb[31].mxu1 }
 0x133   :  { %v1249_v19 = vadd.f32 %v1248_v18, %v1247_v12 }
 0x134   :  { %v677_v20 = vadd.f32 %v1185_v17, %v1645_v14  ;;  %v771_v21 = vadd.f32 %v1246_v10, %v674_v16 }
 0x136   :  { %v1272_v22 = vpop.f32.mrb[32].mxu0  ;;  %v774_v23 = vadd.f32 %v1249_v19, %v677_v20 }
 0x137   :  { %v820_v24 = vadd.f32 %v1272_v22, %v1655_v43  ;;  %v1280_v25 = vpop.f32.mrb[32].mxu1  ;;  %v811_v26 = vpop.f32.mrb[33].mxu0 }
 0x138   :  { %v852_v28 = vadd.f32 %v1280_v25, %v755_v48  ;;  %v812_v31 = vadd.f32 %v811_v26, %v1649_v27  ;;  %v843_v33 = vpop.f32.mrb[33].mxu1  ;;  %v1273_v34 = vpop.f32.mrb[34].mxu0 }
 0x139   :  { %v844_v35 = vadd.f32 %v843_v33, %v747_v30  ;;  %v823_v36 = vadd.f32 %v1273_v34, %v1657_v45  ;;  %v1281_v37 = vpop.f32.mrb[34].mxu1  ;;  %v814_v38 = vpop.f32.mrb[35].mxu0 }
 0x13a   :  { %v855_v39 = vadd.f32 %v1281_v37, %v758_v50  ;;  %v815_v14 = vadd.f32 %v814_v38, %v1651_v29  ;;  %v846_v40 = vpop.f32.mrb[35].mxu1 }
 0x13b   :  { %v1083_v41 = vpack.c.bf16 %v823_v36, %v820_v24  ;;  %v847_v42 = vadd.f32 %v846_v40, %v1673_v32 }
 0x13c   :  { %v1103_v43 = vpack.c.bf16 %v855_v39, %v852_v28  ;;  %v1078_v44 = vpack.c.bf16 %v815_v14, %v812_v31 }
 0x13d   :  { %1115 = vst [vmem:[%s1717_s3 + $0x8] sm:$0xff] %v1083_v41   ;;  %v1098_v27 = vpack.c.bf16 %v847_v42, %v844_v35 }
 0x13e   :  { %1119 = vst [vmem:[%s1717_s3 + $0x28] sm:$0xff] %v1103_v43   ;;  %1079 = vst [vmem:[%s1717_s3] sm:$0xff] %v1078_v44   ;;  %v1276_v29 = vpop.f32.mrb[36].mxu0 }
 0x13f   :  { %1118 = vst [vmem:[%s1717_s3 + $0x20] sm:$0xff] %v1098_v27   ;;  %v836_v45 = vadd.f32 %v1276_v29, %v1667_v11  ;;  %v1284_v30 = vpop.f32.mrb[36].mxu1  ;;  %v827_v32 = vpop.f32.mrb[37].mxu0 }
 0x140   :  { %v868_v46 = vadd.f32 %v1284_v30, %v771_v21  ;;  %v828_v47 = vadd.f32 %v827_v32, %v1661_v59  ;;  %v859_v48 = vpop.f32.mrb[37].mxu1  ;;  %v1277_v49 = vpop.f32.mrb[38].mxu0 }
 0x141   :  { %v860_v50 = vadd.f32 %v859_v48, %v763_v2  ;;  %v839_v51 = vadd.f32 %v1277_v49, %v1669_v13  ;;  %v1285_v52 = vpop.f32.mrb[38].mxu1  ;;  %v830_v53 = vpop.f32.mrb[39].mxu0 }
 0x142   :  { %v871_v54 = vadd.f32 %v1285_v52, %v774_v23  ;;  %v831_v55 = vadd.f32 %v830_v53, %v1663_v61  ;;  %v862_v56 = vpop.f32.mrb[39].mxu1 }
 0x143   :  { %v1093_v57 = vpack.c.bf16 %v839_v51, %v836_v45  ;;  %v863_v58 = vadd.f32 %v862_v56, %v766_v4 }
 0x144   :  { %v1113_v60 = vpack.c.bf16 %v871_v54, %v868_v46  ;;  %v1088_v11 = vpack.c.bf16 %v831_v55, %v828_v47 }
 0x145   :  { %1117 = vst [vmem:[%s1717_s3 + $0x18] sm:$0xff] %v1093_v57   ;;  %v1108_v59 = vpack.c.bf16 %v863_v58, %v860_v50 }
 0x146   :  { %1121 = vst [vmem:[%s1717_s3 + $0x38] sm:$0xff] %v1113_v60   ;;  %1116 = vst [vmem:[%s1717_s3 + $0x10] sm:$0xff] %v1088_v11  }
 0x147   :  { %1120 = vst [vmem:[%s1717_s3 + $0x30] sm:$0xff] %v1108_v59  }

// kernel: forward.60
= control target key start
LH: loop header
LB: loop body
LE: loop exit
PB: predicated region body
PF: predicated region fallthrough
CT: control target
= control target key end

     0   :  { %s1094_s12 = smov 0   ;;  %s1215_s0 = inlined_call_operand.vmem [shape: bf16[768,128], index: 0, kind: input, shape index: {}]   ;;  %s1216_s1 = inlined_call_operand.vmem [shape: bf16[128,128], index: 1, kind: input, shape index: {}]   ;;  %s1217_s2 = inlined_call_operand.vmem [shape: f32[1,128], index: 2, kind: input, shape index: {}]   ;;  %s1218_s3 = inlined_call_operand.vmem [shape: bf16[768,128], index: 3, kind: output, shape index: {}]  }
   0x1 LB: > { %s751_s13 = sadd.s32 4294967295, %s1072_s12   ;;  %p755_p0 = scmp.ge.s32.totalorder %s1072_s12, 1  ;;  %s1072_s12 = sphi %s1094_s12, %s13_s12  }
   0x2   : > { %p138_p1 = scmp.lt.s32.totalorder %s1072_s12, 4 }
   0x4   : > { %p139_p2 = pnand %p755_p0, %p138_p1 }
   0x5   : > { %v1042_v0 = vld [vmem:[%s1216_s1] sm:$0xff] (!%p139_p2)   ;;  %s756_s16 = sshll.u32 (!%p139_p2), %s751_s13, 5  ;;  %v1043_v1 = vld [vmem:[%s1216_s1 + $0x8] sm:$0xff] (!%p139_p2)   ;;  %v1044_v2 = vld [vmem:[%s1216_s1 + $0x10] sm:$0xff] (!%p139_p2)  }
   0x6   : > { %142 = sbr.rel (%p139_p2) target bundleno = 282 (0x11a), region = 32  ;;  %p163_p3 = scmp.lt.s32.totalorder (!%p139_p2), %s756_s16, 95  ;;  %970 = vmatprep.subr.bf16.mxu0 (!%p139_p2), %v1042_v0  ;;  %1018 = vmatprep.subr.bf16.mxu1 (!%p139_p2), %v1042_v0  ;;  %v1045_v3 = vld [vmem:[%s1216_s1 + $0x18] sm:$0xff] (!%p139_p2)   ;;  %v1046_v6 = vld [vmem:[%s1216_s1 + $0x20] sm:$0xff] (!%p139_p2)   ;;  %v1047_v7 = vld [vmem:[%s1216_s1 + $0x28] sm:$0xff] (!%p139_p2)  }
   0x7   : > { %971 = vmatpush3.bf16.msra.mxu0 (!%p139_p2), %v1042_v0  ;;  %1026 = vmatpush3.bf16.msra.mxu1 (!%p139_p2), %v1042_v0  ;;  %v1048_v8 = vld [vmem:[%s1216_s1 + $0x30] sm:$0xff] (!%p139_p2)   ;;  %v1049_v9 = vld [vmem:[%s1216_s1 + $0x38] sm:$0xff] (!%p139_p2)   ;;  %v1155_v25 = vld [vmem:[%s1217_s2] ss:$0 sm:$0xff] (!%p139_p2) }
   0x8   : > { %972 = vmatprep.subr.bf16.mxu0 (!%p139_p2), %v1043_v1  ;;  %1019 = vmatprep.subr.bf16.mxu1 (!%p139_p2), %v1043_v1 }
   0xb   : > { %973 = vmatpush3.bf16.msra.mxu0 (!%p139_p2), %v1043_v1  ;;  %1027 = vmatpush3.bf16.msra.mxu1 (!%p139_p2), %v1043_v1 }
   0xc   : > { %974 = vmatprep.subr.bf16.mxu0 (!%p139_p2), %v1044_v2  ;;  %1020 = vmatprep.subr.bf16.mxu1 (!%p139_p2), %v1044_v2 }
   0xd   : > { %s1220_s16 = smov (!%p163_p3, %s756_s16), 95 }
   0xe   : > { %s757_s21 = sshll.u32 %s1220_s16, 2 }
   0xf   : > { %s1119_s24 = scalar_lea.vmem %s1215_s0, %s757_s21  ;;  %975 = vmatpush3.bf16.msra.mxu0 %v1044_v2  ;;  %1028 = vmatpush3.bf16.msra.mxu1 %v1044_v2  ;;  %s1168_s13 = scalar_lea.vmem %s1218_s3, %s757_s21 }
  0x10   : > { %v1050_v4 = vld [vmem:[%s1119_s24] sm:$0xff]   ;;  %976 = vmatprep.subr.bf16.mxu0 %v1045_v3  ;;  %1021 = vmatprep.subr.bf16.mxu1 %v1045_v3  ;;  %v1052_v10 = vld [vmem:[%s1119_s24 + $0x8] sm:$0xff]   ;;  %v1054_v12 = vld [vmem:[%s1119_s24 + $0x10] sm:$0xff]  }
  0x11   : > { %v1051_v5 = vld [vmem:[%s1119_s24 + $0x40] sm:$0xff]   ;;  %986 = vmatprep.mubr.bf16.mxu0 %v1050_v4  ;;  %v1053_v11 = vld [vmem:[%s1119_s24 + $0x48] sm:$0xff]   ;;  %v1055_v13 = vld [vmem:[%s1119_s24 + $0x50] sm:$0xff]  }
  0x12   : > { %1002 = vmatprep.mubr.bf16.mxu1 %v1051_v5  ;;  %v1056_v14 = vld [vmem:[%s1119_s24 + $0x18] sm:$0xff]   ;;  %v1058_v16 = vld [vmem:[%s1119_s24 + $0x20] sm:$0xff]   ;;  %v1060_v18 = vld [vmem:[%s1119_s24 + $0x28] sm:$0xff]  }
  0x13   : > { %977 = vmatpush3.bf16.msra.mxu0 %v1045_v3  ;;  %1029 = vmatpush3.bf16.msra.mxu1 %v1045_v3  ;;  %v1057_v15 = vld [vmem:[%s1119_s24 + $0x58] sm:$0xff]   ;;  %v1059_v17 = vld [vmem:[%s1119_s24 + $0x60] sm:$0xff]   ;;  %v1061_v19 = vld [vmem:[%s1119_s24 + $0x68] sm:$0xff]  }
  0x14   : > { %978 = vmatprep.subr.bf16.mxu0 %v1046_v6  ;;  %1022 = vmatprep.subr.bf16.mxu1 %v1046_v6  ;;  %v1062_v20 = vld [vmem:[%s1119_s24 + $0x30] sm:$0xff]   ;;  %v1064_v22 = vld [vmem:[%s1119_s24 + $0x38] sm:$0xff]  }
  0x15   : > { %v1063_v21 = vld [vmem:[%s1119_s24 + $0x70] sm:$0xff]   ;;  %v1065_v23 = vld [vmem:[%s1119_s24 + $0x78] sm:$0xff]  }
  0x17   : > { %979 = vmatpush3.bf16.msra.mxu0 %v1046_v6  ;;  %1030 = vmatpush3.bf16.msra.mxu1 %v1046_v6 }
  0x18   : > { %980 = vmatprep.subr.bf16.mxu0 %v1047_v7  ;;  %1023 = vmatprep.subr.bf16.mxu1 %v1047_v7 }
  0x1b   : > { %981 = vmatpush3.bf16.msra.mxu0 %v1047_v7  ;;  %1031 = vmatpush3.bf16.msra.mxu1 %v1047_v7 }
  0x1c   : > { %982 = vmatprep.subr.bf16.mxu0 %v1048_v8  ;;  %1024 = vmatprep.subr.bf16.mxu1 %v1048_v8 }
  0x1f   : > { %983 = vmatpush3.bf16.msra.mxu0 %v1048_v8  ;;  %1032 = vmatpush3.bf16.msra.mxu1 %v1048_v8 }
  0x20   : > { %984 = vmatprep.subr.bf16.mxu0 %v1049_v9  ;;  %1025 = vmatprep.subr.bf16.mxu1 %v1049_v9 }
  0x23   : > { %985 = vmatpush3.bf16.msra.mxu0 %v1049_v9  ;;  %1033 = vmatpush3.bf16.msra.mxu1 %v1049_v9 }
  0x26   : > { %987 = vmatmul.mubr.bf16.vlgmr.msra.gmra.mrb[0].mxu0 %v1052_v10  ;;  %1003 = vmatmul.mubr.bf16.vlgmr.msra.gmra.mrb[0].mxu1 %v1053_v11 }
  0x27   : > { %990 = vmatprep.mubr.bf16.mxu0 %v1054_v12  ;;  %1006 = vmatprep.mubr.bf16.mxu1 %v1055_v13 }
  0x2e   : > { %991 = vmatmul.mubr.bf16.gmra.mrb[4].mxu0 %v1056_v14  ;;  %1007 = vmatmul.mubr.bf16.gmra.mrb[4].mxu1 %v1057_v15 }
  0x2f   : > { %994 = vmatprep.mubr.bf16.mxu0 %v1058_v16  ;;  %1010 = vmatprep.mubr.bf16.mxu1 %v1059_v17 }
  0x36   : > { %995 = vmatmul.mubr.bf16.gmra.mrb[8].mxu0 %v1060_v18  ;;  %1011 = vmatmul.mubr.bf16.gmra.mrb[8].mxu1 %v1061_v19 }
  0x37   : > { %998 = vmatprep.mubr.bf16.mxu0 %v1062_v20  ;;  %1014 = vmatprep.mubr.bf16.mxu1 %v1063_v21 }
  0x3e   : > { %999 = vmatmul.mubr.bf16.gmra.mrb[12].mxu0 %v1064_v22  ;;  %1015 = vmatmul.mubr.bf16.gmra.mrb[12].mxu1 %v1065_v23 }
  0xf9   : > { %v988_v24 = vpop.f32.mrb[0].mxu0  ;;  %v1004_v26 = vpop.f32.mrb[0].mxu1 }
  0xfa   : > { %v408_v27 = vpop.f32.mrb[1].mxu0  ;;  %v472_v28 = vpop.f32.mrb[1].mxu1  ;;  %v417_v31 = vadd.f32 %v988_v24, %v1155_v25  ;;  %v481_v32 = vadd.f32 %v1004_v26, %v1155_v25 }
  0xfb   : > { %v989_v29 = vpop.f32.mrb[2].mxu0  ;;  %v1005_v30 = vpop.f32.mrb[2].mxu1  ;;  %v409_v37 = vadd.f32 %v1155_v25, %v408_v27  ;;  %v473_v38 = vadd.f32 %v1155_v25, %v472_v28 }
  0xfc   : > { %v420_v33 = vadd.f32 %v989_v29, %v1155_v25  ;;  %v484_v34 = vadd.f32 %v1005_v30, %v1155_v25  ;;  %v411_v35 = vpop.f32.mrb[3].mxu0  ;;  %v475_v36 = vpop.f32.mrb[3].mxu1 }
  0xfd   : > { %v412_v39 = vadd.f32 %v1155_v25, %v411_v35  ;;  %v476_v40 = vadd.f32 %v1155_v25, %v475_v36 }
  0xfe   : > { %v859_v41 = vpack.c.bf16 %v420_v33, %v417_v31  ;;  %v899_v42 = vpack.c.bf16 %v484_v34, %v481_v32 }
  0xff   : > { %v854_v43 = vpack.c.bf16 %v412_v39, %v409_v37  ;;  %v894_v44 = vpack.c.bf16 %v476_v40, %v473_v38 }
 0x100   : > { %931 = vst [vmem:[%s1168_s13 + $0x8] sm:$0xff] %v859_v41   ;;  %939 = vst [vmem:[%s1168_s13 + $0x48] sm:$0xff] %v899_v42  }
 0x101   : > { %855 = vst [vmem:[%s1168_s13] sm:$0xff] %v854_v43   ;;  %938 = vst [vmem:[%s1168_s13 + $0x40] sm:$0xff] %v894_v44   ;;  %v992_v45 = vpop.f32.mrb[4].mxu0  ;;  %v1008_v46 = vpop.f32.mrb[4].mxu1 }
 0x102   : > { %v424_v47 = vpop.f32.mrb[5].mxu0  ;;  %v488_v48 = vpop.f32.mrb[5].mxu1  ;;  %v433_v51 = vadd.f32 %v992_v45, %v1155_v25  ;;  %v497_v52 = vadd.f32 %v1008_v46, %v1155_v25 }
 0x103   : > { %v993_v49 = vpop.f32.mrb[6].mxu0  ;;  %v1009_v50 = vpop.f32.mrb[6].mxu1  ;;  %v425_v57 = vadd.f32 %v1155_v25, %v424_v47  ;;  %v489_v58 = vadd.f32 %v1155_v25, %v488_v48 }
 0x104   : > { %v436_v53 = vadd.f32 %v993_v49, %v1155_v25  ;;  %v500_v54 = vadd.f32 %v1009_v50, %v1155_v25  ;;  %v427_v55 = vpop.f32.mrb[7].mxu0  ;;  %v491_v56 = vpop.f32.mrb[7].mxu1 }
 0x105   : > { %v428_v59 = vadd.f32 %v1155_v25, %v427_v55  ;;  %v492_v60 = vadd.f32 %v1155_v25, %v491_v56 }
 0x106   : > { %v869_v61 = vpack.c.bf16 %v436_v53, %v433_v51  ;;  %v909_v62 = vpack.c.bf16 %v500_v54, %v497_v52 }
 0x107   : > { %v864_v63 = vpack.c.bf16 %v428_v59, %v425_v57  ;;  %v904_v0 = vpack.c.bf16 %v492_v60, %v489_v58 }
 0x108   : > { %933 = vst [vmem:[%s1168_s13 + $0x18] sm:$0xff] %v869_v61   ;;  %941 = vst [vmem:[%s1168_s13 + $0x58] sm:$0xff] %v909_v62  }
 0x109   : > { %932 = vst [vmem:[%s1168_s13 + $0x10] sm:$0xff] %v864_v63   ;;  %940 = vst [vmem:[%s1168_s13 + $0x50] sm:$0xff] %v904_v0   ;;  %v996_v1 = vpop.f32.mrb[8].mxu0  ;;  %v1012_v2 = vpop.f32.mrb[8].mxu1 }
 0x10a   : > { %v440_v3 = vpop.f32.mrb[9].mxu0  ;;  %v504_v4 = vpop.f32.mrb[9].mxu1  ;;  %v449_v7 = vadd.f32 %v996_v1, %v1155_v25  ;;  %v513_v8 = vadd.f32 %v1012_v2, %v1155_v25 }
 0x10b   : > { %v997_v5 = vpop.f32.mrb[10].mxu0  ;;  %v1013_v6 = vpop.f32.mrb[10].mxu1  ;;  %v441_v13 = vadd.f32 %v1155_v25, %v440_v3  ;;  %v505_v14 = vadd.f32 %v1155_v25, %v504_v4 }
 0x10c   : > { %v452_v9 = vadd.f32 %v997_v5, %v1155_v25  ;;  %v516_v10 = vadd.f32 %v1013_v6, %v1155_v25  ;;  %v443_v11 = vpop.f32.mrb[11].mxu0  ;;  %v507_v12 = vpop.f32.mrb[11].mxu1 }
 0x10d   : > { %v444_v15 = vadd.f32 %v1155_v25, %v443_v11  ;;  %v508_v16 = vadd.f32 %v1155_v25, %v507_v12 }
 0x10e   : > { %v879_v17 = vpack.c.bf16 %v452_v9, %v449_v7  ;;  %v919_v18 = vpack.c.bf16 %v516_v10, %v513_v8 }
 0x10f   : > { %v874_v19 = vpack.c.bf16 %v444_v15, %v441_v13  ;;  %v914_v20 = vpack.c.bf16 %v508_v16, %v505_v14 }
 0x110   : > { %935 = vst [vmem:[%s1168_s13 + $0x28] sm:$0xff] %v879_v17   ;;  %943 = vst [vmem:[%s1168_s13 + $0x68] sm:$0xff] %v919_v18  }
 0x111   : > { %934 = vst [vmem:[%s1168_s13 + $0x20] sm:$0xff] %v874_v19   ;;  %942 = vst [vmem:[%s1168_s13 + $0x60] sm:$0xff] %v914_v20   ;;  %v1000_v21 = vpop.f32.mrb[12].mxu0  ;;  %v1016_v22 = vpop.f32.mrb[12].mxu1 }
 0x112   : > { %v456_v23 = vpop.f32.mrb[13].mxu0  ;;  %v520_v24 = vpop.f32.mrb[13].mxu1  ;;  %v465_v28 = vadd.f32 %v1000_v21, %v1155_v25  ;;  %v529_v29 = vadd.f32 %v1016_v22, %v1155_v25 }
 0x113   : > { %v1001_v26 = vpop.f32.mrb[14].mxu0  ;;  %v1017_v27 = vpop.f32.mrb[14].mxu1  ;;  %v457_v34 = vadd.f32 %v1155_v25, %v456_v23  ;;  %v521_v35 = vadd.f32 %v1155_v25, %v520_v24 }
 0x114   : > { %v468_v30 = vadd.f32 %v1001_v26, %v1155_v25  ;;  %v532_v31 = vadd.f32 %v1017_v27, %v1155_v25  ;;  %v459_v32 = vpop.f32.mrb[15].mxu0  ;;  %v523_v33 = vpop.f32.mrb[15].mxu1 }
 0x115   : > { %v460_v36 = vadd.f32 %v1155_v25, %v459_v32  ;;  %v524_v37 = vadd.f32 %v1155_v25, %v523_v33 }
 0x116   : > { %v889_v38 = vpack.c.bf16 %v468_v30, %v465_v28  ;;  %v929_v39 = vpack.c.bf16 %v532_v31, %v529_v29 }
 0x117   : > { %v884_v40 = vpack.c.bf16 %v460_v36, %v457_v34  ;;  %v924_v41 = vpack.c.bf16 %v524_v37, %v521_v35 }
 0x118   : > { %937 = vst [vmem:[%s1168_s13 + $0x38] sm:$0xff] %v889_v38   ;;  %945 = vst [vmem:[%s1168_s13 + $0x78] sm:$0xff] %v929_v39  }
 0x119   : > { %936 = vst [vmem:[%s1168_s13 + $0x30] sm:$0xff] %v884_v40   ;;  %944 = vst [vmem:[%s1168_s13 + $0x70] sm:$0xff] %v924_v41  }
 0x11a PF: > { %s13_s12 = sadd.s32 1, %s1072_s12  }
 0x11b   : > { %p10_p4 = scmp.ge.s32.totalorder %s13_s12, 5  }
 0x11d   :  { %12 = sbr.rel (!%p10_p4) target bundleno = 1 (0x1), region = 62 }

// kernel: forward.61
= control target key start
LH: loop header
LB: loop body
LE: loop exit
PB: predicated region body
PF: predicated region fallthrough
CT: control target
= control target key end

     0   :  { %s1774_s12 = smov 0   ;;  %s2000_s0 = inlined_call_operand.vmem [shape: bf16[512,288], index: 0, kind: input, shape index: {}]   ;;  %s2001_s1 = inlined_call_operand.vmem [shape: bf16[288,128], index: 1, kind: input, shape index: {}]   ;;  %s2002_s2 = inlined_call_operand.vmem [shape: f32[1,128], index: 2, kind: input, shape index: {}]   ;;  %s2003_s3 = inlined_call_operand.vmem [shape: bf16[512,128], index: 3, kind: output, shape index: {}]  }
   0x1 LB: > { %s1220_s13 = sadd.s32 4294967295, %s1752_s12   ;;  %p1224_p0 = scmp.ge.s32.totalorder %s1752_s12, 1  ;;  %s1752_s12 = sphi %s1774_s12, %s13_s12  }
   0x2   : > { %p139_p1 = scmp.lt.s32.totalorder %s1752_s12, 3 }
   0x4   : > { %p140_p2 = pnand %p1224_p0, %p139_p1 }
   0x5   : > { %v1664_v0 = vld [vmem:[%s2001_s1 + $0x40] sm:$0xff] (!%p140_p2)   ;;  %s1225_s16 = sshll.u32 (!%p140_p2), %s1220_s13, 5  ;;  %v1666_v2 = vld [vmem:[%s2001_s1 + $0x48] sm:$0xff] (!%p140_p2)   ;;  %v1668_v4 = vld [vmem:[%s2001_s1 + $0x50] sm:$0xff] (!%p140_p2)   ;;  %vm633_vm0 = vcmask (!%p140_p2), 261120  }
   0x6   : > { %143 = sbr.rel (%p140_p2) target bundleno = 350 (0x15e), region = 32  ;;  %v1665_v1 = vld [vmem:[%s2001_s1] sm:$0xff] (!%p140_p2)   ;;  %1473 = vmatprep.subr.bf16.mxu0 (!%p140_p2), %v1664_v0  ;;  %1639 = vmatprep.subr.bf16.mxu1 (!%p140_p2), %v1664_v0  ;;  %p165_p3 = scmp.lt.s32.totalorder (!%p140_p2), %s1225_s16, 63  ;;  %v1667_v3 = vld [vmem:[%s2001_s1 + $0x8] sm:$0xff] (!%p140_p2)   ;;  %v1669_v5 = vld [vmem:[%s2001_s1 + $0x10] sm:$0xff] (!%p140_p2)  }
   0x7   : > { %1474 = vmatpush3.bf16.msra.mxu0 (!%p140_p2), %v1665_v1  ;;  %1647 = vmatpush3.bf16.msra.mxu1 (!%p140_p2), %v1665_v1  ;;  %v1670_v6 = vld [vmem:[%s2001_s1 + $0x58] sm:$0xff] (!%p140_p2)   ;;  %v1672_v8 = vld [vmem:[%s2001_s1 + $0x60] sm:$0xff] (!%p140_p2)   ;;  %v1674_v10 = vld [vmem:[%s2001_s1 + $0x68] sm:$0xff] (!%p140_p2)  }
   0x8   : > { %1475 = vmatprep.subr.bf16.mxu0 (!%p140_p2), %v1666_v2  ;;  %1640 = vmatprep.subr.bf16.mxu1 (!%p140_p2), %v1666_v2  ;;  %v1671_v7 = vld [vmem:[%s2001_s1 + $0x18] sm:$0xff] (!%p140_p2)   ;;  %v1673_v9 = vld [vmem:[%s2001_s1 + $0x20] sm:$0xff] (!%p140_p2)   ;;  %v1675_v13 = vld [vmem:[%s2001_s1 + $0x28] sm:$0xff] (!%p140_p2)  }
   0x9   : > { %v1676_v14 = vld [vmem:[%s2001_s1 + $0x70] sm:$0xff] (!%p140_p2)   ;;  %v1678_v16 = vld [vmem:[%s2001_s1 + $0x78] sm:$0xff] (!%p140_p2)   ;;  %v1686_v18 = vld [vmem:[%s2001_s1 + $0x80] sm:$0xff] (!%p140_p2)  }
   0xa   : > { %v1677_v15 = vld [vmem:[%s2001_s1 + $0x30] sm:$0xff] (!%p140_p2)   ;;  %v1679_v17 = vld [vmem:[%s2001_s1 + $0x38] sm:$0xff] (!%p140_p2)   ;;  %v1699_v23 = vld [vmem:[%s2001_s1 + $0x88] sm:$0xff] (!%p140_p2)  }
   0xb   : > { %1476 = vmatpush3.bf16.msra.mxu0 (!%p140_p2), %v1667_v3  ;;  %1648 = vmatpush3.bf16.msra.mxu1 (!%p140_p2), %v1667_v3 }
   0xc   : > { %1477 = vmatprep.subr.bf16.mxu0 (!%p140_p2), %v1668_v4  ;;  %1641 = vmatprep.subr.bf16.mxu1 (!%p140_p2), %v1668_v4 }
   0xd   : > { %s2005_s16 = smov (!%p165_p3, %s1225_s16), 63 }
   0xe   : > { %s1655_s29 = smul.u32 12, %s2005_s16  ;;  %s1228_s5 = sshll.u32 %s2005_s16, 2 }
   0xf   : > { %1478 = vmatpush3.bf16.msra.mxu0 %v1669_v5  ;;  %1649 = vmatpush3.bf16.msra.mxu1 %v1669_v5  ;;  %s1937_s8 = scalar_lea.vmem %s2003_s3, %s1228_s5 }
  0x10   : > { %1479 = vmatprep.subr.bf16.mxu0 %v1670_v6  ;;  %1642 = vmatprep.subr.bf16.mxu1 %v1670_v6  ;;  %s1815_s9 = scalar_lea.vmem %s2000_s0, %s1655_s29 }
  0x11   : > { %v1682_v11 = vld [vmem:[%s1815_s9 + $0x4] ss:$12 sps:$4 sm:$0xff]   ;;  %v1680_v19 = vld [vmem:[%s1815_s9] ss:$12 sps:$4 sm:$0xff]   ;;  %v1687_v21 = vld [vmem:[%s1815_s9 + $0x1c] ss:$12 sps:$4 sm:$0xff]  }
  0x12   : > { %v1685_v12 = vld [vmem:[%s1815_s9 + $0x124] ss:$12 sps:$4 sm:$0xff]   ;;  %714 = vmatprep.mubr.bf16.mxu0 %v1682_v11  ;;  %v1683_v20 = vld [vmem:[%s1815_s9 + $0x120] ss:$12 sps:$4 sm:$0xff]   ;;  %v1689_v22 = vld [vmem:[%s1815_s9 + $0x13c] ss:$12 sps:$4 sm:$0xff]  }
  0x13   : > { %1480 = vmatpush3.bf16.msra.mxu0 %v1671_v7  ;;  %1650 = vmatpush3.bf16.msra.mxu1 %v1671_v7  ;;  %v1691_v24 = vld [vmem:[%s1815_s9 + $0x18] ss:$12 sps:$4 sm:$0xff]   ;;  %v1693_v26 = vld [vmem:[%s1815_s9 + $0x34] ss:$12 sps:$4 sm:$0xff]   ;;  %v1697_v28 = vld [vmem:[%s1815_s9 + $0x30] ss:$12 sps:$4 sm:$0xff]  }
  0x14   : > { %1481 = vmatprep.subr.bf16.mxu0 %v1672_v8  ;;  %1643 = vmatprep.subr.bf16.mxu1 %v1672_v8  ;;  %v1692_v25 = vld [vmem:[%s1815_s9 + $0x138] ss:$12 sps:$4 sm:$0xff]   ;;  %v1695_v27 = vld [vmem:[%s1815_s9 + $0x154] ss:$12 sps:$4 sm:$0xff]   ;;  %v1698_v29 = vld [vmem:[%s1815_s9 + $0x150] ss:$12 sps:$4 sm:$0xff]  }
  0x15   : > { %810 = vmatprep.mubr.bf16.mxu1 %v1685_v12  ;;  %v1700_v30 = vld [vmem:[%s1815_s9 + $0x4c] ss:$12 sps:$4 sm:$0xff]   ;;  %v1704_v32 = vld [vmem:[%s1815_s9 + $0x48] ss:$12 sps:$4 sm:$0xff]   ;;  %v1706_v34 = vld [vmem:[%s1815_s9 + $0x64] ss:$12 sps:$4 sm:$0xff]  }
  0x16   : > { %v1702_v31 = vld [vmem:[%s1815_s9 + $0x16c] ss:$12 sps:$4 sm:$0xff]   ;;  %v1705_v33 = vld [vmem:[%s1815_s9 + $0x168] ss:$12 sps:$4 sm:$0xff]   ;;  %v1715_v41 = vld [vmem:[%s1815_s9 + $0x50] ss:$12 sps:$4 sm:$0xff]  }
  0x17   : > { %1482 = vmatpush3.bf16.msra.mxu0 %v1673_v9  ;;  %1651 = vmatpush3.bf16.msra.mxu1 %v1673_v9  ;;  %v1708_v35 = vld [vmem:[%s1815_s9 + $0x8] ss:$12 sps:$4 sm:$0xff]   ;;  %v1709_v36 = vld [vmem:[%s1815_s9 + $0x60] ss:$12 sps:$4 sm:$0xff]   ;;  %v1713_v39 = vld [vmem:[%s1815_s9 + $0x38] ss:$12 sps:$4 sm:$0xff]  }
  0x18   : > { %1483 = vmatprep.subr.bf16.mxu0 %v1674_v10  ;;  %1644 = vmatprep.subr.bf16.mxu1 %v1674_v10  ;;  %v1710_v37 = vld [vmem:[%s1815_s9 + $0x20] ss:$12 sps:$4 sm:$0xff]   ;;  %v1711_v38 = vld [vmem:[%s1815_s9 + $0x7c] ss:$12 sps:$4 sm:$0xff]   ;;  %v1714_v40 = vld [vmem:[%s1815_s9 + $0x78] ss:$12 sps:$4 sm:$0xff]  }
  0x19   : > { %v1716_v42 = vld [vmem:[%s1815_s9 + $0x94] ss:$12 sps:$4 sm:$0xff]   ;;  %v1719_v44 = vld [vmem:[%s1815_s9 + $0x90] ss:$12 sps:$4 sm:$0xff]   ;;  %v1721_v46 = vld [vmem:[%s1815_s9 + $0xac] ss:$12 sps:$4 sm:$0xff]  }
  0x1a   : > { %v1718_v43 = vld [vmem:[%s1815_s9 + $0x68] ss:$12 sps:$4 sm:$0xff]   ;;  %v1720_v45 = vld [vmem:[%s1815_s9 + $0x80] ss:$12 sps:$4 sm:$0xff]   ;;  %v1723_v47 = vld [vmem:[%s1815_s9 + $0x98] ss:$12 sps:$4 sm:$0xff]  }
  0x1b   : > { %1484 = vmatpush3.bf16.msra.mxu0 %v1675_v13  ;;  %1652 = vmatpush3.bf16.msra.mxu1 %v1675_v13  ;;  %v1724_v48 = vld [vmem:[%s1815_s9 + $0xa8] ss:$12 sps:$4 sm:$0xff]   ;;  %v1725_v49 = vld [vmem:[%s1815_s9 + $0xb0] ss:$12 sps:$4 sm:$0xff]   ;;  %v1729_v52 = vld [vmem:[%s1815_s9 + $0xc0] ss:$12 sps:$4 sm:$0xff]  }
  0x1c   : > { %1485 = vmatprep.subr.bf16.mxu0 %v1676_v14  ;;  %1645 = vmatprep.subr.bf16.mxu1 %v1676_v14  ;;  %v1726_v50 = vld [vmem:[%s1815_s9 + $0xc4] ss:$12 sps:$4 sm:$0xff]   ;;  %v1728_v51 = vld [vmem:[%s1815_s9 + $0xc8] ss:$12 sps:$4 sm:$0xff]   ;;  %v1730_v53 = vld [vmem:[%s1815_s9 + $0xe0] ss:$12 sps:$4 sm:$0xff]  }
  0x1d   : > { %v1731_v54 = vld [vmem:[%s1815_s9 + $0xdc] ss:$12 sps:$4 sm:$0xff]   ;;  %v1733_v55 = vld [vmem:[%s1815_s9 + $0xf8] ss:$12 sps:$4 sm:$0xff]   ;;  %v1736_v58 = vld [vmem:[%s1815_s9 + $0xf4] ss:$12 sps:$4 sm:$0xff]  }
  0x1e   : > { %v1734_v56 = vld [vmem:[%s1815_s9 + $0xd8] ss:$12 sps:$4 sm:$0xff]   ;;  %v1735_v57 = vld [vmem:[%s1815_s9 + $0x110] ss:$12 sps:$4 sm:$0xff]   ;;  %v1738_v59 = vld [vmem:[%s1815_s9 + $0x128] ss:$12 sps:$4 sm:$0xff]  }
  0x1f   : > { %1486 = vmatpush3.bf16.msra.mxu0 %v1677_v15  ;;  %1653 = vmatpush3.bf16.msra.mxu1 %v1677_v15  ;;  %v1739_v60 = vld [vmem:[%s1815_s9 + $0xf0] ss:$12 sps:$4 sm:$0xff]   ;;  %v1740_v61 = vld [vmem:[%s1815_s9 + $0x140] ss:$12 sps:$4 sm:$0xff]   ;;  %v1743_v63 = vld [vmem:[%s1815_s9 + $0x158] ss:$12 sps:$4 sm:$0xff]  }
  0x20   : > { %1487 = vmatprep.subr.bf16.mxu0 %v1678_v16  ;;  %1646 = vmatprep.subr.bf16.mxu1 %v1678_v16  ;;  %v1741_v62 = vld [vmem:[%s1815_s9 + $0x10c] ss:$12 sps:$4 sm:$0xff]   ;;  %v1744_v0 = vld [vmem:[%s1815_s9 + $0x108] ss:$12 sps:$4 sm:$0xff]   ;;  %v1745_v1 = vld [vmem:[%s1815_s9 + $0x170] ss:$12 sps:$4 sm:$0xff]  }
  0x23   : > { %1488 = vmatpush3.bf16.msra.mxu0 %v1679_v17  ;;  %1654 = vmatpush3.bf16.msra.mxu1 %v1679_v17 }
  0x24   : > { %1603 = vmatprep.subr.bf16.mxu1 %v1686_v18 }
  0x26   : > { %715 = vmatmul.mubr.bf16.vlgmr.msra.gmra.mrb[0].mxu0 %v1680_v19  ;;  %811 = vmatmul.mubr.bf16.vlgmr.msra.gmra.mrb[0].mxu1 %v1683_v20 }
  0x27   : > { %1604 = vmatpush3.bf16.msra.mxu1 %v1686_v18  ;;  %722 = vmatprep.mubr.bf16.mxu0 %v1687_v21 }
  0x28   : > { %818 = vmatprep.mubr.bf16.mxu1 %v1689_v22  ;;  %1605 = vmatprep.subr.bf16.mxu1 %v1699_v23 }
  0x2b   : > { %1606 = vmatpush3.bf16.msra.mxu1 %v1699_v23 }
  0x2e   : > { %723 = vmatmul.mubr.bf16.gmra.mrb[4].mxu0 %v1691_v24  ;;  %819 = vmatmul.mubr.bf16.gmra.mrb[4].mxu1 %v1692_v25 }
  0x2f   : > { %730 = vmatprep.mubr.bf16.mxu0 %v1693_v26  ;;  %826 = vmatprep.mubr.bf16.mxu1 %v1695_v27 }
  0x36   : > { %731 = vmatmul.mubr.bf16.gmra.mrb[8].mxu0 %v1697_v28  ;;  %827 = vmatmul.mubr.bf16.gmra.mrb[8].mxu1 %v1698_v29 }
  0x37   : > { %738 = vmatprep.mubr.bf16.mxu0 %v1700_v30  ;;  %834 = vmatprep.mubr.bf16.mxu1 %v1702_v31 }
  0x3e   : > { %739 = vmatmul.mubr.bf16.gmra.mrb[12].mxu0 %v1704_v32  ;;  %835 = vmatmul.mubr.bf16.gmra.mrb[12].mxu1 %v1705_v33 }
  0x3f   : > { %746 = vmatprep.mubr.bf16.mxu0 %v1706_v34  ;;  %1607 = vmatprep.mubr.msk.bf16.mxu1 %vm633_vm0, %v1708_v35 }
  0x46   : > { %747 = vmatmul.mubr.bf16.gmra.mrb[16].mxu0 %v1709_v36  ;;  %1608 = vmatmul.mubr.msk.bf16.vlgmr.msra.gmra.mrb[16].mxu1 %vm633_vm0, %v1710_v37 }
  0x47   : > { %754 = vmatprep.mubr.bf16.mxu0 %v1711_v38  ;;  %1611 = vmatprep.mubr.msk.bf16.mxu1 %vm633_vm0, %v1713_v39 }
  0x4e   : > { %755 = vmatmul.mubr.bf16.gmra.mrb[20].mxu0 %v1714_v40  ;;  %1612 = vmatmul.mubr.msk.bf16.gmra.mrb[20].mxu1 %vm633_vm0, %v1715_v41 }
  0x4f   : > { %762 = vmatprep.mubr.bf16.mxu0 %v1716_v42  ;;  %1615 = vmatprep.mubr.msk.bf16.mxu1 %vm633_vm0, %v1718_v43 }
  0x56   : > { %763 = vmatmul.mubr.bf16.gmra.mrb[24].mxu0 %v1719_v44  ;;  %1616 = vmatmul.mubr.msk.bf16.gmra.mrb[24].mxu1 %vm633_vm0, %v1720_v45 }
  0x57   : > { %770 = vmatprep.mubr.bf16.mxu0 %v1721_v46  ;;  %1619 = vmatprep.mubr.msk.bf16.mxu1 %vm633_vm0, %v1723_v47 }
  0x5e   : > { %771 = vmatmul.mubr.bf16.gmra.mrb[28].mxu0 %v1724_v48  ;;  %1620 = vmatmul.mubr.msk.bf16.gmra.mrb[28].mxu1 %vm633_vm0, %v1725_v49 }
  0x5f   : > { %778 = vmatprep.mubr.bf16.mxu0 %v1726_v50  ;;  %1623 = vmatprep.mubr.msk.bf16.mxu1 %vm633_vm0, %v1728_v51  ;;  %v1927_v50 = vld [vmem:[%s2002_s2] ss:$0 sm:$0xff] }
  0x66   : > { %779 = vmatmul.mubr.bf16.gmra.mrb[32].mxu0 %v1729_v52  ;;  %1624 = vmatmul.mubr.msk.bf16.gmra.mrb[32].mxu1 %vm633_vm0, %v1730_v53 }
  0x67   : > { %786 = vmatprep.mubr.bf16.mxu0 %v1731_v54  ;;  %1627 = vmatprep.mubr.msk.bf16.mxu1 %vm633_vm0, %v1733_v55 }
  0x6e   : > { %787 = vmatmul.mubr.bf16.gmra.mrb[36].mxu0 %v1734_v56  ;;  %1628 = vmatmul.mubr.msk.bf16.gmra.mrb[36].mxu1 %vm633_vm0, %v1735_v57 }
  0x6f   : > { %794 = vmatprep.mubr.bf16.mxu0 %v1736_v58  ;;  %1631 = vmatprep.mubr.msk.bf16.mxu1 %vm633_vm0, %v1738_v59 }
  0x76   : > { %795 = vmatmul.mubr.bf16.gmra.mrb[40].mxu0 %v1739_v60  ;;  %1632 = vmatmul.mubr.msk.bf16.gmra.mrb[40].mxu1 %vm633_vm0, %v1740_v61 }
  0x77   : > { %802 = vmatprep.mubr.bf16.mxu0 %v1741_v62  ;;  %1635 = vmatprep.mubr.msk.bf16.mxu1 %vm633_vm0, %v1743_v63 }
  0x7e   : > { %803 = vmatmul.mubr.bf16.gmra.mrb[44].mxu0 %v1744_v0  ;;  %1636 = vmatmul.mubr.msk.bf16.gmra.mrb[44].mxu1 %vm633_vm0, %v1745_v1 }
  0xf9   : > { %v1489_v2 = vpop.f32.mrb[0].mxu0  ;;  %v1561_v3 = vpop.f32.mrb[0].mxu1 }
  0xfa   : > { %v1490_v4 = vpop.f32.mrb[1].mxu0  ;;  %v1562_v5 = vpop.f32.mrb[1].mxu1 }
  0xfb   : > { %v1491_v6 = vadd.f32 %v1490_v4, %v1489_v2  ;;  %v1492_v7 = vpop.f32.mrb[2].mxu0  ;;  %v1908_v8 = vadd.f32 %v1562_v5, %v1561_v3  ;;  %v1564_v9 = vpop.f32.mrb[2].mxu1 }
  0xfc   : > { %v1493_v10 = vpop.f32.mrb[3].mxu0  ;;  %v1565_v11 = vpop.f32.mrb[3].mxu1 }
  0xfd   : > { %v1494_v12 = vadd.f32 %v1493_v10, %v1492_v7  ;;  %v1910_v13 = vadd.f32 %v1565_v11, %v1564_v9  ;;  %v717_v54 = vadd.f32 %v1491_v6, %v1927_v50 }
  0xff   : > { %v720_v63 = vadd.f32 %v1494_v12, %v1927_v50 }
 0x101   : > { %v1495_v14 = vpop.f32.mrb[4].mxu0  ;;  %v1567_v15 = vpop.f32.mrb[4].mxu1 }
 0x102   : > { %v1496_v16 = vpop.f32.mrb[5].mxu0  ;;  %v1568_v17 = vpop.f32.mrb[5].mxu1 }
 0x103   : > { %v1497_v18 = vadd.f32 %v1496_v16, %v1495_v14  ;;  %v1498_v19 = vpop.f32.mrb[6].mxu0  ;;  %v1912_v20 = vadd.f32 %v1568_v17, %v1567_v15  ;;  %v1570_v21 = vpop.f32.mrb[6].mxu1 }
 0x104   : > { %v1499_v22 = vpop.f32.mrb[7].mxu0  ;;  %v1571_v23 = vpop.f32.mrb[7].mxu1 }
 0x105   : > { %v1500_v24 = vadd.f32 %v1499_v22, %v1498_v19  ;;  %v1914_v25 = vadd.f32 %v1571_v23, %v1570_v21  ;;  %v725_v51 = vadd.f32 %v1497_v18, %v1927_v50 }
 0x107   : > { %v728_v58 = vadd.f32 %v1500_v24, %v1927_v50 }
 0x109   : > { %v1501_v26 = vpop.f32.mrb[8].mxu0  ;;  %v1573_v27 = vpop.f32.mrb[8].mxu1 }
 0x10a   : > { %v1502_v28 = vpop.f32.mrb[9].mxu0  ;;  %v1574_v29 = vpop.f32.mrb[9].mxu1 }
 0x10b   : > { %v1503_v30 = vadd.f32 %v1502_v28, %v1501_v26  ;;  %v1504_v31 = vpop.f32.mrb[10].mxu0  ;;  %v1916_v32 = vadd.f32 %v1574_v29, %v1573_v27  ;;  %v1576_v33 = vpop.f32.mrb[10].mxu1 }
 0x10c   : > { %v1505_v34 = vpop.f32.mrb[11].mxu0  ;;  %v1577_v35 = vpop.f32.mrb[11].mxu1 }
 0x10d   : > { %v1506_v36 = vadd.f32 %v1505_v34, %v1504_v31  ;;  %v1918_v37 = vadd.f32 %v1577_v35, %v1576_v33  ;;  %v733_v11 = vadd.f32 %v1503_v30, %v1927_v50 }
 0x10f   : > { %v736_v22 = vadd.f32 %v1506_v36, %v1927_v50 }
 0x111   : > { %v1507_v38 = vpop.f32.mrb[12].mxu0  ;;  %v1579_v39 = vpop.f32.mrb[12].mxu1 }
 0x112   : > { %v1508_v40 = vpop.f32.mrb[13].mxu0  ;;  %v1580_v41 = vpop.f32.mrb[13].mxu1 }
 0x113   : > { %v1509_v42 = vadd.f32 %v1508_v40, %v1507_v38  ;;  %v1510_v43 = vpop.f32.mrb[14].mxu0  ;;  %v1920_v44 = vadd.f32 %v1580_v41, %v1579_v39  ;;  %v1582_v45 = vpop.f32.mrb[14].mxu1 }
 0x114   : > { %v1511_v46 = vpop.f32.mrb[15].mxu0  ;;  %v1583_v47 = vpop.f32.mrb[15].mxu1 }
 0x115   : > { %v1512_v48 = vadd.f32 %v1511_v46, %v1510_v43  ;;  %v1922_v49 = vadd.f32 %v1583_v47, %v1582_v45  ;;  %v741_v7 = vadd.f32 %v1509_v42, %v1927_v50 }
 0x117   : > { %v744_v16 = vadd.f32 %v1512_v48, %v1927_v50 }
 0x119   : > { %v1513_v52 = vpop.f32.mrb[16].mxu0  ;;  %v1609_v53 = vpop.f32.mrb[16].mxu1 }
 0x11a   : > { %v886_v55 = vadd.f32 %v1609_v53, %v725_v51  ;;  %v1514_v56 = vpop.f32.mrb[17].mxu0  ;;  %v877_v57 = vpop.f32.mrb[17].mxu1 }
 0x11b   : > { %v1515_v59 = vadd.f32 %v1514_v56, %v1513_v52  ;;  %v878_v60 = vadd.f32 %v877_v57, %v717_v54  ;;  %v1516_v61 = vpop.f32.mrb[18].mxu0  ;;  %v1610_v62 = vpop.f32.mrb[18].mxu1 }
 0x11c   : > { %v889_v0 = vadd.f32 %v1610_v62, %v728_v58  ;;  %v1517_v1 = vpop.f32.mrb[19].mxu0  ;;  %v880_v2 = vpop.f32.mrb[19].mxu1 }
 0x11d   : > { %v1518_v3 = vadd.f32 %v1517_v1, %v1516_v61  ;;  %v881_v4 = vadd.f32 %v880_v2, %v720_v63  ;;  %v749_v35 = vadd.f32 %v1515_v59, %v1927_v50 }
 0x11e   : > { %v1386_v5 = vpack.c.bf16 %v889_v0, %v886_v55 }
 0x11f   : > { %v1381_v6 = vpack.c.bf16 %v881_v4, %v878_v60  ;;  %v752_v46 = vadd.f32 %v1518_v3, %v1927_v50 }
 0x120   : > { %1458 = vst [vmem:[%s1937_s8 + $0x8] sm:$0xff] %v1386_v5  }
 0x121   : > { %1382 = vst [vmem:[%s1937_s8] sm:$0xff] %v1381_v6   ;;  %v1519_v9 = vpop.f32.mrb[20].mxu0  ;;  %v1613_v10 = vpop.f32.mrb[20].mxu1 }
 0x122   : > { %v902_v12 = vadd.f32 %v1613_v10, %v741_v7  ;;  %v1520_v14 = vpop.f32.mrb[21].mxu0  ;;  %v893_v15 = vpop.f32.mrb[21].mxu1 }
 0x123   : > { %v1521_v17 = vadd.f32 %v1520_v14, %v1519_v9  ;;  %v894_v18 = vadd.f32 %v893_v15, %v733_v11  ;;  %v1522_v19 = vpop.f32.mrb[22].mxu0  ;;  %v1614_v21 = vpop.f32.mrb[22].mxu1 }
 0x124   : > { %v905_v23 = vadd.f32 %v1614_v21, %v744_v16  ;;  %v1523_v24 = vpop.f32.mrb[23].mxu0  ;;  %v896_v26 = vpop.f32.mrb[23].mxu1 }
 0x125   : > { %v1524_v27 = vadd.f32 %v1523_v24, %v1522_v19  ;;  %v897_v28 = vadd.f32 %v896_v26, %v736_v22  ;;  %v757_v31 = vadd.f32 %v1521_v17, %v1927_v50 }
 0x126   : > { %v1396_v29 = vpack.c.bf16 %v905_v23, %v902_v12 }
 0x127   : > { %v1391_v30 = vpack.c.bf16 %v897_v28, %v894_v18  ;;  %v760_v40 = vadd.f32 %v1524_v27, %v1927_v50 }
 0x128   : > { %1460 = vst [vmem:[%s1937_s8 + $0x18] sm:$0xff] %v1396_v29  }
 0x129   : > { %1459 = vst [vmem:[%s1937_s8 + $0x10] sm:$0xff] %v1391_v30   ;;  %v1525_v33 = vpop.f32.mrb[24].mxu0  ;;  %v1617_v34 = vpop.f32.mrb[24].mxu1 }
 0x12a   : > { %v918_v38 = vadd.f32 %v1617_v34, %v757_v31  ;;  %v1526_v39 = vpop.f32.mrb[25].mxu0  ;;  %v909_v36 = vpop.f32.mrb[25].mxu1 }
 0x12b   : > { %v1527_v41 = vadd.f32 %v1526_v39, %v1525_v33  ;;  %v910_v42 = vadd.f32 %v909_v36, %v749_v35  ;;  %v1528_v43 = vpop.f32.mrb[26].mxu0  ;;  %v1618_v45 = vpop.f32.mrb[26].mxu1 }
 0x12c   : > { %v921_v47 = vadd.f32 %v1618_v45, %v760_v40  ;;  %v1529_v48 = vpop.f32.mrb[27].mxu0  ;;  %v912_v51 = vpop.f32.mrb[27].mxu1 }
 0x12d   : > { %v1530_v52 = vadd.f32 %v1529_v48, %v1528_v43  ;;  %v913_v53 = vadd.f32 %v912_v51, %v752_v46  ;;  %v765_v58 = vadd.f32 %v1527_v41, %v1927_v50 }
 0x12e   : > { %v1406_v54 = vpack.c.bf16 %v921_v47, %v918_v38  ;;  %v821_v47 = vadd.f32 %v1912_v20, %v1927_v50  ;;  %v816_v20 = vadd.f32 %v1910_v13, %v1927_v50 }
 0x12f   : > { %v1401_v55 = vpack.c.bf16 %v913_v53, %v910_v42  ;;  %v768_v1 = vadd.f32 %v1530_v52, %v1927_v50  ;;  %v813_v53 = vadd.f32 %v1908_v8, %v1927_v50 }
 0x130   : > { %1462 = vst [vmem:[%s1937_s8 + $0x28] sm:$0xff] %v1406_v54  }
 0x131   : > { %1461 = vst [vmem:[%s1937_s8 + $0x20] sm:$0xff] %v1401_v55   ;;  %v1531_v56 = vpop.f32.mrb[28].mxu0  ;;  %v1621_v57 = vpop.f32.mrb[28].mxu1 }
 0x132   : > { %v1532_v59 = vpop.f32.mrb[29].mxu0  ;;  %v925_v60 = vpop.f32.mrb[29].mxu1 }
 0x133   : > { %v1533_v61 = vadd.f32 %v1532_v59, %v1531_v56  ;;  %v926_v62 = vadd.f32 %v925_v60, %v765_v58  ;;  %v1534_v63 = vpop.f32.mrb[30].mxu0  ;;  %v1622_v0 = vpop.f32.mrb[30].mxu1 }
 0x134   : > { %v1535_v2 = vpop.f32.mrb[31].mxu0  ;;  %v928_v3 = vpop.f32.mrb[31].mxu1 }
 0x135   : > { %v773_v4 = vadd.f32 %v1533_v61, %v1927_v50  ;;  %v1536_v5 = vadd.f32 %v1535_v2, %v1534_v63  ;;  %v929_v6 = vadd.f32 %v928_v3, %v768_v1 }
 0x137   : > { %v934_v7 = vadd.f32 %v1621_v57, %v773_v4  ;;  %v776_v9 = vadd.f32 %v1536_v5, %v1927_v50  ;;  %v1411_v10 = vpack.c.bf16 %v929_v6, %v926_v62  ;;  %v824_v57 = vadd.f32 %v1914_v25, %v1927_v50 }
 0x139   : > { %v937_v11 = vadd.f32 %v1622_v0, %v776_v9  ;;  %1463 = vst [vmem:[%s1937_s8 + $0x30] sm:$0xff] %v1411_v10   ;;  %v1537_v12 = vpop.f32.mrb[32].mxu0  ;;  %v1625_v14 = vpop.f32.mrb[32].mxu1 }
 0x13a   : > { %v1538_v15 = vpop.f32.mrb[33].mxu0  ;;  %v941_v16 = vpop.f32.mrb[33].mxu1 }
 0x13b   : > { %v1416_v17 = vpack.c.bf16 %v937_v11, %v934_v7  ;;  %v1539_v18 = vadd.f32 %v1538_v15, %v1537_v12  ;;  %v1540_v19 = vpop.f32.mrb[34].mxu0  ;;  %v1626_v21 = vpop.f32.mrb[34].mxu1  ;;  %v837_v7 = vadd.f32 %v1920_v44, %v1927_v50  ;;  %v829_v11 = vadd.f32 %v1916_v32, %v1927_v50 }
 0x13c   : > { %v1541_v22 = vpop.f32.mrb[35].mxu0  ;;  %v944_v23 = vpop.f32.mrb[35].mxu1 }
 0x13d   : > { %1464 = vst [vmem:[%s1937_s8 + $0x38] sm:$0xff] %v1416_v17   ;;  %v781_v24 = vadd.f32 %v1539_v18, %v1927_v50  ;;  %v1542_v26 = vadd.f32 %v1541_v22, %v1540_v19  ;;  %v832_v22 = vadd.f32 %v1918_v37, %v1927_v50 }
 0x13f   : > { %v942_v27 = vadd.f32 %v941_v16, %v781_v24  ;;  %v784_v28 = vadd.f32 %v1542_v26, %v1927_v50  ;;  %v840_v16 = vadd.f32 %v1922_v49, %v1927_v50 }
 0x141   : > { %v945_v29 = vadd.f32 %v944_v23, %v784_v28  ;;  %v1543_v30 = vpop.f32.mrb[36].mxu0  ;;  %v1961_v31 = vpop.f32.mrb[36].mxu1 }
 0x142   : > { %v1544_v33 = vpop.f32.mrb[37].mxu0  ;;  %v957_v34 = vpop.f32.mrb[37].mxu1 }
 0x143   : > { %v1421_v35 = vpack.c.bf16 %v945_v29, %v942_v27  ;;  %v1545_v38 = vadd.f32 %v1544_v33, %v1543_v30  ;;  %v1546_v39 = vpop.f32.mrb[38].mxu0  ;;  %v1963_v36 = vpop.f32.mrb[38].mxu1 }
 0x144   : > { %v1547_v40 = vpop.f32.mrb[39].mxu0  ;;  %v960_v41 = vpop.f32.mrb[39].mxu1 }
 0x145   : > { %1465 = vst [vmem:[%s1937_s8 + $0x40] sm:$0xff] %v1421_v35   ;;  %v789_v42 = vadd.f32 %v1545_v38, %v1927_v50  ;;  %v1548_v43 = vadd.f32 %v1547_v40, %v1546_v39 }
 0x147   : > { %v950_v45 = vadd.f32 %v1625_v14, %v789_v42  ;;  %v792_v46 = vadd.f32 %v1548_v43, %v1927_v50 }
 0x149   : > { %v953_v48 = vadd.f32 %v1626_v21, %v792_v46  ;;  %v1549_v51 = vpop.f32.mrb[40].mxu0  ;;  %v1633_v52 = vpop.f32.mrb[40].mxu1 }
 0x14a   : > { %v982_v54 = vadd.f32 %v1633_v52, %v821_v47  ;;  %v1550_v55 = vpop.f32.mrb[41].mxu0  ;;  %v973_v56 = vpop.f32.mrb[41].mxu1 }
 0x14b   : > { %v1426_v58 = vpack.c.bf16 %v953_v48, %v950_v45  ;;  %v1551_v59 = vadd.f32 %v1550_v55, %v1549_v51  ;;  %v974_v60 = vadd.f32 %v973_v56, %v813_v53  ;;  %v1552_v61 = vpop.f32.mrb[42].mxu0  ;;  %v1634_v62 = vpop.f32.mrb[42].mxu1 }
 0x14c   : > { %v985_v63 = vadd.f32 %v1634_v62, %v824_v57  ;;  %v1553_v0 = vpop.f32.mrb[43].mxu0  ;;  %v976_v1 = vpop.f32.mrb[43].mxu1 }
 0x14d   : > { %1466 = vst [vmem:[%s1937_s8 + $0x48] sm:$0xff] %v1426_v58   ;;  %v797_v8 = vadd.f32 %v1551_v59, %v1927_v50  ;;  %v1554_v2 = vadd.f32 %v1553_v0, %v1552_v61  ;;  %v977_v3 = vadd.f32 %v976_v1, %v816_v20 }
 0x14e   : > { %v1446_v4 = vpack.c.bf16 %v985_v63, %v982_v54 }
 0x14f   : > { %v958_v25 = vadd.f32 %v957_v34, %v797_v8  ;;  %v800_v5 = vadd.f32 %v1554_v2, %v1927_v50  ;;  %v1441_v6 = vpack.c.bf16 %v977_v3, %v974_v60 }
 0x150   : > { %1470 = vst [vmem:[%s1937_s8 + $0x68] sm:$0xff] %v1446_v4  }
 0x151   : > { %v961_v9 = vadd.f32 %v960_v41, %v800_v5  ;;  %1469 = vst [vmem:[%s1937_s8 + $0x60] sm:$0xff] %v1441_v6   ;;  %v1555_v13 = vpop.f32.mrb[44].mxu0  ;;  %v1637_v10 = vpop.f32.mrb[44].mxu1 }
 0x152   : > { %v998_v12 = vadd.f32 %v1637_v10, %v837_v7  ;;  %v1556_v14 = vpop.f32.mrb[45].mxu0  ;;  %v989_v15 = vpop.f32.mrb[45].mxu1 }
 0x153   : > { %v1431_v17 = vpack.c.bf16 %v961_v9, %v958_v25  ;;  %v1557_v18 = vadd.f32 %v1556_v14, %v1555_v13  ;;  %v990_v19 = vadd.f32 %v989_v15, %v829_v11  ;;  %v1558_v21 = vpop.f32.mrb[46].mxu0  ;;  %v1638_v44 = vpop.f32.mrb[46].mxu1 }
 0x154   : > { %v1001_v23 = vadd.f32 %v1638_v44, %v840_v16  ;;  %v1559_v24 = vpop.f32.mrb[47].mxu0  ;;  %v992_v32 = vpop.f32.mrb[47].mxu1 }
 0x155   : > { %1467 = vst [vmem:[%s1937_s8 + $0x50] sm:$0xff] %v1431_v17   ;;  %v805_v26 = vadd.f32 %v1557_v18, %v1927_v50  ;;  %v1560_v27 = vadd.f32 %v1559_v24, %v1558_v21  ;;  %v993_v28 = vadd.f32 %v992_v32, %v832_v22 }
 0x156   : > { %v1456_v49 = vpack.c.bf16 %v1001_v23, %v998_v12 }
 0x157   : > { %v966_v29 = vadd.f32 %v1961_v31, %v805_v26  ;;  %v808_v30 = vadd.f32 %v1560_v27, %v1927_v50  ;;  %v1451_v33 = vpack.c.bf16 %v993_v28, %v990_v19 }
 0x158   : > { %1472 = vst [vmem:[%s1937_s8 + $0x78] sm:$0xff] %v1456_v49  }
 0x159   : > { %v969_v34 = vadd.f32 %v1963_v36, %v808_v30  ;;  %1471 = vst [vmem:[%s1937_s8 + $0x70] sm:$0xff] %v1451_v33  }
 0x15b   : > { %v1436_v37 = vpack.c.bf16 %v969_v34, %v966_v29 }
 0x15d   : > { %1468 = vst [vmem:[%s1937_s8 + $0x58] sm:$0xff] %v1436_v37  }
 0x15e PF: > { %s13_s12 = sadd.s32 1, %s1752_s12  }
 0x15f   : > { %p10_p4 = scmp.ge.s32.totalorder %s13_s12, 4  }
 0x161   :  { %12 = sbr.rel (!%p10_p4) target bundleno = 1 (0x1), region = 62 }

// kernel: forward.63
= control target key start
LH: loop header
LB: loop body
LE: loop exit
PB: predicated region body
PF: predicated region fallthrough
CT: control target
= control target key end

     0   :  { %s1083_s12 = smov 0   ;;  %s1208_s0 = inlined_call_operand.vmem [shape: bf16[2304,64], index: 0, kind: input, shape index: {}]   ;;  %s1209_s1 = inlined_call_operand.vmem [shape: bf16[64,128], index: 1, kind: input, shape index: {}]   ;;  %s1210_s2 = inlined_call_operand.vmem [shape: f32[1,128], index: 2, kind: input, shape index: {}]   ;;  %s1211_s3 = inlined_call_operand.vmem [shape: bf16[2304,128], index: 3, kind: output, shape index: {}]  }
   0x1 LB: > { %s752_s13 = sadd.s32 4294967295, %s1061_s12   ;;  %p756_p0 = scmp.ge.s32.totalorder %s1061_s12, 1  ;;  %s1061_s12 = sphi %s1083_s12, %s13_s12  }
   0x2   : > { %p138_p1 = scmp.lt.s32.totalorder %s1061_s12, 10 }
   0x4   : > { %p139_p2 = pnand %p756_p0, %p138_p1 }
   0x5   : > { %v1035_v0 = vld [vmem:[%s1209_s1] sm:$0xff] (!%p139_p2)   ;;  %s757_s16 = sshll.u32 (!%p139_p2), %s752_s13, 5  ;;  %v1036_v1 = vld [vmem:[%s1209_s1 + $0x8] sm:$0xff] (!%p139_p2)   ;;  %v1037_v2 = vld [vmem:[%s1209_s1 + $0x10] sm:$0xff] (!%p139_p2)   ;;  %vm326_vm0 = vcmask (!%p139_p2), 523264  }
   0x6   : > { %142 = sbr.rel (%p139_p2) target bundleno = 266 (0x10a), region = 32  ;;  %p163_p3 = scmp.lt.s32.totalorder (!%p139_p2), %s757_s16, 287  ;;  %979 = vmatprep.subr.bf16.mxu0 (!%p139_p2), %v1035_v0  ;;  %1019 = vmatprep.subr.bf16.mxu1 (!%p139_p2), %v1035_v0  ;;  %v1038_v3 = vld [vmem:[%s1209_s1 + $0x18] sm:$0xff] (!%p139_p2)   ;;  %v1148_v21 = vld [vmem:[%s1210_s2] ss:$0 sm:$0xff] (!%p139_p2) }
   0x7   : > { %980 = vmatpush3.bf16.msra.mxu0 (!%p139_p2), %v1035_v0  ;;  %1023 = vmatpush3.bf16.msra.mxu1 (!%p139_p2), %v1035_v0 }
   0x8   : > { %981 = vmatprep.subr.bf16.mxu0 (!%p139_p2), %v1036_v1  ;;  %1020 = vmatprep.subr.bf16.mxu1 (!%p139_p2), %v1036_v1 }
   0xb   : > { %982 = vmatpush3.bf16.msra.mxu0 (!%p139_p2), %v1036_v1  ;;  %1024 = vmatpush3.bf16.msra.mxu1 (!%p139_p2), %v1036_v1 }
   0xc   : > { %983 = vmatprep.subr.bf16.mxu0 (!%p139_p2), %v1037_v2  ;;  %1021 = vmatprep.subr.bf16.mxu1 (!%p139_p2), %v1037_v2 }
   0xd   : > { %s1213_s16 = smov (!%p163_p3, %s757_s16), 287 }
   0xe   : > { %s758_s21 = sshll.u32 %s1213_s16, 2 }
   0xf   : > { %s1111_s26 = scalar_lea.vmem %s1208_s0, %s758_s21  ;;  %984 = vmatpush3.bf16.msra.mxu0 %v1037_v2  ;;  %1025 = vmatpush3.bf16.msra.mxu1 %v1037_v2  ;;  %s1161_s4 = scalar_lea.vmem %s1211_s3, %s758_s21 }
  0x10   : > { %v1039_v4 = vld [vmem:[%s1111_s26] sm:$0xff]   ;;  %985 = vmatprep.subr.bf16.mxu0 %v1038_v3  ;;  %1022 = vmatprep.subr.bf16.mxu1 %v1038_v3  ;;  %v1041_v6 = vld [vmem:[%s1111_s26 + $0x8] sm:$0xff]   ;;  %v1043_v8 = vld [vmem:[%s1111_s26 + $0x10] sm:$0xff]  }
  0x11   : > { %v1040_v5 = vld [vmem:[%s1111_s26 + $0x40] sm:$0xff]   ;;  %987 = vmatprep.mubr.msk.bf16.mxu0 %vm326_vm0, %v1039_v4  ;;  %v1042_v7 = vld [vmem:[%s1111_s26 + $0x48] sm:$0xff]   ;;  %v1044_v9 = vld [vmem:[%s1111_s26 + $0x50] sm:$0xff]  }
  0x12   : > { %1003 = vmatprep.mubr.msk.bf16.mxu1 %vm326_vm0, %v1040_v5  ;;  %v1045_v10 = vld [vmem:[%s1111_s26 + $0x18] sm:$0xff]   ;;  %v1047_v12 = vld [vmem:[%s1111_s26 + $0x20] sm:$0xff]   ;;  %v1049_v14 = vld [vmem:[%s1111_s26 + $0x28] sm:$0xff]  }
  0x13   : > { %986 = vmatpush3.bf16.msra.mxu0 %v1038_v3  ;;  %1026 = vmatpush3.bf16.msra.mxu1 %v1038_v3  ;;  %v1046_v11 = vld [vmem:[%s1111_s26 + $0x58] sm:$0xff]   ;;  %v1048_v13 = vld [vmem:[%s1111_s26 + $0x60] sm:$0xff]   ;;  %v1050_v15 = vld [vmem:[%s1111_s26 + $0x68] sm:$0xff]  }
  0x14   : > { %v1051_v16 = vld [vmem:[%s1111_s26 + $0x30] sm:$0xff]   ;;  %v1053_v18 = vld [vmem:[%s1111_s26 + $0x38] sm:$0xff]  }
  0x15   : > { %v1052_v17 = vld [vmem:[%s1111_s26 + $0x70] sm:$0xff]   ;;  %v1054_v19 = vld [vmem:[%s1111_s26 + $0x78] sm:$0xff]  }
  0x16   : > { %988 = vmatmul.mubr.msk.bf16.vlgmr.msra.gmra.mrb[0].mxu0 %vm326_vm0, %v1041_v6  ;;  %1004 = vmatmul.mubr.msk.bf16.vlgmr.msra.gmra.mrb[0].mxu1 %vm326_vm0, %v1042_v7 }
  0x17   : > { %991 = vmatprep.mubr.msk.bf16.mxu0 %vm326_vm0, %v1043_v8  ;;  %1007 = vmatprep.mubr.msk.bf16.mxu1 %vm326_vm0, %v1044_v9 }
  0x1e   : > { %992 = vmatmul.mubr.msk.bf16.gmra.mrb[4].mxu0 %vm326_vm0, %v1045_v10  ;;  %1008 = vmatmul.mubr.msk.bf16.gmra.mrb[4].mxu1 %vm326_vm0, %v1046_v11 }
  0x1f   : > { %995 = vmatprep.mubr.msk.bf16.mxu0 %vm326_vm0, %v1047_v12  ;;  %1011 = vmatprep.mubr.msk.bf16.mxu1 %vm326_vm0, %v1048_v13 }
  0x26   : > { %996 = vmatmul.mubr.msk.bf16.gmra.mrb[8].mxu0 %vm326_vm0, %v1049_v14  ;;  %1012 = vmatmul.mubr.msk.bf16.gmra.mrb[8].mxu1 %vm326_vm0, %v1050_v15 }
  0x27   : > { %999 = vmatprep.mubr.msk.bf16.mxu0 %vm326_vm0, %v1051_v16  ;;  %1015 = vmatprep.mubr.msk.bf16.mxu1 %vm326_vm0, %v1052_v17 }
  0x2e   : > { %1000 = vmatmul.mubr.msk.bf16.gmra.mrb[12].mxu0 %vm326_vm0, %v1053_v18  ;;  %1016 = vmatmul.mubr.msk.bf16.gmra.mrb[12].mxu1 %vm326_vm0, %v1054_v19 }
  0xe9   : > { %v989_v20 = vpop.f32.mrb[0].mxu0  ;;  %v1005_v22 = vpop.f32.mrb[0].mxu1 }
  0xea   : > { %v409_v23 = vpop.f32.mrb[1].mxu0  ;;  %v473_v24 = vpop.f32.mrb[1].mxu1  ;;  %v418_v27 = vadd.f32 %v989_v20, %v1148_v21  ;;  %v482_v28 = vadd.f32 %v1005_v22, %v1148_v21 }
  0xeb   : > { %v990_v25 = vpop.f32.mrb[2].mxu0  ;;  %v1006_v26 = vpop.f32.mrb[2].mxu1  ;;  %v410_v33 = vadd.f32 %v1148_v21, %v409_v23  ;;  %v474_v34 = vadd.f32 %v1148_v21, %v473_v24 }
  0xec   : > { %v421_v29 = vadd.f32 %v990_v25, %v1148_v21  ;;  %v485_v30 = vadd.f32 %v1006_v26, %v1148_v21  ;;  %v412_v31 = vpop.f32.mrb[3].mxu0  ;;  %v476_v32 = vpop.f32.mrb[3].mxu1 }
  0xed   : > { %v413_v35 = vadd.f32 %v1148_v21, %v412_v31  ;;  %v477_v36 = vadd.f32 %v1148_v21, %v476_v32 }
  0xee   : > { %v872_v37 = vpack.c.bf16 %v421_v29, %v418_v27  ;;  %v912_v38 = vpack.c.bf16 %v485_v30, %v482_v28 }
  0xef   : > { %v867_v39 = vpack.c.bf16 %v413_v35, %v410_v33  ;;  %v907_v40 = vpack.c.bf16 %v477_v36, %v474_v34 }
  0xf0   : > { %944 = vst [vmem:[%s1161_s4 + $0x8] sm:$0xff] %v872_v37   ;;  %952 = vst [vmem:[%s1161_s4 + $0x48] sm:$0xff] %v912_v38  }
  0xf1   : > { %868 = vst [vmem:[%s1161_s4] sm:$0xff] %v867_v39   ;;  %951 = vst [vmem:[%s1161_s4 + $0x40] sm:$0xff] %v907_v40   ;;  %v993_v41 = vpop.f32.mrb[4].mxu0  ;;  %v1009_v42 = vpop.f32.mrb[4].mxu1 }
  0xf2   : > { %v425_v43 = vpop.f32.mrb[5].mxu0  ;;  %v489_v44 = vpop.f32.mrb[5].mxu1  ;;  %v434_v47 = vadd.f32 %v993_v41, %v1148_v21  ;;  %v498_v48 = vadd.f32 %v1009_v42, %v1148_v21 }
  0xf3   : > { %v994_v45 = vpop.f32.mrb[6].mxu0  ;;  %v1010_v46 = vpop.f32.mrb[6].mxu1  ;;  %v426_v53 = vadd.f32 %v1148_v21, %v425_v43  ;;  %v490_v54 = vadd.f32 %v1148_v21, %v489_v44 }
  0xf4   : > { %v437_v49 = vadd.f32 %v994_v45, %v1148_v21  ;;  %v501_v50 = vadd.f32 %v1010_v46, %v1148_v21  ;;  %v428_v51 = vpop.f32.mrb[7].mxu0  ;;  %v492_v52 = vpop.f32.mrb[7].mxu1 }
  0xf5   : > { %v429_v55 = vadd.f32 %v1148_v21, %v428_v51  ;;  %v493_v56 = vadd.f32 %v1148_v21, %v492_v52 }
  0xf6   : > { %v882_v57 = vpack.c.bf16 %v437_v49, %v434_v47  ;;  %v922_v58 = vpack.c.bf16 %v501_v50, %v498_v48 }
  0xf7   : > { %v877_v59 = vpack.c.bf16 %v429_v55, %v426_v53  ;;  %v917_v60 = vpack.c.bf16 %v493_v56, %v490_v54 }
  0xf8   : > { %946 = vst [vmem:[%s1161_s4 + $0x18] sm:$0xff] %v882_v57   ;;  %954 = vst [vmem:[%s1161_s4 + $0x58] sm:$0xff] %v922_v58  }
  0xf9   : > { %945 = vst [vmem:[%s1161_s4 + $0x10] sm:$0xff] %v877_v59   ;;  %953 = vst [vmem:[%s1161_s4 + $0x50] sm:$0xff] %v917_v60   ;;  %v997_v61 = vpop.f32.mrb[8].mxu0  ;;  %v1013_v62 = vpop.f32.mrb[8].mxu1 }
  0xfa   : > { %v441_v63 = vpop.f32.mrb[9].mxu0  ;;  %v505_v0 = vpop.f32.mrb[9].mxu1  ;;  %v450_v3 = vadd.f32 %v997_v61, %v1148_v21  ;;  %v514_v4 = vadd.f32 %v1013_v62, %v1148_v21 }
  0xfb   : > { %v998_v1 = vpop.f32.mrb[10].mxu0  ;;  %v1014_v2 = vpop.f32.mrb[10].mxu1  ;;  %v442_v9 = vadd.f32 %v1148_v21, %v441_v63  ;;  %v506_v10 = vadd.f32 %v1148_v21, %v505_v0 }
  0xfc   : > { %v453_v5 = vadd.f32 %v998_v1, %v1148_v21  ;;  %v517_v6 = vadd.f32 %v1014_v2, %v1148_v21  ;;  %v444_v7 = vpop.f32.mrb[11].mxu0  ;;  %v508_v8 = vpop.f32.mrb[11].mxu1 }
  0xfd   : > { %v445_v11 = vadd.f32 %v1148_v21, %v444_v7  ;;  %v509_v12 = vadd.f32 %v1148_v21, %v508_v8 }
  0xfe   : > { %v892_v13 = vpack.c.bf16 %v453_v5, %v450_v3  ;;  %v932_v14 = vpack.c.bf16 %v517_v6, %v514_v4 }
  0xff   : > { %v887_v15 = vpack.c.bf16 %v445_v11, %v442_v9  ;;  %v927_v16 = vpack.c.bf16 %v509_v12, %v506_v10 }
 0x100   : > { %948 = vst [vmem:[%s1161_s4 + $0x28] sm:$0xff] %v892_v13   ;;  %956 = vst [vmem:[%s1161_s4 + $0x68] sm:$0xff] %v932_v14  }
 0x101   : > { %947 = vst [vmem:[%s1161_s4 + $0x20] sm:$0xff] %v887_v15   ;;  %955 = vst [vmem:[%s1161_s4 + $0x60] sm:$0xff] %v927_v16   ;;  %v1001_v17 = vpop.f32.mrb[12].mxu0  ;;  %v1017_v18 = vpop.f32.mrb[12].mxu1 }
 0x102   : > { %v457_v19 = vpop.f32.mrb[13].mxu0  ;;  %v521_v20 = vpop.f32.mrb[13].mxu1  ;;  %v466_v24 = vadd.f32 %v1001_v17, %v1148_v21  ;;  %v530_v25 = vadd.f32 %v1017_v18, %v1148_v21 }
 0x103   : > { %v1002_v22 = vpop.f32.mrb[14].mxu0  ;;  %v1018_v23 = vpop.f32.mrb[14].mxu1  ;;  %v458_v30 = vadd.f32 %v1148_v21, %v457_v19  ;;  %v522_v31 = vadd.f32 %v1148_v21, %v521_v20 }
 0x104   : > { %v469_v26 = vadd.f32 %v1002_v22, %v1148_v21  ;;  %v533_v27 = vadd.f32 %v1018_v23, %v1148_v21  ;;  %v460_v28 = vpop.f32.mrb[15].mxu0  ;;  %v524_v29 = vpop.f32.mrb[15].mxu1 }
 0x105   : > { %v461_v32 = vadd.f32 %v1148_v21, %v460_v28  ;;  %v525_v33 = vadd.f32 %v1148_v21, %v524_v29 }
 0x106   : > { %v902_v34 = vpack.c.bf16 %v469_v26, %v466_v24  ;;  %v942_v35 = vpack.c.bf16 %v533_v27, %v530_v25 }
 0x107   : > { %v897_v36 = vpack.c.bf16 %v461_v32, %v458_v30  ;;  %v937_v37 = vpack.c.bf16 %v525_v33, %v522_v31 }
 0x108   : > { %950 = vst [vmem:[%s1161_s4 + $0x38] sm:$0xff] %v902_v34   ;;  %958 = vst [vmem:[%s1161_s4 + $0x78] sm:$0xff] %v942_v35  }
 0x109   : > { %949 = vst [vmem:[%s1161_s4 + $0x30] sm:$0xff] %v897_v36   ;;  %957 = vst [vmem:[%s1161_s4 + $0x70] sm:$0xff] %v937_v37  }
 0x10a PF: > { %s13_s12 = sadd.s32 1, %s1061_s12  }
 0x10b   : > { %p10_p4 = scmp.ge.s32.totalorder %s13_s12, 11  }
 0x10d   :  { %12 = sbr.rel (!%p10_p4) target bundleno = 1 (0x1), region = 62 }

// kernel: forward.64
= control target key start
LH: loop header
LB: loop body
LE: loop exit
PB: predicated region body
PF: predicated region fallthrough
CT: control target
= control target key end

     0   :  { %s1202_s12 = smov 0   ;;  %s1355_s0 = inlined_call_operand.vmem [shape: bf16[2304,144], index: 0, kind: input, shape index: {}]   ;;  %s1356_s1 = inlined_call_operand.vmem [shape: bf16[144,128], index: 1, kind: input, shape index: {}]   ;;  %s1357_s2 = inlined_call_operand.vmem [shape: f32[1,128], index: 2, kind: input, shape index: {}]   ;;  %s1358_s3 = inlined_call_operand.vmem [shape: bf16[2304,128], index: 3, kind: output, shape index: {}]  }
   0x1 LB: > { %s859_s13 = sadd.s32 4294967295, %s1179_s12   ;;  %p863_p0 = scmp.ge.s32.totalorder %s1179_s12, 1  ;;  %s1179_s12 = sphi %s1202_s12, %s13_s12  }
   0x2   : > { %p139_p1 = scmp.lt.s32.totalorder %s1179_s12, 10 }
   0x4   : > { %p140_p2 = pnand %p863_p0, %p139_p1 }
   0x5   : > { %v1116_v0 = vld [vmem:[%s1356_s1] sm:$0xff] (!%p140_p2)   ;;  %v1181_v1 = vmov (!%p140_p2), 0   ;;  %s864_s16 = sshll.u32 (!%p140_p2), %s859_s13, 5  ;;  %v1117_v2 = vld [vmem:[%s1356_s1 + $0x8] sm:$0xff] (!%p140_p2)   ;;  %v1118_v3 = vld [vmem:[%s1356_s1 + $0x10] sm:$0xff] (!%p140_p2)   ;;  %vm433_vm0 = vcmask (!%p140_p2), 130048  }
   0x6   : > { %143 = sbr.rel (%p140_p2) target bundleno = 317 (0x13d), region = 32  ;;  %482 = vmatprep.subr.bf16.mxu0 (!%p140_p2), %v1181_v1  ;;  %1089 = vmatprep.subr.bf16.mxu1 (!%p140_p2), %v1181_v1  ;;  %p165_p3 = scmp.lt.s32.totalorder (!%p140_p2), %s864_s16, 287  ;;  %v1119_v4 = vld [vmem:[%s1356_s1 + $0x18] sm:$0xff] (!%p140_p2)   ;;  %v1120_v7 = vld [vmem:[%s1356_s1 + $0x20] sm:$0xff] (!%p140_p2)   ;;  %v1121_v8 = vld [vmem:[%s1356_s1 + $0x28] sm:$0xff] (!%p140_p2)  }
   0x7   : > { %483 = vmatpush1.bf16.msra.mxu0 (!%p140_p2), %v1116_v0  ;;  %1098 = vmatpush1.bf16.msra.mxu1 (!%p140_p2), %v1116_v0  ;;  %v1122_v9 = vld [vmem:[%s1356_s1 + $0x30] sm:$0xff] (!%p140_p2)   ;;  %v1123_v10 = vld [vmem:[%s1356_s1 + $0x38] sm:$0xff] (!%p140_p2)   ;;  %v1124_v11 = vld [vmem:[%s1356_s1 + $0x40] sm:$0xff] (!%p140_p2)  }
   0x8   : > { %484 = vmatprep.subr.bf16.mxu0 (!%p140_p2), %v1181_v1  ;;  %1090 = vmatprep.subr.bf16.mxu1 (!%p140_p2), %v1181_v1  ;;  %v1296_v42 = vld [vmem:[%s1357_s2] ss:$0 sm:$0xff] (!%p140_p2) }
   0xb   : > { %485 = vmatpush1.bf16.msra.mxu0 (!%p140_p2), %v1117_v2  ;;  %1099 = vmatpush1.bf16.msra.mxu1 (!%p140_p2), %v1117_v2 }
   0xc   : > { %486 = vmatprep.subr.bf16.mxu0 (!%p140_p2), %v1181_v1  ;;  %1091 = vmatprep.subr.bf16.mxu1 (!%p140_p2), %v1181_v1 }
   0xd   : > { %s1360_s16 = smov (!%p165_p3, %s864_s16), 287 }
   0xe   : > { %s961_s21 = sshll.u32 %s1360_s16, 3  ;;  %s868_s13 = sshll.u32 %s1360_s16, 2 }
   0xf   : > { %s1225_s24 = scalar_lea.vmem %s1355_s0, %s961_s21  ;;  %487 = vmatpush1.bf16.msra.mxu0 %v1118_v3  ;;  %1100 = vmatpush1.bf16.msra.mxu1 %v1118_v3  ;;  %s1306_s17 = scalar_lea.vmem %s1358_s3, %s868_s13 }
  0x10   : > { %v1127_v5 = vld [vmem:[%s1225_s24 + $0x4] ss:$8 sps:$4 sm:$0xff]   ;;  %488 = vmatprep.subr.bf16.mxu0 %v1181_v1  ;;  %1092 = vmatprep.subr.bf16.mxu1 %v1181_v1  ;;  %v1125_v12 = vld [vmem:[%s1225_s24] ss:$8 sps:$4 sm:$0xff]   ;;  %v1131_v14 = vld [vmem:[%s1225_s24 + $0x14] ss:$8 sps:$4 sm:$0xff]  }
  0x11   : > { %v1130_v6 = vld [vmem:[%s1225_s24 + $0x84] ss:$8 sps:$4 sm:$0xff]   ;;  %911 = vmatprep.mubr.msk.bf16.mxu0 %vm433_vm0, %v1127_v5  ;;  %v1128_v13 = vld [vmem:[%s1225_s24 + $0x80] ss:$8 sps:$4 sm:$0xff]   ;;  %v1133_v15 = vld [vmem:[%s1225_s24 + $0x94] ss:$8 sps:$4 sm:$0xff]  }
  0x12   : > { %919 = vmatprep.mubr.msk.bf16.mxu1 %vm433_vm0, %v1130_v6  ;;  %v1135_v16 = vld [vmem:[%s1225_s24 + $0x10] ss:$8 sps:$4 sm:$0xff]   ;;  %v1137_v18 = vld [vmem:[%s1225_s24 + $0x24] ss:$8 sps:$4 sm:$0xff]   ;;  %v1141_v20 = vld [vmem:[%s1225_s24 + $0x20] ss:$8 sps:$4 sm:$0xff]  }
  0x13   : > { %489 = vmatpush1.bf16.msra.mxu0 %v1119_v4  ;;  %1101 = vmatpush1.bf16.msra.mxu1 %v1119_v4  ;;  %v1136_v17 = vld [vmem:[%s1225_s24 + $0x90] ss:$8 sps:$4 sm:$0xff]   ;;  %v1139_v19 = vld [vmem:[%s1225_s24 + $0xa4] ss:$8 sps:$4 sm:$0xff]   ;;  %v1142_v21 = vld [vmem:[%s1225_s24 + $0xa0] ss:$8 sps:$4 sm:$0xff]  }
  0x14   : > { %490 = vmatprep.subr.bf16.mxu0 %v1181_v1  ;;  %1093 = vmatprep.subr.bf16.mxu1 %v1181_v1  ;;  %v1143_v22 = vld [vmem:[%s1225_s24 + $0x34] ss:$8 sps:$4 sm:$0xff]   ;;  %v1147_v24 = vld [vmem:[%s1225_s24 + $0x30] ss:$8 sps:$4 sm:$0xff]   ;;  %v1149_v26 = vld [vmem:[%s1225_s24 + $0x44] ss:$8 sps:$4 sm:$0xff]  }
  0x15   : > { %v1145_v23 = vld [vmem:[%s1225_s24 + $0xb4] ss:$8 sps:$4 sm:$0xff]   ;;  %v1148_v25 = vld [vmem:[%s1225_s24 + $0xb0] ss:$8 sps:$4 sm:$0xff]   ;;  %v1151_v27 = vld [vmem:[%s1225_s24 + $0xc4] ss:$8 sps:$4 sm:$0xff]  }
  0x16   : > { %v1153_v28 = vld [vmem:[%s1225_s24 + $0x40] ss:$8 sps:$4 sm:$0xff]   ;;  %v1155_v30 = vld [vmem:[%s1225_s24 + $0x54] ss:$8 sps:$4 sm:$0xff]   ;;  %v1159_v32 = vld [vmem:[%s1225_s24 + $0x50] ss:$8 sps:$4 sm:$0xff]  }
  0x17   : > { %491 = vmatpush1.bf16.msra.mxu0 %v1120_v7  ;;  %1102 = vmatpush1.bf16.msra.mxu1 %v1120_v7  ;;  %v1154_v29 = vld [vmem:[%s1225_s24 + $0xc0] ss:$8 sps:$4 sm:$0xff]   ;;  %v1157_v31 = vld [vmem:[%s1225_s24 + $0xd4] ss:$8 sps:$4 sm:$0xff]   ;;  %v1160_v33 = vld [vmem:[%s1225_s24 + $0xd0] ss:$8 sps:$4 sm:$0xff]  }
  0x18   : > { %492 = vmatprep.subr.bf16.mxu0 %v1181_v1  ;;  %1094 = vmatprep.subr.bf16.mxu1 %v1181_v1  ;;  %v1161_v34 = vld [vmem:[%s1225_s24 + $0x64] ss:$8 sps:$4 sm:$0xff]   ;;  %v1165_v36 = vld [vmem:[%s1225_s24 + $0x60] ss:$8 sps:$4 sm:$0xff]   ;;  %v1167_v38 = vld [vmem:[%s1225_s24 + $0x74] ss:$8 sps:$4 sm:$0xff]  }
  0x19   : > { %v1163_v35 = vld [vmem:[%s1225_s24 + $0xe4] ss:$8 sps:$4 sm:$0xff]   ;;  %v1166_v37 = vld [vmem:[%s1225_s24 + $0xe0] ss:$8 sps:$4 sm:$0xff]   ;;  %v1169_v39 = vld [vmem:[%s1225_s24 + $0xf4] ss:$8 sps:$4 sm:$0xff]  }
  0x1a   : > { %v1171_v40 = vld [vmem:[%s1225_s24 + $0x70] ss:$8 sps:$4 sm:$0xff]  }
  0x1b   : > { %493 = vmatpush1.bf16.msra.mxu0 %v1121_v8  ;;  %1103 = vmatpush1.bf16.msra.mxu1 %v1121_v8  ;;  %v1172_v41 = vld [vmem:[%s1225_s24 + $0xf0] ss:$8 sps:$4 sm:$0xff]  }
  0x1c   : > { %494 = vmatprep.subr.bf16.mxu0 %v1181_v1  ;;  %1095 = vmatprep.subr.bf16.mxu1 %v1181_v1 }
  0x1f   : > { %495 = vmatpush1.bf16.msra.mxu0 %v1122_v9  ;;  %1104 = vmatpush1.bf16.msra.mxu1 %v1122_v9 }
  0x20   : > { %496 = vmatprep.subr.bf16.mxu0 %v1181_v1  ;;  %1096 = vmatprep.subr.bf16.mxu1 %v1181_v1 }
  0x23   : > { %497 = vmatpush1.bf16.msra.mxu0 %v1123_v10  ;;  %1105 = vmatpush1.bf16.msra.mxu1 %v1123_v10 }
  0x24   : > { %498 = vmatprep.subr.bf16.mxu0 %v1181_v1  ;;  %1097 = vmatprep.subr.bf16.mxu1 %v1181_v1 }
  0x27   : > { %499 = vmatpush1.bf16.msra.mxu0 %v1124_v11  ;;  %1106 = vmatpush1.bf16.msra.mxu1 %v1124_v11 }
  0x2a   : > { %515 = vmatmul.mubr.bf16.vlgmr.msra.gmra.mrb[0].mxu0 %v1125_v12  ;;  %579 = vmatmul.mubr.bf16.vlgmr.msra.gmra.mrb[0].mxu1 %v1128_v13 }
  0x2b   : > { %912 = vmatprep.mubr.msk.bf16.mxu0 %vm433_vm0, %v1131_v14  ;;  %920 = vmatprep.mubr.msk.bf16.mxu1 %vm433_vm0, %v1133_v15 }
  0x32   : > { %523 = vmatmul.mubr.bf16.gmra.mrb[4].mxu0 %v1135_v16  ;;  %587 = vmatmul.mubr.bf16.gmra.mrb[4].mxu1 %v1136_v17 }
  0x33   : > { %913 = vmatprep.mubr.msk.bf16.mxu0 %vm433_vm0, %v1137_v18  ;;  %921 = vmatprep.mubr.msk.bf16.mxu1 %vm433_vm0, %v1139_v19 }
  0x3a   : > { %531 = vmatmul.mubr.bf16.gmra.mrb[8].mxu0 %v1141_v20  ;;  %595 = vmatmul.mubr.bf16.gmra.mrb[8].mxu1 %v1142_v21 }
  0x3b   : > { %914 = vmatprep.mubr.msk.bf16.mxu0 %vm433_vm0, %v1143_v22  ;;  %922 = vmatprep.mubr.msk.bf16.mxu1 %vm433_vm0, %v1145_v23 }
  0x42   : > { %539 = vmatmul.mubr.bf16.gmra.mrb[12].mxu0 %v1147_v24  ;;  %603 = vmatmul.mubr.bf16.gmra.mrb[12].mxu1 %v1148_v25 }
  0x43   : > { %915 = vmatprep.mubr.msk.bf16.mxu0 %vm433_vm0, %v1149_v26  ;;  %923 = vmatprep.mubr.msk.bf16.mxu1 %vm433_vm0, %v1151_v27 }
  0x4a   : > { %547 = vmatmul.mubr.bf16.gmra.mrb[16].mxu0 %v1153_v28  ;;  %611 = vmatmul.mubr.bf16.gmra.mrb[16].mxu1 %v1154_v29 }
  0x4b   : > { %916 = vmatprep.mubr.msk.bf16.mxu0 %vm433_vm0, %v1155_v30  ;;  %924 = vmatprep.mubr.msk.bf16.mxu1 %vm433_vm0, %v1157_v31 }
  0x52   : > { %555 = vmatmul.mubr.bf16.gmra.mrb[20].mxu0 %v1159_v32  ;;  %619 = vmatmul.mubr.bf16.gmra.mrb[20].mxu1 %v1160_v33 }
  0x53   : > { %917 = vmatprep.mubr.msk.bf16.mxu0 %vm433_vm0, %v1161_v34  ;;  %925 = vmatprep.mubr.msk.bf16.mxu1 %vm433_vm0, %v1163_v35 }
  0x5a   : > { %563 = vmatmul.mubr.bf16.gmra.mrb[24].mxu0 %v1165_v36  ;;  %627 = vmatmul.mubr.bf16.gmra.mrb[24].mxu1 %v1166_v37 }
  0x5b   : > { %918 = vmatprep.mubr.msk.bf16.mxu0 %vm433_vm0, %v1167_v38  ;;  %926 = vmatprep.mubr.msk.bf16.mxu1 %vm433_vm0, %v1169_v39 }
  0x62   : > { %571 = vmatmul.mubr.bf16.gmra.mrb[28].mxu0 %v1171_v40  ;;  %635 = vmatmul.mubr.bf16.gmra.mrb[28].mxu1 %v1172_v41 }
  0xfd   : > { %v516_v43 = vpop.f32.mrb[0].mxu0  ;;  %v580_v44 = vpop.f32.mrb[0].mxu1 }
  0xfe   : > { %v518_v45 = vpop.f32.mrb[1].mxu0  ;;  %v582_v46 = vpop.f32.mrb[1].mxu1  ;;  %v517_v49 = vadd.f32 %v1296_v42, %v516_v43  ;;  %v581_v50 = vadd.f32 %v1296_v42, %v580_v44 }
  0xff   : > { %v519_v47 = vpop.f32.mrb[2].mxu0  ;;  %v583_v48 = vpop.f32.mrb[2].mxu1 }
 0x100   : > { %v520_v51 = vadd.f32 %v1296_v42, %v519_v47  ;;  %v584_v52 = vadd.f32 %v1296_v42, %v583_v48  ;;  %v521_v53 = vpop.f32.mrb[3].mxu0  ;;  %v585_v54 = vpop.f32.mrb[3].mxu1 }
 0x102   : > { %v997_v55 = vpack.c.bf16 %v520_v51, %v517_v49  ;;  %v1037_v56 = vpack.c.bf16 %v584_v52, %v581_v50 }
 0x104   : > { %998 = vst [vmem:[%s1306_s17] sm:$0xff] %v997_v55   ;;  %1081 = vst [vmem:[%s1306_s17 + $0x40] sm:$0xff] %v1037_v56  }
 0x105   : > { %v524_v57 = vpop.f32.mrb[4].mxu0  ;;  %v588_v58 = vpop.f32.mrb[4].mxu1 }
 0x106   : > { %v526_v59 = vpop.f32.mrb[5].mxu0  ;;  %v590_v60 = vpop.f32.mrb[5].mxu1  ;;  %v525_v63 = vadd.f32 %v1296_v42, %v524_v57  ;;  %v589_v0 = vadd.f32 %v1296_v42, %v588_v58 }
 0x107   : > { %v527_v61 = vpop.f32.mrb[6].mxu0  ;;  %v591_v62 = vpop.f32.mrb[6].mxu1 }
 0x108   : > { %v528_v1 = vadd.f32 %v1296_v42, %v527_v61  ;;  %v592_v2 = vadd.f32 %v1296_v42, %v591_v62  ;;  %v529_v3 = vpop.f32.mrb[7].mxu0  ;;  %v593_v4 = vpop.f32.mrb[7].mxu1 }
 0x10a   : > { %v1002_v5 = vpack.c.bf16 %v528_v1, %v525_v63  ;;  %v1042_v6 = vpack.c.bf16 %v592_v2, %v589_v0 }
 0x10c   : > { %1074 = vst [vmem:[%s1306_s17 + $0x8] sm:$0xff] %v1002_v5   ;;  %1082 = vst [vmem:[%s1306_s17 + $0x48] sm:$0xff] %v1042_v6  }
 0x10d   : > { %v532_v7 = vpop.f32.mrb[8].mxu0  ;;  %v596_v8 = vpop.f32.mrb[8].mxu1 }
 0x10e   : > { %v534_v9 = vpop.f32.mrb[9].mxu0  ;;  %v598_v10 = vpop.f32.mrb[9].mxu1  ;;  %v533_v13 = vadd.f32 %v1296_v42, %v532_v7  ;;  %v597_v14 = vadd.f32 %v1296_v42, %v596_v8 }
 0x10f   : > { %v535_v11 = vpop.f32.mrb[10].mxu0  ;;  %v599_v12 = vpop.f32.mrb[10].mxu1 }
 0x110   : > { %v536_v15 = vadd.f32 %v1296_v42, %v535_v11  ;;  %v600_v16 = vadd.f32 %v1296_v42, %v599_v12  ;;  %v537_v17 = vpop.f32.mrb[11].mxu0  ;;  %v601_v18 = vpop.f32.mrb[11].mxu1 }
 0x112   : > { %v1007_v19 = vpack.c.bf16 %v536_v15, %v533_v13  ;;  %v1047_v20 = vpack.c.bf16 %v600_v16, %v597_v14 }
 0x114   : > { %1075 = vst [vmem:[%s1306_s17 + $0x10] sm:$0xff] %v1007_v19   ;;  %1083 = vst [vmem:[%s1306_s17 + $0x50] sm:$0xff] %v1047_v20  }
 0x115   : > { %v540_v21 = vpop.f32.mrb[12].mxu0  ;;  %v604_v22 = vpop.f32.mrb[12].mxu1 }
 0x116   : > { %v542_v23 = vpop.f32.mrb[13].mxu0  ;;  %v606_v24 = vpop.f32.mrb[13].mxu1  ;;  %v541_v27 = vadd.f32 %v1296_v42, %v540_v21  ;;  %v605_v28 = vadd.f32 %v1296_v42, %v604_v22 }
 0x117   : > { %v543_v25 = vpop.f32.mrb[14].mxu0  ;;  %v607_v26 = vpop.f32.mrb[14].mxu1 }
 0x118   : > { %v544_v29 = vadd.f32 %v1296_v42, %v543_v25  ;;  %v608_v30 = vadd.f32 %v1296_v42, %v607_v26  ;;  %v545_v31 = vpop.f32.mrb[15].mxu0  ;;  %v609_v32 = vpop.f32.mrb[15].mxu1 }
 0x11a   : > { %v1012_v33 = vpack.c.bf16 %v544_v29, %v541_v27  ;;  %v1052_v34 = vpack.c.bf16 %v608_v30, %v605_v28 }
 0x11c   : > { %1076 = vst [vmem:[%s1306_s17 + $0x18] sm:$0xff] %v1012_v33   ;;  %1084 = vst [vmem:[%s1306_s17 + $0x58] sm:$0xff] %v1052_v34  }
 0x11d   : > { %v548_v35 = vpop.f32.mrb[16].mxu0  ;;  %v612_v36 = vpop.f32.mrb[16].mxu1 }
 0x11e   : > { %v550_v37 = vpop.f32.mrb[17].mxu0  ;;  %v614_v38 = vpop.f32.mrb[17].mxu1  ;;  %v549_v41 = vadd.f32 %v1296_v42, %v548_v35  ;;  %v613_v43 = vadd.f32 %v1296_v42, %v612_v36 }
 0x11f   : > { %v551_v39 = vpop.f32.mrb[18].mxu0  ;;  %v615_v40 = vpop.f32.mrb[18].mxu1 }
 0x120   : > { %v552_v44 = vadd.f32 %v1296_v42, %v551_v39  ;;  %v616_v45 = vadd.f32 %v1296_v42, %v615_v40  ;;  %v553_v46 = vpop.f32.mrb[19].mxu0  ;;  %v617_v47 = vpop.f32.mrb[19].mxu1 }
 0x122   : > { %v1017_v48 = vpack.c.bf16 %v552_v44, %v549_v41  ;;  %v1057_v49 = vpack.c.bf16 %v616_v45, %v613_v43 }
 0x124   : > { %1077 = vst [vmem:[%s1306_s17 + $0x20] sm:$0xff] %v1017_v48   ;;  %1085 = vst [vmem:[%s1306_s17 + $0x60] sm:$0xff] %v1057_v49  }
 0x125   : > { %v556_v50 = vpop.f32.mrb[20].mxu0  ;;  %v620_v51 = vpop.f32.mrb[20].mxu1 }
 0x126   : > { %v558_v52 = vpop.f32.mrb[21].mxu0  ;;  %v622_v53 = vpop.f32.mrb[21].mxu1  ;;  %v557_v56 = vadd.f32 %v1296_v42, %v556_v50  ;;  %v621_v57 = vadd.f32 %v1296_v42, %v620_v51 }
 0x127   : > { %v559_v54 = vpop.f32.mrb[22].mxu0  ;;  %v623_v55 = vpop.f32.mrb[22].mxu1 }
 0x128   : > { %v560_v58 = vadd.f32 %v1296_v42, %v559_v54  ;;  %v624_v59 = vadd.f32 %v1296_v42, %v623_v55  ;;  %v561_v60 = vpop.f32.mrb[23].mxu0  ;;  %v625_v61 = vpop.f32.mrb[23].mxu1 }
 0x12a   : > { %v1022_v62 = vpack.c.bf16 %v560_v58, %v557_v56  ;;  %v1062_v63 = vpack.c.bf16 %v624_v59, %v621_v57 }
 0x12c   : > { %1078 = vst [vmem:[%s1306_s17 + $0x28] sm:$0xff] %v1022_v62   ;;  %1086 = vst [vmem:[%s1306_s17 + $0x68] sm:$0xff] %v1062_v63  }
 0x12d   : > { %v564_v0 = vpop.f32.mrb[24].mxu0  ;;  %v628_v1 = vpop.f32.mrb[24].mxu1 }
 0x12e   : > { %v566_v2 = vpop.f32.mrb[25].mxu0  ;;  %v630_v3 = vpop.f32.mrb[25].mxu1  ;;  %v565_v6 = vadd.f32 %v1296_v42, %v564_v0  ;;  %v629_v7 = vadd.f32 %v1296_v42, %v628_v1 }
 0x12f   : > { %v567_v4 = vpop.f32.mrb[26].mxu0  ;;  %v631_v5 = vpop.f32.mrb[26].mxu1 }
 0x130   : > { %v568_v8 = vadd.f32 %v1296_v42, %v567_v4  ;;  %v632_v9 = vadd.f32 %v1296_v42, %v631_v5  ;;  %v569_v10 = vpop.f32.mrb[27].mxu0  ;;  %v633_v11 = vpop.f32.mrb[27].mxu1 }
 0x132   : > { %v1027_v12 = vpack.c.bf16 %v568_v8, %v565_v6  ;;  %v1067_v13 = vpack.c.bf16 %v632_v9, %v629_v7 }
 0x134   : > { %1079 = vst [vmem:[%s1306_s17 + $0x30] sm:$0xff] %v1027_v12   ;;  %1087 = vst [vmem:[%s1306_s17 + $0x70] sm:$0xff] %v1067_v13  }
 0x135   : > { %v572_v14 = vpop.f32.mrb[28].mxu0  ;;  %v636_v15 = vpop.f32.mrb[28].mxu1 }
 0x136   : > { %v574_v16 = vpop.f32.mrb[29].mxu0  ;;  %v638_v17 = vpop.f32.mrb[29].mxu1  ;;  %v573_v20 = vadd.f32 %v1296_v42, %v572_v14  ;;  %v637_v21 = vadd.f32 %v1296_v42, %v636_v15 }
 0x137   : > { %v575_v18 = vpop.f32.mrb[30].mxu0  ;;  %v639_v19 = vpop.f32.mrb[30].mxu1 }
 0x138   : > { %v576_v22 = vadd.f32 %v1296_v42, %v575_v18  ;;  %v640_v23 = vadd.f32 %v1296_v42, %v639_v19  ;;  %v577_v24 = vpop.f32.mrb[31].mxu0  ;;  %v641_v25 = vpop.f32.mrb[31].mxu1 }
 0x13a   : > { %v1032_v26 = vpack.c.bf16 %v576_v22, %v573_v20  ;;  %v1072_v27 = vpack.c.bf16 %v640_v23, %v637_v21 }
 0x13c   : > { %1080 = vst [vmem:[%s1306_s17 + $0x38] sm:$0xff] %v1032_v26   ;;  %1088 = vst [vmem:[%s1306_s17 + $0x78] sm:$0xff] %v1072_v27  }
 0x13d PF: > { %s13_s12 = sadd.s32 1, %s1179_s12  }
 0x13e   : > { %p10_p4 = scmp.ge.s32.totalorder %s13_s12, 11  }
 0x140   :  { %12 = sbr.rel (!%p10_p4) target bundleno = 1 (0x1), region = 62 }

// kernel: forward.67
= control target key start
LH: loop header
LB: loop body
LE: loop exit
PB: predicated region body
PF: predicated region fallthrough
CT: control target
= control target key end

     0   :  { %s1038_s12 = smov 0   ;;  %s1154_s0 = inlined_call_operand.vmem [shape: bf16[2560,16], index: 0, kind: input, shape index: {}]   ;;  %s1155_s1 = inlined_call_operand.vmem [shape: bf16[16,128], index: 1, kind: input, shape index: {}]   ;;  %s1156_s2 = inlined_call_operand.vmem [shape: f32[1,128], index: 2, kind: input, shape index: {}]   ;;  %s1157_s3 = inlined_call_operand.vmem [shape: bf16[2560,128], index: 3, kind: output, shape index: {}]  }
   0x1 LB: > { %s728_s13 = sadd.s32 4294967295, %s1016_s12   ;;  %p732_p0 = scmp.ge.s32.totalorder %s1016_s12, 1  ;;  %s1016_s12 = sphi %s1038_s12, %s13_s12  }
   0x2   : > { %p138_p1 = scmp.lt.s32.totalorder %s1016_s12, 11 }
   0x4   : > { %p139_p2 = pnand %p732_p0, %p138_p1 }
   0x5   : > { %v993_v0 = vld [vmem:[%s1155_s1] sm:$0xff] (!%p139_p2)   ;;  %s733_s16 = sshll.u32 (!%p139_p2), %s728_s13, 5  ;;  %vm302_vm0 = vcmask (!%p139_p2), 130048  }
   0x6   : > { %142 = sbr.rel (%p139_p2) target bundleno = 263 (0x107), region = 32  ;;  %p163_p3 = scmp.lt.s32.totalorder (!%p139_p2), %s733_s16, 319  ;;  %949 = vmatprep.subr.bf16.mxu0 (!%p139_p2), %v993_v0  ;;  %983 = vmatprep.subr.bf16.mxu1 (!%p139_p2), %v993_v0  ;;  %v1094_v18 = vld [vmem:[%s1156_s2] ss:$0 sm:$0xff] (!%p139_p2) }
   0x7   : > { %950 = vmatpush3.bf16.msra.mxu0 (!%p139_p2), %v993_v0  ;;  %984 = vmatpush3.bf16.msra.mxu1 (!%p139_p2), %v993_v0 }
   0xd   : > { %s1159_s16 = smov (!%p163_p3, %s733_s16), 319 }
   0xe   : > { %s734_s17 = sshll.u32 %s1159_s16, 2 }
   0xf   : > { %s1057_s20 = scalar_lea.vmem %s1154_s0, %s734_s17  ;;  %s1105_s25 = scalar_lea.vmem %s1157_s3, %s734_s17 }
  0x10   : > { %v994_v1 = vld [vmem:[%s1057_s20] sm:$0xff]   ;;  %v996_v3 = vld [vmem:[%s1057_s20 + $0x8] sm:$0xff]   ;;  %v998_v5 = vld [vmem:[%s1057_s20 + $0x10] sm:$0xff]  }
  0x11   : > { %v995_v2 = vld [vmem:[%s1057_s20 + $0x40] sm:$0xff]   ;;  %951 = vmatprep.mubr.msk.bf16.mxu0 %vm302_vm0, %v994_v1  ;;  %v997_v4 = vld [vmem:[%s1057_s20 + $0x48] sm:$0xff]   ;;  %v999_v6 = vld [vmem:[%s1057_s20 + $0x50] sm:$0xff]  }
  0x12   : > { %967 = vmatprep.mubr.msk.bf16.mxu1 %vm302_vm0, %v995_v2  ;;  %952 = vmatmul.mubr.msk.bf16.vlgmr.msra.gmra.mrb[0].mxu0 %vm302_vm0, %v996_v3  ;;  %v1000_v7 = vld [vmem:[%s1057_s20 + $0x18] sm:$0xff]   ;;  %v1002_v9 = vld [vmem:[%s1057_s20 + $0x20] sm:$0xff]   ;;  %v1004_v11 = vld [vmem:[%s1057_s20 + $0x28] sm:$0xff]  }
  0x13   : > { %968 = vmatmul.mubr.msk.bf16.vlgmr.msra.gmra.mrb[0].mxu1 %vm302_vm0, %v997_v4  ;;  %955 = vmatprep.mubr.msk.bf16.mxu0 %vm302_vm0, %v998_v5  ;;  %v1001_v8 = vld [vmem:[%s1057_s20 + $0x58] sm:$0xff]   ;;  %v1003_v10 = vld [vmem:[%s1057_s20 + $0x60] sm:$0xff]   ;;  %v1005_v12 = vld [vmem:[%s1057_s20 + $0x68] sm:$0xff]  }
  0x14   : > { %971 = vmatprep.mubr.msk.bf16.mxu1 %vm302_vm0, %v999_v6  ;;  %v1006_v13 = vld [vmem:[%s1057_s20 + $0x30] sm:$0xff]   ;;  %v1008_v15 = vld [vmem:[%s1057_s20 + $0x38] sm:$0xff]  }
  0x15   : > { %v1007_v14 = vld [vmem:[%s1057_s20 + $0x70] sm:$0xff]   ;;  %v1009_v16 = vld [vmem:[%s1057_s20 + $0x78] sm:$0xff]  }
  0x1a   : > { %956 = vmatmul.mubr.msk.bf16.gmra.mrb[4].mxu0 %vm302_vm0, %v1000_v7 }
  0x1b   : > { %972 = vmatmul.mubr.msk.bf16.gmra.mrb[4].mxu1 %vm302_vm0, %v1001_v8  ;;  %959 = vmatprep.mubr.msk.bf16.mxu0 %vm302_vm0, %v1002_v9 }
  0x1c   : > { %975 = vmatprep.mubr.msk.bf16.mxu1 %vm302_vm0, %v1003_v10 }
  0x22   : > { %960 = vmatmul.mubr.msk.bf16.gmra.mrb[8].mxu0 %vm302_vm0, %v1004_v11 }
  0x23   : > { %976 = vmatmul.mubr.msk.bf16.gmra.mrb[8].mxu1 %vm302_vm0, %v1005_v12  ;;  %963 = vmatprep.mubr.msk.bf16.mxu0 %vm302_vm0, %v1006_v13 }
  0x24   : > { %979 = vmatprep.mubr.msk.bf16.mxu1 %vm302_vm0, %v1007_v14 }
  0x2a   : > { %964 = vmatmul.mubr.msk.bf16.gmra.mrb[12].mxu0 %vm302_vm0, %v1008_v15 }
  0x2b   : > { %980 = vmatmul.mubr.msk.bf16.gmra.mrb[12].mxu1 %vm302_vm0, %v1009_v16 }
  0xe5   : > { %v953_v17 = vpop.f32.mrb[0].mxu0 }
  0xe6   : > { %v969_v19 = vpop.f32.mrb[0].mxu1  ;;  %v385_v20 = vpop.f32.mrb[1].mxu0  ;;  %v394_v23 = vadd.f32 %v953_v17, %v1094_v18 }
  0xe7   : > { %v449_v21 = vpop.f32.mrb[1].mxu1  ;;  %v954_v22 = vpop.f32.mrb[2].mxu0  ;;  %v458_v27 = vadd.f32 %v969_v19, %v1094_v18  ;;  %v386_v28 = vadd.f32 %v1094_v18, %v385_v20 }
  0xe8   : > { %v397_v24 = vadd.f32 %v954_v22, %v1094_v18  ;;  %v970_v25 = vpop.f32.mrb[2].mxu1  ;;  %v388_v26 = vpop.f32.mrb[3].mxu0  ;;  %v450_v32 = vadd.f32 %v1094_v18, %v449_v21 }
  0xe9   : > { %v461_v29 = vadd.f32 %v970_v25, %v1094_v18  ;;  %v389_v30 = vadd.f32 %v1094_v18, %v388_v26  ;;  %v452_v31 = vpop.f32.mrb[3].mxu1 }
  0xea   : > { %v845_v33 = vpack.c.bf16 %v397_v24, %v394_v23  ;;  %v453_v34 = vadd.f32 %v1094_v18, %v452_v31 }
  0xeb   : > { %v885_v35 = vpack.c.bf16 %v461_v29, %v458_v27  ;;  %v840_v36 = vpack.c.bf16 %v389_v30, %v386_v28 }
  0xec   : > { %917 = vst [vmem:[%s1105_s25 + $0x8] sm:$0xff] %v845_v33   ;;  %v880_v37 = vpack.c.bf16 %v453_v34, %v450_v32 }
  0xed   : > { %925 = vst [vmem:[%s1105_s25 + $0x48] sm:$0xff] %v885_v35   ;;  %841 = vst [vmem:[%s1105_s25] sm:$0xff] %v840_v36   ;;  %v957_v38 = vpop.f32.mrb[4].mxu0 }
  0xee   : > { %924 = vst [vmem:[%s1105_s25 + $0x40] sm:$0xff] %v880_v37   ;;  %v973_v39 = vpop.f32.mrb[4].mxu1  ;;  %v401_v40 = vpop.f32.mrb[5].mxu0  ;;  %v410_v43 = vadd.f32 %v957_v38, %v1094_v18 }
  0xef   : > { %v465_v41 = vpop.f32.mrb[5].mxu1  ;;  %v958_v42 = vpop.f32.mrb[6].mxu0  ;;  %v474_v47 = vadd.f32 %v973_v39, %v1094_v18  ;;  %v402_v48 = vadd.f32 %v1094_v18, %v401_v40 }
  0xf0   : > { %v413_v44 = vadd.f32 %v958_v42, %v1094_v18  ;;  %v974_v45 = vpop.f32.mrb[6].mxu1  ;;  %v404_v46 = vpop.f32.mrb[7].mxu0  ;;  %v466_v52 = vadd.f32 %v1094_v18, %v465_v41 }
  0xf1   : > { %v477_v49 = vadd.f32 %v974_v45, %v1094_v18  ;;  %v405_v50 = vadd.f32 %v1094_v18, %v404_v46  ;;  %v468_v51 = vpop.f32.mrb[7].mxu1 }
  0xf2   : > { %v855_v53 = vpack.c.bf16 %v413_v44, %v410_v43  ;;  %v469_v54 = vadd.f32 %v1094_v18, %v468_v51 }
  0xf3   : > { %v895_v55 = vpack.c.bf16 %v477_v49, %v474_v47  ;;  %v850_v56 = vpack.c.bf16 %v405_v50, %v402_v48 }
  0xf4   : > { %919 = vst [vmem:[%s1105_s25 + $0x18] sm:$0xff] %v855_v53   ;;  %v890_v57 = vpack.c.bf16 %v469_v54, %v466_v52 }
  0xf5   : > { %927 = vst [vmem:[%s1105_s25 + $0x58] sm:$0xff] %v895_v55   ;;  %918 = vst [vmem:[%s1105_s25 + $0x10] sm:$0xff] %v850_v56   ;;  %v961_v58 = vpop.f32.mrb[8].mxu0 }
  0xf6   : > { %926 = vst [vmem:[%s1105_s25 + $0x50] sm:$0xff] %v890_v57   ;;  %v977_v59 = vpop.f32.mrb[8].mxu1  ;;  %v417_v60 = vpop.f32.mrb[9].mxu0  ;;  %v426_v63 = vadd.f32 %v961_v58, %v1094_v18 }
  0xf7   : > { %v481_v61 = vpop.f32.mrb[9].mxu1  ;;  %v962_v62 = vpop.f32.mrb[10].mxu0  ;;  %v490_v3 = vadd.f32 %v977_v59, %v1094_v18  ;;  %v418_v4 = vadd.f32 %v1094_v18, %v417_v60 }
  0xf8   : > { %v429_v0 = vadd.f32 %v962_v62, %v1094_v18  ;;  %v978_v1 = vpop.f32.mrb[10].mxu1  ;;  %v420_v2 = vpop.f32.mrb[11].mxu0  ;;  %v482_v8 = vadd.f32 %v1094_v18, %v481_v61 }
  0xf9   : > { %v493_v5 = vadd.f32 %v978_v1, %v1094_v18  ;;  %v421_v6 = vadd.f32 %v1094_v18, %v420_v2  ;;  %v484_v7 = vpop.f32.mrb[11].mxu1 }
  0xfa   : > { %v865_v9 = vpack.c.bf16 %v429_v0, %v426_v63  ;;  %v485_v10 = vadd.f32 %v1094_v18, %v484_v7 }
  0xfb   : > { %v905_v11 = vpack.c.bf16 %v493_v5, %v490_v3  ;;  %v860_v12 = vpack.c.bf16 %v421_v6, %v418_v4 }
  0xfc   : > { %921 = vst [vmem:[%s1105_s25 + $0x28] sm:$0xff] %v865_v9   ;;  %v900_v13 = vpack.c.bf16 %v485_v10, %v482_v8 }
  0xfd   : > { %929 = vst [vmem:[%s1105_s25 + $0x68] sm:$0xff] %v905_v11   ;;  %920 = vst [vmem:[%s1105_s25 + $0x20] sm:$0xff] %v860_v12   ;;  %v965_v14 = vpop.f32.mrb[12].mxu0 }
  0xfe   : > { %928 = vst [vmem:[%s1105_s25 + $0x60] sm:$0xff] %v900_v13   ;;  %v981_v15 = vpop.f32.mrb[12].mxu1  ;;  %v433_v16 = vpop.f32.mrb[13].mxu0  ;;  %v442_v20 = vadd.f32 %v965_v14, %v1094_v18 }
  0xff   : > { %v497_v17 = vpop.f32.mrb[13].mxu1  ;;  %v966_v19 = vpop.f32.mrb[14].mxu0  ;;  %v506_v24 = vadd.f32 %v981_v15, %v1094_v18  ;;  %v434_v25 = vadd.f32 %v1094_v18, %v433_v16 }
 0x100   : > { %v445_v21 = vadd.f32 %v966_v19, %v1094_v18  ;;  %v982_v22 = vpop.f32.mrb[14].mxu1  ;;  %v436_v23 = vpop.f32.mrb[15].mxu0  ;;  %v498_v29 = vadd.f32 %v1094_v18, %v497_v17 }
 0x101   : > { %v509_v26 = vadd.f32 %v982_v22, %v1094_v18  ;;  %v437_v27 = vadd.f32 %v1094_v18, %v436_v23  ;;  %v500_v28 = vpop.f32.mrb[15].mxu1 }
 0x102   : > { %v875_v30 = vpack.c.bf16 %v445_v21, %v442_v20  ;;  %v501_v31 = vadd.f32 %v1094_v18, %v500_v28 }
 0x103   : > { %v915_v32 = vpack.c.bf16 %v509_v26, %v506_v24  ;;  %v870_v33 = vpack.c.bf16 %v437_v27, %v434_v25 }
 0x104   : > { %923 = vst [vmem:[%s1105_s25 + $0x38] sm:$0xff] %v875_v30   ;;  %v910_v34 = vpack.c.bf16 %v501_v31, %v498_v29 }
 0x105   : > { %931 = vst [vmem:[%s1105_s25 + $0x78] sm:$0xff] %v915_v32   ;;  %922 = vst [vmem:[%s1105_s25 + $0x30] sm:$0xff] %v870_v33  }
 0x106   : > { %930 = vst [vmem:[%s1105_s25 + $0x70] sm:$0xff] %v910_v34  }
 0x107 PF: > { %s13_s12 = sadd.s32 1, %s1016_s12  }
 0x108   : > { %p10_p4 = scmp.ge.s32.totalorder %s13_s12, 12  }
 0x10a   :  { %12 = sbr.rel (!%p10_p4) target bundleno = 1 (0x1), region = 62 }

// kernel: forward.68
= control target key start
LH: loop header
LB: loop body
LE: loop exit
PB: predicated region body
PF: predicated region fallthrough
CT: control target
= control target key end

     0   :  { %s202_s0 = inlined_call_operand.vmem [shape: bf16[35,128], index: 0, kind: input, shape index: {}]   ;;  %s203_s1 = inlined_call_operand.vmem [shape: f32[35,128], index: 1, kind: input, shape index: {}]   ;;  %s204_s2 = inlined_call_operand.vmem [shape: f32[35,128], index: 2, kind: input, shape index: {}]   ;;  %s205_s3 = inlined_call_operand.vmem [shape: f32[35,128], index: 3, kind: output, shape index: {0}]   ;;  %s206_s4 = inlined_call_operand.vmem [shape: f32[35,128], index: 4, kind: output, shape index: {1}]  }
   0x1   :  { %v90_v0 = vld [vmem:[%s202_s0] sm:$0xff]   ;;  %v97_v3 = vld [vmem:[%s202_s0 + $0x8] sm:$0xff]   ;;  %v20_v6 = vld [vmem:[%s202_s0 + $0x10] sm:$0x3] }
   0x2   :  { %v91_v1 = vunpack.c.l.bf16 %v90_v0  ;;  %v92_v2 = vunpack.c.h.bf16 %v90_v0  ;;  %v95_v4 = vunpack.c.l.bf16 %v97_v3  ;;  %v96_v5 = vunpack.c.h.bf16 %v97_v3  ;;  %v51_v28 = vld [vmem:[%s203_s1] sm:$0xff]  ;;  %v52_v30 = vld [vmem:[%s203_s1 + $0x8] sm:$0xff]  ;;  %v53_v33 = vld [vmem:[%s203_s1 + $0x10] sm:$0xff] }
   0x3   :  { %v25_v9 = vunpack.c.l.bf16 %v20_v6  ;;  %v66_v29 = vld [vmem:[%s204_s2] sm:$0xff]  ;;  %v67_v31 = vld [vmem:[%s204_s2 + $0x8] sm:$0xff]  ;;  %v68_v34 = vld [vmem:[%s204_s2 + $0x10] sm:$0xff] }
   0x4   :  { %v26_v7 = vmul.f32 20.0, %v91_v1  ;;  %v27_v8 = vmul.f32 20.0, %v92_v2  ;;  %v28_v10 = vmul.f32 20.0, %v95_v4  ;;  %v29_v11 = vmul.f32 20.0, %v96_v5  ;;  %v54_v37 = vld [vmem:[%s203_s1 + $0x18] sm:$0xff] }
   0x5   :  { %v30_v14 = vmul.f32 20.0, %v25_v9  ;;  %v69_v39 = vld [vmem:[%s204_s2 + $0x18] sm:$0xff]  ;;  %v55_v42 = vld [vmem:[%s203_s1 + $0x20] sm:$0x7] }
   0x6   :  { %v31_v12 = vadd.f32 -30.0, %v26_v7  ;;  %v32_v13 = vadd.f32 -30.0, %v27_v8  ;;  %v33_v15 = vadd.f32 -30.0, %v28_v10  ;;  %v34_v16 = vadd.f32 -30.0, %v29_v11  ;;  %v70_v44 = vld [vmem:[%s204_s2 + $0x20] sm:$0x7] }
   0x7   :  { %v35_v19 = vadd.f32 -30.0, %v30_v14 }
   0x8   :  { %v36_v17 = vmul.f32 0.115129255, %v31_v12  ;;  %v37_v18 = vmul.f32 0.115129255, %v32_v13  ;;  %v38_v20 = vmul.f32 0.115129255, %v33_v15 }
   0x9   :  { %v39_v21 = vmul.f32 0.115129255, %v34_v16  ;;  %v40_v24 = vmul.f32 0.115129255, %v35_v19 }
   0xa   :  { %v41_v22 = vmul.f32 1.442695, %v36_v17  ;;  %v43_v23 = vmul.f32 1.442695, %v37_v18  ;;  %v45_v25 = vmul.f32 1.442695, %v38_v20 }
   0xb   :  { %v47_v26 = vmul.f32 1.442695, %v39_v21  ;;  %v49_v27 = vmul.f32 1.442695, %v40_v24 }
   0xc   :  { %98 = vpow2.f32 %v41_v22 }
   0xd   :  { %100 = vpow2.f32 %v43_v23 }
   0xe   :  { %102 = vpow2.f32 %v45_v25 }
   0xf   :  { %104 = vpow2.f32 %v47_v26 }
  0x10   :  { %106 = vpow2.f32 %v49_v27 }
  0x16   :  { %v99_v32 = vpop.eup %98 }
  0x17   :  { %v101_v35 = vpop.eup %100  ;;  %v56_v36 = vmul.f32 %v99_v32, %v51_v28  ;;  %v71_v38 = vmul.f32 %v99_v32, %v66_v29 }
  0x18   :  { %v103_v40 = vpop.eup %102  ;;  %v57_v41 = vmul.f32 %v101_v35, %v52_v30  ;;  %v72_v43 = vmul.f32 %v101_v35, %v67_v31 }
  0x19   :  { %v105_v45 = vpop.eup %104  ;;  %61 = vst [vmem:[%s205_s3] sm:$0xff] %v56_v36  ;;  %v58_v46 = vmul.f32 %v103_v40, %v53_v33  ;;  %76 = vst [vmem:[%s206_s4] sm:$0xff] %v71_v38  ;;  %v73_v47 = vmul.f32 %v103_v40, %v68_v34 }
  0x1a   :  { %v107_v48 = vpop.eup %106  ;;  %62 = vst [vmem:[%s205_s3 + $0x8] sm:$0xff] %v57_v41  ;;  %v59_v49 = vmul.f32 %v105_v45, %v54_v37  ;;  %77 = vst [vmem:[%s206_s4 + $0x8] sm:$0xff] %v72_v43  ;;  %v74_v50 = vmul.f32 %v105_v45, %v69_v39 }
  0x1b   :  { %63 = vst [vmem:[%s205_s3 + $0x10] sm:$0xff] %v58_v46  ;;  %v60_v51 = vmul.f32 %v107_v48, %v55_v42  ;;  %78 = vst [vmem:[%s206_s4 + $0x10] sm:$0xff] %v73_v47  ;;  %v75_v52 = vmul.f32 %v107_v48, %v70_v44 }
  0x1c   :  { %64 = vst [vmem:[%s205_s3 + $0x18] sm:$0xff] %v59_v49  ;;  %79 = vst [vmem:[%s206_s4 + $0x18] sm:$0xff] %v74_v50 }
  0x1d   :  { %65 = vst [vmem:[%s205_s3 + $0x20] sm:$0x7] %v60_v51  ;;  %80 = vst [vmem:[%s206_s4 + $0x20] sm:$0x7] %v75_v52 }

// kernel: forward.69
= control target key start
LH: loop header
LB: loop body
LE: loop exit
PB: predicated region body
PF: predicated region fallthrough
CT: control target
= control target key end

     0   :  { %v397_v0 = vmov 0.0|0.0   ;;  %vm398_vm0 = vmmov 0   ;;  %v399_v6 = vmov 0.0   ;;  %vm37_vm1 = vcmask 588800   ;;  %s597_s1 = inlined_call_operand.vmem [shape: f32[72,128], index: 1, kind: input, shape index: {}]   ;;  %s598_s0 = inlined_call_operand.vmem [shape: f32[132,72], index: 0, kind: input, shape index: {}]   ;;  %s599_s2 = inlined_call_operand.vmem [shape: f32[132,128], index: 2, kind: output, shape index: {}]  }
   0x1   :  { %372 = vmatprep.subr.bf16.mxu0 %v397_v0  ;;  %v28_v1 = vld [vmem:[%s597_s1] sm:$0xff]  ;;  %v29_v2 = vld [vmem:[%s597_s1 + $0x8] sm:$0xff]  ;;  %384 = vmatprep.subr.bf16.mxu1 %v397_v0  ;;  %v30_v3 = vld [vmem:[%s597_s1 + $0x10] sm:$0xff] }
   0x2   :  { %v373_v4 = vpack.c.bf16 %v29_v2, %v28_v1  ;;  %v31_v5 = vld [vmem:[%s597_s1 + $0x18] sm:$0xff]  ;;  %321 = vmatprep.mubr.msk.f32.mxu0 %vm398_vm0, %v399_v6  ;;  %348 = vmatprep.mubr.msk.f32.mxu1 %vm398_vm0, %v399_v6  ;;  %v32_v8 = vld [vmem:[%s597_s1 + $0x20] sm:$0xff]  ;;  %v33_v9 = vld [vmem:[%s597_s1 + $0x28] sm:$0xff] }
   0x3   :  { %v376_v7 = vpack.c.bf16 %v31_v5, %v30_v3  ;;  %v379_v10 = vpack.c.bf16 %v33_v9, %v32_v8  ;;  %v34_v11 = vld [vmem:[%s597_s1 + $0x30] sm:$0xff]  ;;  %v35_v12 = vld [vmem:[%s597_s1 + $0x38] sm:$0xff]  ;;  %v36_v14 = vld [vmem:[%s597_s1 + $0x40] sm:$0xff] }
   0x4   :  { %374 = vmatpush3.bf16.msra.mxu0 %v373_v4  ;;  %389 = vmatpush3.bf16.msra.mxu1 %v373_v4  ;;  %v382_v13 = vpack.c.bf16 %v35_v12, %v34_v11  ;;  %v11_v15 = vld [vmem:[%s598_s0] sm:$0xff]  ;;  %v20_v16 = vld [vmem:[%s598_s0 + $0x48] sm:$0xff]  ;;  %v21_v18 = vld [vmem:[%s598_s0 + $0x50] sm:$0xff] }
   0x5   :  { %375 = vmatprep.subr.bf16.mxu0 %v397_v0  ;;  %385 = vmatprep.subr.bf16.mxu1 %v397_v0  ;;  %v12_v17 = vld [vmem:[%s598_s0 + $0x8] sm:$0xff]  ;;  %v13_v19 = vld [vmem:[%s598_s0 + $0x10] sm:$0xff]  ;;  %v22_v20 = vld [vmem:[%s598_s0 + $0x58] sm:$0xff] }
   0x6   :  { %v14_v21 = vld [vmem:[%s598_s0 + $0x18] sm:$0xff]  ;;  %v23_v22 = vld [vmem:[%s598_s0 + $0x60] sm:$0xff]  ;;  %v24_v24 = vld [vmem:[%s598_s0 + $0x68] sm:$0xff] }
   0x7   :  { %v15_v23 = vld [vmem:[%s598_s0 + $0x20] sm:$0xff]  ;;  %v16_v25 = vld [vmem:[%s598_s0 + $0x28] sm:$0xff]  ;;  %v25_v26 = vld [vmem:[%s598_s0 + $0x70] sm:$0xff] }
   0x8   :  { %377 = vmatpush3.bf16.msra.mxu0 %v376_v7  ;;  %390 = vmatpush3.bf16.msra.mxu1 %v376_v7  ;;  %v17_v27 = vld [vmem:[%s598_s0 + $0x30] sm:$0xff]  ;;  %v26_v28 = vld [vmem:[%s598_s0 + $0x78] sm:$0xff]  ;;  %v27_v30 = vld [vmem:[%s598_s0 + $0x80] sm:$0xf] }
   0x9   :  { %378 = vmatprep.subr.bf16.mxu0 %v397_v0  ;;  %386 = vmatprep.subr.bf16.mxu1 %v397_v0  ;;  %v18_v29 = vld [vmem:[%s598_s0 + $0x38] sm:$0xff]  ;;  %v19_v31 = vld [vmem:[%s598_s0 + $0x40] sm:$0xff] }
   0xc   :  { %380 = vmatpush3.bf16.msra.mxu0 %v379_v10  ;;  %391 = vmatpush3.bf16.msra.mxu1 %v379_v10 }
   0xd   :  { %381 = vmatprep.subr.bf16.mxu0 %v397_v0  ;;  %387 = vmatprep.subr.bf16.mxu1 %v397_v0 }
  0x10   :  { %383 = vmatpush3.bf16.msra.mxu0 %v382_v13  ;;  %392 = vmatpush3.bf16.msra.mxu1 %v382_v13 }
  0x11   :  { %319 = vmatprep.subr.mxu0 %v399_v6  ;;  %388 = vmatprep.subr.mxu1 %v399_v6 }
  0x14   :  { %320 = vmatpush3.msra.mxu0 %v36_v14  ;;  %393 = vmatpush3.msra.mxu1 %v36_v14 }
  0x15   :  { %322 = vmatmul.mubr.msk.f32.vlgmr.msra.gmra.mrb[0].mxu0 %vm37_vm1, %v11_v15  ;;  %349 = vmatmul.mubr.msk.f32.vlgmr.msra.gmra.mrb[0].mxu1 %vm37_vm1, %v20_v16 }
  0x16   :  { %324 = vmatprep.mubr.msk.f32.mxu0 %vm398_vm0, %v399_v6  ;;  %351 = vmatprep.mubr.msk.f32.mxu1 %vm398_vm0, %v399_v6 }
  0x19   :  { %325 = vmatmul.mubr.msk.f32.gmra.mrb[2].mxu0 %vm37_vm1, %v12_v17  ;;  %352 = vmatmul.mubr.msk.f32.gmra.mrb[2].mxu1 %vm37_vm1, %v21_v18 }
  0x1a   :  { %327 = vmatprep.mubr.msk.f32.mxu0 %vm398_vm0, %v399_v6  ;;  %354 = vmatprep.mubr.msk.f32.mxu1 %vm398_vm0, %v399_v6 }
  0x1d   :  { %328 = vmatmul.mubr.msk.f32.gmra.mrb[4].mxu0 %vm37_vm1, %v13_v19  ;;  %355 = vmatmul.mubr.msk.f32.gmra.mrb[4].mxu1 %vm37_vm1, %v22_v20 }
  0x1e   :  { %330 = vmatprep.mubr.msk.f32.mxu0 %vm398_vm0, %v399_v6  ;;  %357 = vmatprep.mubr.msk.f32.mxu1 %vm398_vm0, %v399_v6 }
  0x21   :  { %331 = vmatmul.mubr.msk.f32.gmra.mrb[6].mxu0 %vm37_vm1, %v14_v21  ;;  %358 = vmatmul.mubr.msk.f32.gmra.mrb[6].mxu1 %vm37_vm1, %v23_v22 }
  0x22   :  { %333 = vmatprep.mubr.msk.f32.mxu0 %vm398_vm0, %v399_v6  ;;  %360 = vmatprep.mubr.msk.f32.mxu1 %vm398_vm0, %v399_v6 }
  0x25   :  { %334 = vmatmul.mubr.msk.f32.gmra.mrb[8].mxu0 %vm37_vm1, %v15_v23  ;;  %361 = vmatmul.mubr.msk.f32.gmra.mrb[8].mxu1 %vm37_vm1, %v24_v24 }
  0x26   :  { %336 = vmatprep.mubr.msk.f32.mxu0 %vm398_vm0, %v399_v6  ;;  %363 = vmatprep.mubr.msk.f32.mxu1 %vm398_vm0, %v399_v6 }
  0x29   :  { %337 = vmatmul.mubr.msk.f32.gmra.mrb[10].mxu0 %vm37_vm1, %v16_v25  ;;  %364 = vmatmul.mubr.msk.f32.gmra.mrb[10].mxu1 %vm37_vm1, %v25_v26 }
  0x2a   :  { %339 = vmatprep.mubr.msk.f32.mxu0 %vm398_vm0, %v399_v6  ;;  %366 = vmatprep.mubr.msk.f32.mxu1 %vm398_vm0, %v399_v6 }
  0x2d   :  { %340 = vmatmul.mubr.msk.f32.gmra.mrb[12].mxu0 %vm37_vm1, %v17_v27  ;;  %367 = vmatmul.mubr.msk.f32.gmra.mrb[12].mxu1 %vm37_vm1, %v26_v28 }
  0x2e   :  { %342 = vmatprep.mubr.msk.f32.mxu0 %vm398_vm0, %v399_v6  ;;  %369 = vmatprep.mubr.msk.f32.mxu1 %vm398_vm0, %v399_v6 }
  0x31   :  { %343 = vmatmul.mubr.msk.f32.gmra.mrb[14].mxu0 %vm37_vm1, %v18_v29  ;;  %370 = vmatmul.mubr.msk.f32.gmra.mrb[14].mxu1 %vm37_vm1, %v27_v30 }
  0x32   :  { %345 = vmatprep.mubr.msk.f32.mxu0 %vm398_vm0, %v399_v6 }
  0x35   :  { %346 = vmatmul.mubr.msk.f32.gmra.mrb[16].mxu0 %vm37_vm1, %v19_v31 }
  0xe8   :  { %v155_v32 = vpop.f32.mrb[0].mxu0  ;;  %v200_v33 = vpop.f32.mrb[0].mxu1 }
  0xe9   :  { %239 = vst [vmem:[%s599_s2] sm:$0xff] %v155_v32  ;;  %v323_v34 = vpop.f32.mrb[1].mxu0  ;;  %248 = vst [vmem:[%s599_s2 + $0x48] sm:$0xff] %v200_v33  ;;  %v350_v35 = vpop.f32.mrb[1].mxu1 }
  0xec   :  { %v160_v36 = vpop.f32.mrb[2].mxu0  ;;  %v205_v37 = vpop.f32.mrb[2].mxu1 }
  0xed   :  { %240 = vst [vmem:[%s599_s2 + $0x8] sm:$0xff] %v160_v36  ;;  %v326_v38 = vpop.f32.mrb[3].mxu0  ;;  %249 = vst [vmem:[%s599_s2 + $0x50] sm:$0xff] %v205_v37  ;;  %v353_v39 = vpop.f32.mrb[3].mxu1 }
  0xf0   :  { %v165_v40 = vpop.f32.mrb[4].mxu0  ;;  %v210_v41 = vpop.f32.mrb[4].mxu1 }
  0xf1   :  { %241 = vst [vmem:[%s599_s2 + $0x10] sm:$0xff] %v165_v40  ;;  %v329_v42 = vpop.f32.mrb[5].mxu0  ;;  %250 = vst [vmem:[%s599_s2 + $0x58] sm:$0xff] %v210_v41  ;;  %v356_v43 = vpop.f32.mrb[5].mxu1 }
  0xf4   :  { %v170_v44 = vpop.f32.mrb[6].mxu0  ;;  %v215_v45 = vpop.f32.mrb[6].mxu1 }
  0xf5   :  { %242 = vst [vmem:[%s599_s2 + $0x18] sm:$0xff] %v170_v44  ;;  %v332_v46 = vpop.f32.mrb[7].mxu0  ;;  %251 = vst [vmem:[%s599_s2 + $0x60] sm:$0xff] %v215_v45  ;;  %v359_v47 = vpop.f32.mrb[7].mxu1 }
  0xf8   :  { %v175_v48 = vpop.f32.mrb[8].mxu0  ;;  %v220_v49 = vpop.f32.mrb[8].mxu1 }
  0xf9   :  { %243 = vst [vmem:[%s599_s2 + $0x20] sm:$0xff] %v175_v48  ;;  %v335_v50 = vpop.f32.mrb[9].mxu0  ;;  %252 = vst [vmem:[%s599_s2 + $0x68] sm:$0xff] %v220_v49  ;;  %v362_v51 = vpop.f32.mrb[9].mxu1 }
  0xfc   :  { %v180_v52 = vpop.f32.mrb[10].mxu0  ;;  %v225_v53 = vpop.f32.mrb[10].mxu1 }
  0xfd   :  { %244 = vst [vmem:[%s599_s2 + $0x28] sm:$0xff] %v180_v52  ;;  %v338_v54 = vpop.f32.mrb[11].mxu0  ;;  %253 = vst [vmem:[%s599_s2 + $0x70] sm:$0xff] %v225_v53  ;;  %v365_v55 = vpop.f32.mrb[11].mxu1 }
 0x100   :  { %v185_v56 = vpop.f32.mrb[12].mxu0  ;;  %v230_v57 = vpop.f32.mrb[12].mxu1 }
 0x101   :  { %245 = vst [vmem:[%s599_s2 + $0x30] sm:$0xff] %v185_v56  ;;  %v341_v58 = vpop.f32.mrb[13].mxu0  ;;  %254 = vst [vmem:[%s599_s2 + $0x78] sm:$0xff] %v230_v57  ;;  %v368_v59 = vpop.f32.mrb[13].mxu1 }
 0x104   :  { %v190_v60 = vpop.f32.mrb[14].mxu0  ;;  %v235_v61 = vpop.f32.mrb[14].mxu1 }
 0x105   :  { %246 = vst [vmem:[%s599_s2 + $0x38] sm:$0xff] %v190_v60  ;;  %v344_v62 = vpop.f32.mrb[15].mxu0  ;;  %255 = vst [vmem:[%s599_s2 + $0x80] sm:$0xf] %v235_v61  ;;  %v371_v63 = vpop.f32.mrb[15].mxu1 }
 0x108   :  { %v195_v0 = vpop.f32.mrb[16].mxu0 }
 0x109   :  { %247 = vst [vmem:[%s599_s2 + $0x40] sm:$0xff] %v195_v0  ;;  %v347_v1 = vpop.f32.mrb[17].mxu0 }

</bundles_post_ra>
